<compile_context>
chip_gen: v7x
topology: tpu7x:2x2x1
jax: 0.10.0
libtpu: 0.0.40
codegen_flags: <defaults>
</compile_context>

<pallas_src>
import numpy as np

import jax
import jax.numpy as jnp
from jax.experimental import pallas as pl
from jax.experimental.pallas import tpu as pltpu

_LANE = 128
_EPS = 1e-10  # BboxLoss constructs IOUloss(..., eps=1e-10)


# ---------------------------------------------------------------------------
# kernels
# ---------------------------------------------------------------------------
def _giou_partial(lane_ref):
    """GIoU loss * weight, fg-masked, reduced to an (8, 128) partial sum.

    lane_ref block: (10, TS, 128) with rows
      0..3 pred box x1 y1 x2 y2, 4..7 target box, 8 fg_mask, 9 bbox_weight.
    """
    b1_x1 = lane_ref[0]
    b1_y1 = lane_ref[1]
    b1_x2 = lane_ref[2]
    b1_y2 = lane_ref[3]
    b2_x1 = lane_ref[4]
    b2_y1 = lane_ref[5]
    b2_x2 = lane_ref[6]
    b2_y2 = lane_ref[7]
    mask = lane_ref[8]
    wgt = lane_ref[9]

    inter_w = jnp.maximum(jnp.minimum(b1_x2, b2_x2) - jnp.maximum(b1_x1, b2_x1), 0.0)
    inter_h = jnp.maximum(jnp.minimum(b1_y2, b2_y2) - jnp.maximum(b1_y1, b2_y1), 0.0)
    inter = inter_w * inter_h
    w1 = b1_x2 - b1_x1
    h1 = b1_y2 - b1_y1 + _EPS
    w2 = b2_x2 - b2_x1
    h2 = b2_y2 - b2_y1 + _EPS
    union = w1 * h1 + w2 * h2 - inter + _EPS
    iou = inter / union
    cw = jnp.maximum(b1_x2, b2_x2) - jnp.minimum(b1_x1, b2_x1)
    ch = jnp.maximum(b1_y2, b2_y2) - jnp.minimum(b1_y1, b2_y1)
    c_area = cw * ch + _EPS
    giou = iou - (c_area - union) / c_area

    # where() (not multiply) so garbage in non-fg / padded anchors can't
    # poison the sum (masked_select equivalence).
    contrib = jnp.where(mask > 0.0, (1.0 - giou) * wgt, 0.0)  # (TS, 128)

    # pairwise tree over vreg-aligned 8-sublane chunks (short dep chain even
    # at the 32768-anchor IoU-only tiles).
    ts = contrib.shape[0]
    parts = [contrib[s:s + 8] for s in range(0, ts, 8)]
    while len(parts) > 1:
        nxt = [a + b for a, b in zip(parts[0::2], parts[1::2])]
        if len(parts) % 2:
            nxt.append(parts[-1])
        parts = nxt
    return parts[0]  # (8, 128)


def _iou_kernel(lane_ref, iou_out_ref):
    iou_out_ref[...] = _giou_partial(lane_ref)


def _iou_dfl_kernel(lane_ref, col_ref, pd_ref, dmat_ref, selt_ref,
                    iou_out_ref, dfl_out_ref):
    f32 = jnp.float32

    # ----- GIoU (lane-major, full 8x128 vregs) -----
    iou_out_ref[...] = _giou_partial(lane_ref)

    # ----- Distribution Focal Loss (pred_dist in its native (T, 4*r1) layout)
    col = col_ref[...]                 # (T, 11): floor(t)x4, frac(t)x4, -1, mask, 0.25*wgt
    lhs = col[:, 0:9]
    mask = col[:, 9:10]
    wgt_q = col[:, 10:11]

    # d68[:, b] = t_{group(b)} - bin_b via a single DEFAULT-precision (1-pass
    # bf16) selector matmul.  floor(t)/bin are small ints (exact in bf16);
    # frac(t) picks up <=2^-9 rounding, well inside the loss tolerance.
    d68 = jnp.dot(lhs, dmat_ref[...], preferred_element_type=f32)    # (T, 4*r1)
    # Fused left/right one-hot:  CE_l*wl + CE_r*wr = lse - sum_b pd[b]*relu(1-|d|)
    w68 = jnp.maximum(1.0 - jnp.abs(d68), 0.0)

    pd = pd_ref[...].astype(f32)                                     # (T, 4*r1)
    # log-sum-exp per (anchor, coordinate). Per-anchor max over all 4*r1
    # logits (identical to per-coordinate max unless one group sits ~88+
    # logits below the global max, impossible for real detector heads).
    m = jnp.max(pd, axis=1, keepdims=True)                           # (T, 1)
    e = jnp.exp(pd - m)                                              # (T, 4*r1)
    grp = jnp.dot(e, selt_ref[...], preferred_element_type=f32)      # (T, 4)
    lse = jnp.log(grp) + m                                           # (T, 4)

    ce_sum = (jnp.sum(lse, axis=1, keepdims=True)
              - jnp.sum(pd * w68, axis=1, keepdims=True))            # (T, 1)
    contrib = jnp.where(mask > 0.0, ce_sum * wgt_q, 0.0)             # 0.25*mean folded in
    part = jnp.sum(contrib)

    # spread the scalar partial over the lane-dense (8,128) block (cheap
    # dense vst; exact up to ~1e-5 relative when re-summed outside).
    dfl_out_ref[...] = jnp.full((8, _LANE), part * (1.0 / (8.0 * _LANE)), f32)


# ---------------------------------------------------------------------------
# module wrapper
# ---------------------------------------------------------------------------
def _round_up(x, m):
    return ((x + m - 1) // m) * m


class BboxLoss:
    """JAX/Pallas equivalent of the PyTorch BboxLoss module (iou_type='giou')."""

    def __init__(self, num_classes, reg_max, use_dfl=False, iou_type='giou',
                 tile_n=None, vmem_limit_bytes=None):
        # TODO(synk): only the module-default 'giou' iou_type is implemented
        # ('ciou'/'diou'/'siou' branches of IOUloss are not exercised here).
        assert iou_type == 'giou', "only giou is implemented"
        if tile_n is not None:
            assert tile_n % 1024 == 0, "tile_n must be a multiple of 1024"
        self.num_classes = num_classes
        self.reg_max = reg_max
        self.use_dfl = use_dfl
        self.tile_n = tile_n
        # 32 MiB fits the default tiles on every generation (v7x has 64 MiB
        # physical VMEM).  On v5e/v6e pass tile_n=16384, vmem_limit_bytes=48MiB.
        self.vmem_limit_bytes = vmem_limit_bytes

        r1 = reg_max + 1
        nb = 4 * r1
        self._nb = nb
        if use_dfl:
            ar = np.arange(nb)
            g = ar // r1
            sel = (g[None, :] == np.arange(4)[:, None]).astype(np.float32)   # (4, nb)
            bins = (ar - g * r1).astype(np.float32)[None, :]                 # (1, nb)
            # rows 0-3: selector applied to floor(t); 4-7: applied to frac(t);
            # row 8: bin index (pairs with the constant -1 column of `col`)
            self._dfl_mat = jnp.asarray(np.concatenate([sel, sel, bins], 0))  # (9, nb)
            self._sel_t = jnp.asarray(np.ascontiguousarray(sel.T))            # (nb, 4)

    def __call__(self, pred_dist, pred_bboxes, anchor_points, target_bboxes,
                 target_scores, target_scores_sum, fg_mask):
        f32 = jnp.float32
        B, L, _ = pred_bboxes.shape
        N = B * L
        nb = self._nb

        # -- tile selection ----------------------------------------------------
        cap = self.tile_n if self.tile_n is not None else (8192 if self.use_dfl else 32768)
        tile = min(cap, _round_up(N, 1024))
        if N > 1024:
            # keep >= 2 grid steps so both v7x TensorCores get work
            tile = min(tile, _round_up(-(-N // 2), 1024))
        num_tiles = -(-N // tile)
        n_pad = num_tiles * tile
        ts = tile // _LANE

        # -- small per-anchor tensors (cheap XLA glue) --------------------------
        pb = pred_bboxes.astype(f32).reshape(N, 4)
        tb = target_bboxes.astype(f32).reshape(N, 4)
        msk = fg_mask.reshape(N, 1).astype(f32)
        wgt = jnp.sum(target_scores.astype(f32), axis=-1).reshape(N, 1)

        # lane-major pack for GIoU: rows [pred box(4), target box(4), mask, weight]
        lane = jnp.concatenate([pb, tb, msk, wgt], axis=1).T       # (10, N)
        if n_pad != N:
            lane = jnp.pad(lane, ((0, 0), (0, n_pad - N)))
        lane = lane.reshape(10, n_pad // _LANE, _LANE)

        grid = (num_tiles,)
        lane_spec = pl.BlockSpec((10, ts, _LANE), lambda i: (0, i, 0))
        out_spec = pl.BlockSpec((8, _LANE), lambda i: (i, 0))
        out_shape_one = jax.ShapeDtypeStruct((num_tiles * 8, _LANE), f32)
        cparams = pltpu.CompilerParams(
            dimension_semantics=("parallel",),
            vmem_limit_bytes=(self.vmem_limit_bytes
                              if self.vmem_limit_bytes is not None
                              else 32 * 1024 * 1024),
        )

        if self.use_dfl:
            # bbox2dist + weight prep done once here (was lane-sparse in-kernel work)
            ap = jnp.asarray(anchor_points, f32)
            if ap.ndim == 2:
                ap = jnp.broadcast_to(ap[None], (B, L, 2))
            ap = ap.reshape(N, 2)
            lt = ap - tb[:, 0:2]
            rb = tb[:, 2:4] - ap
            t4 = jnp.clip(jnp.concatenate([lt, rb], axis=1), 0.0,
                          self.reg_max - 0.01)                     # (N, 4)
            ti = jnp.floor(t4)
            tf = t4 - ti
            neg1 = jnp.full((N, 1), -1.0, f32)
            # anchor-major side stream: [floor(t) x4, frac(t) x4, -1, mask, 0.25*wgt]
            col = jnp.concatenate([ti, tf, neg1, msk, 0.25 * wgt], axis=1)  # (N, 11)

            # pred_dist stays in its native layout / dtype; only padded when the
            # tile does not divide N (keeps the last block fully defined).
            pd = pred_dist.reshape(N, nb)
            if n_pad != N:
                col = jnp.pad(col, ((0, n_pad - N), (0, 0)))
                pd = jnp.pad(pd, ((0, n_pad - N), (0, 0)))

            iou_part, dfl_part = pl.pallas_call(
                _iou_dfl_kernel,
                grid=grid,
                in_specs=[
                    lane_spec,
                    pl.BlockSpec((tile, 11), lambda i: (i, 0)),
                    pl.BlockSpec((tile, nb), lambda i: (i, 0)),
                    pl.BlockSpec((9, nb), lambda i: (0, 0)),   # constant selector+bins
                    pl.BlockSpec((nb, 4), lambda i: (0, 0)),   # constant group-sum selector
                ],
                out_specs=(out_spec, out_spec),
                out_shape=(out_shape_one, out_shape_one),
                compiler_params=cparams,
            )(lane, col, pd, self._dfl_mat, self._sel_t)
            dfl_sum = jnp.sum(dfl_part)
        else:
            iou_part = pl.pallas_call(
                _iou_kernel,
                grid=grid,
                in_specs=[lane_spec],
                out_specs=out_spec,
                out_shape=out_shape_one,
                compiler_params=cparams,
            )(lane)
            dfl_sum = jnp.asarray(0.0, f32)
        iou_sum = jnp.sum(iou_part)

        num_pos = jnp.sum(fg_mask.astype(f32))
        tss = jnp.asarray(target_scores_sum, f32)
        denom = jnp.where(tss == 0, jnp.asarray(1.0, f32), tss)

        loss_iou = jnp.where(num_pos > 0, iou_sum / denom, 0.0).astype(f32)
        if self.use_dfl:
            loss_dfl = jnp.where(num_pos > 0, dfl_sum / denom, 0.0).astype(f32)
        else:
            loss_dfl = jnp.asarray(0.0, f32)
        return loss_iou, loss_dfl


# ---------------------------------------------------------------------------
# pure-JAX reference (mirrors the PyTorch module) for a correctness check
# ---------------------------------------------------------------------------
def _reference_bbox_loss(pred_dist, pred_bboxes, anchor_points, target_bboxes,
                         target_scores, target_scores_sum, fg_mask, reg_max):
    f32 = jnp.float32
    eps = 1e-10
    B, L, _ = pred_bboxes.shape
    mask = fg_mask.astype(f32)
    weight = jnp.sum(target_scores.astype(f32), -1) * mask

    pb = pred_bboxes.astype(f32)
    tb = target_bboxes.astype(f32)
    px1, py1, px2, py2 = pb[..., 0], pb[..., 1], pb[..., 2], pb[..., 3]
    tx1, ty1, tx2, ty2 = tb[..., 0], tb[..., 1], tb[..., 2], tb[..., 3]
    inter = (jnp.maximum(jnp.minimum(px2, tx2) - jnp.maximum(px1, tx1), 0.0)
             * jnp.maximum(jnp.minimum(py2, ty2) - jnp.maximum(py1, ty1), 0.0))
    w1, h1 = px2 - px1, py2 - py1 + eps
    w2, h2 = tx2 - tx1, ty2 - ty1 + eps
    union = w1 * h1 + w2 * h2 - inter + eps
    iou = inter / union
    cw = jnp.maximum(px2, tx2) - jnp.minimum(px1, tx1)
    ch = jnp.maximum(py2, ty2) - jnp.minimum(py1, ty1)
    c_area = cw * ch + eps
    giou = iou - (c_area - union) / c_area
    iou_sum = jnp.sum((1.0 - giou) * weight)

    r1 = reg_max + 1
    ap = jnp.broadcast_to(jnp.asarray(anchor_points, f32)[None], (B, L, 2))
    lt = ap - tb[..., 0:2]
    rb = tb[..., 2:4] - ap
    t = jnp.clip(jnp.concatenate([lt, rb], -1), 0.0, reg_max - 0.01)
    logits = pred_dist.astype(f32).reshape(B, L, 4, r1)
    lsm = jax.nn.log_softmax(logits, axis=-1)
    tl = jnp.floor(t)
    wl = tl + 1.0 - t
    wr = 1.0 - wl
    tl_i = tl.astype(jnp.int32)
    ce_l = -jnp.take_along_axis(lsm, tl_i[..., None], axis=-1)[..., 0]
    ce_r = -jnp.take_along_axis(lsm, (tl_i + 1)[..., None], axis=-1)[..., 0]
    dfl_sum = jnp.sum(jnp.mean(ce_l * wl + ce_r * wr, axis=-1) * weight)

    tss = jnp.asarray(target_scores_sum, f32)
    denom = jnp.where(tss == 0, 1.0, tss)
    num_pos = jnp.sum(mask)
    return (jnp.where(num_pos > 0, iou_sum / denom, 0.0),
            jnp.where(num_pos > 0, dfl_sum / denom, 0.0))


if __name__ == "__main__":
    B, L = 2, 512            # batch, anchors  (N = 1024 = one tile, no padding)
    NUM_CLASSES = 4
    REG_MAX = 16

    key = jax.random.PRNGKey(0)
    k1, k2, k3, k4, k5, k6 = jax.random.split(key, 6)

    anchor_points = jax.random.uniform(k1, (L, 2), jnp.float32, 1.0, 15.0)
    t_wh = jax.random.uniform(k2, (B, L, 2), jnp.float32, 1.0, 8.0)
    tgt_x1y1 = jnp.maximum(anchor_points[None] - 0.5 * t_wh, 0.0)
    tgt_x2y2 = anchor_points[None] + 0.5 * t_wh
    target_bboxes = jnp.concatenate([tgt_x1y1, tgt_x2y2], axis=-1)       # (B, L, 4)
    pred_bboxes = target_bboxes + 0.5 * jax.random.normal(k3, (B, L, 4), jnp.float32)
    pred_dist = jax.random.normal(k4, (B, L, 4 * (REG_MAX + 1)), jnp.float32)
    fg_mask = jax.random.bernoulli(k5, 0.4, (B, L))
    target_scores = (jax.random.uniform(k6, (B, L, NUM_CLASSES), jnp.float32)
                     * fg_mask[..., None].astype(jnp.float32))
    target_scores_sum = jnp.sum(target_scores)

    args = (pred_dist, pred_bboxes, anchor_points, target_bboxes,
            target_scores, target_scores_sum, fg_mask)

    # DFL + GIoU kernel
    loss_mod = BboxLoss(NUM_CLASSES, REG_MAX, use_dfl=True, iou_type='giou')
    loss_iou, loss_dfl = jax.jit(loss_mod.__call__)(*args)
    jax.block_until_ready((loss_iou, loss_dfl))

    # GIoU-only kernel
    loss_mod2 = BboxLoss(NUM_CLASSES, REG_MAX, use_dfl=False, iou_type='giou')
    iou_only, dfl_zero = jax.jit(loss_mod2.__call__)(*args)
    jax.block_until_ready((iou_only, dfl_zero))

    ref_iou, ref_dfl = _reference_bbox_loss(
        pred_dist, pred_bboxes, anchor_points, target_bboxes, target_scores,
        target_scores_sum, fg_mask, REG_MAX)

    assert jnp.isfinite(loss_iou) and jnp.isfinite(loss_dfl)
    assert jnp.allclose(loss_iou, ref_iou, rtol=2e-2, atol=1e-3), (loss_iou, ref_iou)
    assert jnp.allclose(loss_dfl, ref_dfl, rtol=2e-2, atol=1e-3), (loss_dfl, ref_dfl)
    assert jnp.allclose(iou_only, ref_iou, rtol=2e-2, atol=1e-3), (iou_only, ref_iou)
    assert float(dfl_zero) == 0.0
    print("KERNEL_OK")
</pallas_src>

<mosaic_0001>
module attributes {stable_mosaic.version = 11 : i64} {
  func.func @_iou_dfl_kernel(%arg0: i32, %arg1: memref<10x8x128xf32, #tpu.memory_space<vmem>>, %arg2: memref<1024x11xf32, #tpu.memory_space<vmem>>, %arg3: memref<1024x68xf32, #tpu.memory_space<vmem>>, %arg4: memref<9x68xf32, #tpu.memory_space<vmem>>, %arg5: memref<68x4xf32, #tpu.memory_space<vmem>>, %arg6: memref<8x128xf32, #tpu.memory_space<vmem>>, %arg7: memref<8x128xf32, #tpu.memory_space<vmem>>) attributes {dimension_semantics = [#tpu.dimension_semantics<parallel>], iteration_bounds = array<i64: 1>, scalar_prefetch = 0 : i64, scratch_operands = 0 : i64, tpu.core_type = #tpu.core_type<tc>, window_params = [{transform_indices = @transform_0, window_bounds = array<i64: 10, 8, 128>}, {transform_indices = @transform_1, window_bounds = array<i64: 1024, 11>}, {transform_indices = @transform_2, window_bounds = array<i64: 1024, 68>}, {pipeline_mode = #tpu.pipeline_mode<synchronous>, transform_indices = @transform_3, window_bounds = array<i64: 9, 68>}, {pipeline_mode = #tpu.pipeline_mode<synchronous>, transform_indices = @transform_4, window_bounds = array<i64: 68, 4>}, {transform_indices = @transform_5, window_bounds = array<i64: 8, 128>}, {transform_indices = @transform_6, window_bounds = array<i64: 8, 128>}]} {
    %c0 = arith.constant 0 : index
    %c0_0 = arith.constant 0 : index
    %c0_1 = arith.constant 0 : index
    %0 = vector.load %arg1[%c0, %c0_0, %c0_1] : memref<10x8x128xf32, #tpu.memory_space<vmem>>, vector<1x8x128xf32>
    %1 = vector.shape_cast %0 : vector<1x8x128xf32> to vector<8x128xf32>
    %c1 = arith.constant 1 : index
    %c0_2 = arith.constant 0 : index
    %c0_3 = arith.constant 0 : index
    %2 = vector.load %arg1[%c1, %c0_2, %c0_3] : memref<10x8x128xf32, #tpu.memory_space<vmem>>, vector<1x8x128xf32>
    %3 = vector.shape_cast %2 : vector<1x8x128xf32> to vector<8x128xf32>
    %c2 = arith.constant 2 : index
    %c0_4 = arith.constant 0 : index
    %c0_5 = arith.constant 0 : index
    %4 = vector.load %arg1[%c2, %c0_4, %c0_5] : memref<10x8x128xf32, #tpu.memory_space<vmem>>, vector<1x8x128xf32>
    %5 = vector.shape_cast %4 : vector<1x8x128xf32> to vector<8x128xf32>
    %c3 = arith.constant 3 : index
    %c0_6 = arith.constant 0 : index
    %c0_7 = arith.constant 0 : index
    %6 = vector.load %arg1[%c3, %c0_6, %c0_7] : memref<10x8x128xf32, #tpu.memory_space<vmem>>, vector<1x8x128xf32>
    %7 = vector.shape_cast %6 : vector<1x8x128xf32> to vector<8x128xf32>
    %c4 = arith.constant 4 : index
    %c0_8 = arith.constant 0 : index
    %c0_9 = arith.constant 0 : index
    %8 = vector.load %arg1[%c4, %c0_8, %c0_9] : memref<10x8x128xf32, #tpu.memory_space<vmem>>, vector<1x8x128xf32>
    %9 = vector.shape_cast %8 : vector<1x8x128xf32> to vector<8x128xf32>
    %c5 = arith.constant 5 : index
    %c0_10 = arith.constant 0 : index
    %c0_11 = arith.constant 0 : index
    %10 = vector.load %arg1[%c5, %c0_10, %c0_11] : memref<10x8x128xf32, #tpu.memory_space<vmem>>, vector<1x8x128xf32>
    %11 = vector.shape_cast %10 : vector<1x8x128xf32> to vector<8x128xf32>
    %c6 = arith.constant 6 : index
    %c0_12 = arith.constant 0 : index
    %c0_13 = arith.constant 0 : index
    %12 = vector.load %arg1[%c6, %c0_12, %c0_13] : memref<10x8x128xf32, #tpu.memory_space<vmem>>, vector<1x8x128xf32>
    %13 = vector.shape_cast %12 : vector<1x8x128xf32> to vector<8x128xf32>
    %c7 = arith.constant 7 : index
    %c0_14 = arith.constant 0 : index
    %c0_15 = arith.constant 0 : index
    %14 = vector.load %arg1[%c7, %c0_14, %c0_15] : memref<10x8x128xf32, #tpu.memory_space<vmem>>, vector<1x8x128xf32>
    %15 = vector.shape_cast %14 : vector<1x8x128xf32> to vector<8x128xf32>
    %c8 = arith.constant 8 : index
    %c0_16 = arith.constant 0 : index
    %c0_17 = arith.constant 0 : index
    %16 = vector.load %arg1[%c8, %c0_16, %c0_17] : memref<10x8x128xf32, #tpu.memory_space<vmem>>, vector<1x8x128xf32>
    %17 = vector.shape_cast %16 : vector<1x8x128xf32> to vector<8x128xf32>
    %c9 = arith.constant 9 : index
    %c0_18 = arith.constant 0 : index
    %c0_19 = arith.constant 0 : index
    %18 = vector.load %arg1[%c9, %c0_18, %c0_19] : memref<10x8x128xf32, #tpu.memory_space<vmem>>, vector<1x8x128xf32>
    %19 = vector.shape_cast %18 : vector<1x8x128xf32> to vector<8x128xf32>
    %20 = arith.minimumf %5, %13 : vector<8x128xf32>
    %21 = arith.maximumf %1, %9 : vector<8x128xf32>
    %22 = arith.subf %20, %21 : vector<8x128xf32>
    %cst = arith.constant 0.000000e+00 : f32
    %23 = vector.broadcast %cst : f32 to vector<8x128xf32>
    %24 = arith.maximumf %22, %23 : vector<8x128xf32>
    %25 = arith.minimumf %7, %15 : vector<8x128xf32>
    %26 = arith.maximumf %3, %11 : vector<8x128xf32>
    %27 = arith.subf %25, %26 : vector<8x128xf32>
    %cst_20 = arith.constant 0.000000e+00 : f32
    %28 = vector.broadcast %cst_20 : f32 to vector<8x128xf32>
    %29 = arith.maximumf %27, %28 : vector<8x128xf32>
    %30 = arith.mulf %24, %29 : vector<8x128xf32>
    %31 = arith.subf %5, %1 : vector<8x128xf32>
    %32 = arith.subf %7, %3 : vector<8x128xf32>
    %cst_21 = arith.constant 1.000000e-10 : f32
    %33 = vector.broadcast %cst_21 : f32 to vector<8x128xf32>
    %34 = arith.addf %32, %33 : vector<8x128xf32>
    %35 = arith.subf %13, %9 : vector<8x128xf32>
    %36 = arith.subf %15, %11 : vector<8x128xf32>
    %cst_22 = arith.constant 1.000000e-10 : f32
    %37 = vector.broadcast %cst_22 : f32 to vector<8x128xf32>
    %38 = arith.addf %36, %37 : vector<8x128xf32>
    %39 = arith.mulf %31, %34 : vector<8x128xf32>
    %40 = arith.mulf %35, %38 : vector<8x128xf32>
    %41 = arith.addf %39, %40 : vector<8x128xf32>
    %42 = arith.subf %41, %30 : vector<8x128xf32>
    %cst_23 = arith.constant 1.000000e-10 : f32
    %43 = vector.broadcast %cst_23 : f32 to vector<8x128xf32>
    %44 = arith.addf %42, %43 : vector<8x128xf32>
    %45 = arith.divf %30, %44 : vector<8x128xf32>
    %46 = arith.maximumf %5, %13 : vector<8x128xf32>
    %47 = arith.minimumf %1, %9 : vector<8x128xf32>
    %48 = arith.subf %46, %47 : vector<8x128xf32>
    %49 = arith.maximumf %7, %15 : vector<8x128xf32>
    %50 = arith.minimumf %3, %11 : vector<8x128xf32>
    %51 = arith.subf %49, %50 : vector<8x128xf32>
    %52 = arith.mulf %48, %51 : vector<8x128xf32>
    %cst_24 = arith.constant 1.000000e-10 : f32
    %53 = vector.broadcast %cst_24 : f32 to vector<8x128xf32>
    %54 = arith.addf %52, %53 : vector<8x128xf32>
    %55 = arith.subf %54, %44 : vector<8x128xf32>
    %56 = arith.divf %55, %54 : vector<8x128xf32>
    %57 = arith.subf %45, %56 : vector<8x128xf32>
    %cst_25 = arith.constant 0.000000e+00 : f32
    %58 = vector.broadcast %cst_25 : f32 to vector<8x128xf32>
    %59 = arith.cmpf ogt, %17, %58 : vector<8x128xf32>
    %cst_26 = arith.constant 1.000000e+00 : f32
    %60 = vector.broadcast %cst_26 : f32 to vector<8x128xf32>
    %61 = arith.subf %60, %57 : vector<8x128xf32>
    %62 = arith.mulf %61, %19 : vector<8x128xf32>
    %cst_27 = arith.constant 0.000000e+00 : f32
    %63 = vector.broadcast %cst_27 : f32 to vector<8x128xf32>
    %64 = arith.select %59, %62, %63 : vector<8x128xi1>, vector<8x128xf32>
    %c0_28 = arith.constant 0 : index
    %c0_29 = arith.constant 0 : index
    %65 = vector.load %arg6[%c0_28, %c0_29] : memref<8x128xf32, #tpu.memory_space<vmem>>, vector<8x128xf32>
    tpu.vector_store %arg6[%c0_28, %c0_29], %64 {strides = array<i32>} : memref<8x128xf32, #tpu.memory_space<vmem>>, vector<8x128xf32>,
    %c0_30 = arith.constant 0 : index
    %c0_31 = arith.constant 0 : index
    %66 = vector.load %arg2[%c0_30, %c0_31] : memref<1024x11xf32, #tpu.memory_space<vmem>>, vector<1024x11xf32>
    %67 = vector.extract_strided_slice %66 {offsets = [0, 0], sizes = [1024, 9], strides = [1, 1]} : vector<1024x11xf32> to vector<1024x9xf32>
    %68 = vector.extract_strided_slice %66 {offsets = [0, 9], sizes = [1024, 1], strides = [1, 1]} : vector<1024x11xf32> to vector<1024x1xf32>
    %69 = vector.extract_strided_slice %66 {offsets = [0, 10], sizes = [1024, 1], strides = [1, 1]} : vector<1024x11xf32> to vector<1024x1xf32>
    %c0_32 = arith.constant 0 : index
    %c0_33 = arith.constant 0 : index
    %70 = vector.load %arg4[%c0_32, %c0_33] : memref<9x68xf32, #tpu.memory_space<vmem>>, vector<9x68xf32>
    %cst_34 = arith.constant dense<0.000000e+00> : vector<1024x68xf32>
    %71 = tpu.matmul %67, %70, %cst_34 {dimension_numbers = #tpu.dot_dimension_numbers<[1], [0], [0], [1], [0, 0, 1, 1], [], []>} : vector<1024x9xf32>, vector<9x68xf32>, vector<1024x68xf32> -> vector<1024x68xf32>
    %72 = math.absf %71 : vector<1024x68xf32>
    %cst_35 = arith.constant 1.000000e+00 : f32
    %73 = vector.broadcast %cst_35 : f32 to vector<1024x68xf32>
    %74 = arith.subf %73, %72 : vector<1024x68xf32>
    %cst_36 = arith.constant 0.000000e+00 : f32
    %75 = vector.broadcast %cst_36 : f32 to vector<1024x68xf32>
    %76 = arith.maximumf %74, %75 : vector<1024x68xf32>
    %c0_37 = arith.constant 0 : index
    %c0_38 = arith.constant 0 : index
    %77 = vector.load %arg3[%c0_37, %c0_38] : memref<1024x68xf32, #tpu.memory_space<vmem>>, vector<1024x68xf32>
    %cst_39 = arith.constant dense<0xFF800000> : vector<1024xf32>
    %78 = vector.multi_reduction <maximumf>, %77, %cst_39 [1] : vector<1024x68xf32> to vector<1024xf32>
    %79 = vector.shape_cast %78 : vector<1024xf32> to vector<1024x1xf32>
    %80 = vector.broadcast %79 : vector<1024x1xf32> to vector<1024x68xf32>
    %81 = arith.subf %77, %80 : vector<1024x68xf32>
    %82 = math.exp %81 : vector<1024x68xf32>
    %c0_40 = arith.constant 0 : index
    %c0_41 = arith.constant 0 : index
    %83 = vector.load %arg5[%c0_40, %c0_41] : memref<68x4xf32, #tpu.memory_space<vmem>>, vector<68x4xf32>
    %cst_42 = arith.constant dense<0.000000e+00> : vector<1024x4xf32>
    %84 = tpu.matmul %82, %83, %cst_42 {dimension_numbers = #tpu.dot_dimension_numbers<[1], [0], [0], [1], [0, 0, 1, 1], [], []>} : vector<1024x68xf32>, vector<68x4xf32>, vector<1024x4xf32> -> vector<1024x4xf32>
    %85 = math.log %84 : vector<1024x4xf32>
    %86 = vector.broadcast %79 : vector<1024x1xf32> to vector<1024x4xf32>
    %87 = arith.addf %85, %86 : vector<1024x4xf32>
    %cst_43 = arith.constant dense<0.000000e+00> : vector<1024xf32>
    %88 = vector.multi_reduction <add>, %87, %cst_43 [1] : vector<1024x4xf32> to vector<1024xf32>
    %89 = vector.shape_cast %88 : vector<1024xf32> to vector<1024x1xf32>
    %90 = arith.mulf %77, %76 : vector<1024x68xf32>
    %cst_44 = arith.constant dense<0.000000e+00> : vector<1024xf32>
    %91 = vector.multi_reduction <add>, %90, %cst_44 [1] : vector<1024x68xf32> to vector<1024xf32>
    %92 = vector.shape_cast %91 : vector<1024xf32> to vector<1024x1xf32>
    %93 = arith.subf %89, %92 : vector<1024x1xf32>
    %cst_45 = arith.constant 0.000000e+00 : f32
    %94 = vector.broadcast %cst_45 : f32 to vector<1024x1xf32>
    %95 = arith.cmpf ogt, %68, %94 : vector<1024x1xf32>
    %96 = arith.mulf %93, %69 : vector<1024x1xf32>
    %cst_46 = arith.constant 0.000000e+00 : f32
    %97 = vector.broadcast %cst_46 : f32 to vector<1024x1xf32>
    %98 = arith.select %95, %96, %97 : vector<1024x1xi1>, vector<1024x1xf32>
    %99 = vector.shape_cast %98 : vector<1024x1xf32> to vector<1x1024x1xf32>
    %cst_47 = arith.constant dense<0.000000e+00> : vector<1xf32>
    %100 = vector.multi_reduction <add>, %99, %cst_47 [1, 2] : vector<1x1024x1xf32> to vector<1xf32>
    %101 = vector.shape_cast %100 : vector<1xf32> to vector<1x1x1xf32>
    %102 = vector.extract %101[0, 0, 0] : f32 from vector<1x1x1xf32>
    %cst_48 = arith.constant 9.765625E-4 : f32
    %103 = arith.mulf %102, %cst_48 : f32
    %104 = vector.broadcast %103 : f32 to vector<8x128xf32>
    %c0_49 = arith.constant 0 : index
    %c0_50 = arith.constant 0 : index
    %105 = vector.load %arg7[%c0_49, %c0_50] : memref<8x128xf32, #tpu.memory_space<vmem>>, vector<8x128xf32>
    tpu.vector_store %arg7[%c0_49, %c0_50], %104 {strides = array<i32>} : memref<8x128xf32, #tpu.memory_space<vmem>>, vector<8x128xf32>,
    return
  }
  func.func @transform_0(%arg0: i32) -> (i32, i32, i32) {
    %c0_i32 = arith.constant 0 : i32
    %c0_i32_0 = arith.constant 0 : i32
    %c0_i32_1 = arith.constant 0 : i32
    return %c0_i32, %arg0, %c0_i32_0 : i32, i32, i32
  }
  func.func @transform_1(%arg0: i32) -> (i32, i32) {
    %c0_i32 = arith.constant 0 : i32
    %c0_i32_0 = arith.constant 0 : i32
    return %arg0, %c0_i32 : i32, i32
  }
  func.func @transform_2(%arg0: i32) -> (i32, i32) {
    %c0_i32 = arith.constant 0 : i32
    %c0_i32_0 = arith.constant 0 : i32
    return %arg0, %c0_i32 : i32, i32
  }
  func.func @transform_3(%arg0: i32) -> (i32, i32) {
    %c0_i32 = arith.constant 0 : i32
    %c0_i32_0 = arith.constant 0 : i32
    %c0_i32_1 = arith.constant 0 : i32
    return %c0_i32, %c0_i32_0 : i32, i32
  }
  func.func @transform_4(%arg0: i32) -> (i32, i32) {
    %c0_i32 = arith.constant 0 : i32
    %c0_i32_0 = arith.constant 0 : i32
    %c0_i32_1 = arith.constant 0 : i32
    return %c0_i32, %c0_i32_0 : i32, i32
  }
  func.func @transform_5(%arg0: i32) -> (i32, i32) {
    %c0_i32 = arith.constant 0 : i32
    %c0_i32_0 = arith.constant 0 : i32
    return %arg0, %c0_i32 : i32, i32
  }
  func.func @transform_6(%arg0: i32) -> (i32, i32) {
    %c0_i32 = arith.constant 0 : i32
    %c0_i32_0 = arith.constant 0 : i32
    return %arg0, %c0_i32 : i32, i32
  }
}

</mosaic_0001>

<bundles_post_ra>
// kernel: a_call__.1
= control target key start
LH: loop header
LB: loop body
LE: loop exit
PB: predicated region body
PF: predicated region fallthrough
CT: control target
= control target key end

     0   :  { %vm1816_vm0 = vcmask 556032   ;;  %vm595_vm1 = vcmask 1040384   ;;  %vm210_vm2 = vcmask 72704   ;;  %vm8631_vm3 = vmmov 1   ;;  %s8632_s16 = smov 127   ;;  %s8633_s11 = smov 119   ;;  %s14234_s2 = inlined_call_operand.vmem [shape: f32[1024,68], index: 2, kind: input, shape index: {}]   ;;  %s14235_s0 = inlined_call_operand.vmem [shape: f32[10,8,128], index: 0, kind: input, shape index: {}]   ;;  %s14236_s3 = inlined_call_operand.vmem [shape: f32[9,68], index: 3, kind: input, shape index: {}]   ;;  %s14237_s1 = inlined_call_operand.vmem [shape: f32[1024,11], index: 1, kind: input, shape index: {}]   ;;  %s14238_s4 = inlined_call_operand.vmem [shape: f32[68,4], index: 4, kind: input, shape index: {}]   ;;  %s14239_s5 = inlined_call_operand.vmem [shape: f32[8,128], index: 5, kind: output, shape index: {0}]   ;;  %s14240_s6 = inlined_call_operand.vmem [shape: f32[8,128], index: 6, kind: output, shape index: {1}]  }
   0x1   :  { %v8672_v0 = vld [vmem:[%s14234_s2 + $0x10] sm:$0xff]  ;;  %v1688_v1 = vld [vmem:[%s14234_s2] sm:$0xff]  ;;  %v6780_v5 = vld [vmem:[%s14235_s0 + $0x8] sm:$0xff]  ;;  %vm2978_vm6 = vcmask 1043456   ;;  %vm4071_vm7 = vcmask 31744  }
   0x2   :  { %v22_v2 = vld [vmem:[%s14235_s0] sm:$0xff]  ;;  %v1823_v3 = vsel %vm1816_vm0, %v8672_v0, -inf  ;;  %v1817_v4 = vsel %vm1816_vm0, %v1688_v1, -inf  ;;  %v6781_v6 = vld [vmem:[%s14235_s0 + $0x10] sm:$0xff]  ;;  %v6782_v7 = vld [vmem:[%s14235_s0 + $0x18] sm:$0xff] }
   0x3   :  { %1824 = vmax.xlane.f32.xlu1 %v1823_v3  ;;  %1818 = vmax.xlane.f32.xlu0 %v1817_v4  ;;  %v6783_v8 = vld [vmem:[%s14235_s0 + $0x20] sm:$0xff]  ;;  %v6784_v9 = vld [vmem:[%s14235_s0 + $0x28] sm:$0xff]  ;;  %v6785_v10 = vld [vmem:[%s14235_s0 + $0x30] sm:$0xff]  ;;  %v50_v11 = vsub.f32 %v6781_v6, %v22_v2  ;;  %v51_v12 = vsub.f32 %v6782_v7, %v6780_v5 }
   0x4   :  { %v6786_v13 = vld [vmem:[%s14235_s0 + $0x38] sm:$0xff]  ;;  %v41_v14 = vmin.f32 %v6781_v6, %v6785_v10  ;;  %v42_v15 = vmax.f32 %v22_v2, %v6783_v8  ;;  %v46_v16 = vmax.f32 %v6780_v5, %v6784_v9  ;;  %v53_v17 = vsub.f32 %v6785_v10, %v6783_v8  ;;  %v208_v22 = vld [vmem:[%s14236_s3] sm:$0xff]  ;;  %v209_v23 = vld [vmem:[%s14236_s3 + $0x8] sm:$0x1] }
   0x5   :  { %v45_v18 = vmin.f32 %v6782_v7, %v6786_v13  ;;  %v52_v19 = vadd.f32 1e-10, %v51_v12  ;;  %v54_v20 = vsub.f32 %v6786_v13, %v6784_v9  ;;  %v63_v21 = vmax.f32 %v6781_v6, %v6785_v10  ;;  %v8713_v28 = vld [vmem:[%s14234_s2 + $0x18] sm:$0xff]  ;;  %v1689_v29 = vld [vmem:[%s14234_s2 + $0x8] sm:$0xff]  ;;  %v80_v30 = vld [vmem:[%s14237_s1] sm:$0xff] }
   0x6   :  { %v43_v24 = vsub.f32 %v41_v14, %v42_v15  ;;  %v64_v25 = vmin.f32 %v22_v2, %v6783_v8  ;;  %v66_v26 = vmax.f32 %v6782_v7, %v6786_v13  ;;  %v67_v27 = vmin.f32 %v6780_v5, %v6784_v9  ;;  %vm8722_vm4 = vmpackc.low %vm595_vm1, %vm8631_vm3  ;;  %7318 = vmatprep.mubr.msk.f32.mxu0 %vm210_vm2, %v80_v30  ;;  %v8730_v39 = vld [vmem:[%s14234_s2 + $0x28] sm:$0xff]  ;;  %v2585_v40 = vld [vmem:[%s14238_s4] sm:$0xff] }
   0x7   :  { %v47_v31 = vsub.f32 %v45_v18, %v46_v16  ;;  %v55_v32 = vadd.f32 1e-10, %v54_v20  ;;  %v56_v33 = vmul.f32 %v52_v19, %v50_v11  ;;  %v7720_v38 = vpack.c.bf16 %v209_v23, %v208_v22  ;;  %v8741_v45 = vld [vmem:[%s14234_s2 + $0x20] sm:$0xff]  ;;  %v2586_v46 = vld [vmem:[%s14238_s4 + $0x8] sm:$0xff]  ;;  %v82_v55 = vld [vmem:[%s14237_s1 + $0x10] sm:$0xff] }
   0x8   :  { %v44_v35 = vmax.f32 %v43_v24, 0.0  ;;  %v65_v36 = vsub.f32 %v63_v21, %v64_v25  ;;  %v68_v37 = vsub.f32 %v66_v26, %v67_v27  ;;  %v1826_v43 = vsel %vm1816_vm0, %v8713_v28, -inf  ;;  %v81_v51 = vld [vmem:[%s14237_s1 + $0x8] sm:$0xff]  ;;  %v8763_v56 = vld [vmem:[%s14234_s2 + $0x38] sm:$0xff]  ;;  %v8768_v58 = vld [vmem:[%s14234_s2 + $0x30] sm:$0xff] }
   0x9   :  { %v48_v41 = vmax.f32 %v47_v31, 0.0  ;;  %v57_v42 = vmul.f32 %v55_v32, %v53_v17  ;;  %v1820_v44 = vsel %vm1816_vm0, %v1689_v29, -inf  ;;  %7722 = vmatprep.subr.msk.bf16.mxu0 %vm8722_vm4, %v7720_v38  ;;  %1827 = vmax.xlane.f32.xlu1 %v1826_v43  ;;  %v7726_v48 = vpack.c.bf16 %v2586_v46, %v2585_v40  ;;  %v83_v60 = vld [vmem:[%s14237_s1 + $0x18] sm:$0xff]  ;;  %v84_v63 = vld [vmem:[%s14237_s1 + $0x20] sm:$0xff]  ;;  %v8785_v1 = vld [vmem:[%s14234_s2 + $0x48] sm:$0xff] }
   0xa   :  { %v69_v47 = vmul.f32 %v68_v37, %v65_v36  ;;  %7725 = vmatpush3.bf16.msk.msra.mxu0 %vm8722_vm4, %v7720_v38  ;;  %1821 = vmax.xlane.f32.xlu0 %v1820_v44  ;;  %v1832_v52 = vsel %vm1816_vm0, %v8730_v39, -inf  ;;  %v1829_v54 = vsel %vm1816_vm0, %v8741_v45, -inf  ;;  %v1838_v61 = vsel %vm1816_vm0, %v8763_v56, -inf  ;;  %v8790_v2 = vld [vmem:[%s14234_s2 + $0x40] sm:$0xff]  ;;  %v85_v3 = vld [vmem:[%s14237_s1 + $0x28] sm:$0xff]  ;;  %v86_v6 = vld [vmem:[%s14237_s1 + $0x30] sm:$0xff] }
   0xb   :  { %v49_v49 = vmul.f32 %v48_v41, %v44_v35  ;;  %v58_v50 = vadd.f32 %v57_v42, %v56_v33  ;;  %7727 = vmatprep.subr.bf16.mxu0 %v7726_v48  ;;  %7742 = vmatprep.subr.bf16.mxu1 %v7726_v48  ;;  %v1835_v62 = vsel %vm1816_vm0, %v8768_v58, -inf  ;;  %v1844_v4 = vsel %vm1816_vm0, %v8785_v1, -inf  ;;  %v8807_v7 = vld [vmem:[%s14234_s2 + $0x58] sm:$0xff]  ;;  %v8812_v8 = vld [vmem:[%s14234_s2 + $0x50] sm:$0xff]  ;;  %v88_v14 = vld [vmem:[%s14237_s1 + $0x40] sm:$0xff] }
   0xc   :  { %v70_v53 = vadd.f32 1e-10, %v69_v47  ;;  %7747 = vmatpush3.bf16.msra.mxu1 %v7726_v48  ;;  %v1841_v5 = vsel %vm1816_vm0, %v8790_v2, -inf  ;;  %v87_v10 = vld [vmem:[%s14237_s1 + $0x38] sm:$0xff]  ;;  %v1850_v11 = vsel %vm1816_vm0, %v8807_v7, -inf  ;;  %v1847_v13 = vsel %vm1816_vm0, %v8812_v8, -inf }
   0xd   :  { %v59_v57 = vsub.f32 %v58_v50, %v49_v49  ;;  %7319 = vmatmul.mubr.msk.f32.vlgmr.msra.gmra.mrb[0].mxu0 %vm210_vm2, %v81_v51  ;;  %1833 = vmax.xlane.f32.xlu1 %v1832_v52  ;;  %v8829_v15 = vld [vmem:[%s14234_s2 + $0x68] sm:$0xff]  ;;  %v8834_v16 = vld [vmem:[%s14234_s2 + $0x60] sm:$0xff]  ;;  %v2587_v21 = vld [vmem:[%s14238_s4 + $0x10] sm:$0xff] }
   0xe   :  { %7757 = vrcp.f32 %v70_v53  ;;  %1830 = vmax.xlane.f32.xlu0 %v1829_v54  ;;  %7321 = vmatprep.mubr.msk.f32.mxu0 %vm210_vm2, %v82_v55  ;;  %v89_v19 = vld [vmem:[%s14237_s1 + $0x48] sm:$0xff]  ;;  %v1856_v20 = vsel %vm1816_vm0, %v8829_v15, -inf  ;;  %v2588_v22 = vld [vmem:[%s14238_s4 + $0x18] sm:$0xff]  ;;  %v1853_v24 = vsel %vm1816_vm0, %v8834_v16, -inf  ;;  %v90_v25 = vld [vmem:[%s14237_s1 + $0x50] sm:$0xff] }
   0xf   :  { %v60_v59 = vadd.f32 1e-10, %v59_v57  ;;  %7729 = vmatpush3.bf16.msra.mxu0 %v7726_v48  ;;  %v8857_v26 = vld [vmem:[%s14234_s2 + $0x78] sm:$0xff]  ;;  %v7730_v27 = vpack.c.bf16 %v2588_v22, %v2587_v21  ;;  %v8862_v29 = vld [vmem:[%s14234_s2 + $0x70] sm:$0xff]  ;;  %v6787_v30 = vld [vmem:[%s14235_s0 + $0x40] sm:$0xff] }
  0x10   :  { %v6788_v32 = vld [vmem:[%s14235_s0 + $0x48] sm:$0xff]  ;;  %v91_v33 = vld [vmem:[%s14237_s1 + $0x58] sm:$0xff]  ;;  %v1862_v34 = vsel %vm1816_vm0, %v8857_v26, -inf  ;;  %v1859_v36 = vsel %vm1816_vm0, %v8862_v29, -inf  ;;  %v92_v37 = vld [vmem:[%s14237_s1 + $0x60] sm:$0xff]  ;;  %vm75_vm5 = vcmp.gt.f32.partialorder %v6787_v30, 0.0 }
  0x11   :  { %7759 = vrcp.f32 %v60_v59  ;;  %7322 = vmatmul.mubr.msk.f32.gmra.mrb[2].mxu0 %vm210_vm2, %v83_v60  ;;  %1839 = vmax.xlane.f32.xlu1 %v1838_v61  ;;  %v71_v9 = vsub.f32 %v70_v53, %v60_v59  ;;  %v8885_v38 = vld [vmem:[%s14234_s2 + $0x88] sm:$0xff]  ;;  %v8890_v40 = vld [vmem:[%s14234_s2 + $0x80] sm:$0xff]  ;;  %v94_v47 = vld [vmem:[%s14237_s1 + $0x70] sm:$0xff] }
  0x12   :  { %1836 = vmax.xlane.f32.xlu0 %v1835_v62  ;;  %7324 = vmatprep.mubr.msk.f32.mxu0 %vm210_vm2, %v84_v63  ;;  %v93_v42 = vld [vmem:[%s14237_s1 + $0x68] sm:$0xff]  ;;  %v1868_v43 = vsel %vm1816_vm0, %v8885_v38, -inf  ;;  %v1865_v46 = vsel %vm1816_vm0, %v8890_v40, -inf  ;;  %v8907_v48 = vld [vmem:[%s14234_s2 + $0x98] sm:$0xff]  ;;  %v96_v53 = vld [vmem:[%s14237_s1 + $0x80] sm:$0xff] }
  0x13   :  { %7731 = vmatprep.subr.bf16.mxu0 %v7730_v27  ;;  %7743 = vmatprep.subr.bf16.mxu1 %v7730_v27  ;;  %v95_v50 = vld [vmem:[%s14237_s1 + $0x78] sm:$0xff]  ;;  %v1874_v51 = vsel %vm1816_vm0, %v8907_v48, -inf  ;;  %v8932_v54 = vld [vmem:[%s14234_s2 + $0xa8] sm:$0xff]  ;;  %v8937_v55 = vld [vmem:[%s14234_s2 + $0xa0] sm:$0xff] }
  0x14   :  { %7733 = vmatpush3.bf16.msra.mxu0 %v7730_v27  ;;  %7748 = vmatpush3.bf16.msra.mxu1 %v7730_v27  ;;  %v97_v57 = vld [vmem:[%s14237_s1 + $0x88] sm:$0xff]  ;;  %v1880_v59 = vsel %vm1816_vm0, %v8932_v54, -inf  ;;  %v1877_v60 = vsel %vm1816_vm0, %v8937_v55, -inf  ;;  %v98_v61 = vld [vmem:[%s14237_s1 + $0x90] sm:$0xff]  ;;  %v8954_v62 = vld [vmem:[%s14234_s2 + $0xb8] sm:$0xff] }
  0x15   :  { %7325 = vmatmul.mubr.msk.f32.gmra.mrb[4].mxu0 %vm210_vm2, %v85_v3  ;;  %1845 = vmax.xlane.f32.xlu1 %v1844_v4  ;;  %v2589_v63 = vld [vmem:[%s14238_s4 + $0x20] sm:$0xff]  ;;  %v8962_v3 = vld [vmem:[%s14234_s2 + $0xb0] sm:$0xff]  ;;  %v2590_v4 = vld [vmem:[%s14238_s4 + $0x28] sm:$0xff] }
  0x16   :  { %1842 = vmax.xlane.f32.xlu0 %v1841_v5  ;;  %7327 = vmatprep.mubr.msk.f32.mxu0 %vm210_vm2, %v86_v6  ;;  %v7734_v5 = vpack.c.bf16 %v2590_v4, %v2589_v63  ;;  %v99_v6 = vld [vmem:[%s14237_s1 + $0x98] sm:$0xff]  ;;  %v1714_v21 = vld [vmem:[%s14234_s2 + $0xd0] sm:$0xff]  ;;  %v1717_v27 = vld [vmem:[%s14234_s2 + $0xe8] sm:$0xff] }
  0x17   :  { %v103_v22 = vld [vmem:[%s14237_s1 + $0xb8] sm:$0xff]  ;;  %v1716_v30 = vld [vmem:[%s14234_s2 + $0xe0] sm:$0xff]  ;;  %v1722_v63 = vld [vmem:[%s14234_s2 + $0x110] sm:$0xff] }
  0x18   :  { %v7758_v12 = vpop.eup %7757  ;;  %7735 = vmatprep.subr.bf16.mxu0 %v7734_v5  ;;  %7744 = vmatprep.subr.bf16.mxu1 %v7734_v5  ;;  %v111_v4 = vld [vmem:[%s14237_s1 + $0xf8] sm:$0xff] }
  0x19   :  { %v73_v17 = vmul.f32 %v7758_v12, %v71_v9  ;;  %7328 = vmatmul.mubr.msk.f32.gmra.mrb[6].mxu0 %vm210_vm2, %v87_v10  ;;  %1851 = vmax.xlane.f32.xlu1 %v1850_v11  ;;  %v1886_v9 = vsel %vm1816_vm0, %v8954_v62, -inf  ;;  %v1883_v10 = vsel %vm1816_vm0, %v8962_v3, -inf  ;;  %v100_v11 = vld [vmem:[%s14237_s1 + $0xa0] sm:$0xff]  ;;  %v8982_v12 = vld [vmem:[%s14234_s2 + $0xc8] sm:$0xff] }
  0x1a   :  { %1848 = vmax.xlane.f32.xlu0 %v1847_v13  ;;  %7330 = vmatprep.mubr.msk.f32.mxu0 %vm210_vm2, %v88_v14  ;;  %v8987_v13 = vld [vmem:[%s14234_s2 + $0xc0] sm:$0xff]  ;;  %v101_v14 = vld [vmem:[%s14237_s1 + $0xa8] sm:$0xff] }
  0x1b   :  { %v7760_v18 = vpop.eup %7759  ;;  %7737 = vmatpush3.bf16.msra.mxu0 %v7734_v5  ;;  %7749 = vmatpush3.bf16.msra.mxu1 %v7734_v5 }
  0x1c   :  { %v62_v23 = vmul.f32 %v7760_v18, %v49_v49  ;;  %v8915_v49 = vld [vmem:[%s14234_s2 + $0x90] sm:$0xff]  ;;  %v1889_v18 = vsel %vm1816_vm0, %v8987_v13, -inf }
  0x1d   :  { %7331 = vmatmul.mubr.msk.f32.gmra.mrb[8].mxu0 %vm210_vm2, %v89_v19  ;;  %1857 = vmax.xlane.f32.xlu1 %v1856_v20  ;;  %v1871_v52 = vsel %vm1816_vm0, %v8915_v49, -inf  ;;  %v102_v19 = vld [vmem:[%s14237_s1 + $0xb0] sm:$0xff]  ;;  %v1715_v20 = vld [vmem:[%s14234_s2 + $0xd8] sm:$0xff] }
  0x1e   :  { %v74_v31 = vsub.f32 %v62_v23, %v73_v17  ;;  %1854 = vmax.xlane.f32.xlu0 %v1853_v24  ;;  %7333 = vmatprep.mubr.msk.f32.mxu0 %vm210_vm2, %v90_v25  ;;  %v1892_v17 = vsel %vm1816_vm0, %v8982_v12, -inf  ;;  %v1898_v23 = vsel %vm1816_vm0, %v1715_v20, -inf  ;;  %v1895_v24 = vsel %vm1816_vm0, %v1714_v21, -inf  ;;  %v104_v25 = vld [vmem:[%s14237_s1 + $0xc0] sm:$0xff]  ;;  %v1727_v20 = vld [vmem:[%s14234_s2 + $0x138] sm:$0xff]  ;;  %v1726_v21 = vld [vmem:[%s14234_s2 + $0x130] sm:$0xff] }
  0x20   :  { %v76_v35 = vsub.f32 1.0, %v74_v31  ;;  %v105_v31 = vld [vmem:[%s14237_s1 + $0xc8] sm:$0xff] }
  0x21   :  { %7334 = vmatmul.mubr.msk.f32.gmra.mrb[10].mxu0 %vm210_vm2, %v91_v33  ;;  %1863 = vmax.xlane.f32.xlu1 %v1862_v34  ;;  %v2591_v33 = vld [vmem:[%s14238_s4 + $0x30] sm:$0xff]  ;;  %v2592_v34 = vld [vmem:[%s14238_s4 + $0x38] sm:$0xff] }
  0x22   :  { %v77_v41 = vmul.f32 %v6788_v32, %v76_v35  ;;  %1860 = vmax.xlane.f32.xlu0 %v1859_v36  ;;  %7336 = vmatprep.mubr.msk.f32.mxu0 %vm210_vm2, %v92_v37  ;;  %v1904_v32 = vsel %vm1816_vm0, %v1717_v27, -inf  ;;  %v1901_v35 = vsel %vm1816_vm0, %v1716_v30, -inf  ;;  %v106_v36 = vld [vmem:[%s14237_s1 + $0xd0] sm:$0xff]  ;;  %v1719_v37 = vld [vmem:[%s14234_s2 + $0xf8] sm:$0xff]  ;;  %v1729_v27 = vld [vmem:[%s14234_s2 + $0x148] sm:$0xff] }
  0x23   :  { %v1728_v30 = vld [vmem:[%s14234_s2 + $0x140] sm:$0xff] }
  0x24   :  { %v78_v44 = vsel %vm75_vm5, %v77_v41, 0.0  ;;  %v7738_v41 = vpack.c.bf16 %v2592_v34, %v2591_v33  ;;  %v1937_v33 = vsel %vm1816_vm0, %v1728_v30, -inf  ;;  %v118_v34 = vld [vmem:[%s14237_s1 + $0x130] sm:$0xff] }
  0x25   :  { %79 = vst [vmem:[%s14239_s5] sm:$0xff] %v78_v44  ;;  %7337 = vmatmul.mubr.msk.f32.gmra.mrb[12].mxu0 %vm210_vm2, %v93_v42  ;;  %1869 = vmax.xlane.f32.xlu1 %v1868_v43  ;;  %v1718_v42 = vld [vmem:[%s14234_s2 + $0xf0] sm:$0xff]  ;;  %v107_v43 = vld [vmem:[%s14237_s1 + $0xd8] sm:$0xff]  ;;  %v1910_v44 = vsel %vm1816_vm0, %v1719_v37, -inf }
  0x26   :  { %1866 = vmax.xlane.f32.xlu0 %v1865_v46  ;;  %7339 = vmatprep.mubr.msk.f32.mxu0 %vm210_vm2, %v94_v47  ;;  %v1907_v46 = vsel %vm1816_vm0, %v1718_v42, -inf  ;;  %v108_v47 = vld [vmem:[%s14237_s1 + $0xe0] sm:$0xff]  ;;  %v119_v37 = vld [vmem:[%s14237_s1 + $0x138] sm:$0xff]  ;;  %v130_v30 = vld [vmem:[%s14237_s1 + $0x190] sm:$0xff] }
  0x27   :  { %7745 = vmatprep.subr.bf16.mxu1 %v7738_v41  ;;  %7739 = vmatprep.subr.bf16.mxu0 %v7738_v41 }
  0x28   :  { %7750 = vmatpush3.bf16.msra.mxu1 %v7738_v41  ;;  %7741 = vmatpush3.bf16.msra.mxu0 %v7738_v41 }
  0x29   :  { %7340 = vmatmul.mubr.msk.f32.gmra.mrb[14].mxu0 %vm210_vm2, %v95_v50  ;;  %1875 = vmax.xlane.f32.xlu1 %v1874_v51  ;;  %v1721_v50 = vld [vmem:[%s14234_s2 + $0x108] sm:$0xff]  ;;  %v1720_v51 = vld [vmem:[%s14234_s2 + $0x100] sm:$0xff] }
  0x2a   :  { %1872 = vmax.xlane.f32.xlu0 %v1871_v52  ;;  %7342 = vmatprep.mubr.msk.f32.mxu0 %vm210_vm2, %v96_v53  ;;  %v2593_v52 = vld [vmem:[%s14238_s4 + $0x40] sm:$0xf]  ;;  %v109_v53 = vld [vmem:[%s14237_s1 + $0xe8] sm:$0xff] }
  0x2b   :  { %7746 = vmatprep.subr.msk.mxu1 %vm2978_vm6, %v2593_v52  ;;  %7526 = vmatprep.subr.msk.mxu0 %vm2978_vm6, %v2593_v52 }
  0x2c   :  { %7751 = vmatpush3.msk.msra.mxu1 %vm2978_vm6, %v2593_v52  ;;  %7527 = vmatpush3.msk.msra.mxu0 %vm2978_vm6, %v2593_v52  ;;  %v122_v52 = vld [vmem:[%s14237_s1 + $0x150] sm:$0xff] }
  0x2d   :  { %7343 = vmatmul.mubr.msk.f32.gmra.mrb[16].mxu0 %vm210_vm2, %v97_v57  ;;  %1881 = vmax.xlane.f32.xlu1 %v1880_v59  ;;  %v1916_v57 = vsel %vm1816_vm0, %v1721_v50, -inf  ;;  %v1913_v59 = vsel %vm1816_vm0, %v1720_v51, -inf }
  0x2e   :  { %1878 = vmax.xlane.f32.xlu0 %v1877_v60  ;;  %7345 = vmatprep.mubr.msk.f32.mxu0 %vm210_vm2, %v98_v61  ;;  %v110_v60 = vld [vmem:[%s14237_s1 + $0xf0] sm:$0xff]  ;;  %v1723_v61 = vld [vmem:[%s14234_s2 + $0x118] sm:$0xff] }
  0x2f   :  { %v1922_v5 = vsel %vm1816_vm0, %v1723_v61, -inf }
  0x31   :  { %7346 = vmatmul.mubr.msk.f32.gmra.mrb[18].mxu0 %vm210_vm2, %v99_v6  ;;  %1887 = vmax.xlane.f32.xlu1 %v1886_v9  ;;  %v1919_v6 = vsel %vm1816_vm0, %v1722_v63, -inf  ;;  %v112_v9 = vld [vmem:[%s14237_s1 + $0x100] sm:$0xff] }
  0x32   :  { %1884 = vmax.xlane.f32.xlu0 %v1883_v10  ;;  %7348 = vmatprep.mubr.msk.f32.mxu0 %vm210_vm2, %v100_v11  ;;  %v1725_v10 = vld [vmem:[%s14234_s2 + $0x128] sm:$0xff]  ;;  %v1724_v11 = vld [vmem:[%s14234_s2 + $0x120] sm:$0xff] }
  0x33   :  { %v124_v63 = vld [vmem:[%s14237_s1 + $0x160] sm:$0xff] }
  0x35   :  { %7349 = vmatmul.mubr.msk.f32.gmra.mrb[20].mxu0 %vm210_vm2, %v101_v14  ;;  %1893 = vmax.xlane.f32.xlu1 %v1892_v17  ;;  %v113_v14 = vld [vmem:[%s14237_s1 + $0x108] sm:$0xff]  ;;  %v1928_v17 = vsel %vm1816_vm0, %v1725_v10, -inf }
  0x36   :  { %1890 = vmax.xlane.f32.xlu0 %v1889_v18  ;;  %7351 = vmatprep.mubr.msk.f32.mxu0 %vm210_vm2, %v102_v19  ;;  %v1925_v18 = vsel %vm1816_vm0, %v1724_v11, -inf  ;;  %v114_v19 = vld [vmem:[%s14237_s1 + $0x110] sm:$0xff] }
  0x37   :  { %v126_v11 = vld [vmem:[%s14237_s1 + $0x170] sm:$0xff] }
  0x39   :  { %7352 = vmatmul.mubr.msk.f32.gmra.mrb[22].mxu0 %vm210_vm2, %v103_v22  ;;  %1899 = vmax.xlane.f32.xlu1 %v1898_v23  ;;  %v115_v22 = vld [vmem:[%s14237_s1 + $0x118] sm:$0xff]  ;;  %v1934_v23 = vsel %vm1816_vm0, %v1727_v20, -inf }
  0x3a   :  { %1896 = vmax.xlane.f32.xlu0 %v1895_v24  ;;  %7354 = vmatprep.mubr.msk.f32.mxu0 %vm210_vm2, %v104_v25  ;;  %v1931_v24 = vsel %vm1816_vm0, %v1726_v21, -inf  ;;  %v116_v25 = vld [vmem:[%s14237_s1 + $0x120] sm:$0xff] }
  0x3b   :  { %v128_v21 = vld [vmem:[%s14237_s1 + $0x180] sm:$0xff] }
  0x3d   :  { %7355 = vmatmul.mubr.msk.f32.gmra.mrb[24].mxu0 %vm210_vm2, %v105_v31  ;;  %1905 = vmax.xlane.f32.xlu1 %v1904_v32  ;;  %v117_v31 = vld [vmem:[%s14237_s1 + $0x128] sm:$0xff]  ;;  %v1940_v32 = vsel %vm1816_vm0, %v1729_v27, -inf }
  0x3e   :  { %1902 = vmax.xlane.f32.xlu0 %v1901_v35  ;;  %7357 = vmatprep.mubr.msk.f32.mxu0 %vm210_vm2, %v106_v36  ;;  %v1731_v35 = vld [vmem:[%s14234_s2 + $0x158] sm:$0xff]  ;;  %v1730_v36 = vld [vmem:[%s14234_s2 + $0x150] sm:$0xff] }
  0x3f   :  { %v1946_v41 = vsel %vm1816_vm0, %v1731_v35, -inf  ;;  %v1943_v42 = vsel %vm1816_vm0, %v1730_v36, -inf  ;;  %v132_v36 = vld [vmem:[%s14237_s1 + $0x1a0] sm:$0xff] }
  0x41   :  { %7358 = vmatmul.mubr.msk.f32.gmra.mrb[26].mxu0 %vm210_vm2, %v107_v43  ;;  %1911 = vmax.xlane.f32.xlu1 %v1910_v44  ;;  %v120_v43 = vld [vmem:[%s14237_s1 + $0x140] sm:$0xff]  ;;  %v1733_v44 = vld [vmem:[%s14234_s2 + $0x168] sm:$0xff] }
  0x42   :  { %1908 = vmax.xlane.f32.xlu0 %v1907_v46  ;;  %7360 = vmatprep.mubr.msk.f32.mxu0 %vm210_vm2, %v108_v47  ;;  %v1732_v46 = vld [vmem:[%s14234_s2 + $0x160] sm:$0xff]  ;;  %v121_v47 = vld [vmem:[%s14237_s1 + $0x148] sm:$0xff]  ;;  %v1952_v50 = vsel %vm1816_vm0, %v1733_v44, -inf }
  0x43   :  { %v1949_v51 = vsel %vm1816_vm0, %v1732_v46, -inf  ;;  %v134_v46 = vld [vmem:[%s14237_s1 + $0x1b0] sm:$0xff] }
  0x45   :  { %7361 = vmatmul.mubr.msk.f32.gmra.mrb[28].mxu0 %vm210_vm2, %v109_v53  ;;  %1917 = vmax.xlane.f32.xlu1 %v1916_v57  ;;  %v1735_v53 = vld [vmem:[%s14234_s2 + $0x178] sm:$0xff]  ;;  %v1734_v57 = vld [vmem:[%s14234_s2 + $0x170] sm:$0xff] }
  0x46   :  { %1914 = vmax.xlane.f32.xlu0 %v1913_v59  ;;  %7363 = vmatprep.mubr.msk.f32.mxu0 %vm210_vm2, %v110_v60  ;;  %v123_v59 = vld [vmem:[%s14237_s1 + $0x158] sm:$0xff]  ;;  %v1958_v60 = vsel %vm1816_vm0, %v1735_v53, -inf  ;;  %v1955_v61 = vsel %vm1816_vm0, %v1734_v57, -inf  ;;  %v136_v57 = vld [vmem:[%s14237_s1 + $0x1c0] sm:$0xff] }
  0x49   :  { %7364 = vmatmul.mubr.msk.f32.gmra.mrb[30].mxu0 %vm210_vm2, %v111_v4  ;;  %1923 = vmax.xlane.f32.xlu1 %v1922_v5  ;;  %v1737_v4 = vld [vmem:[%s14234_s2 + $0x188] sm:$0xff]  ;;  %v1736_v5 = vld [vmem:[%s14234_s2 + $0x180] sm:$0xff] }
  0x4a   :  { %1920 = vmax.xlane.f32.xlu0 %v1919_v6  ;;  %7366 = vmatprep.mubr.msk.f32.mxu0 %vm210_vm2, %v112_v9  ;;  %v125_v6 = vld [vmem:[%s14237_s1 + $0x168] sm:$0xff]  ;;  %v1964_v9 = vsel %vm1816_vm0, %v1737_v4, -inf  ;;  %v1961_v10 = vsel %vm1816_vm0, %v1736_v5, -inf  ;;  %v138_v5 = vld [vmem:[%s14237_s1 + $0x1d0] sm:$0xff] }
  0x4d   :  { %7367 = vmatmul.mubr.msk.f32.gmra.mrb[32].mxu0 %vm210_vm2, %v113_v14  ;;  %1929 = vmax.xlane.f32.xlu1 %v1928_v17  ;;  %v1739_v14 = vld [vmem:[%s14234_s2 + $0x198] sm:$0xff]  ;;  %v1738_v17 = vld [vmem:[%s14234_s2 + $0x190] sm:$0xff] }
  0x4e   :  { %1926 = vmax.xlane.f32.xlu0 %v1925_v18  ;;  %7369 = vmatprep.mubr.msk.f32.mxu0 %vm210_vm2, %v114_v19  ;;  %v127_v18 = vld [vmem:[%s14237_s1 + $0x178] sm:$0xff]  ;;  %v1970_v19 = vsel %vm1816_vm0, %v1739_v14, -inf  ;;  %v1967_v20 = vsel %vm1816_vm0, %v1738_v17, -inf  ;;  %v140_v17 = vld [vmem:[%s14237_s1 + $0x1e0] sm:$0xff] }
  0x51   :  { %7370 = vmatmul.mubr.msk.f32.gmra.mrb[34].mxu0 %vm210_vm2, %v115_v22  ;;  %1935 = vmax.xlane.f32.xlu1 %v1934_v23  ;;  %v1741_v22 = vld [vmem:[%s14234_s2 + $0x1a8] sm:$0xff]  ;;  %v1740_v23 = vld [vmem:[%s14234_s2 + $0x1a0] sm:$0xff] }
  0x52   :  { %1932 = vmax.xlane.f32.xlu0 %v1931_v24  ;;  %7372 = vmatprep.mubr.msk.f32.mxu0 %vm210_vm2, %v116_v25  ;;  %v129_v24 = vld [vmem:[%s14237_s1 + $0x188] sm:$0xff]  ;;  %v1976_v25 = vsel %vm1816_vm0, %v1741_v22, -inf  ;;  %v1973_v27 = vsel %vm1816_vm0, %v1740_v23, -inf  ;;  %v142_v23 = vld [vmem:[%s14237_s1 + $0x1f0] sm:$0xff] }
  0x55   :  { %7373 = vmatmul.mubr.msk.f32.gmra.mrb[36].mxu0 %vm210_vm2, %v117_v31  ;;  %1941 = vmax.xlane.f32.xlu1 %v1940_v32  ;;  %v1743_v31 = vld [vmem:[%s14234_s2 + $0x1b8] sm:$0xff]  ;;  %v1742_v32 = vld [vmem:[%s14234_s2 + $0x1b0] sm:$0xff] }
  0x56   :  { %1938 = vmax.xlane.f32.xlu0 %v1937_v33  ;;  %7375 = vmatprep.mubr.msk.f32.mxu0 %vm210_vm2, %v118_v34  ;;  %v131_v33 = vld [vmem:[%s14237_s1 + $0x198] sm:$0xff]  ;;  %v1982_v34 = vsel %vm1816_vm0, %v1743_v31, -inf  ;;  %v1979_v35 = vsel %vm1816_vm0, %v1742_v32, -inf  ;;  %v144_v32 = vld [vmem:[%s14237_s1 + $0x200] sm:$0xff] }
  0x59   :  { %7376 = vmatmul.mubr.msk.f32.gmra.mrb[38].mxu0 %vm210_vm2, %v119_v37  ;;  %1947 = vmax.xlane.f32.xlu1 %v1946_v41  ;;  %v1745_v37 = vld [vmem:[%s14234_s2 + $0x1c8] sm:$0xff]  ;;  %v1744_v41 = vld [vmem:[%s14234_s2 + $0x1c0] sm:$0xff] }
  0x5a   :  { %1944 = vmax.xlane.f32.xlu0 %v1943_v42  ;;  %7378 = vmatprep.mubr.msk.f32.mxu0 %vm210_vm2, %v120_v43  ;;  %v133_v42 = vld [vmem:[%s14237_s1 + $0x1a8] sm:$0xff]  ;;  %v1988_v43 = vsel %vm1816_vm0, %v1745_v37, -inf  ;;  %v1985_v44 = vsel %vm1816_vm0, %v1744_v41, -inf  ;;  %v146_v41 = vld [vmem:[%s14237_s1 + $0x210] sm:$0xff] }
  0x5d   :  { %7379 = vmatmul.mubr.msk.f32.gmra.mrb[40].mxu0 %vm210_vm2, %v121_v47  ;;  %1953 = vmax.xlane.f32.xlu1 %v1952_v50  ;;  %v1747_v47 = vld [vmem:[%s14234_s2 + $0x1d8] sm:$0xff]  ;;  %v1746_v50 = vld [vmem:[%s14234_s2 + $0x1d0] sm:$0xff] }
  0x5e   :  { %1950 = vmax.xlane.f32.xlu0 %v1949_v51  ;;  %7381 = vmatprep.mubr.msk.f32.mxu0 %vm210_vm2, %v122_v52  ;;  %v135_v51 = vld [vmem:[%s14237_s1 + $0x1b8] sm:$0xff]  ;;  %v1994_v52 = vsel %vm1816_vm0, %v1747_v47, -inf  ;;  %v1991_v53 = vsel %vm1816_vm0, %v1746_v50, -inf  ;;  %v148_v50 = vld [vmem:[%s14237_s1 + $0x220] sm:$0xff] }
  0x61   :  { %7382 = vmatmul.mubr.msk.f32.gmra.mrb[42].mxu0 %vm210_vm2, %v123_v59  ;;  %1959 = vmax.xlane.f32.xlu1 %v1958_v60  ;;  %v1749_v59 = vld [vmem:[%s14234_s2 + $0x1e8] sm:$0xff]  ;;  %v1748_v60 = vld [vmem:[%s14234_s2 + $0x1e0] sm:$0xff] }
  0x62   :  { %1956 = vmax.xlane.f32.xlu0 %v1955_v61  ;;  %7384 = vmatprep.mubr.msk.f32.mxu0 %vm210_vm2, %v124_v63  ;;  %v137_v61 = vld [vmem:[%s14237_s1 + $0x1c8] sm:$0xff]  ;;  %v2000_v63 = vsel %vm1816_vm0, %v1749_v59, -inf  ;;  %v1997_v4 = vsel %vm1816_vm0, %v1748_v60, -inf }
  0x65   :  { %7385 = vmatmul.mubr.msk.f32.gmra.mrb[44].mxu0 %vm210_vm2, %v125_v6  ;;  %1965 = vmax.xlane.f32.xlu1 %v1964_v9  ;;  %v1751_v6 = vld [vmem:[%s14234_s2 + $0x1f8] sm:$0xff]  ;;  %v1750_v9 = vld [vmem:[%s14234_s2 + $0x1f0] sm:$0xff] }
  0x66   :  { %1962 = vmax.xlane.f32.xlu0 %v1961_v10  ;;  %7387 = vmatprep.mubr.msk.f32.mxu0 %vm210_vm2, %v126_v11  ;;  %v139_v10 = vld [vmem:[%s14237_s1 + $0x1d8] sm:$0xff]  ;;  %v2006_v11 = vsel %vm1816_vm0, %v1751_v6, -inf  ;;  %v2003_v14 = vsel %vm1816_vm0, %v1750_v9, -inf  ;;  %v1762_v6 = vld [vmem:[%s14234_s2 + $0x250] sm:$0xff] }
  0x69   :  { %7388 = vmatmul.mubr.msk.f32.gmra.mrb[46].mxu0 %vm210_vm2, %v127_v18  ;;  %1971 = vmax.xlane.f32.xlu1 %v1970_v19  ;;  %v1753_v18 = vld [vmem:[%s14234_s2 + $0x208] sm:$0xff]  ;;  %v1752_v19 = vld [vmem:[%s14234_s2 + $0x200] sm:$0xff] }
  0x6a   :  { %1968 = vmax.xlane.f32.xlu0 %v1967_v20  ;;  %7390 = vmatprep.mubr.msk.f32.mxu0 %vm210_vm2, %v128_v21  ;;  %v141_v20 = vld [vmem:[%s14237_s1 + $0x1e8] sm:$0xff]  ;;  %v2012_v21 = vsel %vm1816_vm0, %v1753_v18, -inf  ;;  %v2009_v22 = vsel %vm1816_vm0, %v1752_v19, -inf  ;;  %v2039_v18 = vsel %vm1816_vm0, %v1762_v6, -inf  ;;  %v152_v19 = vld [vmem:[%s14237_s1 + $0x240] sm:$0xff] }
  0x6d   :  { %7391 = vmatmul.mubr.msk.f32.gmra.mrb[48].mxu0 %vm210_vm2, %v129_v24  ;;  %1977 = vmax.xlane.f32.xlu1 %v1976_v25  ;;  %v1755_v24 = vld [vmem:[%s14234_s2 + $0x218] sm:$0xff]  ;;  %v1754_v25 = vld [vmem:[%s14234_s2 + $0x210] sm:$0xff] }
  0x6e   :  { %1974 = vmax.xlane.f32.xlu0 %v1973_v27  ;;  %7393 = vmatprep.mubr.msk.f32.mxu0 %vm210_vm2, %v130_v30  ;;  %v143_v27 = vld [vmem:[%s14237_s1 + $0x1f8] sm:$0xff]  ;;  %v2018_v30 = vsel %vm1816_vm0, %v1755_v24, -inf  ;;  %v2015_v31 = vsel %vm1816_vm0, %v1754_v25, -inf }
  0x71   :  { %7394 = vmatmul.mubr.msk.f32.gmra.mrb[50].mxu0 %vm210_vm2, %v131_v33  ;;  %1983 = vmax.xlane.f32.xlu1 %v1982_v34  ;;  %v1757_v33 = vld [vmem:[%s14234_s2 + $0x228] sm:$0xff]  ;;  %v1756_v34 = vld [vmem:[%s14234_s2 + $0x220] sm:$0xff] }
  0x72   :  { %1980 = vmax.xlane.f32.xlu0 %v1979_v35  ;;  %7396 = vmatprep.mubr.msk.f32.mxu0 %vm210_vm2, %v132_v36  ;;  %v145_v35 = vld [vmem:[%s14237_s1 + $0x208] sm:$0xff]  ;;  %v2024_v36 = vsel %vm1816_vm0, %v1757_v33, -inf  ;;  %v2021_v37 = vsel %vm1816_vm0, %v1756_v34, -inf  ;;  %v1766_v34 = vld [vmem:[%s14234_s2 + $0x270] sm:$0xff] }
  0x75   :  { %7397 = vmatmul.mubr.msk.f32.gmra.mrb[52].mxu0 %vm210_vm2, %v133_v42  ;;  %1989 = vmax.xlane.f32.xlu1 %v1988_v43  ;;  %v1759_v42 = vld [vmem:[%s14234_s2 + $0x238] sm:$0xff]  ;;  %v1758_v43 = vld [vmem:[%s14234_s2 + $0x230] sm:$0xff] }
  0x76   :  { %1986 = vmax.xlane.f32.xlu0 %v1985_v44  ;;  %7399 = vmatprep.mubr.msk.f32.mxu0 %vm210_vm2, %v134_v46  ;;  %v147_v44 = vld [vmem:[%s14237_s1 + $0x218] sm:$0xff]  ;;  %v2030_v46 = vsel %vm1816_vm0, %v1759_v42, -inf  ;;  %v2027_v47 = vsel %vm1816_vm0, %v1758_v43, -inf }
  0x79   :  { %7400 = vmatmul.mubr.msk.f32.gmra.mrb[54].mxu0 %vm210_vm2, %v135_v51  ;;  %1995 = vmax.xlane.f32.xlu1 %v1994_v52  ;;  %v1761_v52 = vld [vmem:[%s14234_s2 + $0x248] sm:$0xff] }
  0x7a   :  { %1992 = vmax.xlane.f32.xlu0 %v1991_v53  ;;  %7402 = vmatprep.mubr.msk.f32.mxu0 %vm210_vm2, %v136_v57  ;;  %v1760_v57 = vld [vmem:[%s14234_s2 + $0x240] sm:$0xff] }
  0x7d   :  { %7403 = vmatmul.mubr.msk.f32.gmra.mrb[56].mxu0 %vm210_vm2, %v137_v61  ;;  %2001 = vmax.xlane.f32.xlu1 %v2000_v63  ;;  %v149_v61 = vld [vmem:[%s14237_s1 + $0x228] sm:$0xff]  ;;  %v2036_v63 = vsel %vm1816_vm0, %v1761_v52, -inf }
  0x7e   :  { %1998 = vmax.xlane.f32.xlu0 %v1997_v4  ;;  %7405 = vmatprep.mubr.msk.f32.mxu0 %vm210_vm2, %v138_v5  ;;  %v150_v4 = vld [vmem:[%s14237_s1 + $0x230] sm:$0xff]  ;;  %v1763_v5 = vld [vmem:[%s14234_s2 + $0x258] sm:$0xff] }
  0x81   :  { %7406 = vmatmul.mubr.msk.f32.gmra.mrb[58].mxu0 %vm210_vm2, %v139_v10  ;;  %2007 = vmax.xlane.f32.xlu1 %v2006_v11  ;;  %v151_v10 = vld [vmem:[%s14237_s1 + $0x238] sm:$0xff]  ;;  %v2042_v11 = vsel %vm1816_vm0, %v1763_v5, -inf }
  0x82   :  { %2004 = vmax.xlane.f32.xlu0 %v2003_v14  ;;  %7408 = vmatprep.mubr.msk.f32.mxu0 %vm210_vm2, %v140_v17  ;;  %v1771_v5 = vld [vmem:[%s14234_s2 + $0x298] sm:$0xff] }
  0x85   :  { %7409 = vmatmul.mubr.msk.f32.gmra.mrb[60].mxu0 %vm210_vm2, %v141_v20  ;;  %2013 = vmax.xlane.f32.xlu1 %v2012_v21  ;;  %v1765_v20 = vld [vmem:[%s14234_s2 + $0x268] sm:$0xff]  ;;  %v1764_v21 = vld [vmem:[%s14234_s2 + $0x260] sm:$0xff] }
  0x86   :  { %2010 = vmax.xlane.f32.xlu0 %v2009_v22  ;;  %7411 = vmatprep.mubr.msk.f32.mxu0 %vm210_vm2, %v142_v23  ;;  %v153_v23 = vld [vmem:[%s14237_s1 + $0x248] sm:$0xff]  ;;  %v2048_v24 = vsel %vm1816_vm0, %v1765_v20, -inf }
  0x89   :  { %7412 = vmatmul.mubr.msk.f32.gmra.mrb[62].mxu0 %vm210_vm2, %v143_v27  ;;  %2019 = vmax.xlane.f32.xlu1 %v2018_v30  ;;  %v2045_v30 = vsel %vm1816_vm0, %v1764_v21, -inf }
  0x8a   :  { %2016 = vmax.xlane.f32.xlu0 %v2015_v31  ;;  %7414 = vmatprep.mubr.msk.f32.mxu0 %vm210_vm2, %v144_v32  ;;  %v154_v31 = vld [vmem:[%s14237_s1 + $0x250] sm:$0xff]  ;;  %v1767_v32 = vld [vmem:[%s14234_s2 + $0x278] sm:$0xff] }
  0x8d   :  { %7415 = vmatmul.mubr.msk.f32.gmra.mrb[64].mxu0 %vm210_vm2, %v145_v35  ;;  %2025 = vmax.xlane.f32.xlu1 %v2024_v36 }
  0x8e   :  { %2022 = vmax.xlane.f32.xlu0 %v2021_v37  ;;  %7417 = vmatprep.mubr.msk.f32.mxu0 %vm210_vm2, %v146_v41  ;;  %v155_v41 = vld [vmem:[%s14237_s1 + $0x258] sm:$0xff] }
  0x90   :  { %v9378_v51 = vpop.xlane.xlu1 %1824  ;;  %v9389_v59 = vpop.xlane.xlu0 %1818 }
  0x91   :  { %v2203_v53 = vsub.f32 %v8672_v0, %v9378_v51  ;;  %7418 = vmatmul.mubr.msk.f32.gmra.mrb[66].mxu0 %vm210_vm2, %v147_v44  ;;  %2031 = vmax.xlane.f32.xlu1 %v2030_v46  ;;  %14339 = vst [vmem:[#allocation2_spill] sm:$0xff] %v9389_v59  ;;  %v2033_v0 = vsel %vm1816_vm0, %v1760_v57, -inf  ;;  %v2051_v44 = vsel %vm1816_vm0, %v1766_v34, -inf  ;;  %v156_v46 = vld [vmem:[%s14237_s1 + $0x260] sm:$0xff] }
  0x92   :  { %2028 = vmax.xlane.f32.xlu0 %v2027_v47  ;;  %7420 = vmatprep.mubr.msk.f32.mxu0 %vm210_vm2, %v148_v50  ;;  %v1769_v47 = vld [vmem:[%s14234_s2 + $0x288] sm:$0xff] }
  0x93   :  { %v2333_v60 = vmul.f32 1.442695, %v2203_v53 }
  0x95   :  { %7761 = vpow2.f32 %v2333_v60  ;;  %7421 = vmatmul.mubr.msk.f32.gmra.mrb[68].mxu0 %vm210_vm2, %v149_v61  ;;  %2037 = vmax.xlane.f32.xlu1 %v2036_v63  ;;  %v157_v60 = vld [vmem:[%s14237_s1 + $0x268] sm:$0xff] }
  0x96   :  { %2034 = vmax.xlane.f32.xlu0 %v2033_v0  ;;  %7423 = vmatprep.mubr.msk.f32.mxu0 %vm210_vm2, %v150_v4  ;;  %v9408_v9 = vpop.xlane.xlu1 %1827  ;;  %v158_v4 = vld [vmem:[%s14237_s1 + $0x270] sm:$0xff] }
  0x97   :  { %v2204_v14 = vsub.f32 %v8713_v28, %v9408_v9  ;;  %v9416_v17 = vpop.xlane.xlu0 %1821 }
  0x98   :  { %14340 = vst [vmem:[#allocation3_spill] sm:$0xff] %v9416_v17 }
  0x99   :  { %v2335_v22 = vmul.f32 1.442695, %v2204_v14  ;;  %7424 = vmatmul.mubr.msk.f32.gmra.mrb[70].mxu0 %vm210_vm2, %v151_v10  ;;  %2043 = vmax.xlane.f32.xlu1 %v2042_v11 }
  0x9a   :  { %2040 = vmax.xlane.f32.xlu0 %v2039_v18  ;;  %7426 = vmatprep.mubr.msk.f32.mxu0 %vm210_vm2, %v152_v19  ;;  %v9430_v28 = vpop.xlane.xlu1 %1833  ;;  %v159_v19 = vld [vmem:[%s14237_s1 + $0x278] sm:$0xff] }
  0x9b   :  { %7763 = vpow2.f32 %v2335_v22  ;;  %v2206_v25 = vsub.f32 %v8730_v39, %v9430_v28  ;;  %v9438_v27 = vpop.xlane.xlu0 %1830 }
  0x9c   :  { %v2205_v33 = vsub.f32 %v8741_v45, %v9438_v27  ;;  %v2054_v45 = vsel %vm1816_vm0, %v1767_v32, -inf }
  0x9d   :  { %v2339_v39 = vmul.f32 1.442695, %v2206_v25  ;;  %7427 = vmatmul.mubr.msk.f32.gmra.mrb[72].mxu0 %vm210_vm2, %v153_v23  ;;  %2049 = vmax.xlane.f32.xlu1 %v2048_v24  ;;  %v160_v23 = vld [vmem:[%s14237_s1 + $0x280] sm:$0xff]  ;;  %v1773_v24 = vld [vmem:[%s14234_s2 + $0x2a8] sm:$0xff] }
  0x9e   :  { %v2337_v36 = vmul.f32 1.442695, %v2205_v33  ;;  %2046 = vmax.xlane.f32.xlu0 %v2045_v30  ;;  %7429 = vmatprep.mubr.msk.f32.mxu0 %vm210_vm2, %v154_v31  ;;  %v9454_v37 = vpop.xlane.xlu1 %1839 }
  0x9f   :  { %v7762_v35 = vpop.eup %7761  ;;  %7765 = vpow2.f32 %v2339_v39  ;;  %v2208_v42 = vsub.f32 %v8763_v56, %v9454_v37  ;;  %v9462_v43 = vpop.xlane.xlu0 %1836  ;;  %v1768_v56 = vld [vmem:[%s14234_s2 + $0x280] sm:$0xff]  ;;  %v2072_v39 = vsel %vm1816_vm0, %v1773_v24, -inf  ;;  %v1779_v24 = vld [vmem:[%s14234_s2 + $0x2d8] sm:$0xff] }
  0xa0   :  { %7531 = vmatprep.mubr.msk.f32.mxu1 %vm1816_vm0, %v7762_v35  ;;  %7767 = vpow2.f32 %v2337_v36  ;;  %v2207_v50 = vsub.f32 %v8768_v58, %v9462_v43  ;;  %v2060_v58 = vsel %vm1816_vm0, %v1769_v47, -inf  ;;  %v2057_v0 = vsel %vm1816_vm0, %v1768_v56, -inf }
  0xa1   :  { %v2343_v52 = vmul.f32 1.442695, %v2208_v42  ;;  %7430 = vmatmul.mubr.msk.f32.gmra.mrb[74].mxu0 %vm210_vm2, %v155_v41  ;;  %2055 = vmax.xlane.f32.xlu1 %v2054_v45  ;;  %v162_v45 = vld [vmem:[%s14237_s1 + $0x290] sm:$0xff]  ;;  %v1775_v42 = vld [vmem:[%s14234_s2 + $0x2b8] sm:$0xff] }
  0xa2   :  { %v2341_v53 = vmul.f32 1.442695, %v2207_v50  ;;  %2052 = vmax.xlane.f32.xlu0 %v2051_v44  ;;  %7432 = vmatprep.mubr.msk.f32.mxu0 %vm210_vm2, %v156_v46  ;;  %v9479_v57 = vpop.xlane.xlu1 %1845 }
  0xa3   :  { %7769 = vpow2.f32 %v2343_v52  ;;  %v2210_v61 = vsub.f32 %v8785_v1, %v9479_v57  ;;  %v9487_v63 = vpop.xlane.xlu0 %1842  ;;  %v1770_v1 = vld [vmem:[%s14234_s2 + $0x290] sm:$0xff] }
  0xa4   :  { %7771 = vpow2.f32 %v2341_v53  ;;  %v2209_v6 = vsub.f32 %v8790_v2, %v9487_v63  ;;  %v2066_v2 = vsel %vm1816_vm0, %v1771_v5, -inf  ;;  %v2063_v22 = vsel %vm1816_vm0, %v1770_v1, -inf }
  0xa5   :  { %v7764_v10 = vpop.eup %7763  ;;  %v2347_v11 = vmul.f32 1.442695, %v2210_v61  ;;  %7433 = vmatmul.mubr.msk.f32.gmra.mrb[76].mxu0 %vm210_vm2, %v157_v60  ;;  %2061 = vmax.xlane.f32.xlu1 %v2060_v58  ;;  %v2078_v53 = vsel %vm1816_vm0, %v1775_v42, -inf  ;;  %v1781_v42 = vld [vmem:[%s14234_s2 + $0x2e8] sm:$0xff] }
  0xa6   :  { %v2345_v14 = vmul.f32 1.442695, %v2209_v6  ;;  %2058 = vmax.xlane.f32.xlu0 %v2057_v0  ;;  %7435 = vmatprep.mubr.msk.f32.mxu0 %vm210_vm2, %v158_v4  ;;  %v9503_v18 = vpop.xlane.xlu1 %1851  ;;  %v164_v0 = vld [vmem:[%s14237_s1 + $0x2a0] sm:$0xff]  ;;  %v1777_v4 = vld [vmem:[%s14234_s2 + $0x2c8] sm:$0xff] }
  0xa7   :  { %7773 = vpow2.f32 %v2347_v11  ;;  %7532 = vmatmul.mubr.msk.f32.vlgmr.msra.gmra.mrb[0].mxu1 %vm1816_vm0, %v7764_v10  ;;  %v2212_v20 = vsub.f32 %v8807_v7, %v9503_v18  ;;  %v9512_v21 = vpop.xlane.xlu0 %1848  ;;  %v1772_v7 = vld [vmem:[%s14234_s2 + $0x2a0] sm:$0xff] }
  0xa8   :  { %7775 = vpow2.f32 %v2345_v14  ;;  %v2211_v25 = vsub.f32 %v8812_v8, %v9512_v21  ;;  %v161_v8 = vld [vmem:[%s14237_s1 + $0x288] sm:$0xff]  ;;  %v2069_v41 = vsel %vm1816_vm0, %v1772_v7, -inf }
  0xa9   :  { %v7766_v30 = vpop.eup %7765  ;;  %v2351_v31 = vmul.f32 1.442695, %v2212_v20  ;;  %7436 = vmatmul.mubr.msk.f32.gmra.mrb[78].mxu0 %vm210_vm2, %v159_v19  ;;  %2067 = vmax.xlane.f32.xlu1 %v2066_v2  ;;  %v2084_v19 = vsel %vm1816_vm0, %v1777_v4, -inf  ;;  %v1783_v4 = vld [vmem:[%s14234_s2 + $0x2f8] sm:$0xff] }
  0xaa   :  { %v7768_v32 = vpop.eup %7767  ;;  %v2349_v33 = vmul.f32 1.442695, %v2211_v25  ;;  %2064 = vmax.xlane.f32.xlu0 %v2063_v22  ;;  %7438 = vmatprep.mubr.msk.f32.mxu0 %vm210_vm2, %v160_v23  ;;  %v9528_v34 = vpop.xlane.xlu1 %1857  ;;  %v166_v23 = vld [vmem:[%s14237_s1 + $0x2b0] sm:$0xff] }
  0xab   :  { %7777 = vpow2.f32 %v2351_v31  ;;  %v2214_v35 = vsub.f32 %v8829_v15, %v9528_v34  ;;  %7534 = vmatprep.mubr.msk.f32.mxu1 %vm1816_vm0, %v7768_v32  ;;  %v9537_v36 = vpop.xlane.xlu0 %1854  ;;  %v1774_v15 = vld [vmem:[%s14234_s2 + $0x2b0] sm:$0xff] }
  0xac   :  { %7779 = vpow2.f32 %v2349_v33  ;;  %v2213_v44 = vsub.f32 %v8834_v16, %v9537_v36  ;;  %7535 = vmatmul.mubr.msk.f32.gmra.mrb[2].mxu1 %vm1816_vm0, %v7766_v30  ;;  %v163_v16 = vld [vmem:[%s14237_s1 + $0x298] sm:$0xff]  ;;  %v2075_v61 = vsel %vm1816_vm0, %v1774_v15, -inf }
  0xad   :  { %v7770_v46 = vpop.eup %7769  ;;  %v2355_v47 = vmul.f32 1.442695, %v2214_v35  ;;  %7439 = vmatmul.mubr.msk.f32.gmra.mrb[80].mxu0 %vm210_vm2, %v161_v8  ;;  %2073 = vmax.xlane.f32.xlu1 %v2072_v39  ;;  %v2090_v8 = vsel %vm1816_vm0, %v1779_v24, -inf  ;;  %v1785_v24 = vld [vmem:[%s14234_s2 + $0x308] sm:$0xff] }
  0xae   :  { %v7772_v50 = vpop.eup %7771  ;;  %v2353_v56 = vmul.f32 1.442695, %v2213_v44  ;;  %2070 = vmax.xlane.f32.xlu0 %v2069_v41  ;;  %7441 = vmatprep.mubr.msk.f32.mxu0 %vm210_vm2, %v162_v45  ;;  %v9554_v52 = vpop.xlane.xlu1 %1863  ;;  %v168_v45 = vld [vmem:[%s14237_s1 + $0x2c0] sm:$0xff] }
  0xaf   :  { %7781 = vpow2.f32 %v2355_v47  ;;  %v2216_v60 = vsub.f32 %v8857_v26, %v9554_v52  ;;  %7537 = vmatprep.mubr.msk.f32.mxu1 %vm1816_vm0, %v7772_v50  ;;  %v9563_v58 = vpop.xlane.xlu0 %1860  ;;  %v1776_v26 = vld [vmem:[%s14234_s2 + $0x2c0] sm:$0xff] }
  0xb0   :  { %7783 = vpow2.f32 %v2353_v56  ;;  %v2215_v5 = vsub.f32 %v8862_v29, %v9563_v58  ;;  %7538 = vmatmul.mubr.msk.f32.gmra.mrb[4].mxu1 %vm1816_vm0, %v7770_v46  ;;  %v165_v29 = vld [vmem:[%s14237_s1 + $0x2a8] sm:$0xff]  ;;  %v2081_v22 = vsel %vm1816_vm0, %v1776_v26, -inf }
  0xb1   :  { %v7774_v6 = vpop.eup %7773  ;;  %v2359_v1 = vmul.f32 1.442695, %v2216_v60  ;;  %7442 = vmatmul.mubr.msk.f32.gmra.mrb[82].mxu0 %vm210_vm2, %v163_v16  ;;  %2079 = vmax.xlane.f32.xlu1 %v2078_v53  ;;  %v2096_v16 = vsel %vm1816_vm0, %v1781_v42, -inf  ;;  %v1787_v42 = vld [vmem:[%s14234_s2 + $0x318] sm:$0xff] }
  0xb2   :  { %v7776_v10 = vpop.eup %7775  ;;  %v2357_v11 = vmul.f32 1.442695, %v2215_v5  ;;  %2076 = vmax.xlane.f32.xlu0 %v2075_v61  ;;  %7444 = vmatprep.mubr.msk.f32.mxu0 %vm210_vm2, %v164_v0  ;;  %v9580_v14 = vpop.xlane.xlu1 %1869  ;;  %v170_v0 = vld [vmem:[%s14237_s1 + $0x2d0] sm:$0xff] }
  0xb3   :  { %7785 = vpow2.f32 %v2359_v1  ;;  %v2218_v2 = vsub.f32 %v8885_v38, %v9580_v14  ;;  %7540 = vmatprep.mubr.msk.f32.mxu1 %vm1816_vm0, %v7776_v10  ;;  %v9589_v20 = vpop.xlane.xlu0 %1866  ;;  %v1778_v38 = vld [vmem:[%s14234_s2 + $0x2d0] sm:$0xff] }
  0xb4   :  { %7787 = vpow2.f32 %v2357_v11  ;;  %v2217_v25 = vsub.f32 %v8890_v40, %v9589_v20  ;;  %7541 = vmatmul.mubr.msk.f32.gmra.mrb[6].mxu1 %vm1816_vm0, %v7774_v6  ;;  %v167_v40 = vld [vmem:[%s14237_s1 + $0x2b8] sm:$0xff]  ;;  %v2087_v41 = vsel %vm1816_vm0, %v1778_v38, -inf }
  0xb5   :  { %v7778_v7 = vpop.eup %7777  ;;  %v2363_v30 = vmul.f32 1.442695, %v2218_v2  ;;  %7445 = vmatmul.mubr.msk.f32.gmra.mrb[84].mxu0 %vm210_vm2, %v165_v29  ;;  %2085 = vmax.xlane.f32.xlu1 %v2084_v19  ;;  %v2102_v29 = vsel %vm1816_vm0, %v1783_v4, -inf  ;;  %v176_v4 = vld [vmem:[%s14237_s1 + $0x300] sm:$0xff] }
  0xb6   :  { %v7780_v31 = vpop.eup %7779  ;;  %v2361_v32 = vmul.f32 1.442695, %v2217_v25  ;;  %2082 = vmax.xlane.f32.xlu0 %v2081_v22  ;;  %7447 = vmatprep.mubr.msk.f32.mxu0 %vm210_vm2, %v166_v23  ;;  %v9606_v33 = vpop.xlane.xlu1 %1875  ;;  %v172_v23 = vld [vmem:[%s14237_s1 + $0x2e0] sm:$0xff] }
  0xb7   :  { %7789 = vpow2.f32 %v2363_v30  ;;  %v2220_v39 = vsub.f32 %v8907_v48, %v9606_v33  ;;  %7543 = vmatprep.mubr.msk.f32.mxu1 %vm1816_vm0, %v7780_v31  ;;  %v9615_v35 = vpop.xlane.xlu0 %1872  ;;  %v1780_v48 = vld [vmem:[%s14234_s2 + $0x2e0] sm:$0xff] }
  0xb8   :  { %7791 = vpow2.f32 %v2361_v32  ;;  %v2219_v44 = vsub.f32 %v8915_v49, %v9615_v35  ;;  %7544 = vmatmul.mubr.msk.f32.gmra.mrb[8].mxu1 %vm1816_vm0, %v7778_v7  ;;  %v169_v49 = vld [vmem:[%s14237_s1 + $0x2c8] sm:$0xff]  ;;  %v2093_v61 = vsel %vm1816_vm0, %v1780_v48, -inf }
  0xb9   :  { %v7782_v15 = vpop.eup %7781  ;;  %v2367_v46 = vmul.f32 1.442695, %v2220_v39  ;;  %7448 = vmatmul.mubr.msk.f32.gmra.mrb[86].mxu0 %vm210_vm2, %v167_v40  ;;  %2091 = vmax.xlane.f32.xlu1 %v2090_v8  ;;  %v2108_v40 = vsel %vm1816_vm0, %v1785_v24, -inf  ;;  %v8275_v24 = vld [vmem:[%s14234_s2 + $0xe8] sm:$0xff] }
  0xba   :  { %v7784_v47 = vpop.eup %7783  ;;  %v2365_v50 = vmul.f32 1.442695, %v2219_v44  ;;  %2088 = vmax.xlane.f32.xlu0 %v2087_v41  ;;  %7450 = vmatprep.mubr.msk.f32.mxu0 %vm210_vm2, %v168_v45  ;;  %v9632_v56 = vpop.xlane.xlu1 %1881  ;;  %v174_v45 = vld [vmem:[%s14237_s1 + $0x2f0] sm:$0xff] }
  0xbb   :  { %7793 = vpow2.f32 %v2367_v46  ;;  %v2222_v53 = vsub.f32 %v8932_v54, %v9632_v56  ;;  %7546 = vmatprep.mubr.msk.f32.mxu1 %vm1816_vm0, %v7784_v47  ;;  %v9641_v60 = vpop.xlane.xlu0 %1878  ;;  %v1782_v54 = vld [vmem:[%s14234_s2 + $0x2f0] sm:$0xff] }
  0xbc   :  { %7795 = vpow2.f32 %v2365_v50  ;;  %v2221_v5 = vsub.f32 %v8937_v55, %v9641_v60  ;;  %7547 = vmatmul.mubr.msk.f32.gmra.mrb[10].mxu1 %vm1816_vm0, %v7782_v15  ;;  %v171_v55 = vld [vmem:[%s14237_s1 + $0x2d8] sm:$0xff]  ;;  %v2099_v22 = vsel %vm1816_vm0, %v1782_v54, -inf  ;;  %v8274_v54 = vld [vmem:[%s14234_s2 + $0xd0] sm:$0xff] }
  0xbd   :  { %v7786_v26 = vpop.eup %7785  ;;  %v2371_v6 = vmul.f32 1.442695, %v2222_v53  ;;  %7451 = vmatmul.mubr.msk.f32.gmra.mrb[88].mxu0 %vm210_vm2, %v169_v49  ;;  %2097 = vmax.xlane.f32.xlu1 %v2096_v16  ;;  %v2114_v49 = vsel %vm1816_vm0, %v1787_v42, -inf  ;;  %v8273_v16 = vld [vmem:[%s14234_s2 + $0xd8] sm:$0xff] }
  0xbe   :  { %v7788_v1 = vpop.eup %7787  ;;  %v2369_v10 = vmul.f32 1.442695, %v2221_v5  ;;  %2094 = vmax.xlane.f32.xlu0 %v2093_v61  ;;  %7453 = vmatprep.mubr.msk.f32.mxu0 %vm210_vm2, %v170_v0  ;;  %v9658_v11 = vpop.xlane.xlu1 %1887  ;;  %v1789_v5 = vld [vmem:[%s14234_s2 + $0x328] sm:$0xff] }
  0xbf   :  { %7797 = vpow2.f32 %v2371_v6  ;;  %v2224_v19 = vsub.f32 %v8954_v62, %v9658_v11  ;;  %7549 = vmatprep.mubr.msk.f32.mxu1 %vm1816_vm0, %v7788_v1  ;;  %v9667_v2 = vpop.xlane.xlu0 %1884  ;;  %v1784_v62 = vld [vmem:[%s14234_s2 + $0x300] sm:$0xff] }
  0xc0   :  { %7799 = vpow2.f32 %v2369_v10  ;;  %v2223_v25 = vsub.f32 %v8962_v3, %v9667_v2  ;;  %7550 = vmatmul.mubr.msk.f32.gmra.mrb[12].mxu1 %vm1816_vm0, %v7786_v26  ;;  %v173_v3 = vld [vmem:[%s14237_s1 + $0x2e8] sm:$0xff]  ;;  %v2105_v41 = vsel %vm1816_vm0, %v1784_v62, -inf  ;;  %v1788_v6 = vld [vmem:[%s14234_s2 + $0x320] sm:$0xff] }
  0xc1   :  { %v7790_v38 = vpop.eup %7789  ;;  %v2375_v7 = vmul.f32 1.442695, %v2224_v19  ;;  %7454 = vmatmul.mubr.msk.f32.gmra.mrb[90].mxu0 %vm210_vm2, %v171_v55  ;;  %2103 = vmax.xlane.f32.xlu1 %v2102_v29 }
  0xc2   :  { %v7792_v30 = vpop.eup %7791  ;;  %v2373_v31 = vmul.f32 1.442695, %v2223_v25  ;;  %2100 = vmax.xlane.f32.xlu0 %v2099_v22  ;;  %7456 = vmatprep.mubr.msk.f32.mxu0 %vm210_vm2, %v172_v23  ;;  %v9684_v32 = vpop.xlane.xlu1 %1893  ;;  %v177_v22 = vld [vmem:[%s14237_s1 + $0x308] sm:$0xff]  ;;  %v2120_v23 = vsel %vm1816_vm0, %v1789_v5, -inf }
  0xc3   :  { %7801 = vpow2.f32 %v2375_v7  ;;  %v2226_v8 = vsub.f32 %v8982_v12, %v9684_v32  ;;  %7552 = vmatprep.mubr.msk.f32.mxu1 %vm1816_vm0, %v7792_v30  ;;  %v9693_v39 = vpop.xlane.xlu0 %1890  ;;  %v1786_v12 = vld [vmem:[%s14234_s2 + $0x310] sm:$0xff]  ;;  %v1791_v30 = vld [vmem:[%s14234_s2 + $0x338] sm:$0xff] }
  0xc4   :  { %7803 = vpow2.f32 %v2373_v31  ;;  %v2225_v44 = vsub.f32 %v8987_v13, %v9693_v39  ;;  %7553 = vmatmul.mubr.msk.f32.gmra.mrb[14].mxu1 %vm1816_vm0, %v7790_v38  ;;  %v175_v13 = vld [vmem:[%s14237_s1 + $0x2f8] sm:$0xff]  ;;  %v2111_v0 = vsel %vm1816_vm0, %v1786_v12, -inf  ;;  %v2117_v38 = vsel %vm1816_vm0, %v1788_v6, -inf  ;;  %v178_v7 = vld [vmem:[%s14237_s1 + $0x310] sm:$0xff]  ;;  %v8276_v31 = vld [vmem:[%s14234_s2 + $0xe0] sm:$0xff] }
  0xc5   :  { %v7794_v48 = vpop.eup %7793  ;;  %v2379_v15 = vmul.f32 1.442695, %v2226_v8  ;;  %7457 = vmatmul.mubr.msk.f32.gmra.mrb[92].mxu0 %vm210_vm2, %v173_v3  ;;  %2109 = vmax.xlane.f32.xlu1 %v2108_v40  ;;  %v1790_v40 = vld [vmem:[%s14234_s2 + $0x330] sm:$0xff]  ;;  %v179_v12 = vld [vmem:[%s14237_s1 + $0x318] sm:$0xff] }
  0xc6   :  { %v7796_v46 = vpop.eup %7795  ;;  %v2377_v47 = vmul.f32 1.442695, %v2225_v44  ;;  %2106 = vmax.xlane.f32.xlu0 %v2105_v41  ;;  %7459 = vmatprep.mubr.msk.f32.mxu0 %vm210_vm2, %v174_v45  ;;  %v9710_v50 = vpop.xlane.xlu1 %1899 }
  0xc7   :  { %7805 = vpow2.f32 %v2379_v15  ;;  %v2228_v53 = vsub.f32 %v8273_v16, %v9710_v50  ;;  %7555 = vmatprep.mubr.msk.f32.mxu1 %vm1816_vm0, %v7796_v46  ;;  %v9721_v61 = vpop.xlane.xlu0 %1896  ;;  %v8277_v15 = vld [vmem:[%s14234_s2 + $0xf8] sm:$0xff]  ;;  %v1793_v16 = vld [vmem:[%s14234_s2 + $0x348] sm:$0xff] }
  0xc8   :  { %7807 = vpow2.f32 %v2377_v47  ;;  %v2227_v26 = vsub.f32 %v8274_v54, %v9721_v61  ;;  %7556 = vmatmul.mubr.msk.f32.gmra.mrb[16].mxu1 %vm1816_vm0, %v7794_v48  ;;  %v2126_v48 = vsel %vm1816_vm0, %v1791_v30, -inf }
  0xc9   :  { %v7798_v1 = vpop.eup %7797  ;;  %v2383_v10 = vmul.f32 1.442695, %v2228_v53  ;;  %7460 = vmatmul.mubr.msk.f32.gmra.mrb[94].mxu0 %vm210_vm2, %v175_v13  ;;  %2115 = vmax.xlane.f32.xlu1 %v2114_v49  ;;  %v2123_v13 = vsel %vm1816_vm0, %v1790_v40, -inf  ;;  %v180_v49 = vld [vmem:[%s14237_s1 + $0x320] sm:$0xff]  ;;  %v8278_v53 = vld [vmem:[%s14234_s2 + $0xf0] sm:$0xff] }
  0xca   :  { %v7800_v55 = vpop.eup %7799  ;;  %v2381_v29 = vmul.f32 1.442695, %v2227_v26  ;;  %2112 = vmax.xlane.f32.xlu0 %v2111_v0  ;;  %7462 = vmatprep.mubr.msk.f32.mxu0 %vm210_vm2, %v176_v4  ;;  %v9740_v19 = vpop.xlane.xlu1 %1905  ;;  %v1792_v4 = vld [vmem:[%s14234_s2 + $0x340] sm:$0xff] }
  0xcb   :  { %14341 = vst [vmem:[#allocation4_spill] sm:$0xff] %v9740_v19  ;;  %7809 = vpow2.f32 %v2383_v10  ;;  %v2230_v25 = vsub.f32 %v8275_v24, %v9740_v19  ;;  %7558 = vmatprep.mubr.msk.f32.mxu1 %vm1816_vm0, %v7800_v55  ;;  %v9751_v62 = vpop.xlane.xlu0 %1902  ;;  %v181_v10 = vld [vmem:[%s14237_s1 + $0x328] sm:$0xff]  ;;  %v2132_v55 = vsel %vm1816_vm0, %v1793_v16, -inf  ;;  %v2129_v24 = vsel %vm1816_vm0, %v1792_v4, -inf  ;;  %v1796_v4 = vld [vmem:[%s14234_s2 + $0x360] sm:$0xff] }
  0xcc   :  { %14342 = vst [vmem:[#allocation5_spill] sm:$0xff] %v9751_v62  ;;  %7811 = vpow2.f32 %v2381_v29  ;;  %v2229_v3 = vsub.f32 %v8276_v31, %v9751_v62  ;;  %7559 = vmatmul.mubr.msk.f32.gmra.mrb[18].mxu1 %vm1816_vm0, %v7798_v1  ;;  %v8279_v29 = vld [vmem:[%s14234_s2 + $0x108] sm:$0xff]  ;;  %v1794_v31 = vld [vmem:[%s14234_s2 + $0x350] sm:$0xff] }
  0xcd   :  { %v7802_v8 = vpop.eup %7801  ;;  %v2387_v41 = vmul.f32 1.442695, %v2230_v25  ;;  %7463 = vmatmul.mubr.msk.f32.gmra.mrb[96].mxu0 %vm210_vm2, %v177_v22  ;;  %2121 = vmax.xlane.f32.xlu1 %v2120_v23  ;;  %v182_v25 = vld [vmem:[%s14237_s1 + $0x330] sm:$0xff]  ;;  %v1797_v16 = vld [vmem:[%s14234_s2 + $0x368] sm:$0xff] }
  0xce   :  { %v7804_v45 = vpop.eup %7803  ;;  %v2385_v42 = vmul.f32 1.442695, %v2229_v3  ;;  %2118 = vmax.xlane.f32.xlu0 %v2117_v38  ;;  %7465 = vmatprep.mubr.msk.f32.mxu0 %vm210_vm2, %v178_v7  ;;  %v9770_v44 = vpop.xlane.xlu1 %1911  ;;  %v1795_v38 = vld [vmem:[%s14234_s2 + $0x358] sm:$0xff]  ;;  %v8280_v7 = vld [vmem:[%s14234_s2 + $0x100] sm:$0xff] }
  0xcf   :  { %14343 = vst [vmem:[#allocation6_spill] sm:$0xff] %v9770_v44  ;;  %7813 = vpow2.f32 %v2387_v41  ;;  %v2232_v46 = vsub.f32 %v8277_v15, %v9770_v44  ;;  %7561 = vmatprep.mubr.msk.f32.mxu1 %vm1816_vm0, %v7804_v45  ;;  %v9781_v47 = vpop.xlane.xlu0 %1908 }
  0xd0   :  { %14344 = vst [vmem:[#allocation7_spill] sm:$0xff] %v9781_v47  ;;  %7815 = vpow2.f32 %v2385_v42  ;;  %v2231_v0 = vsub.f32 %v8278_v53, %v9781_v47  ;;  %7562 = vmatmul.mubr.msk.f32.gmra.mrb[20].mxu1 %vm1816_vm0, %v7802_v8  ;;  %v183_v42 = vld [vmem:[%s14237_s1 + $0x338] sm:$0xff]  ;;  %v8282_v53 = vld [vmem:[%s14234_s2 + $0x110] sm:$0xff] }
  0xd1   :  { %v7806_v5 = vpop.eup %7805  ;;  %v2391_v54 = vmul.f32 1.442695, %v2232_v46  ;;  %7466 = vmatmul.mubr.msk.f32.gmra.mrb[98].mxu0 %vm210_vm2, %v179_v12  ;;  %2127 = vmax.xlane.f32.xlu1 %v2126_v48  ;;  %v2138_v12 = vsel %vm1816_vm0, %v1795_v38, -inf  ;;  %v8281_v48 = vld [vmem:[%s14234_s2 + $0x118] sm:$0xff]  ;;  %v2141_v38 = vsel %vm1816_vm0, %v1796_v4, -inf  ;;  %v188_v4 = vld [vmem:[%s14237_s1 + $0x360] sm:$0xff] }
  0xd2   :  { %v7808_v26 = vpop.eup %7807  ;;  %v2389_v6 = vmul.f32 1.442695, %v2231_v0  ;;  %2124 = vmax.xlane.f32.xlu0 %v2123_v13  ;;  %7468 = vmatprep.mubr.msk.f32.mxu0 %vm210_vm2, %v180_v49  ;;  %v9800_v1 = vpop.xlane.xlu1 %1917  ;;  %v2135_v13 = vsel %vm1816_vm0, %v1794_v31, -inf  ;;  %v184_v49 = vld [vmem:[%s14237_s1 + $0x340] sm:$0xff] }
  0xd3   :  { %14345 = vst [vmem:[#allocation8_spill] sm:$0xff] %v9800_v1  ;;  %7817 = vpow2.f32 %v2391_v54  ;;  %v2234_v22 = vsub.f32 %v8279_v29, %v9800_v1  ;;  %7564 = vmatprep.mubr.msk.f32.mxu1 %vm1816_vm0, %v7808_v26  ;;  %v9811_v23 = vpop.xlane.xlu0 %1914  ;;  %v2144_v29 = vsel %vm1816_vm0, %v1797_v16, -inf  ;;  %v8284_v31 = vld [vmem:[%s14234_s2 + $0x120] sm:$0xff] }
  0xd4   :  { %14346 = vst [vmem:[#allocation9_spill] sm:$0xff] %v9811_v23  ;;  %7819 = vpow2.f32 %v2389_v6  ;;  %v2233_v30 = vsub.f32 %v8280_v7, %v9811_v23  ;;  %7565 = vmatmul.mubr.msk.f32.gmra.mrb[22].mxu1 %vm1816_vm0, %v7806_v5  ;;  %v186_v7 = vld [vmem:[%s14237_s1 + $0x350] sm:$0xff] }
  0xd5   :  { %v7810_v3 = vpop.eup %7809  ;;  %v2395_v40 = vmul.f32 1.442695, %v2234_v22  ;;  %7469 = vmatmul.mubr.msk.f32.gmra.mrb[100].mxu0 %vm210_vm2, %v181_v10  ;;  %2133 = vmax.xlane.f32.xlu1 %v2132_v55  ;;  %v185_v55 = vld [vmem:[%s14237_s1 + $0x348] sm:$0xff] }
  0xd6   :  { %v7812_v8 = vpop.eup %7811  ;;  %v2393_v41 = vmul.f32 1.442695, %v2233_v30  ;;  %2130 = vmax.xlane.f32.xlu0 %v2129_v24  ;;  %7471 = vmatprep.mubr.msk.f32.mxu0 %vm210_vm2, %v182_v25  ;;  %v9830_v45 = vpop.xlane.xlu1 %1923  ;;  %v8283_v22 = vld [vmem:[%s14234_s2 + $0x128] sm:$0xff]  ;;  %v1799_v30 = vld [vmem:[%s14234_s2 + $0x378] sm:$0xff] }
  0xd7   :  { %14347 = vst [vmem:[#allocation10_spill] sm:$0xff] %v9830_v45  ;;  %7821 = vpow2.f32 %v2395_v40  ;;  %v2236_v15 = vsub.f32 %v8281_v48, %v9830_v45  ;;  %7567 = vmatprep.mubr.msk.f32.mxu1 %vm1816_vm0, %v7812_v8  ;;  %v9841_v46 = vpop.xlane.xlu0 %1920  ;;  %v1798_v40 = vld [vmem:[%s14234_s2 + $0x370] sm:$0xff] }
  0xd8   :  { %14348 = vst [vmem:[#allocation11_spill] sm:$0xff] %v9841_v46  ;;  %7823 = vpow2.f32 %v2393_v41  ;;  %v2235_v0 = vsub.f32 %v8282_v53, %v9841_v46  ;;  %7568 = vmatmul.mubr.msk.f32.gmra.mrb[24].mxu1 %vm1816_vm0, %v7810_v3 }
  0xd9   :  { %v7814_v5 = vpop.eup %7813  ;;  %v2399_v54 = vmul.f32 1.442695, %v2236_v15  ;;  %7472 = vmatmul.mubr.msk.f32.gmra.mrb[102].mxu0 %vm210_vm2, %v183_v42  ;;  %2139 = vmax.xlane.f32.xlu1 %v2138_v12  ;;  %v187_v15 = vld [vmem:[%s14237_s1 + $0x358] sm:$0xff] }
  0xda   :  { %v7816_v26 = vpop.eup %7815  ;;  %v2397_v6 = vmul.f32 1.442695, %v2235_v0  ;;  %2136 = vmax.xlane.f32.xlu0 %v2135_v13  ;;  %7474 = vmatprep.mubr.msk.f32.mxu0 %vm210_vm2, %v184_v49  ;;  %v9860_v10 = vpop.xlane.xlu1 %1929  ;;  %v2150_v13 = vsel %vm1816_vm0, %v1799_v30, -inf  ;;  %v8285_v49 = vld [vmem:[%s14234_s2 + $0x138] sm:$0xff]  ;;  %v2147_v0 = vsel %vm1816_vm0, %v1798_v40, -inf  ;;  %v8287_v40 = vld [vmem:[%s14234_s2 + $0x148] sm:$0xff] }
  0xdb   :  { %14349 = vst [vmem:[#allocation12_spill] sm:$0xff] %v9860_v10  ;;  %7825 = vpow2.f32 %v2399_v54  ;;  %v2238_v24 = vsub.f32 %v8283_v22, %v9860_v10  ;;  %7570 = vmatprep.mubr.msk.f32.mxu1 %vm1816_vm0, %v7816_v26  ;;  %v9871_v25 = vpop.xlane.xlu0 %1926  ;;  %v8286_v54 = vld [vmem:[%s14234_s2 + $0x130] sm:$0xff] }
  0xdc   :  { %14350 = vst [vmem:[#allocation13_spill] sm:$0xff] %v9871_v25  ;;  %7827 = vpow2.f32 %v2397_v6  ;;  %v2237_v3 = vsub.f32 %v8284_v31, %v9871_v25  ;;  %7571 = vmatmul.mubr.msk.f32.gmra.mrb[26].mxu1 %vm1816_vm0, %v7814_v5  ;;  %v1801_v5 = vld [vmem:[%s14234_s2 + $0x388] sm:$0xff]  ;;  %v1815_v25 = vld [vmem:[%s14234_s2 + $0x3f8] sm:$0xff] }
  0xdd   :  { %v7818_v8 = vpop.eup %7817  ;;  %v2403_v41 = vmul.f32 1.442695, %v2238_v24  ;;  %7475 = vmatmul.mubr.msk.f32.gmra.mrb[104].mxu0 %vm210_vm2, %v185_v55  ;;  %2145 = vmax.xlane.f32.xlu1 %v2144_v29  ;;  %v1800_v55 = vld [vmem:[%s14234_s2 + $0x380] sm:$0xff]  ;;  %v189_v31 = vld [vmem:[%s14237_s1 + $0x368] sm:$0xff] }
  0xde   :  { %v7820_v42 = vpop.eup %7819  ;;  %v2401_v12 = vmul.f32 1.442695, %v2237_v3  ;;  %2142 = vmax.xlane.f32.xlu0 %v2141_v38  ;;  %7477 = vmatprep.mubr.msk.f32.mxu0 %vm210_vm2, %v186_v7  ;;  %v9890_v48 = vpop.xlane.xlu1 %1935  ;;  %v2156_v3 = vsel %vm1816_vm0, %v1801_v5, -inf }
  0xdf   :  { %14351 = vst [vmem:[#allocation14_spill] sm:$0xff] %v9890_v48  ;;  %7829 = vpow2.f32 %v2403_v41  ;;  %v2240_v16 = vsub.f32 %v8285_v49, %v9890_v48  ;;  %7573 = vmatprep.mubr.msk.f32.mxu1 %vm1816_vm0, %v7820_v42  ;;  %v9901_v53 = vpop.xlane.xlu0 %1932  ;;  %v2153_v42 = vsel %vm1816_vm0, %v1800_v55, -inf }
  0xe0   :  { %14352 = vst [vmem:[#allocation15_spill] sm:$0xff] %v9901_v53  ;;  %7831 = vpow2.f32 %v2401_v12  ;;  %v2239_v26 = vsub.f32 %v8286_v54, %v9901_v53  ;;  %7574 = vmatmul.mubr.msk.f32.gmra.mrb[28].mxu1 %vm1816_vm0, %v7818_v8  ;;  %v9915_v6 = vpop.f32.mrb[0].mxu0  ;;  %v190_v12 = vld [vmem:[%s14237_s1 + $0x370] sm:$0xff] }
  0xe1   :  { %v7822_v29 = vpop.eup %7821  ;;  %v2407_v22 = vmul.f32 1.442695, %v2240_v16  ;;  %7478 = vmatmul.mubr.msk.f32.gmra.mrb[106].mxu0 %vm210_vm2, %v187_v15  ;;  %2151 = vmax.xlane.f32.xlu1 %v2150_v13  ;;  %v9921_v24 = vpop.f32.mrb[1].mxu0  ;;  %v1803_v15 = vld [vmem:[%s14234_s2 + $0x398] sm:$0xff]  ;;  %v8288_v13 = vld [vmem:[%s14234_s2 + $0x140] sm:$0xff] }
  0xe2   :  { %v7824_v38 = vpop.eup %7823  ;;  %v2405_v7 = vmul.f32 1.442695, %v2239_v26  ;;  %2148 = vmax.xlane.f32.xlu0 %v2147_v0  ;;  %7480 = vmatprep.mubr.msk.f32.mxu0 %vm210_vm2, %v188_v4  ;;  %v9924_v30 = vpop.xlane.xlu1 %1941  ;;  %v1802_v0 = vld [vmem:[%s14234_s2 + $0x390] sm:$0xff] }
  0xe3   :  { %14353 = vst [vmem:[#allocation16_spill] sm:$0xff] %v9924_v30  ;;  %7833 = vpow2.f32 %v2407_v22  ;;  %v2242_v8 = vsub.f32 %v8287_v40, %v9924_v30  ;;  %7576 = vmatprep.mubr.msk.f32.mxu1 %vm1816_vm0, %v7824_v38  ;;  %v9935_v41 = vpop.xlane.xlu0 %1938  ;;  %v2162_v38 = vsel %vm1816_vm0, %v1803_v15, -inf  ;;  %v2159_v40 = vsel %vm1816_vm0, %v1802_v0, -inf }
  0xe4   :  { %14354 = vst [vmem:[#allocation17_spill] sm:$0xff] %v9935_v41  ;;  %7835 = vpow2.f32 %v2405_v7  ;;  %v2241_v49 = vsub.f32 %v8288_v13, %v9935_v41  ;;  %7577 = vmatmul.mubr.msk.f32.gmra.mrb[30].mxu1 %vm1816_vm0, %v7822_v29  ;;  %v9949_v16 = vpop.f32.mrb[2].mxu0  ;;  %v191_v29 = vld [vmem:[%s14237_s1 + $0x378] sm:$0xff] }
  0xe5   :  { %v7826_v4 = vpop.eup %7825  ;;  %v2411_v5 = vmul.f32 1.442695, %v2242_v8  ;;  %7481 = vmatmul.mubr.msk.f32.gmra.mrb[108].mxu0 %vm210_vm2, %v189_v31  ;;  %2157 = vmax.xlane.f32.xlu1 %v2156_v3  ;;  %v9955_v54 = vpop.f32.mrb[3].mxu0  ;;  %v8289_v7 = vld [vmem:[%s14234_s2 + $0x158] sm:$0xff]  ;;  %v192_v8 = vld [vmem:[%s14237_s1 + $0x380] sm:$0xff] }
  0xe6   :  { %v7828_v26 = vpop.eup %7827  ;;  %v2409_v55 = vmul.f32 1.442695, %v2241_v49  ;;  %2154 = vmax.xlane.f32.xlu0 %v2153_v42  ;;  %7483 = vmatprep.mubr.msk.f32.mxu0 %vm210_vm2, %v190_v12  ;;  %v9958_v22 = vpop.xlane.xlu1 %1947  ;;  %v1805_v42 = vld [vmem:[%s14234_s2 + $0x3a8] sm:$0xff]  ;;  %v8290_v12 = vld [vmem:[%s14234_s2 + $0x150] sm:$0xff]  ;;  %v1804_v49 = vld [vmem:[%s14234_s2 + $0x3a0] sm:$0xff] }
  0xe7   :  { %14355 = vst [vmem:[#allocation18_spill] sm:$0xff] %v9958_v22  ;;  %7837 = vpow2.f32 %v2411_v5  ;;  %v2244_v31 = vsub.f32 %v8289_v7, %v9958_v22  ;;  %7579 = vmatprep.mubr.msk.f32.mxu1 %vm1816_vm0, %v7828_v26  ;;  %v9969_v3 = vpop.xlane.xlu0 %1944 }
  0xe8   :  { %14356 = vst [vmem:[#allocation19_spill] sm:$0xff] %v9969_v3  ;;  %7839 = vpow2.f32 %v2409_v55  ;;  %v2243_v15 = vsub.f32 %v8290_v12, %v9969_v3  ;;  %7580 = vmatmul.mubr.msk.f32.gmra.mrb[32].mxu1 %vm1816_vm0, %v7826_v4  ;;  %v9983_v13 = vpop.f32.mrb[4].mxu0  ;;  %v193_v4 = vld [vmem:[%s14237_s1 + $0x388] sm:$0xff]  ;;  %v2168_v3 = vsel %vm1816_vm0, %v1805_v42, -inf  ;;  %v1807_v42 = vld [vmem:[%s14234_s2 + $0x3b8] sm:$0xff] }
  0xe9   :  { %v7830_v0 = vpop.eup %7829  ;;  %v2415_v5 = vmul.f32 1.442695, %v2244_v31  ;;  %7484 = vmatmul.mubr.msk.f32.gmra.mrb[110].mxu0 %vm210_vm2, %v191_v29  ;;  %2163 = vmax.xlane.f32.xlu1 %v2162_v38  ;;  %v9989_v26 = vpop.f32.mrb[5].mxu0  ;;  %v8291_v29 = vld [vmem:[%s14234_s2 + $0x168] sm:$0xff]  ;;  %v1309_v44 = vand.u32 2147483647, %v9983_v13 }
  0xea   :  { %v7832_v55 = vpop.eup %7831  ;;  %v2413_v7 = vmul.f32 1.442695, %v2243_v15  ;;  %2160 = vmax.xlane.f32.xlu0 %v2159_v40  ;;  %7486 = vmatprep.mubr.msk.f32.mxu0 %vm210_vm2, %v192_v8  ;;  %v9992_v12 = vpop.xlane.xlu1 %1953  ;;  %v2165_v40 = vsel %vm1816_vm0, %v1804_v49, -inf  ;;  %v194_v8 = vld [vmem:[%s14237_s1 + $0x390] sm:$0xff]  ;;  %v8292_v15 = vld [vmem:[%s14234_s2 + $0x160] sm:$0xff] }
  0xeb   :  { %14357 = vst [vmem:[#allocation20_spill] sm:$0xff] %v9992_v12  ;;  %7841 = vpow2.f32 %v2415_v5  ;;  %v2246_v38 = vsub.f32 %v8291_v29, %v9992_v12  ;;  %7582 = vmatprep.mubr.msk.f32.mxu1 %vm1816_vm0, %v7832_v55  ;;  %v10003_v31 = vpop.xlane.xlu0 %1950  ;;  %v1806_v49 = vld [vmem:[%s14234_s2 + $0x3b0] sm:$0xff]  ;;  %v1308_v62 = vand.u32 2147483647, %v9989_v26 }
  0xec   :  { %14358 = vst [vmem:[#allocation21_spill] sm:$0xff] %v10003_v31  ;;  %7843 = vpow2.f32 %v2413_v7  ;;  %v2245_v5 = vsub.f32 %v8292_v15, %v10003_v31  ;;  %7583 = vmatmul.mubr.msk.f32.gmra.mrb[34].mxu1 %vm1816_vm0, %v7830_v0  ;;  %v10017_v55 = vpop.f32.mrb[6].mxu0  ;;  %v195_v0 = vld [vmem:[%s14237_s1 + $0x398] sm:$0xff]  ;;  %v2174_v31 = vsel %vm1816_vm0, %v1807_v42, -inf  ;;  %v8294_v42 = vld [vmem:[%s14234_s2 + $0x170] sm:$0xff] }
  0xed   :  { %v7834_v29 = vpop.eup %7833  ;;  %v2419_v12 = vmul.f32 1.442695, %v2246_v38  ;;  %7487 = vmatmul.mubr.msk.f32.gmra.mrb[112].mxu0 %vm210_vm2, %v193_v4  ;;  %2169 = vmax.xlane.f32.xlu1 %v2168_v3  ;;  %v10023_v7 = vpop.f32.mrb[7].mxu0  ;;  %v8293_v3 = vld [vmem:[%s14234_s2 + $0x178] sm:$0xff]  ;;  %v202_v26 = vld [vmem:[%s14237_s1 + $0x3d0] sm:$0xff] }
  0xee   :  { %v7836_v22 = vpop.eup %7835  ;;  %v2417_v41 = vmul.f32 1.442695, %v2245_v5  ;;  %2166 = vmax.xlane.f32.xlu0 %v2165_v40  ;;  %7489 = vmatprep.mubr.msk.f32.mxu0 %vm210_vm2, %v194_v8  ;;  %v10026_v15 = vpop.xlane.xlu1 %1959  ;;  %v2171_v40 = vsel %vm1816_vm0, %v1806_v49, -inf  ;;  %v196_v8 = vld [vmem:[%s14237_s1 + $0x3a0] sm:$0xff] }
  0xef   :  { %14359 = vst [vmem:[#allocation22_spill] sm:$0xff] %v10026_v15  ;;  %7845 = vpow2.f32 %v2419_v12  ;;  %v2248_v4 = vsub.f32 %v8293_v3, %v10026_v15  ;;  %7585 = vmatprep.mubr.msk.f32.mxu1 %vm1816_vm0, %v7836_v22  ;;  %v10037_v38 = vpop.xlane.xlu0 %1956  ;;  %v1809_v12 = vld [vmem:[%s14234_s2 + $0x3c8] sm:$0xff]  ;;  %v1808_v49 = vld [vmem:[%s14234_s2 + $0x3c0] sm:$0xff]  ;;  %v1305_v15 = vand.u32 2147483647, %v9915_v6  ;;  %v198_v6 = vld [vmem:[%s14237_s1 + $0x3b0] sm:$0xff] }
  0xf0   :  { %14360 = vst [vmem:[#allocation23_spill] sm:$0xff] %v10037_v38  ;;  %7847 = vpow2.f32 %v2417_v41  ;;  %v2247_v5 = vsub.f32 %v8294_v42, %v10037_v38  ;;  %7586 = vmatmul.mubr.msk.f32.gmra.mrb[36].mxu1 %vm1816_vm0, %v7834_v29  ;;  %v10051_v22 = vpop.f32.mrb[8].mxu0  ;;  %v197_v42 = vld [vmem:[%s14237_s1 + $0x3a8] sm:$0xff]  ;;  %v2180_v38 = vsel %vm1816_vm0, %v1809_v12, -inf  ;;  %v1810_v12 = vld [vmem:[%s14234_s2 + $0x3d0] sm:$0xff] }
  0xf1   :  { %v7838_v3 = vpop.eup %7837  ;;  %v2423_v30 = vmul.f32 1.442695, %v2248_v4  ;;  %7490 = vmatmul.mubr.msk.f32.gmra.mrb[114].mxu0 %vm210_vm2, %v195_v0  ;;  %2175 = vmax.xlane.f32.xlu1 %v2174_v31  ;;  %v10058_v41 = vpop.f32.mrb[9].mxu0  ;;  %v1811_v31 = vld [vmem:[%s14234_s2 + $0x3d8] sm:$0xff]  ;;  %v8295_v0 = vld [vmem:[%s14234_s2 + $0x188] sm:$0xff]  ;;  %v10108_v46 = vsub.f32 1.0, %v1305_v15 }
  0xf2   :  { %v7840_v53 = vpop.eup %7839  ;;  %v2421_v48 = vmul.f32 1.442695, %v2247_v5  ;;  %2172 = vmax.xlane.f32.xlu0 %v2171_v40  ;;  %7492 = vmatprep.mubr.msk.f32.mxu0 %vm210_vm2, %v196_v8  ;;  %v10061_v29 = vpop.xlane.xlu1 %1965  ;;  %v2177_v8 = vsel %vm1816_vm0, %v1808_v49, -inf  ;;  %v1812_v5 = vld [vmem:[%s14234_s2 + $0x3e0] sm:$0xff]  ;;  %v199_v15 = vld [vmem:[%s14237_s1 + $0x3b8] sm:$0xff] }
  0xf3   :  { %14361 = vst [vmem:[#allocation24_spill] sm:$0xff] %v10061_v29  ;;  %7849 = vpow2.f32 %v2423_v30  ;;  %v2250_v4 = vsub.f32 %v8295_v0, %v10061_v29  ;;  %7588 = vmatprep.mubr.msk.f32.mxu1 %vm1816_vm0, %v7840_v53  ;;  %v10078_v40 = vpop.xlane.xlu0 %1962  ;;  %v1813_v30 = vld [vmem:[%s14234_s2 + $0x3e8] sm:$0xff]  ;;  %v1304_v0 = vand.u32 2147483647, %v9921_v24  ;;  %v8296_v53 = vld [vmem:[%s14234_s2 + $0x180] sm:$0xff] }
  0xf4   :  { %14362 = vst [vmem:[#allocation25_spill] sm:$0xff] %v10078_v40  ;;  %7851 = vpow2.f32 %v2421_v48  ;;  %v2249_v49 = vsub.f32 %v8296_v53, %v10078_v40  ;;  %7589 = vmatmul.mubr.msk.f32.gmra.mrb[38].mxu1 %vm1816_vm0, %v7838_v3  ;;  %v10096_v29 = vpop.f32.mrb[10].mxu0  ;;  %v10104_v24 = vld [vmem:[%s14234_s2] sm:$0xff]  ;;  %v2186_v40 = vsel %vm1816_vm0, %v1811_v31, -inf  ;;  %v8298_v31 = vld [vmem:[%s14234_s2 + $0x198] sm:$0xff] }
  0xf5   :  { %v7842_v10 = vpop.eup %7841  ;;  %v2201_v48 = vsub.f32 %v10104_v24, %v9389_v59  ;;  %v2427_v53 = vmul.f32 1.442695, %v2250_v4  ;;  %7493 = vmatmul.mubr.msk.f32.gmra.mrb[116].mxu0 %vm210_vm2, %v197_v42  ;;  %2181 = vmax.xlane.f32.xlu1 %v2180_v38  ;;  %v10111_v3 = vpop.f32.mrb[11].mxu0  ;;  %v2183_v4 = vsel %vm1816_vm0, %v1810_v12, -inf  ;;  %v2192_v42 = vsel %vm1816_vm0, %v1813_v30, -inf  ;;  %v200_v12 = vld [vmem:[%s14237_s1 + $0x3c0] sm:$0xff] }
  0xf6   :  { %v7844_v45 = vpop.eup %7843  ;;  %v2425_v23 = vmul.f32 1.442695, %v2249_v49  ;;  %2178 = vmax.xlane.f32.xlu0 %v2177_v8  ;;  %7495 = vmatprep.mubr.msk.f32.mxu0 %vm210_vm2, %v198_v6  ;;  %v10115_v1 = vpop.xlane.xlu1 %1971  ;;  %v2189_v38 = vsel %vm1816_vm0, %v1812_v5, -inf  ;;  %v1307_v59 = vand.u32 2147483647, %v9949_v16  ;;  %v10135_v30 = vsel %vm1816_vm0, %v1815_v25, -inf }
  0xf7   :  { %14363 = vst [vmem:[#allocation26_spill] sm:$0xff] %v10115_v1  ;;  %7853 = vpow2.f32 %v2427_v53  ;;  %v2252_v6 = vsub.f32 %v8298_v31, %v10115_v1  ;;  %7591 = vmatprep.mubr.msk.f32.mxu1 %vm1816_vm0, %v7844_v45  ;;  %v10129_v8 = vpop.xlane.xlu0 %1968  ;;  %v10137_v5 = vsub.f32 1.0, %v1304_v0  ;;  %v1306_v16 = vand.u32 2147483647, %v9955_v54  ;;  %v8299_v49 = vld [vmem:[%s14234_s2 + $0x190] sm:$0xff]  ;;  %v201_v25 = vld [vmem:[%s14237_s1 + $0x3c8] sm:$0xff] }
  0xf8   :  { %14364 = vst [vmem:[#allocation27_spill] sm:$0xff] %v10129_v8  ;;  %7855 = vpow2.f32 %v2425_v23  ;;  %v2251_v45 = vsub.f32 %v8299_v49, %v10129_v8  ;;  %7592 = vmatmul.mubr.msk.f32.gmra.mrb[40].mxu1 %vm1816_vm0, %v7842_v10  ;;  %v10145_v53 = vpop.f32.mrb[12].mxu0  ;;  %v1814_v0 = vld [vmem:[%s14234_s2 + $0x3f0] sm:$0xff]  ;;  %v2329_v23 = vmul.f32 1.442695, %v2201_v48  ;;  %v8300_v31 = vld [vmem:[%s14234_s2 + $0x8] sm:$0xff] }
  0xf9   :  { %v7846_v54 = vpop.eup %7845  ;;  %v2202_v49 = vsub.f32 %v8300_v31, %v9416_v17  ;;  %v1561_v10 = vmax.f32 %v10108_v46, 0.0  ;;  %v2431_v8 = vmul.f32 1.442695, %v2252_v6  ;;  %7496 = vmatmul.mubr.msk.f32.gmra.mrb[118].mxu0 %vm210_vm2, %v199_v15  ;;  %2187 = vmax.xlane.f32.xlu1 %v2186_v40  ;;  %v10159_v1 = vpop.f32.mrb[13].mxu0  ;;  %v10166_v17 = vsub.f32 1.0, %v1307_v59  ;;  %v8301_v46 = vld [vmem:[%s14234_s2 + $0x1a8] sm:$0xff] }
  0xfa   :  { %v7848_v47 = vpop.eup %7847  ;;  %v2429_v48 = vmul.f32 1.442695, %v2251_v45  ;;  %2184 = vmax.xlane.f32.xlu0 %v2183_v4  ;;  %7498 = vmatprep.mubr.msk.f32.mxu0 %vm210_vm2, %v200_v12  ;;  %v10164_v19 = vpop.xlane.xlu1 %1977  ;;  %v2195_v15 = vsel %vm1816_vm0, %v1814_v0, -inf  ;;  %v1560_v59 = vmax.f32 %v10137_v5, 0.0  ;;  %v10180_v4 = vsub.f32 1.0, %v1306_v16  ;;  %v8302_v6 = vld [vmem:[%s14234_s2 + $0x1a0] sm:$0xff] }
  0xfb   :  { %7857 = vpow2.f32 %v2431_v8  ;;  %v2254_v40 = vsub.f32 %v8301_v46, %v10164_v19  ;;  %7594 = vmatprep.mubr.msk.f32.mxu1 %vm1816_vm0, %v7848_v47  ;;  %v10173_v13 = vpop.xlane.xlu0 %1974  ;;  %v2331_v45 = vmul.f32 1.442695, %v2202_v49  ;;  %v4457_v46 = vmul.f32 %v8300_v31, %v1561_v10  ;;  %v203_v16 = vld [vmem:[%s14237_s1 + $0x3d8] sm:$0xff] }
  0xfc   :  { %14365 = vst [vmem:[#allocation28_spill] sm:$0xff] %v10173_v13  ;;  %7859 = vpow2.f32 %v2429_v48  ;;  %v2253_v8 = vsub.f32 %v8302_v6, %v10173_v13  ;;  %7595 = vmatmul.mubr.msk.f32.gmra.mrb[42].mxu1 %vm1816_vm0, %v7846_v54  ;;  %v10187_v47 = vpop.f32.mrb[14].mxu0  ;;  %v10195_v6 = vsub.f32 1.0, %v1309_v44  ;;  %v10197_v54 = vsub.f32 1.0, %v1308_v62  ;;  %v8303_v44 = vld [vmem:[%s14234_s2 + $0x1b8] sm:$0xff] }
  0xfd   :  { %v7850_v12 = vpop.eup %7849  ;;  %7861 = vpow2.f32 %v2329_v23  ;;  %v2435_v0 = vmul.f32 1.442695, %v2254_v40  ;;  %7499 = vmatmul.mubr.msk.f32.gmra.mrb[120].mxu0 %vm210_vm2, %v201_v25  ;;  %2193 = vmax.xlane.f32.xlu1 %v2192_v42  ;;  %v10190_v5 = vpop.f32.mrb[15].mxu0  ;;  %v1311_v13 = vand.u32 2147483647, %v10017_v55  ;;  %v1563_v42 = vmax.f32 %v10166_v17, 0.0 }
  0xfe   :  { %v7852_v48 = vpop.eup %7851  ;;  %v2433_v23 = vmul.f32 1.442695, %v2253_v8  ;;  %2190 = vmax.xlane.f32.xlu0 %v2189_v38  ;;  %7501 = vmatprep.mubr.msk.f32.mxu0 %vm210_vm2, %v202_v26  ;;  %v10201_v31 = vpop.xlane.xlu1 %1983  ;;  %v1310_v25 = vand.u32 2147483647, %v10023_v7  ;;  %v204_v38 = vld [vmem:[%s14237_s1 + $0x3e0] sm:$0xff]  ;;  %v4456_v49 = vmul.f32 %v10104_v24, %v1560_v59  ;;  %v1562_v17 = vmax.f32 %v10180_v4, 0.0 }
  0xff   :  { %7863 = vpow2.f32 %v2435_v0  ;;  %v2256_v62 = vsub.f32 %v8303_v44, %v10201_v31  ;;  %7597 = vmatprep.mubr.msk.f32.mxu1 %vm1816_vm0, %v7852_v48  ;;  %v10210_v55 = vpop.xlane.xlu0 %1980  ;;  %v8304_v7 = vld [vmem:[%s14234_s2 + $0x1b0] sm:$0xff]  ;;  %v1313_v8 = vand.u32 2147483647, %v10051_v22  ;;  %v4587_v59 = vsel %vm1816_vm0, %v4457_v46, 0.0 }
 0x100   :  { %14366 = vst [vmem:[#allocation29_spill] sm:$0xff] %v10210_v55  ;;  %7865 = vpow2.f32 %v2433_v23  ;;  %v2255_v10 = vsub.f32 %v8304_v7, %v10210_v55  ;;  %7598 = vmatmul.mubr.msk.f32.gmra.mrb[44].mxu1 %vm1816_vm0, %v7850_v12  ;;  %v10222_v40 = vpop.f32.mrb[16].mxu0  ;;  %v1565_v48 = vmax.f32 %v10195_v6, 0.0  ;;  %v1564_v12 = vmax.f32 %v10197_v54, 0.0  ;;  %v206_v54 = vld [vmem:[%s14237_s1 + $0x3f0] sm:$0xff] }
 0x101   :  { %v7854_v26 = vpop.eup %7853  ;;  %7867 = vpow2.f32 %v2331_v45  ;;  %v2439_v0 = vmul.f32 1.442695, %v2256_v62  ;;  %7502 = vmatmul.mubr.msk.f32.gmra.mrb[122].mxu0 %vm210_vm2, %v203_v16  ;;  %2199 = vmax.xlane.f32.xlu1 %v10135_v30  ;;  %v10227_v24 = vpop.f32.mrb[17].mxu0  ;;  %v10232_v23 = vsub.f32 1.0, %v1311_v13  ;;  %v205_v30 = vld [vmem:[%s14237_s1 + $0x3e8] sm:$0xff]  ;;  %v8305_v45 = vld [vmem:[%s14234_s2 + $0x18] sm:$0xff] }
 0x102   :  { %v7856_v4 = vpop.eup %7855  ;;  %v2437_v44 = vmul.f32 1.442695, %v2255_v10  ;;  %2196 = vmax.xlane.f32.xlu0 %v2195_v15  ;;  %7504 = vmatprep.mubr.msk.f32.mxu0 %vm210_vm2, %v204_v38  ;;  %v10235_v22 = vpop.xlane.xlu1 %1989  ;;  %v4459_v46 = vmul.f32 %v8305_v45, %v1563_v42  ;;  %v10243_v16 = vsub.f32 1.0, %v1310_v25  ;;  %v8306_v13 = vld [vmem:[%s14234_s2 + $0x1c8] sm:$0xff]  ;;  %v1312_v62 = vand.u32 2147483647, %v10058_v41 }
 0x103   :  { %14367 = vst [vmem:[#allocation30_spill] sm:$0xff] %v10235_v22  ;;  %7869 = vpow2.f32 %v2439_v0  ;;  %v2258_v15 = vsub.f32 %v8306_v13, %v10235_v22  ;;  %7600 = vmatprep.mubr.msk.f32.mxu1 %vm1816_vm0, %v7856_v4  ;;  %v10250_v6 = vpop.xlane.xlu0 %1986  ;;  %v8307_v42 = vld [vmem:[%s14234_s2 + $0x1c0] sm:$0xff]  ;;  %v4584_v38 = vsel %vm1816_vm0, %v4456_v49, 0.0  ;;  %v8308_v0 = vld [vmem:[%s14234_s2 + $0x10] sm:$0xff]  ;;  %v10267_v41 = vsub.f32 1.0, %v1313_v8  ;;  %v8309_v49 = vld [vmem:[%s14234_s2 + $0x28] sm:$0xff] }
 0x104   :  { %14368 = vst [vmem:[#allocation31_spill] sm:$0xff] %v10250_v6  ;;  %7871 = vpow2.f32 %v2437_v44  ;;  %v2257_v25 = vsub.f32 %v8307_v42, %v10250_v6  ;;  %7601 = vmatmul.mubr.msk.f32.gmra.mrb[46].mxu1 %vm1816_vm0, %v7854_v26  ;;  %v10262_v7 = vpop.f32.mrb[18].mxu0  ;;  %v4458_v4 = vmul.f32 %v8308_v0, %v1562_v17  ;;  %v1315_v44 = vand.u32 2147483647, %v10096_v29  ;;  %v8310_v17 = vld [vmem:[%s14234_s2 + $0x20] sm:$0xff] }
 0x105   :  { %v7858_v10 = vpop.eup %7857  ;;  %v2443_v45 = vmul.f32 1.442695, %v2258_v15  ;;  %7505 = vmatmul.mubr.msk.f32.gmra.mrb[124].mxu0 %vm210_vm2, %v205_v30  ;;  %4588 = vadd.xlane.f32.xlu1 %v4587_v59  ;;  %v10271_v13 = vpop.f32.mrb[19].mxu0  ;;  %v4461_v42 = vmul.f32 %v8309_v49, %v1565_v48  ;;  %v4460_v8 = vmul.f32 %v8310_v17, %v1564_v12  ;;  %v1567_v0 = vmax.f32 %v10232_v23, 0.0  ;;  %v207_v30 = vld [vmem:[%s14237_s1 + $0x3f8] sm:$0xff] }
 0x106   :  { %v7860_v26 = vpop.eup %7859  ;;  %v2441_v29 = vmul.f32 1.442695, %v2257_v25  ;;  %7507 = vmatprep.mubr.msk.f32.mxu0 %vm210_vm2, %v206_v54  ;;  %4585 = vadd.xlane.f32.xlu0 %v4584_v38  ;;  %v10281_v59 = vpop.xlane.xlu1 %1995  ;;  %v1566_v48 = vmax.f32 %v10243_v16, 0.0  ;;  %v8311_v12 = vld [vmem:[%s14234_s2 + $0x1d8] sm:$0xff]  ;;  %v4593_v25 = vsel %vm1816_vm0, %v4459_v46, 0.0  ;;  %v10295_v38 = vsub.f32 1.0, %v1312_v62 }
 0x107   :  { %14369 = vst [vmem:[#allocation32_spill] sm:$0xff] %v10281_v59  ;;  %v7862_v15 = vpop.eup %7861  ;;  %7873 = vpow2.f32 %v2443_v45  ;;  %v2260_v23 = vsub.f32 %v8311_v12, %v10281_v59  ;;  %7603 = vmatprep.mubr.msk.f32.mxu1 %vm1816_vm0, %v7860_v26  ;;  %v10292_v54 = vpop.xlane.xlu0 %1992  ;;  %v1314_v49 = vand.u32 2147483647, %v10111_v3  ;;  %v8312_v16 = vld [vmem:[%s14234_s2 + $0x1d0] sm:$0xff]  ;;  %v1569_v12 = vmax.f32 %v10267_v41, 0.0 }
 0x108   :  { %14370 = vst [vmem:[#allocation33_spill] sm:$0xff] %v10292_v54  ;;  %7875 = vpow2.f32 %v2441_v29  ;;  %v2259_v45 = vsub.f32 %v8312_v16, %v10292_v54  ;;  %7604 = vmatmul.mubr.msk.f32.gmra.mrb[48].mxu1 %vm1816_vm0, %v7858_v10  ;;  %v10303_v17 = vpop.f32.mrb[20].mxu0  ;;  %v10306_v59 = vsub.f32 1.0, %v1315_v44  ;;  %v4590_v3 = vsel %vm1816_vm0, %v4458_v4, 0.0  ;;  %v8313_v10 = vld [vmem:[%s14234_s2 + $0x38] sm:$0xff]  ;;  %v8314_v4 = vld [vmem:[%s14234_s2 + $0x30] sm:$0xff] }
 0x109   :  { %v7864_v26 = vpop.eup %7863  ;;  %v2447_v46 = vmul.f32 1.442695, %v2260_v23  ;;  %7508 = vmatmul.mubr.msk.f32.gmra.mrb[126].mxu0 %vm210_vm2, %v207_v30  ;;  %4594 = vadd.xlane.f32.xlu1 %v4593_v25  ;;  %v10310_v62 = vpop.f32.mrb[21].mxu0  ;;  %v4463_v16 = vmul.f32 %v8313_v10, %v1567_v0  ;;  %v1317_v54 = vand.u32 2147483647, %v10145_v53  ;;  %v4462_v25 = vmul.f32 %v8314_v4, %v1566_v48  ;;  %v8315_v53 = vld [vmem:[%s14234_s2 + $0x1e8] sm:$0xff] }
 0x10a   :  { %v7866_v29 = vpop.eup %7865  ;;  %v1316_v41 = vand.u32 2147483647, %v10159_v1  ;;  %v2445_v44 = vmul.f32 1.442695, %v2259_v45  ;;  %7528 = vmatprep.mubr.msk.f32.mxu0 %vm1816_vm0, %v7862_v15  ;;  %4591 = vadd.xlane.f32.xlu0 %v4590_v3  ;;  %v10318_v30 = vpop.xlane.xlu1 %2001  ;;  %v1319_v6 = vand.u32 2147483647, %v10187_v47 }
 0x10b   :  { %14371 = vst [vmem:[#allocation34_spill] sm:$0xff] %v10318_v30  ;;  %v7868_v23 = vpop.eup %7867  ;;  %7877 = vpow2.f32 %v2447_v46  ;;  %v2262_v1 = vsub.f32 %v8315_v53, %v10318_v30  ;;  %7606 = vmatprep.mubr.msk.f32.mxu1 %vm1816_vm0, %v7866_v29  ;;  %v10329_v0 = vpop.xlane.xlu0 %1998  ;;  %v10331_v15 = vsub.f32 1.0, %v1314_v49  ;;  %v8316_v48 = vld [vmem:[%s14234_s2 + $0x1e0] sm:$0xff]  ;;  %v4599_v45 = vsel %vm1816_vm0, %v4461_v42, 0.0  ;;  %v8317_v29 = vld [vmem:[%s14234_s2 + $0x48] sm:$0xff] }
 0x10c   :  { %14372 = vst [vmem:[#allocation35_spill] sm:$0xff] %v10329_v0  ;;  %7879 = vpow2.f32 %v2445_v44  ;;  %v2261_v47 = vsub.f32 %v8316_v48, %v10329_v0  ;;  %7607 = vmatmul.mubr.msk.f32.gmra.mrb[50].mxu1 %vm1816_vm0, %v7864_v26  ;;  %v10339_v46 = vpop.f32.mrb[22].mxu0  ;;  %v4465_v49 = vmul.f32 %v8317_v29, %v1569_v12  ;;  %v1568_v10 = vmax.f32 %v10295_v38, 0.0 }
 0x10d   :  { %v7870_v3 = vpop.eup %7869  ;;  %v2451_v44 = vmul.f32 1.442695, %v2262_v1  ;;  %7529 = vmatmul.mubr.msk.f32.vlgmr.msra.gmra.mrb[128].mxu0 %vm1816_vm0, %v7868_v23  ;;  %4600 = vadd.xlane.f32.xlu1 %v4599_v45  ;;  %v4596_v4 = vsel %vm1816_vm0, %v4460_v8, 0.0  ;;  %v10347_v53 = vpop.f32.mrb[23].mxu0  ;;  %v1571_v42 = vmax.f32 %v10306_v59, 0.0  ;;  %v1445_v48 = vsub.f32 1.0, %v1317_v54 }
 0x10e   :  { %v7872_v26 = vpop.eup %7871  ;;  %v10350_v0 = vsub.f32 1.0, %v1316_v41  ;;  %v2449_v30 = vmul.f32 1.442695, %v2261_v47  ;;  %4597 = vadd.xlane.f32.xlu0 %v4596_v4  ;;  %v10352_v22 = vpop.xlane.xlu1 %2007  ;;  %v10354_v12 = vsub.f32 1.0, %v1319_v6  ;;  %v1318_v38 = vand.u32 2147483647, %v10190_v5 }
 0x10f   :  { %14373 = vst [vmem:[#allocation36_spill] sm:$0xff] %v10352_v22  ;;  %7881 = vpow2.f32 %v2451_v44  ;;  %v8318_v8 = vld [vmem:[%s14234_s2 + $0x1f8] sm:$0xff]  ;;  %7609 = vmatprep.mubr.msk.f32.mxu1 %vm1816_vm0, %v7872_v26  ;;  %v10362_v59 = vpop.xlane.xlu0 %2004  ;;  %v1570_v54 = vmax.f32 %v10331_v15, 0.0  ;;  %v8319_v6 = vld [vmem:[%s14234_s2 + $0x1f0] sm:$0xff]  ;;  %v4605_v41 = vsel %vm1816_vm0, %v4463_v16, 0.0  ;;  %v8320_v45 = vld [vmem:[%s14234_s2 + $0x40] sm:$0xff] }
 0x110   :  { %v2264_v23 = vsub.f32 %v8318_v8, %v10352_v22  ;;  %14374 = vst [vmem:[#allocation37_spill] sm:$0xff] %v10362_v59  ;;  %7883 = vpow2.f32 %v2449_v30  ;;  %v2263_v5 = vsub.f32 %v8319_v6, %v10362_v59  ;;  %7610 = vmatmul.mubr.msk.f32.gmra.mrb[52].mxu1 %vm1816_vm0, %v7870_v3  ;;  %v10371_v1 = vpop.f32.mrb[24].mxu0  ;;  %v4464_v29 = vmul.f32 %v8320_v45, %v1568_v10  ;;  %v8321_v16 = vld [vmem:[%s14234_s2 + $0x58] sm:$0xff] }
 0x111   :  { %v7874_v47 = vpop.eup %7873  ;;  %v1321_v30 = vand.u32 2147483647, %v10222_v40  ;;  %4606 = vadd.xlane.f32.xlu1 %v4605_v41  ;;  %v4602_v44 = vsel %vm1816_vm0, %v4462_v25, 0.0  ;;  %v10378_v4 = vpop.f32.mrb[25].mxu0  ;;  %v4467_v3 = vmul.f32 %v8321_v16, %v1571_v42  ;;  %v1573_v8 = vmax.f32 %v1445_v48, 0.0  ;;  %v8322_v25 = vld [vmem:[%s14234_s2 + $0x208] sm:$0xff] }
 0x112   :  { %v2455_v15 = vmul.f32 1.442695, %v2264_v23  ;;  %v7876_v26 = vpop.eup %7875  ;;  %v1572_v6 = vmax.f32 %v10350_v0, 0.0  ;;  %v2453_v59 = vmul.f32 1.442695, %v2263_v5  ;;  %4603 = vadd.xlane.f32.xlu0 %v4602_v44  ;;  %v10384_v10 = vpop.xlane.xlu1 %2013  ;;  %v1575_v40 = vmax.f32 %v10354_v12, 0.0 }
 0x113   :  { %14375 = vst [vmem:[#allocation38_spill] sm:$0xff] %v10384_v10  ;;  %v1446_v23 = vsub.f32 1.0, %v1318_v38  ;;  %v2266_v41 = vsub.f32 %v8322_v25, %v10384_v10  ;;  %7612 = vmatprep.mubr.msk.f32.mxu1 %vm1816_vm0, %v7876_v26  ;;  %v10392_v42 = vpop.xlane.xlu0 %2010  ;;  %v1320_v0 = vand.u32 2147483647, %v10227_v24  ;;  %v8323_v48 = vld [vmem:[%s14234_s2 + $0x200] sm:$0xff]  ;;  %v4611_v38 = vsel %vm1816_vm0, %v4465_v49, 0.0 }
 0x114   :  { %7885 = vpow2.f32 %v2455_v15  ;;  %14376 = vst [vmem:[#allocation39_spill] sm:$0xff] %v10392_v42  ;;  %v2265_v12 = vsub.f32 %v8323_v48, %v10392_v42  ;;  %7613 = vmatmul.mubr.msk.f32.gmra.mrb[54].mxu1 %vm1816_vm0, %v7874_v47  ;;  %v10401_v5 = vpop.f32.mrb[26].mxu0  ;;  %v8324_v15 = vld [vmem:[%s14234_s2 + $0x50] sm:$0xff]  ;;  %v1449_v24 = vsub.f32 1.0, %v1321_v30  ;;  %v4608_v26 = vsel %vm1816_vm0, %v4464_v29, 0.0  ;;  %v8325_v49 = vld [vmem:[%s14234_s2 + $0x68] sm:$0xff] }
 0x115   :  { %7887 = vpow2.f32 %v2453_v59  ;;  %v7878_v45 = vpop.eup %7877  ;;  %v4466_v44 = vmul.f32 %v8324_v15, %v1570_v54  ;;  %v2459_v59 = vmul.f32 1.442695, %v2266_v41  ;;  %4612 = vadd.xlane.f32.xlu1 %v4611_v38  ;;  %v10407_v16 = vpop.f32.mrb[27].mxu0  ;;  %v4469_v47 = vmul.f32 %v8325_v49, %v1573_v8  ;;  %v8326_v29 = vld [vmem:[%s14234_s2 + $0x60] sm:$0xff]  ;;  %v8327_v38 = vld [vmem:[%s14234_s2 + $0x218] sm:$0xff] }
 0x116   :  { %v7880_v25 = vpop.eup %7879  ;;  %v1323_v48 = vand.u32 2147483647, %v10262_v7  ;;  %v1322_v42 = vand.u32 2147483647, %v10271_v13  ;;  %v2457_v10 = vmul.f32 1.442695, %v2265_v12  ;;  %4609 = vadd.xlane.f32.xlu0 %v4608_v26  ;;  %v10414_v54 = vpop.xlane.xlu1 %2019  ;;  %v4468_v30 = vmul.f32 %v8326_v29, %v1572_v6 }
 0x117   :  { %14377 = vst [vmem:[#allocation40_spill] sm:$0xff] %v10414_v54  ;;  %v1574_v41 = vmax.f32 %v1446_v23, 0.0  ;;  %7889 = vpow2.f32 %v2459_v59  ;;  %v2268_v8 = vsub.f32 %v8327_v38, %v10414_v54  ;;  %7615 = vmatprep.mubr.msk.f32.mxu1 %vm1816_vm0, %v7880_v25  ;;  %v10424_v7 = vpop.xlane.xlu0 %2016  ;;  %v8328_v13 = vld [vmem:[%s14234_s2 + $0x78] sm:$0xff]  ;;  %v8329_v6 = vld [vmem:[%s14234_s2 + $0x210] sm:$0xff]  ;;  %v4617_v15 = vsel %vm1816_vm0, %v4467_v3, 0.0 }
 0x118   :  { %14378 = vst [vmem:[#allocation41_spill] sm:$0xff] %v10424_v7  ;;  %v10429_v12 = vmul.f32 %v8328_v13, %v1575_v40  ;;  %7891 = vpow2.f32 %v2457_v10  ;;  %v2267_v23 = vsub.f32 %v8329_v6, %v10424_v7  ;;  %7616 = vmatmul.mubr.msk.f32.gmra.mrb[56].mxu1 %vm1816_vm0, %v7878_v45  ;;  %v10437_v59 = vpop.f32.mrb[28].mxu0  ;;  %v1577_v25 = vmax.f32 %v1449_v24, 0.0 }
 0x119   :  { %v7882_v26 = vpop.eup %7881  ;;  %v1448_v49 = vsub.f32 1.0, %v1320_v0  ;;  %v2463_v29 = vmul.f32 1.442695, %v2268_v8  ;;  %4618 = vadd.xlane.f32.xlu1 %v4617_v15  ;;  %v4614_v40 = vsel %vm1816_vm0, %v4466_v44, 0.0  ;;  %v10440_v10 = vpop.f32.mrb[29].mxu0  ;;  %v1451_v13 = vsub.f32 1.0, %v1323_v48 }
 0x11a   :  { %v7884_v38 = vpop.eup %7883  ;;  %v10442_v54 = vsub.f32 1.0, %v1322_v42  ;;  %v1325_v6 = vand.u32 2147483647, %v10303_v17  ;;  %v2461_v45 = vmul.f32 1.442695, %v2267_v23  ;;  %4615 = vadd.xlane.f32.xlu0 %v4614_v40  ;;  %v10445_v3 = vpop.xlane.xlu1 %2025  ;;  %v8330_v0 = vld [vmem:[%s14234_s2 + $0x70] sm:$0xff] }
 0x11b   :  { %14379 = vst [vmem:[#allocation42_spill] sm:$0xff] %v10445_v3  ;;  %v4470_v24 = vmul.f32 %v8330_v0, %v1574_v41  ;;  %v1324_v8 = vand.u32 2147483647, %v10310_v62  ;;  %7893 = vpow2.f32 %v2463_v29  ;;  %v8331_v44 = vld [vmem:[%s14234_s2 + $0x228] sm:$0xff]  ;;  %7618 = vmatprep.mubr.msk.f32.mxu1 %vm1816_vm0, %v7884_v38  ;;  %v10456_v17 = vpop.xlane.xlu0 %2022  ;;  %v1327_v48 = vand.u32 2147483647, %v10339_v46 }
 0x11c   :  { %v2270_v42 = vsub.f32 %v8331_v44, %v10445_v3  ;;  %14380 = vst [vmem:[#allocation43_spill] sm:$0xff] %v10456_v17  ;;  %7895 = vpow2.f32 %v2461_v45  ;;  %v8332_v41 = vld [vmem:[%s14234_s2 + $0x220] sm:$0xff]  ;;  %7619 = vmatmul.mubr.msk.f32.gmra.mrb[58].mxu1 %vm1816_vm0, %v7882_v26  ;;  %v4623_v23 = vsel %vm1816_vm0, %v4469_v47, 0.0  ;;  %v10465_v15 = vpop.f32.mrb[30].mxu0  ;;  %v8333_v40 = vld [vmem:[%s14234_s2 + $0x88] sm:$0xff]  ;;  %v1576_v46 = vmax.f32 %v1448_v49, 0.0 }
 0x11d   :  { %v2269_v62 = vsub.f32 %v8332_v41, %v10456_v17  ;;  %v4473_v38 = vmul.f32 %v8333_v40, %v1577_v25  ;;  %4624 = vadd.xlane.f32.xlu1 %v4623_v23  ;;  %v4620_v0 = vsel %vm1816_vm0, %v4468_v30, 0.0  ;;  %v1579_v3 = vmax.f32 %v1451_v13, 0.0  ;;  %v10474_v7 = vpop.f32.mrb[31].mxu0  ;;  %v8334_v25 = vld [vmem:[%s14234_s2 + $0x238] sm:$0xff]  ;;  %v8335_v13 = vld [vmem:[%s14234_s2 + $0x230] sm:$0xff] }
 0x11e   :  { %v7886_v29 = vpop.eup %7885  ;;  %v2467_v45 = vmul.f32 1.442695, %v2270_v42  ;;  %v1578_v41 = vmax.f32 %v10442_v54, 0.0  ;;  %v1453_v26 = vsub.f32 1.0, %v1325_v6  ;;  %4621 = vadd.xlane.f32.xlu0 %v4620_v0  ;;  %v10472_v47 = vpop.xlane.xlu1 %2031  ;;  %v1452_v22 = vsub.f32 1.0, %v1324_v8 }
 0x11f   :  { %v7888_v44 = vpop.eup %7887  ;;  %v2465_v17 = vmul.f32 1.442695, %v2269_v62  ;;  %v1326_v55 = vand.u32 2147483647, %v10347_v53  ;;  %v2272_v30 = vsub.f32 %v8334_v25, %v10472_v47  ;;  %v10482_v54 = vpop.xlane.xlu0 %2028  ;;  %v10484_v49 = vsub.f32 1.0, %v1327_v48  ;;  %v8336_v48 = vld [vmem:[%s14234_s2 + $0x80] sm:$0xff] }
 0x120   :  { %7897 = vpow2.f32 %v2467_v45  ;;  %7621 = vmatprep.mubr.msk.f32.mxu1 %vm1816_vm0, %v7888_v44  ;;  %14381 = vst [vmem:[#allocation44_spill] sm:$0xff] %v10482_v54  ;;  %v2271_v53 = vsub.f32 %v8335_v13, %v10482_v54  ;;  %v4629_v6 = vsel %vm1816_vm0, %v10429_v12, 0.0  ;;  %v10493_v8 = vpop.f32.mrb[32].mxu0  ;;  %v4472_v62 = vmul.f32 %v8336_v48, %v1576_v46  ;;  %v8337_v12 = vld [vmem:[%s14234_s2 + $0x98] sm:$0xff] }
 0x121   :  { %7899 = vpow2.f32 %v2465_v17  ;;  %7622 = vmatmul.mubr.msk.f32.gmra.mrb[60].mxu1 %vm1816_vm0, %v7886_v29  ;;  %v7890_v42 = vpop.eup %7889  ;;  %v1329_v17 = vand.u32 2147483647, %v10371_v1  ;;  %v2471_v23 = vmul.f32 1.442695, %v2272_v30  ;;  %4630 = vadd.xlane.f32.xlu1 %v4629_v6  ;;  %v4626_v40 = vsel %vm1816_vm0, %v4470_v24, 0.0  ;;  %v10500_v45 = vpop.f32.mrb[33].mxu0 }
 0x122   :  { %v7892_v29 = vpop.eup %7891  ;;  %v4475_v0 = vmul.f32 %v8337_v12, %v1579_v3  ;;  %v1581_v44 = vmax.f32 %v1453_v26, 0.0  ;;  %v1328_v25 = vand.u32 2147483647, %v10378_v4  ;;  %v2469_v13 = vmul.f32 1.442695, %v2271_v53  ;;  %4627 = vadd.xlane.f32.xlu0 %v4626_v40  ;;  %v10506_v46 = vpop.xlane.xlu1 %2037  ;;  %v8338_v1 = vld [vmem:[%s14234_s2 + $0x90] sm:$0xff] }
 0x123   :  { %14382 = vst [vmem:[#allocation45_spill] sm:$0xff] %v10506_v46  ;;  %v4474_v24 = vmul.f32 %v8338_v1, %v1578_v41  ;;  %v1580_v30 = vmax.f32 %v1452_v22, 0.0  ;;  %7901 = vpow2.f32 %v2471_v23  ;;  %v8339_v6 = vld [vmem:[%s14234_s2 + $0x248] sm:$0xff]  ;;  %7624 = vmatprep.mubr.msk.f32.mxu1 %vm1816_vm0, %v7892_v29  ;;  %v10516_v4 = vpop.xlane.xlu0 %2034  ;;  %v10518_v26 = vsub.f32 1.0, %v1326_v55  ;;  %v8340_v53 = vld [vmem:[%s14234_s2 + $0x240] sm:$0xff] }
 0x124   :  { %v2274_v3 = vsub.f32 %v8339_v6, %v10506_v46  ;;  %14383 = vst [vmem:[#allocation46_spill] sm:$0xff] %v10516_v4  ;;  %7903 = vpow2.f32 %v2469_v13  ;;  %v2273_v22 = vsub.f32 %v8340_v53, %v10516_v4  ;;  %v4635_v41 = vsel %vm1816_vm0, %v4473_v38, 0.0  ;;  %v10526_v48 = vpop.f32.mrb[34].mxu0  ;;  %v8341_v1 = vld [vmem:[%s14234_s2 + $0xa8] sm:$0xff] }
 0x125   :  { %7625 = vmatmul.mubr.msk.f32.gmra.mrb[62].mxu1 %vm1816_vm0, %v7890_v42  ;;  %v7894_v23 = vpop.eup %7893  ;;  %v1583_v40 = vmax.f32 %v10484_v49, 0.0  ;;  %v10529_v29 = vsub.f32 1.0, %v1329_v17  ;;  %4636 = vadd.xlane.f32.xlu1 %v4635_v41  ;;  %v4632_v12 = vsel %vm1816_vm0, %v4472_v62, 0.0  ;;  %v4477_v6 = vmul.f32 %v8341_v1, %v1581_v44  ;;  %v10540_v49 = vpop.f32.mrb[35].mxu0  ;;  %v8342_v62 = vld [vmem:[%s14234_s2 + $0xa0] sm:$0xff]  ;;  %v8343_v44 = vld [vmem:[%s14234_s2 + $0x258] sm:$0xff] }
 0x126   :  { %v2475_v55 = vmul.f32 1.442695, %v2274_v3  ;;  %v7896_v13 = vpop.eup %7895  ;;  %v10535_v42 = vsub.f32 1.0, %v1328_v25  ;;  %v1331_v38 = vand.u32 2147483647, %v10401_v5  ;;  %4633 = vadd.xlane.f32.xlu0 %v4632_v12  ;;  %v10538_v4 = vpop.xlane.xlu1 %2043  ;;  %v4476_v17 = vmul.f32 %v8342_v62, %v1580_v30  ;;  %v8344_v30 = vld [vmem:[%s14234_s2 + $0x250] sm:$0xff] }
 0x127   :  { %v2473_v53 = vmul.f32 1.442695, %v2273_v22  ;;  %14384 = vst [vmem:[#allocation47_spill] sm:$0xff] %v10538_v4  ;;  %v1330_v3 = vand.u32 2147483647, %v10407_v16  ;;  %v2276_v5 = vsub.f32 %v8343_v44, %v10538_v4  ;;  %7627 = vmatprep.mubr.msk.f32.mxu1 %vm1816_vm0, %v7896_v13  ;;  %v10551_v25 = vpop.xlane.xlu0 %2040  ;;  %v4641_v41 = vsel %vm1816_vm0, %v4475_v0, 0.0 }
 0x128   :  { %7905 = vpow2.f32 %v2475_v55  ;;  %14385 = vst [vmem:[#allocation48_spill] sm:$0xff] %v10551_v25  ;;  %v1333_v22 = vand.u32 2147483647, %v10437_v59  ;;  %v2275_v16 = vsub.f32 %v8344_v30, %v10551_v25  ;;  %v10560_v55 = vpop.f32.mrb[36].mxu0  ;;  %v8345_v13 = vld [vmem:[%s14234_s2 + $0xb8] sm:$0xff]  ;;  %v1582_v59 = vmax.f32 %v10518_v26, 0.0 }
 0x129   :  { %7907 = vpow2.f32 %v2473_v53  ;;  %7628 = vmatmul.mubr.msk.f32.gmra.mrb[64].mxu1 %vm1816_vm0, %v7894_v23  ;;  %v4479_v1 = vmul.f32 %v8345_v13, %v1583_v40  ;;  %v2479_v53 = vmul.f32 1.442695, %v2276_v5  ;;  %4642 = vadd.xlane.f32.xlu1 %v4641_v41  ;;  %v4638_v62 = vsel %vm1816_vm0, %v4474_v24, 0.0  ;;  %v10573_v46 = vpop.f32.mrb[37].mxu0  ;;  %v8346_v24 = vld [vmem:[%s14234_s2 + $0x268] sm:$0xff]  ;;  %v8347_v5 = vld [vmem:[%s14234_s2 + $0x260] sm:$0xff] }
 0x12a   :  { %v7898_v12 = vpop.eup %7897  ;;  %v1585_v30 = vmax.f32 %v10529_v29, 0.0  ;;  %v1584_v23 = vmax.f32 %v10535_v42, 0.0  ;;  %v10569_v0 = vsub.f32 1.0, %v1331_v38  ;;  %v2477_v25 = vmul.f32 1.442695, %v2275_v16  ;;  %4639 = vadd.xlane.f32.xlu0 %v4638_v62  ;;  %v10571_v4 = vpop.xlane.xlu1 %2049  ;;  %v8348_v13 = vld [vmem:[%s14234_s2 + $0xb0] sm:$0xff] }
 0x12b   :  { %v7900_v44 = vpop.eup %7899  ;;  %14386 = vst [vmem:[#allocation49_spill] sm:$0xff] %v10571_v4  ;;  %v1458_v40 = vsub.f32 1.0, %v1330_v3  ;;  %v1332_v26 = vand.u32 2147483647, %v10440_v10  ;;  %7909 = vpow2.f32 %v2479_v53  ;;  %v2278_v29 = vsub.f32 %v8346_v24, %v10571_v4  ;;  %v10581_v42 = vpop.xlane.xlu0 %2046 }
 0x12c   :  { %7630 = vmatprep.mubr.msk.f32.mxu1 %vm1816_vm0, %v7900_v44  ;;  %14387 = vst [vmem:[#allocation50_spill] sm:$0xff] %v10581_v42  ;;  %v1461_v38 = vsub.f32 1.0, %v1333_v22  ;;  %7911 = vpow2.f32 %v2477_v25  ;;  %v2277_v3 = vsub.f32 %v8347_v5, %v10581_v42  ;;  %v4647_v10 = vsel %vm1816_vm0, %v4477_v6, 0.0  ;;  %v10589_v16 = vpop.f32.mrb[38].mxu0  ;;  %v8349_v6 = vld [vmem:[%s14234_s2 + $0xc8] sm:$0xff]  ;;  %v8350_v5 = vld [vmem:[%s14234_s2 + $0xc0] sm:$0xff] }
 0x12d   :  { %7631 = vmatmul.mubr.msk.f32.gmra.mrb[66].mxu1 %vm1816_vm0, %v7898_v12  ;;  %v7902_v41 = vpop.eup %7901  ;;  %v4478_v53 = vmul.f32 %v8348_v13, %v1582_v59  ;;  %v1335_v25 = vand.u32 2147483647, %v10465_v15  ;;  %v2483_v22 = vmul.f32 1.442695, %v2278_v29  ;;  %4648 = vadd.xlane.f32.xlu1 %v4647_v10  ;;  %v4644_v62 = vsel %vm1816_vm0, %v4476_v17, 0.0  ;;  %v10596_v44 = vpop.f32.mrb[39].mxu0 }
 0x12e   :  { %v7904_v24 = vpop.eup %7903  ;;  %v4481_v12 = vmul.f32 %v8349_v6, %v1585_v30  ;;  %v4480_v42 = vmul.f32 %v8350_v5, %v1584_v23  ;;  %v1587_v59 = vmax.f32 %v10569_v0, 0.0  ;;  %v2481_v15 = vmul.f32 1.442695, %v2277_v3  ;;  %4645 = vadd.xlane.f32.xlu0 %v4644_v62  ;;  %v10605_v29 = vpop.xlane.xlu1 %2055  ;;  %v8351_v13 = vld [vmem:[%s14234_s2 + $0x278] sm:$0xff] }
 0x12f   :  { %14388 = vst [vmem:[#allocation51_spill] sm:$0xff] %v10605_v29  ;;  %v1586_v17 = vmax.f32 %v1458_v40, 0.0  ;;  %v10607_v10 = vsub.f32 1.0, %v1332_v26  ;;  %7913 = vpow2.f32 %v2483_v22  ;;  %v2280_v30 = vsub.f32 %v8351_v13, %v10605_v29  ;;  %7633 = vmatprep.mubr.msk.f32.mxu1 %vm1816_vm0, %v7904_v24  ;;  %v10614_v6 = vpop.xlane.xlu0 %2052  ;;  %v8352_v40 = vld [vmem:[%s14234_s2 + $0x270] sm:$0xff] }
 0x130   :  { %14389 = vst [vmem:[#allocation52_spill] sm:$0xff] %v10614_v6  ;;  %v1589_v23 = vmax.f32 %v1461_v38, 0.0  ;;  %v1334_v0 = vand.u32 2147483647, %v10474_v7  ;;  %7915 = vpow2.f32 %v2481_v15  ;;  %v2279_v26 = vsub.f32 %v8352_v40, %v10614_v6  ;;  %v10622_v3 = vpop.f32.mrb[40].mxu0 }
 0x131   :  { %7634 = vmatmul.mubr.msk.f32.gmra.mrb[68].mxu1 %vm1816_vm0, %v7902_v41  ;;  %v10624_v62 = vsub.f32 1.0, %v1335_v25  ;;  %v2487_v24 = vmul.f32 1.442695, %v2280_v30  ;;  %v4653_v5 = vsel %vm1816_vm0, %v4479_v1, 0.0  ;;  %v4650_v38 = vsel %vm1816_vm0, %v4478_v53, 0.0  ;;  %v10628_v7 = vpop.f32.mrb[41].mxu0 }
 0x132   :  { %v7906_v22 = vpop.eup %7905  ;;  %v1337_v13 = vand.u32 2147483647, %v10493_v8  ;;  %v1336_v29 = vand.u32 2147483647, %v10500_v45  ;;  %v2485_v40 = vmul.f32 1.442695, %v2279_v26  ;;  %4654 = vadd.xlane.f32.xlu1 %v4653_v5  ;;  %4651 = vadd.xlane.f32.xlu0 %v4650_v38  ;;  %v10632_v41 = vpop.xlane.xlu1 %2061 }
 0x133   :  { %v7908_v15 = vpop.eup %7907  ;;  %14390 = vst [vmem:[#allocation53_spill] sm:$0xff] %v10632_v41  ;;  %v8353_v25 = vld [vmem:[%s14234_s2 + $0xd8] sm:$0xff]  ;;  %v8354_v1 = vld [vmem:[%s14234_s2 + $0xd0] sm:$0xff]  ;;  %7917 = vpow2.f32 %v2487_v24  ;;  %v8355_v8 = vld [vmem:[%s14234_s2 + $0x288] sm:$0xff]  ;;  %v10645_v26 = vpop.xlane.xlu0 %2058  ;;  %v1588_v38 = vmax.f32 %v10607_v10, 0.0 }
 0x134   :  { %v4483_v30 = vmul.f32 %v8353_v25, %v1587_v59  ;;  %v4482_v53 = vmul.f32 %v8354_v1, %v1586_v17  ;;  %v2282_v45 = vsub.f32 %v8355_v8, %v10632_v41  ;;  %7636 = vmatprep.mubr.msk.f32.mxu1 %vm1816_vm0, %v7908_v15  ;;  %14391 = vst [vmem:[#allocation54_spill] sm:$0xff] %v10645_v26  ;;  %v8356_v59 = vld [vmem:[%s14234_s2 + $0xe8] sm:$0xff]  ;;  %7919 = vpow2.f32 %v2485_v40  ;;  %v8357_v17 = vld [vmem:[%s14234_s2 + $0x280] sm:$0xff]  ;;  %v10658_v15 = vpop.f32.mrb[42].mxu0 }
 0x135   :  { %v10650_v5 = vmul.f32 %v8356_v59, %v1589_v23  ;;  %v2281_v24 = vsub.f32 %v8357_v17, %v10645_v26  ;;  %7637 = vmatmul.mubr.msk.f32.gmra.mrb[70].mxu1 %vm1816_vm0, %v7906_v22  ;;  %v7910_v25 = vpop.eup %7909  ;;  %v1462_v1 = vsub.f32 1.0, %v1334_v0  ;;  %v4659_v41 = vsel %vm1816_vm0, %v4481_v12, 0.0  ;;  %v10662_v59 = vpop.f32.mrb[43].mxu0 }
 0x136   :  { %v2491_v8 = vmul.f32 1.442695, %v2282_v45  ;;  %v4656_v23 = vsel %vm1816_vm0, %v4480_v42, 0.0  ;;  %v7912_v10 = vpop.eup %7911  ;;  %v1591_v40 = vmax.f32 %v10624_v62, 0.0  ;;  %v1465_v6 = vsub.f32 1.0, %v1337_v13  ;;  %4660 = vadd.xlane.f32.xlu1 %v4659_v41  ;;  %v10667_v22 = vpop.xlane.xlu1 %2067  ;;  %v8358_v42 = vld [vmem:[%s14234_s2 + $0x298] sm:$0xff] }
 0x137   :  { %v10665_v4 = vsub.f32 1.0, %v1336_v29  ;;  %v2489_v17 = vmul.f32 1.442695, %v2281_v24  ;;  %4657 = vadd.xlane.f32.xlu0 %v4656_v23  ;;  %14392 = vst [vmem:[#allocation55_spill] sm:$0xff] %v10667_v22  ;;  %v1339_v0 = vand.u32 2147483647, %v10526_v48  ;;  %v2284_v12 = vsub.f32 %v8358_v42, %v10667_v22  ;;  %7639 = vmatprep.mubr.msk.f32.mxu1 %vm1816_vm0, %v7912_v10  ;;  %v10676_v29 = vpop.xlane.xlu0 %2064 }
 0x138   :  { %v1338_v45 = vand.u32 2147483647, %v10540_v49  ;;  %7921 = vpow2.f32 %v2491_v8  ;;  %14393 = vst [vmem:[#allocation56_spill] sm:$0xff] %v10676_v29  ;;  %v8359_v62 = vld [vmem:[%s14234_s2 + $0xe0] sm:$0xff]  ;;  %v1341_v48 = vand.u32 2147483647, %v10560_v55 }
 0x139   :  { %v4484_v13 = vmul.f32 %v8359_v62, %v1588_v38  ;;  %7923 = vpow2.f32 %v2489_v17  ;;  %v8360_v49 = vld [vmem:[%s14234_s2 + $0x290] sm:$0xff]  ;;  %7640 = vmatmul.mubr.msk.f32.gmra.mrb[72].mxu1 %vm1816_vm0, %v7910_v25  ;;  %v10687_v24 = vpop.f32.mrb[44].mxu0  ;;  %v7914_v8 = vpop.eup %7913  ;;  %v1590_v23 = vmax.f32 %v1462_v1, 0.0  ;;  %v2495_v10 = vmul.f32 1.442695, %v2284_v12  ;;  %v8361_v17 = vld [vmem:[%s14234_s2 + $0xf8] sm:$0xff] }
 0x13a   :  { %v2283_v41 = vsub.f32 %v8360_v49, %v10676_v29  ;;  %v4665_v42 = vsel %vm1816_vm0, %v4483_v30, 0.0  ;;  %v4662_v38 = vsel %vm1816_vm0, %v4482_v53, 0.0  ;;  %v10691_v62 = vpop.f32.mrb[45].mxu0  ;;  %v7916_v55 = vpop.eup %7915  ;;  %v4487_v22 = vmul.f32 %v8361_v17, %v1591_v40  ;;  %v8362_v53 = vld [vmem:[%s14234_s2 + $0x2a8] sm:$0xff] }
 0x13b   :  { %v1593_v49 = vmax.f32 %v1465_v6, 0.0  ;;  %v1592_v25 = vmax.f32 %v10665_v4, 0.0  ;;  %4666 = vadd.xlane.f32.xlu1 %v4665_v42  ;;  %4663 = vadd.xlane.f32.xlu0 %v4662_v38  ;;  %v10697_v1 = vpop.xlane.xlu1 %2073  ;;  %v1467_v12 = vsub.f32 1.0, %v1339_v0  ;;  %v10699_v30 = vsub.f32 1.0, %v1338_v45  ;;  %v10706_v6 = vpop.xlane.xlu0 %2070  ;;  %v8363_v0 = vld [vmem:[%s14234_s2 + $0x2a0] sm:$0xff]  ;;  %v8364_v42 = vld [vmem:[%s14234_s2 + $0xf0] sm:$0xff] }
 0x13c   :  { %v2493_v29 = vmul.f32 1.442695, %v2283_v41  ;;  %14394 = vst [vmem:[#allocation57_spill] sm:$0xff] %v10697_v1  ;;  %7925 = vpow2.f32 %v2495_v10  ;;  %v2286_v26 = vsub.f32 %v8362_v53, %v10697_v1  ;;  %7642 = vmatprep.mubr.msk.f32.mxu1 %vm1816_vm0, %v7916_v55  ;;  %14395 = vst [vmem:[#allocation58_spill] sm:$0xff] %v10706_v6  ;;  %v10708_v4 = vsub.f32 1.0, %v1341_v48  ;;  %v10716_v41 = vpop.f32.mrb[46].mxu0 }
 0x13d   :  { %v1340_v40 = vand.u32 2147483647, %v10573_v46  ;;  %v2285_v45 = vsub.f32 %v8363_v0, %v10706_v6  ;;  %7643 = vmatmul.mubr.msk.f32.gmra.mrb[74].mxu1 %vm1816_vm0, %v7914_v8  ;;  %v7918_v10 = vpop.eup %7917  ;;  %v4486_v48 = vmul.f32 %v8364_v42, %v1590_v23  ;;  %v4671_v46 = vsel %vm1816_vm0, %v10650_v5, 0.0  ;;  %v10724_v55 = vpop.f32.mrb[47].mxu0  ;;  %v8365_v8 = vld [vmem:[%s14234_s2 + $0x108] sm:$0xff]  ;;  %v8366_v5 = vld [vmem:[%s14234_s2 + $0x100] sm:$0xff] }
 0x13e   :  { %7927 = vpow2.f32 %v2493_v29  ;;  %v2499_v38 = vmul.f32 1.442695, %v2286_v26  ;;  %v4668_v29 = vsel %vm1816_vm0, %v4484_v13, 0.0  ;;  %v7920_v17 = vpop.eup %7919  ;;  %v4489_v53 = vmul.f32 %v8365_v8, %v1593_v49  ;;  %v8367_v49 = vld [vmem:[%s14234_s2 + $0x2b8] sm:$0xff] }
 0x13f   :  { %v1343_v0 = vand.u32 2147483647, %v10589_v16  ;;  %v1342_v6 = vand.u32 2147483647, %v10596_v44  ;;  %v2497_v1 = vmul.f32 1.442695, %v2285_v45  ;;  %4672 = vadd.xlane.f32.xlu1 %v4671_v46  ;;  %4669 = vadd.xlane.f32.xlu0 %v4668_v29  ;;  %v10731_v26 = vpop.xlane.xlu1 %2079  ;;  %v4488_v13 = vmul.f32 %v8366_v5, %v1592_v25  ;;  %v10741_v44 = vpop.xlane.xlu0 %2076 }
 0x140   :  { %14396 = vst [vmem:[#allocation59_spill] sm:$0xff] %v10731_v26  ;;  %v1595_v23 = vmax.f32 %v1467_v12, 0.0  ;;  %7929 = vpow2.f32 %v2499_v38  ;;  %v2288_v16 = vsub.f32 %v8367_v49, %v10731_v26  ;;  %7645 = vmatprep.mubr.msk.f32.mxu1 %vm1816_vm0, %v7920_v17  ;;  %14397 = vst [vmem:[#allocation60_spill] sm:$0xff] %v10741_v44  ;;  %v1594_v45 = vmax.f32 %v10699_v30, 0.0  ;;  %v8368_v25 = vld [vmem:[%s14234_s2 + $0x2b0] sm:$0xff]  ;;  %v10750_v38 = vpop.f32.mrb[48].mxu0 }
 0x141   :  { %v1597_v42 = vmax.f32 %v10708_v4, 0.0  ;;  %7931 = vpow2.f32 %v2497_v1  ;;  %v2287_v12 = vsub.f32 %v8368_v25, %v10741_v44  ;;  %7646 = vmatmul.mubr.msk.f32.gmra.mrb[76].mxu1 %vm1816_vm0, %v7918_v10  ;;  %v1468_v29 = vsub.f32 1.0, %v1340_v40  ;;  %v10754_v5 = vpop.f32.mrb[49].mxu0  ;;  %v8369_v40 = vld [vmem:[%s14234_s2 + $0x118] sm:$0xff] }
 0x142   :  { %v7922_v46 = vpop.eup %7921  ;;  %v2503_v17 = vmul.f32 1.442695, %v2288_v16  ;;  %v4677_v8 = vsel %vm1816_vm0, %v4487_v22, 0.0  ;;  %v4674_v30 = vsel %vm1816_vm0, %v4486_v48, 0.0  ;;  %v1471_v4 = vsub.f32 1.0, %v1343_v0  ;;  %v8371_v16 = vld [vmem:[%s14234_s2 + $0x110] sm:$0xff] }
 0x143   :  { %v7924_v1 = vpop.eup %7923  ;;  %v10756_v49 = vsub.f32 1.0, %v1342_v6  ;;  %v1345_v26 = vand.u32 2147483647, %v10622_v3  ;;  %v2501_v25 = vmul.f32 1.442695, %v2287_v12  ;;  %4678 = vadd.xlane.f32.xlu1 %v4677_v8  ;;  %4675 = vadd.xlane.f32.xlu0 %v4674_v30  ;;  %v10759_v10 = vpop.xlane.xlu1 %2085  ;;  %v4491_v22 = vmul.f32 %v8369_v40, %v1595_v23  ;;  %v8370_v6 = vld [vmem:[%s14234_s2 + $0x2c8] sm:$0xff] }
 0x144   :  { %14398 = vst [vmem:[#allocation61_spill] sm:$0xff] %v10759_v10  ;;  %v1344_v48 = vand.u32 2147483647, %v10628_v7  ;;  %7933 = vpow2.f32 %v2503_v17  ;;  %v2290_v0 = vsub.f32 %v8370_v6, %v10759_v10  ;;  %7648 = vmatprep.mubr.msk.f32.mxu1 %vm1816_vm0, %v7924_v1  ;;  %v10770_v3 = vpop.xlane.xlu0 %2082  ;;  %v4490_v12 = vmul.f32 %v8371_v16, %v1594_v45  ;;  %v8372_v7 = vld [vmem:[%s14234_s2 + $0x128] sm:$0xff]  ;;  %v8373_v17 = vld [vmem:[%s14234_s2 + $0x2c0] sm:$0xff]  ;;  %v10785_v30 = vpop.f32.mrb[50].mxu0 }
 0x145   :  { %14399 = vst [vmem:[#allocation62_spill] sm:$0xff] %v10770_v3  ;;  %v10778_v23 = vmul.f32 %v8372_v7, %v1597_v42  ;;  %7935 = vpow2.f32 %v2501_v25  ;;  %v2289_v8 = vsub.f32 %v8373_v17, %v10770_v3  ;;  %7649 = vmatmul.mubr.msk.f32.gmra.mrb[78].mxu1 %vm1816_vm0, %v7922_v46  ;;  %v1596_v40 = vmax.f32 %v1468_v29, 0.0  ;;  %v10789_v42 = vpop.f32.mrb[51].mxu0 }
 0x146   :  { %v7926_v1 = vpop.eup %7925  ;;  %v2507_v45 = vmul.f32 1.442695, %v2290_v0  ;;  %v4683_v6 = vsel %vm1816_vm0, %v4489_v53, 0.0  ;;  %v4680_v16 = vsel %vm1816_vm0, %v4488_v13, 0.0  ;;  %v1599_v7 = vmax.f32 %v1471_v4, 0.0  ;;  %v8374_v53 = vld [vmem:[%s14234_s2 + $0x2d8] sm:$0xff] }
 0x147   :  { %v1598_v10 = vmax.f32 %v10756_v49, 0.0  ;;  %v1473_v44 = vsub.f32 1.0, %v1345_v26  ;;  %v2505_v54 = vmul.f32 1.442695, %v2289_v8  ;;  %4684 = vadd.xlane.f32.xlu1 %v4683_v6  ;;  %4681 = vadd.xlane.f32.xlu0 %v4680_v16  ;;  %v10792_v46 = vpop.xlane.xlu1 %2091  ;;  %v1472_v17 = vsub.f32 1.0, %v1344_v48 }
 0x148   :  { %v7928_v25 = vpop.eup %7927  ;;  %14400 = vst [vmem:[#allocation63_spill] sm:$0xff] %v10792_v46  ;;  %v1347_v29 = vand.u32 2147483647, %v10658_v15  ;;  %7937 = vpow2.f32 %v2507_v45  ;;  %v2292_v13 = vsub.f32 %v8374_v53, %v10792_v46  ;;  %v10800_v4 = vpop.xlane.xlu0 %2088  ;;  %v1346_v26 = vand.u32 2147483647, %v10662_v59  ;;  %v8375_v15 = vld [vmem:[%s14234_s2 + $0x2d0] sm:$0xff] }
 0x149   :  { %7651 = vmatprep.mubr.msk.f32.mxu1 %vm1816_vm0, %v7928_v25  ;;  %14401 = vst [vmem:[#allocation64_spill] sm:$0xff] %v10800_v4  ;;  %v1349_v49 = vand.u32 2147483647, %v10687_v24  ;;  %7939 = vpow2.f32 %v2505_v54  ;;  %v2291_v48 = vsub.f32 %v8375_v15, %v10800_v4  ;;  %v10809_v0 = vpop.f32.mrb[52].mxu0  ;;  %v8376_v45 = vld [vmem:[%s14234_s2 + $0x120] sm:$0xff]  ;;  %v4689_v24 = vsel %vm1816_vm0, %v4491_v22, 0.0 }
 0x14a   :  { %7652 = vmatmul.mubr.msk.f32.gmra.mrb[80].mxu1 %vm1816_vm0, %v7926_v1  ;;  %v7930_v8 = vpop.eup %7929  ;;  %v4492_v6 = vmul.f32 %v8376_v45, %v1596_v40  ;;  %v2511_v59 = vmul.f32 1.442695, %v2292_v13  ;;  %v4686_v54 = vsel %vm1816_vm0, %v4490_v12, 0.0  ;;  %v10816_v16 = vpop.f32.mrb[53].mxu0  ;;  %v8377_v1 = vld [vmem:[%s14234_s2 + $0x138] sm:$0xff]  ;;  %v8378_v15 = vld [vmem:[%s14234_s2 + $0x130] sm:$0xff] }
 0x14b   :  { %v7932_v25 = vpop.eup %7931  ;;  %v4495_v53 = vmul.f32 %v8377_v1, %v1599_v7  ;;  %v4494_v4 = vmul.f32 %v8378_v15, %v1598_v10  ;;  %v1601_v46 = vmax.f32 %v1473_v44, 0.0  ;;  %v2509_v40 = vmul.f32 1.442695, %v2291_v48  ;;  %4690 = vadd.xlane.f32.xlu1 %v4689_v24  ;;  %4687 = vadd.xlane.f32.xlu0 %v4686_v54  ;;  %v10824_v22 = vpop.xlane.xlu1 %2097  ;;  %v8379_v45 = vld [vmem:[%s14234_s2 + $0x2e8] sm:$0xff] }
 0x14c   :  { %14402 = vst [vmem:[#allocation65_spill] sm:$0xff] %v10824_v22  ;;  %v1600_v12 = vmax.f32 %v1472_v17, 0.0  ;;  %v1475_v13 = vsub.f32 1.0, %v1347_v29  ;;  %7941 = vpow2.f32 %v2511_v59  ;;  %v2294_v7 = vsub.f32 %v8379_v45, %v10824_v22  ;;  %7654 = vmatprep.mubr.msk.f32.mxu1 %vm1816_vm0, %v7932_v25  ;;  %v10831_v1 = vpop.xlane.xlu0 %2094  ;;  %v8380_v17 = vld [vmem:[%s14234_s2 + $0x2e0] sm:$0xff]  ;;  %v10839_v48 = vpop.f32.mrb[54].mxu0 }
 0x14d   :  { %14403 = vst [vmem:[#allocation66_spill] sm:$0xff] %v10831_v1  ;;  %v1474_v10 = vsub.f32 1.0, %v1346_v26  ;;  %v1348_v44 = vand.u32 2147483647, %v10691_v62  ;;  %7943 = vpow2.f32 %v2509_v40  ;;  %v2293_v29 = vsub.f32 %v8380_v17, %v10831_v1  ;;  %v10844_v62 = vpop.f32.mrb[55].mxu0  ;;  %v8381_v40 = vld [vmem:[%s14234_s2 + $0x148] sm:$0xff] }
 0x14e   :  { %7655 = vmatmul.mubr.msk.f32.gmra.mrb[82].mxu1 %vm1816_vm0, %v7930_v8  ;;  %v7934_v59 = vpop.eup %7933  ;;  %v1477_v24 = vsub.f32 1.0, %v1349_v49  ;;  %v2515_v54 = vmul.f32 1.442695, %v2294_v7  ;;  %v4695_v25 = vsel %vm1816_vm0, %v10778_v23, 0.0  ;;  %v4692_v26 = vsel %vm1816_vm0, %v4492_v6, 0.0  ;;  %v8382_v23 = vld [vmem:[%s14234_s2 + $0x140] sm:$0xff] }
 0x14f   :  { %v7936_v15 = vpop.eup %7935  ;;  %v4497_v45 = vmul.f32 %v8381_v40, %v1601_v46  ;;  %v1351_v8 = vand.u32 2147483647, %v10716_v41  ;;  %v1350_v17 = vand.u32 2147483647, %v10724_v55  ;;  %v2513_v1 = vmul.f32 1.442695, %v2293_v29  ;;  %4696 = vadd.xlane.f32.xlu1 %v4695_v25  ;;  %4693 = vadd.xlane.f32.xlu0 %v4692_v26  ;;  %v10851_v49 = vpop.xlane.xlu1 %2103 }
 0x150   :  { %14404 = vst [vmem:[#allocation67_spill] sm:$0xff] %v10851_v49  ;;  %v4496_v6 = vmul.f32 %v8382_v23, %v1600_v12  ;;  %v1603_v7 = vmax.f32 %v1475_v13, 0.0  ;;  %7945 = vpow2.f32 %v2515_v54  ;;  %v8383_v46 = vld [vmem:[%s14234_s2 + $0x2f8] sm:$0xff]  ;;  %7657 = vmatprep.mubr.msk.f32.mxu1 %vm1816_vm0, %v7936_v15  ;;  %v10861_v55 = vpop.xlane.xlu0 %2100  ;;  %v1602_v29 = vmax.f32 %v1474_v10, 0.0  ;;  %v8384_v12 = vld [vmem:[%s14234_s2 + $0x2f0] sm:$0xff]  ;;  %v10870_v54 = vpop.f32.mrb[56].mxu0 }
 0x151   :  { %v2296_v41 = vsub.f32 %v8383_v46, %v10851_v49  ;;  %14405 = vst [vmem:[#allocation68_spill] sm:$0xff] %v10861_v55  ;;  %v10863_v25 = vsub.f32 1.0, %v1348_v44  ;;  %7947 = vpow2.f32 %v2513_v1  ;;  %v2295_v13 = vsub.f32 %v8384_v12, %v10861_v55  ;;  %v10874_v44 = vpop.f32.mrb[57].mxu0 }
 0x152   :  { %7658 = vmatmul.mubr.msk.f32.gmra.mrb[84].mxu1 %vm1816_vm0, %v7934_v59  ;;  %v7938_v26 = vpop.eup %7937  ;;  %v1605_v40 = vmax.f32 %v1477_v24, 0.0  ;;  %v4701_v15 = vsel %vm1816_vm0, %v4495_v53, 0.0  ;;  %v4698_v10 = vsel %vm1816_vm0, %v4494_v4, 0.0  ;;  %v1479_v46 = vsub.f32 1.0, %v1351_v8  ;;  %v8385_v24 = vld [vmem:[%s14234_s2 + $0x158] sm:$0xff]  ;;  %v8386_v8 = vld [vmem:[%s14234_s2 + $0x308] sm:$0xff] }
 0x153   :  { %v2519_v23 = vmul.f32 1.442695, %v2296_v41  ;;  %v7940_v1 = vpop.eup %7939  ;;  %v10876_v49 = vsub.f32 1.0, %v1350_v17  ;;  %v1353_v22 = vand.u32 2147483647, %v10750_v38  ;;  %4702 = vadd.xlane.f32.xlu1 %v4701_v15  ;;  %4699 = vadd.xlane.f32.xlu0 %v4698_v10  ;;  %v10879_v59 = vpop.xlane.xlu1 %2109  ;;  %v4499_v53 = vmul.f32 %v8385_v24, %v1603_v7  ;;  %v8387_v41 = vld [vmem:[%s14234_s2 + $0x150] sm:$0xff] }
 0x154   :  { %v2517_v12 = vmul.f32 1.442695, %v2295_v13  ;;  %14406 = vst [vmem:[#allocation69_spill] sm:$0xff] %v10879_v59  ;;  %v1352_v4 = vand.u32 2147483647, %v10754_v5  ;;  %v2298_v17 = vsub.f32 %v8386_v8, %v10879_v59  ;;  %7660 = vmatprep.mubr.msk.f32.mxu1 %vm1816_vm0, %v7940_v1  ;;  %v10890_v38 = vpop.xlane.xlu0 %2106  ;;  %v4498_v13 = vmul.f32 %v8387_v41, %v1602_v29  ;;  %v8388_v5 = vld [vmem:[%s14234_s2 + $0x300] sm:$0xff] }
 0x155   :  { %7949 = vpow2.f32 %v2519_v23  ;;  %14407 = vst [vmem:[#allocation70_spill] sm:$0xff] %v10890_v38  ;;  %v1604_v7 = vmax.f32 %v10863_v25, 0.0  ;;  %v2297_v23 = vsub.f32 %v8388_v5, %v10890_v38  ;;  %v10901_v15 = vpop.f32.mrb[58].mxu0  ;;  %v8389_v1 = vld [vmem:[%s14234_s2 + $0x168] sm:$0xff]  ;;  %v4707_v25 = vsel %vm1816_vm0, %v4497_v45, 0.0  ;;  %v8390_v45 = vld [vmem:[%s14234_s2 + $0x318] sm:$0xff] }
 0x156   :  { %7951 = vpow2.f32 %v2517_v12  ;;  %7661 = vmatmul.mubr.msk.f32.gmra.mrb[86].mxu1 %vm1816_vm0, %v7938_v26  ;;  %v7942_v10 = vpop.eup %7941  ;;  %v4501_v24 = vmul.f32 %v8389_v1, %v1605_v40  ;;  %v2523_v29 = vmul.f32 1.442695, %v2298_v17  ;;  %v4704_v12 = vsel %vm1816_vm0, %v4496_v6, 0.0  ;;  %v10908_v8 = vpop.f32.mrb[59].mxu0  ;;  %v8392_v1 = vld [vmem:[%s14234_s2 + $0x160] sm:$0xff] }
 0x157   :  { %v7944_v41 = vpop.eup %7943  ;;  %v1607_v59 = vmax.f32 %v1479_v46, 0.0  ;;  %v1606_v5 = vmax.f32 %v10876_v49, 0.0  ;;  %v10911_v26 = vsub.f32 1.0, %v1353_v22  ;;  %v2521_v38 = vmul.f32 1.442695, %v2297_v23  ;;  %4708 = vadd.xlane.f32.xlu1 %v4707_v25  ;;  %4705 = vadd.xlane.f32.xlu0 %v4704_v12  ;;  %v10913_v55 = vpop.xlane.xlu1 %2115 }
 0x158   :  { %v1480_v3 = vsub.f32 1.0, %v1352_v4  ;;  %v1355_v40 = vand.u32 2147483647, %v10785_v30  ;;  %7953 = vpow2.f32 %v2523_v29  ;;  %v2300_v6 = vsub.f32 %v8390_v45, %v10913_v55  ;;  %7663 = vmatprep.mubr.msk.f32.mxu1 %vm1816_vm0, %v7944_v41  ;;  %v10921_v49 = vpop.xlane.xlu0 %2112  ;;  %v8391_v30 = vld [vmem:[%s14234_s2 + $0x310] sm:$0xff]  ;;  %v10930_v17 = vpop.f32.mrb[60].mxu0 }
 0x159   :  { %14408 = vst [vmem:[#allocation71_spill] sm:$0xff] %v10921_v49  ;;  %v1354_v22 = vand.u32 2147483647, %v10789_v42  ;;  %v1357_v46 = vand.u32 2147483647, %v10809_v0  ;;  %7955 = vpow2.f32 %v2521_v38  ;;  %v2299_v4 = vsub.f32 %v8391_v30, %v10921_v49  ;;  %v10937_v25 = vpop.f32.mrb[61].mxu0 }
 0x15a   :  { %7664 = vmatmul.mubr.msk.f32.gmra.mrb[88].mxu1 %vm1816_vm0, %v7942_v10  ;;  %v7946_v23 = vpop.eup %7945  ;;  %v4500_v29 = vmul.f32 %v8392_v1, %v1604_v7  ;;  %v2527_v42 = vmul.f32 1.442695, %v2300_v6  ;;  %v4713_v0 = vsel %vm1816_vm0, %v4499_v53, 0.0  ;;  %v4710_v38 = vsel %vm1816_vm0, %v4498_v13, 0.0  ;;  %v8393_v10 = vld [vmem:[%s14234_s2 + $0x178] sm:$0xff]  ;;  %v8394_v45 = vld [vmem:[%s14234_s2 + $0x170] sm:$0xff] }
 0x15b   :  { %v7948_v12 = vpop.eup %7947  ;;  %v4503_v41 = vmul.f32 %v8393_v10, %v1607_v59  ;;  %v4502_v30 = vmul.f32 %v8394_v45, %v1606_v5  ;;  %v1609_v7 = vmax.f32 %v10911_v26, 0.0  ;;  %v2525_v6 = vmul.f32 1.442695, %v2299_v4  ;;  %4714 = vadd.xlane.f32.xlu1 %v4713_v0  ;;  %4711 = vadd.xlane.f32.xlu0 %v4710_v38  ;;  %v10946_v53 = vpop.xlane.xlu1 %2121  ;;  %v8395_v59 = vld [vmem:[%s14234_s2 + $0x328] sm:$0xff] }
 0x15c   :  { %14409 = vst [vmem:[#allocation72_spill] sm:$0xff] %v10946_v53  ;;  %v1608_v13 = vmax.f32 %v1480_v3, 0.0  ;;  %v10948_v1 = vsub.f32 1.0, %v1355_v40  ;;  %7957 = vpow2.f32 %v2527_v42  ;;  %v2302_v10 = vsub.f32 %v8395_v59, %v10946_v53  ;;  %7666 = vmatprep.mubr.msk.f32.mxu1 %vm1816_vm0, %v7948_v12  ;;  %v10955_v5 = vpop.xlane.xlu0 %2118  ;;  %v8396_v3 = vld [vmem:[%s14234_s2 + $0x320] sm:$0xff]  ;;  %v10963_v42 = vpop.f32.mrb[62].mxu0 }
 0x15d   :  { %14410 = vst [vmem:[#allocation73_spill] sm:$0xff] %v10955_v5  ;;  %v1482_v26 = vsub.f32 1.0, %v1354_v22  ;;  %v1356_v4 = vand.u32 2147483647, %v10816_v16  ;;  %7959 = vpow2.f32 %v2525_v6  ;;  %v2301_v40 = vsub.f32 %v8396_v3, %v10955_v5  ;;  %v10969_v16 = vpop.f32.mrb[63].mxu0 }
 0x15e   :  { %7667 = vmatmul.mubr.msk.f32.gmra.mrb[90].mxu1 %vm1816_vm0, %v7946_v23  ;;  %v10965_v38 = vsub.f32 1.0, %v1357_v46  ;;  %v2531_v12 = vmul.f32 1.442695, %v2302_v10  ;;  %v4719_v45 = vsel %vm1816_vm0, %v4501_v24, 0.0  ;;  %v4716_v22 = vsel %vm1816_vm0, %v4500_v29, 0.0  ;;  %v8397_v46 = vld [vmem:[%s14234_s2 + $0x188] sm:$0xff] }
 0x15f   :  { %v7950_v0 = vpop.eup %7949  ;;  %v1359_v59 = vand.u32 2147483647, %v10839_v48  ;;  %v1358_v53 = vand.u32 2147483647, %v10844_v62  ;;  %v2529_v3 = vmul.f32 1.442695, %v2301_v40  ;;  %4720 = vadd.xlane.f32.xlu1 %v4719_v45  ;;  %4717 = vadd.xlane.f32.xlu0 %v4716_v22  ;;  %v10973_v23 = vpop.xlane.xlu1 %2127  ;;  %v4505_v10 = vmul.f32 %v8397_v46, %v1609_v7 }
 0x160   :  { %v7952_v6 = vpop.eup %7951  ;;  %14411 = vst [vmem:[#allocation74_spill] sm:$0xff] %v10973_v23  ;;  %v8398_v24 = vld [vmem:[%s14234_s2 + $0x180] sm:$0xff]  ;;  %7961 = vpow2.f32 %v2531_v12  ;;  %v8399_v48 = vld [vmem:[%s14234_s2 + $0x338] sm:$0xff]  ;;  %v10986_v40 = vpop.xlane.xlu0 %2124  ;;  %v1611_v45 = vmax.f32 %v10948_v1, 0.0  ;;  %v1610_v22 = vmax.f32 %v1482_v26, 0.0  ;;  %v8400_v7 = vld [vmem:[%s14234_s2 + $0x330] sm:$0xff] }
 0x161   :  { %v4504_v29 = vmul.f32 %v8398_v24, %v1608_v13  ;;  %v2304_v62 = vsub.f32 %v8399_v48, %v10973_v23  ;;  %7669 = vmatprep.mubr.msk.f32.mxu1 %vm1816_vm0, %v7952_v6  ;;  %7963 = vpow2.f32 %v2529_v3  ;;  %v2303_v13 = vsub.f32 %v8400_v7, %v10986_v40  ;;  %v10994_v12 = vpop.f32.mrb[64].mxu0 }
 0x162   :  { %7670 = vmatmul.mubr.msk.f32.gmra.mrb[92].mxu1 %vm1816_vm0, %v7950_v0  ;;  %14412 = vst [vmem:[#allocation75_spill] sm:$0xff] %v10994_v12  ;;  %v7954_v46 = vpop.eup %7953  ;;  %v1484_v24 = vsub.f32 1.0, %v1356_v4  ;;  %v4725_v6 = vsel %vm1816_vm0, %v4503_v41, 0.0  ;;  %v4722_v23 = vsel %vm1816_vm0, %v4502_v30, 0.0  ;;  %v10998_v1 = vpop.f32.mrb[65].mxu0  ;;  %v1613_v3 = vmax.f32 %v10965_v38, 0.0 }
 0x163   :  { %v2535_v48 = vmul.f32 1.442695, %v2304_v62  ;;  %14413 = vst [vmem:[#allocation76_spill] sm:$0xff] %v10998_v1  ;;  %v7956_v26 = vpop.eup %7955  ;;  %v1487_v5 = vsub.f32 1.0, %v1359_v59  ;;  %v11001_v49 = vsub.f32 1.0, %v1358_v53  ;;  %4726 = vadd.xlane.f32.xlu1 %v4725_v6  ;;  %4723 = vadd.xlane.f32.xlu0 %v4722_v23  ;;  %v11003_v0 = vpop.xlane.xlu1 %2133  ;;  %v8401_v41 = vld [vmem:[%s14234_s2 + $0x348] sm:$0xff] }
 0x164   :  { %v2533_v7 = vmul.f32 1.442695, %v2303_v13  ;;  %v1361_v4 = vand.u32 2147483647, %v10870_v54  ;;  %v1360_v62 = vand.u32 2147483647, %v10874_v44  ;;  %v2306_v30 = vsub.f32 %v8401_v41, %v11003_v0  ;;  %7672 = vmatprep.mubr.msk.f32.mxu1 %vm1816_vm0, %v7956_v26  ;;  %v11012_v53 = vpop.xlane.xlu0 %2130 }
 0x165   :  { %7965 = vpow2.f32 %v2535_v48  ;;  %v8402_v38 = vld [vmem:[%s14234_s2 + $0x198] sm:$0xff]  ;;  %v8403_v54 = vld [vmem:[%s14234_s2 + $0x190] sm:$0xff]  ;;  %v8404_v23 = vld [vmem:[%s14234_s2 + $0x340] sm:$0xff]  ;;  %v11025_v48 = vpop.f32.mrb[66].mxu0  ;;  %v1612_v26 = vmax.f32 %v1484_v24, 0.0 }
 0x166   :  { %v4507_v59 = vmul.f32 %v8402_v38, %v1611_v45  ;;  %v4506_v44 = vmul.f32 %v8403_v54, %v1610_v22  ;;  %7967 = vpow2.f32 %v2533_v7  ;;  %v2305_v13 = vsub.f32 %v8404_v23, %v11012_v53  ;;  %7673 = vmatmul.mubr.msk.f32.gmra.mrb[94].mxu1 %vm1816_vm0, %v7954_v46  ;;  %14414 = vst [vmem:[#allocation77_spill] sm:$0xff] %v11025_v48  ;;  %v7958_v6 = vpop.eup %7957  ;;  %v11029_v1 = vpop.f32.mrb[67].mxu0  ;;  %v8405_v7 = vld [vmem:[%s14234_s2 + $0x1a8] sm:$0xff] }
 0x167   :  { %v2539_v41 = vmul.f32 1.442695, %v2306_v30  ;;  %v4731_v45 = vsel %vm1816_vm0, %v4505_v10, 0.0  ;;  %v4728_v38 = vsel %vm1816_vm0, %v4504_v29, 0.0  ;;  %14415 = vst [vmem:[#allocation78_spill] sm:$0xff] %v11029_v1  ;;  %v7960_v22 = vpop.eup %7959  ;;  %v4509_v54 = vmul.f32 %v8405_v7, %v1613_v3  ;;  %v11035_v24 = vpop.xlane.xlu1 %2139  ;;  %v8406_v29 = vld [vmem:[%s14234_s2 + $0x358] sm:$0xff] }
 0x168   :  { %v1615_v23 = vmax.f32 %v1487_v5, 0.0  ;;  %v1614_v46 = vmax.f32 %v11001_v49, 0.0  ;;  %v2537_v12 = vmul.f32 1.442695, %v2305_v13  ;;  %4732 = vadd.xlane.f32.xlu1 %v4731_v45  ;;  %4729 = vadd.xlane.f32.xlu0 %v4728_v38  ;;  %v1489_v30 = vsub.f32 1.0, %v1361_v4  ;;  %v11044_v5 = vpop.xlane.xlu0 %2136  ;;  %v8407_v4 = vld [vmem:[%s14234_s2 + $0x350] sm:$0xff] }
 0x169   :  { %v11037_v10 = vsub.f32 1.0, %v1360_v62  ;;  %7969 = vpow2.f32 %v2539_v41  ;;  %v2308_v1 = vsub.f32 %v8406_v29, %v11035_v24  ;;  %7675 = vmatprep.mubr.msk.f32.mxu1 %vm1816_vm0, %v7960_v22  ;;  %v1363_v49 = vand.u32 2147483647, %v10901_v15  ;;  %v11053_v13 = vpop.f32.mrb[68].mxu0  ;;  %v8408_v45 = vld [vmem:[%s14234_s2 + $0x1a0] sm:$0xff] }
 0x16a   :  { %v1362_v3 = vand.u32 2147483647, %v10908_v8  ;;  %7971 = vpow2.f32 %v2537_v12  ;;  %v2307_v62 = vsub.f32 %v8407_v4, %v11044_v5  ;;  %7676 = vmatmul.mubr.msk.f32.gmra.mrb[96].mxu1 %vm1816_vm0, %v7958_v6  ;;  %14416 = vst [vmem:[#allocation79_spill] sm:$0xff] %v11053_v13  ;;  %v7962_v41 = vpop.eup %7961  ;;  %v4508_v38 = vmul.f32 %v8408_v45, %v1612_v26  ;;  %v11060_v22 = vpop.f32.mrb[69].mxu0  ;;  %v8409_v6 = vld [vmem:[%s14234_s2 + $0x1b8] sm:$0xff] }
 0x16b   :  { %v2543_v15 = vmul.f32 1.442695, %v2308_v1  ;;  %v4737_v8 = vsel %vm1816_vm0, %v4507_v59, 0.0  ;;  %v4734_v12 = vsel %vm1816_vm0, %v4506_v44, 0.0  ;;  %14417 = vst [vmem:[#allocation80_spill] sm:$0xff] %v11060_v22  ;;  %v7964_v7 = vpop.eup %7963  ;;  %v4511_v29 = vmul.f32 %v8409_v6, %v1615_v23  ;;  %v11065_v13 = vpop.xlane.xlu1 %2145  ;;  %v8410_v1 = vld [vmem:[%s14234_s2 + $0x1b0] sm:$0xff] }
 0x16c   :  { %v2541_v4 = vmul.f32 1.442695, %v2307_v62  ;;  %4738 = vadd.xlane.f32.xlu1 %v4737_v8  ;;  %4735 = vadd.xlane.f32.xlu0 %v4734_v12  ;;  %v4510_v59 = vmul.f32 %v8410_v1, %v1614_v46  ;;  %v1617_v26 = vmax.f32 %v1489_v30, 0.0  ;;  %v8411_v44 = vld [vmem:[%s14234_s2 + $0x368] sm:$0xff]  ;;  %v11075_v23 = vpop.xlane.xlu0 %2142  ;;  %v1616_v62 = vmax.f32 %v11037_v10, 0.0  ;;  %v8412_v46 = vld [vmem:[%s14234_s2 + $0x360] sm:$0xff] }
 0x16d   :  { %7973 = vpow2.f32 %v2543_v15  ;;  %v2310_v45 = vsub.f32 %v8411_v44, %v11065_v13  ;;  %7678 = vmatprep.mubr.msk.f32.mxu1 %vm1816_vm0, %v7964_v7  ;;  %v1491_v8 = vsub.f32 1.0, %v1363_v49  ;;  %v2309_v30 = vsub.f32 %v8412_v46, %v11075_v23  ;;  %v11083_v15 = vpop.f32.mrb[70].mxu0 }
 0x16e   :  { %7975 = vpow2.f32 %v2541_v4  ;;  %7679 = vmatmul.mubr.msk.f32.gmra.mrb[98].mxu1 %vm1816_vm0, %v7962_v41  ;;  %14418 = vst [vmem:[#allocation81_spill] sm:$0xff] %v11083_v15  ;;  %v1490_v6 = vsub.f32 1.0, %v1362_v3  ;;  %v4743_v7 = vsel %vm1816_vm0, %v4509_v54, 0.0  ;;  %v4740_v44 = vsel %vm1816_vm0, %v4508_v38, 0.0  ;;  %v11087_v10 = vpop.f32.mrb[71].mxu0  ;;  %v8413_v41 = vld [vmem:[%s14234_s2 + $0x1c8] sm:$0xff] }
 0x16f   :  { %v7966_v12 = vpop.eup %7965  ;;  %v2547_v1 = vmul.f32 1.442695, %v2310_v45  ;;  %14419 = vst [vmem:[#allocation82_spill] sm:$0xff] %v11087_v10  ;;  %v1365_v4 = vand.u32 2147483647, %v10930_v17  ;;  %v11090_v46 = vpop.xlane.xlu1 %2151  ;;  %v4513_v3 = vmul.f32 %v8413_v41, %v1617_v26  ;;  %v8414_v54 = vld [vmem:[%s14234_s2 + $0x378] sm:$0xff] }
 0x170   :  { %v7968_v49 = vpop.eup %7967  ;;  %v2545_v22 = vmul.f32 1.442695, %v2309_v30  ;;  %4744 = vadd.xlane.f32.xlu1 %v4743_v7  ;;  %4741 = vadd.xlane.f32.xlu0 %v4740_v44  ;;  %v1364_v45 = vand.u32 2147483647, %v10937_v25  ;;  %v2312_v38 = vsub.f32 %v8414_v54, %v11090_v46  ;;  %v11101_v17 = vpop.xlane.xlu0 %2148  ;;  %v8415_v30 = vld [vmem:[%s14234_s2 + $0x1c0] sm:$0xff]  ;;  %v1619_v44 = vmax.f32 %v1491_v8, 0.0 }
 0x171   :  { %7977 = vpow2.f32 %v2547_v1  ;;  %7681 = vmatprep.mubr.msk.f32.mxu1 %vm1816_vm0, %v7968_v49  ;;  %v4512_v7 = vmul.f32 %v8415_v30, %v1616_v62  ;;  %v8416_v25 = vld [vmem:[%s14234_s2 + $0x370] sm:$0xff]  ;;  %v11111_v1 = vpop.f32.mrb[72].mxu0  ;;  %v1618_v41 = vmax.f32 %v1490_v6, 0.0  ;;  %v4749_v10 = vsel %vm1816_vm0, %v4511_v29, 0.0  ;;  %v8417_v29 = vld [vmem:[%s14234_s2 + $0x388] sm:$0xff] }
 0x172   :  { %7979 = vpow2.f32 %v2545_v22  ;;  %v2311_v26 = vsub.f32 %v8416_v25, %v11101_v17  ;;  %7682 = vmatmul.mubr.msk.f32.gmra.mrb[100].mxu1 %vm1816_vm0, %v7966_v12  ;;  %14420 = vst [vmem:[#allocation83_spill] sm:$0xff] %v11111_v1  ;;  %v2551_v54 = vmul.f32 1.442695, %v2312_v38  ;;  %v4746_v15 = vsel %vm1816_vm0, %v4510_v59, 0.0  ;;  %v11115_v62 = vpop.f32.mrb[73].mxu0  ;;  %v8420_v38 = vld [vmem:[%s14234_s2 + $0x1d0] sm:$0xff] }
 0x173   :  { %v7970_v49 = vpop.eup %7969  ;;  %14421 = vst [vmem:[#allocation84_spill] sm:$0xff] %v11115_v62  ;;  %v1493_v8 = vsub.f32 1.0, %v1365_v4  ;;  %v1367_v30 = vand.u32 2147483647, %v10963_v42  ;;  %v11118_v25 = vpop.xlane.xlu1 %2157  ;;  %v1492_v12 = vsub.f32 1.0, %v1364_v45  ;;  %v8418_v42 = vld [vmem:[%s14234_s2 + $0x1d8] sm:$0xff] }
 0x174   :  { %v7972_v22 = vpop.eup %7971  ;;  %v2549_v48 = vmul.f32 1.442695, %v2311_v26  ;;  %4750 = vadd.xlane.f32.xlu1 %v4749_v10  ;;  %4747 = vadd.xlane.f32.xlu0 %v4746_v15  ;;  %v1366_v1 = vand.u32 2147483647, %v10969_v16  ;;  %7981 = vpow2.f32 %v2551_v54  ;;  %v2314_v59 = vsub.f32 %v8417_v29, %v11118_v25  ;;  %v11126_v6 = vpop.xlane.xlu0 %2154  ;;  %v8419_v16 = vld [vmem:[%s14234_s2 + $0x380] sm:$0xff] }
 0x175   :  { %7684 = vmatprep.mubr.msk.f32.mxu1 %vm1816_vm0, %v7972_v22  ;;  %14422 = vst [vmem:[#allocation85_spill] sm:$0xff] %v11126_v6  ;;  %v4515_v15 = vmul.f32 %v8418_v42, %v1619_v44  ;;  %v2313_v10 = vsub.f32 %v8419_v16, %v11126_v6  ;;  %v11136_v4 = vpop.f32.mrb[74].mxu0  ;;  %v4514_v26 = vmul.f32 %v8420_v38, %v1618_v41  ;;  %v4755_v44 = vsel %vm1816_vm0, %v4513_v3, 0.0  ;;  %v8421_v41 = vld [vmem:[%s14234_s2 + $0x398] sm:$0xff] }
 0x176   :  { %7983 = vpow2.f32 %v2549_v48  ;;  %7685 = vmatmul.mubr.msk.f32.gmra.mrb[102].mxu1 %vm1816_vm0, %v7970_v49  ;;  %14423 = vst [vmem:[#allocation86_spill] sm:$0xff] %v11136_v4  ;;  %v2555_v54 = vmul.f32 1.442695, %v2314_v59  ;;  %v4752_v48 = vsel %vm1816_vm0, %v4512_v7, 0.0  ;;  %v11143_v22 = vpop.f32.mrb[75].mxu0  ;;  %v1621_v42 = vmax.f32 %v1493_v8, 0.0 }
 0x177   :  { %v7974_v45 = vpop.eup %7973  ;;  %14424 = vst [vmem:[#allocation87_spill] sm:$0xff] %v11143_v22  ;;  %v1495_v16 = vsub.f32 1.0, %v1367_v30  ;;  %v2553_v62 = vmul.f32 1.442695, %v2313_v10  ;;  %v11145_v49 = vpop.xlane.xlu1 %2163  ;;  %v1620_v4 = vmax.f32 %v1492_v12, 0.0  ;;  %v1494_v6 = vsub.f32 1.0, %v1366_v1 }
 0x178   :  { %v7976_v29 = vpop.eup %7975  ;;  %4756 = vadd.xlane.f32.xlu1 %v4755_v44  ;;  %4753 = vadd.xlane.f32.xlu0 %v4752_v48  ;;  %7985 = vpow2.f32 %v2555_v54  ;;  %v2316_v3 = vsub.f32 %v8421_v41, %v11145_v49  ;;  %v11152_v7 = vpop.xlane.xlu0 %2160  ;;  %v8422_v8 = vld [vmem:[%s14234_s2 + $0x390] sm:$0xff]  ;;  %v4761_v10 = vsel %vm1816_vm0, %v4515_v15, 0.0  ;;  %v4758_v38 = vsel %vm1816_vm0, %v4514_v26, 0.0  ;;  %v8424_v15 = vld [vmem:[%s14234_s2 + $0x1e0] sm:$0xff] }
 0x179   :  { %7687 = vmatprep.mubr.msk.f32.mxu1 %vm1816_vm0, %v7976_v29  ;;  %7987 = vpow2.f32 %v2553_v62  ;;  %v2315_v30 = vsub.f32 %v8422_v8, %v11152_v7  ;;  %v11159_v1 = vpop.f32.mrb[76].mxu0  ;;  %v8423_v62 = vld [vmem:[%s14234_s2 + $0x1e8] sm:$0xff]  ;;  %v1623_v29 = vmax.f32 %v1495_v16, 0.0  ;;  %v4516_v26 = vmul.f32 %v8424_v15, %v1620_v4 }
 0x17a   :  { %7688 = vmatmul.mubr.msk.f32.gmra.mrb[104].mxu1 %vm1816_vm0, %v7974_v45  ;;  %14425 = vst [vmem:[#allocation88_spill] sm:$0xff] %v11159_v1  ;;  %v2559_v59 = vmul.f32 1.442695, %v2316_v3  ;;  %v11163_v54 = vpop.f32.mrb[77].mxu0  ;;  %v4517_v48 = vmul.f32 %v8423_v62, %v1621_v42  ;;  %v7533_v8 = vpop.f32.mrb[0].mxu1  ;;  %v1622_v3 = vmax.f32 %v1494_v6, 0.0 }
 0x17b   :  { %v7978_v12 = vpop.eup %7977  ;;  %14426 = vst [vmem:[#allocation89_spill] sm:$0xff] %v11163_v54  ;;  %v2557_v41 = vmul.f32 1.442695, %v2315_v30  ;;  %v11168_v45 = vpop.xlane.xlu1 %2169  ;;  %v8425_v1 = vld [vmem:[%s14234_s2 + $0x3a8] sm:$0xff]  ;;  %v8426_v30 = vld [vmem:[%s14234_s2 + $0x3a0] sm:$0xff] }
 0x17c   :  { %v7980_v44 = vpop.eup %7979  ;;  %4762 = vadd.xlane.f32.xlu1 %v4761_v10  ;;  %4759 = vadd.xlane.f32.xlu0 %v4758_v38  ;;  %7989 = vpow2.f32 %v2559_v59  ;;  %v3058_v54 = vpop.f32.mrb[1].mxu1  ;;  %v2318_v42 = vsub.f32 %v8425_v1, %v11168_v45  ;;  %v4767_v15 = vsel %vm1816_vm0, %v4517_v48, 0.0 }
 0x17d   :  { %7690 = vmatprep.mubr.msk.f32.mxu1 %vm1816_vm0, %v7980_v44  ;;  %v11178_v16 = vpop.xlane.xlu0 %2166  ;;  %7991 = vpow2.f32 %v2557_v41  ;;  %v11185_v6 = vpop.f32.mrb[78].mxu0  ;;  %v8427_v44 = vld [vmem:[%s14234_s2 + $0x1f8] sm:$0xff] }
 0x17e   :  { %14427 = vst [vmem:[#allocation90_spill] sm:$0xff] %v11178_v16  ;;  %v2317_v4 = vsub.f32 %v8426_v30, %v11178_v16  ;;  %7691 = vmatmul.mubr.msk.f32.gmra.mrb[106].mxu1 %vm1816_vm0, %v7978_v12  ;;  %14428 = vst [vmem:[#allocation91_spill] sm:$0xff] %v11185_v6  ;;  %v7982_v59 = vpop.eup %7981  ;;  %7993 = vlog2.f32 %v7533_v8  ;;  %v2563_v10 = vmul.f32 1.442695, %v2318_v42  ;;  %v11187_v38 = vpop.f32.mrb[79].mxu0  ;;  %v4519_v62 = vmul.f32 %v8427_v44, %v1623_v29  ;;  %v8428_v12 = vld [vmem:[%s14234_s2 + $0x1f0] sm:$0xff] }
 0x17f   :  { %14429 = vst [vmem:[#allocation92_spill] sm:$0xff] %v11187_v38  ;;  %7995 = vlog2.f32 %v3058_v54  ;;  %v11193_v30 = vpop.xlane.xlu1 %2175  ;;  %v4518_v8 = vmul.f32 %v8428_v12, %v1622_v3  ;;  %v4764_v42 = vsel %vm1816_vm0, %v4516_v26, 0.0  ;;  %v7536_v38 = vpop.f32.mrb[2].mxu1  ;;  %v8429_v54 = vld [vmem:[%s14234_s2 + $0x3b8] sm:$0xff]  ;;  %v8430_v29 = vld [vmem:[%s14234_s2 + $0x3b0] sm:$0xff] }
 0x180   :  { %v7984_v1 = vpop.eup %7983  ;;  %v2561_v41 = vmul.f32 1.442695, %v2317_v4  ;;  %14430 = vst [vmem:[#allocation93_spill] sm:$0xff] %v11193_v30  ;;  %7997 = vpow2.f32 %v2563_v10  ;;  %4768 = vadd.xlane.f32.xlu1 %v4767_v15  ;;  %4765 = vadd.xlane.f32.xlu0 %v4764_v42  ;;  %v2320_v48 = vsub.f32 %v8429_v54, %v11193_v30  ;;  %v3068_v26 = vpop.f32.mrb[3].mxu1  ;;  %v4773_v12 = vsel %vm1816_vm0, %v4519_v62, 0.0 }
 0x181   :  { %7693 = vmatprep.mubr.msk.f32.mxu1 %vm1816_vm0, %v7984_v1  ;;  %v11200_v6 = vpop.xlane.xlu0 %2172  ;;  %v11211_v4 = vpop.f32.mrb[80].mxu0  ;;  %v4770_v54 = vsel %vm1816_vm0, %v4518_v8, 0.0 }
 0x182   :  { %14431 = vst [vmem:[#allocation94_spill] sm:$0xff] %v11200_v6  ;;  %7999 = vpow2.f32 %v2561_v41  ;;  %v2319_v3 = vsub.f32 %v8430_v29, %v11200_v6  ;;  %7694 = vmatmul.mubr.msk.f32.gmra.mrb[108].mxu1 %vm1816_vm0, %v7982_v59  ;;  %14432 = vst [vmem:[#allocation95_spill] sm:$0xff] %v11211_v4  ;;  %v7986_v10 = vpop.eup %7985  ;;  %v11213_v1 = vpop.f32.mrb[81].mxu0  ;;  %v2567_v41 = vmul.f32 1.442695, %v2320_v48  ;;  %v8431_v48 = vld [vmem:[%s14234_s2 + $0x3c8] sm:$0xff] }
 0x183   :  { %14433 = vst [vmem:[#allocation96_spill] sm:$0xff] %v11213_v1  ;;  %v7988_v44 = vpop.eup %7987  ;;  %v11216_v42 = vpop.xlane.xlu1 %2181  ;;  %8001 = vlog2.f32 %v7536_v38  ;;  %v8432_v38 = vld [vmem:[%s14234_s2 + $0x3c0] sm:$0xff] }
 0x184   :  { %v2565_v15 = vmul.f32 1.442695, %v2319_v3  ;;  %14434 = vst [vmem:[#allocation97_spill] sm:$0xff] %v11216_v42  ;;  %4774 = vadd.xlane.f32.xlu1 %v4773_v12  ;;  %v7539_v29 = vpop.f32.mrb[4].mxu1  ;;  %7696 = vmatprep.mubr.msk.f32.mxu1 %vm1816_vm0, %v7988_v44  ;;  %8003 = vpow2.f32 %v2567_v41  ;;  %v2322_v3 = vsub.f32 %v8431_v48, %v11216_v42  ;;  %v11231_v44 = vpop.f32.mrb[82].mxu0 }
 0x185   :  { %v11220_v59 = vpop.xlane.xlu0 %2178  ;;  %4771 = vadd.xlane.f32.xlu0 %v4770_v54  ;;  %v3078_v8 = vpop.f32.mrb[5].mxu1  ;;  %14436 = vst [vmem:[#allocation99_spill] sm:$0xff] %v11231_v44 }
 0x186   :  { %14435 = vst [vmem:[#allocation98_spill] sm:$0xff] %v11220_v59  ;;  %v2321_v62 = vsub.f32 %v8432_v38, %v11220_v59  ;;  %7697 = vmatmul.mubr.msk.f32.gmra.mrb[110].mxu1 %vm1816_vm0, %v7986_v10  ;;  %v7990_v12 = vpop.eup %7989  ;;  %8005 = vpow2.f32 %v2565_v15  ;;  %v11233_v41 = vpop.f32.mrb[83].mxu0  ;;  %v2571_v1 = vmul.f32 1.442695, %v2322_v3  ;;  %v8433_v15 = vld [vmem:[%s14234_s2 + $0x3d8] sm:$0xff] }
 0x187   :  { %14437 = vst [vmem:[#allocation100_spill] sm:$0xff] %v11233_v41  ;;  %v7992_v54 = vpop.eup %7991  ;;  %8007 = vlog2.f32 %v3068_v26  ;;  %v11235_v48 = vpop.xlane.xlu1 %2187 }
 0x188   :  { %v2569_v4 = vmul.f32 1.442695, %v2321_v62  ;;  %14438 = vst [vmem:[#allocation101_spill] sm:$0xff] %v11235_v48  ;;  %v7994_v22 = vpop.eup %7993  ;;  %8009 = vlog2.f32 %v7539_v29  ;;  %v7542_v42 = vpop.f32.mrb[6].mxu1  ;;  %7699 = vmatprep.mubr.msk.f32.mxu1 %vm1816_vm0, %v7992_v54  ;;  %v2324_v41 = vsub.f32 %v8433_v15, %v11235_v48 }
 0x189   :  { %v11238_v38 = vpop.xlane.xlu0 %2184  ;;  %v7996_v10 = vpop.eup %7995  ;;  %8011 = vpow2.f32 %v2571_v1  ;;  %v3694_v44 = vmul.f32 0.6931472, %v7994_v22  ;;  %v8434_v1 = vld [vmem:[%s14234_s2 + $0x3d0] sm:$0xff]  ;;  %v8435_v22 = vld [vmem:[%s14234_s2 + $0x3e8] sm:$0xff] }
 0x18a   :  { %14439 = vst [vmem:[#allocation102_spill] sm:$0xff] %v11238_v38  ;;  %v3088_v26 = vpop.f32.mrb[7].mxu1  ;;  %7700 = vmatmul.mubr.msk.f32.gmra.mrb[112].mxu1 %vm1816_vm0, %v7990_v12  ;;  %v11245_v3 = vpop.f32.mrb[84].mxu0  ;;  %8013 = vpow2.f32 %v2569_v4  ;;  %v2575_v59 = vmul.f32 1.442695, %v2324_v41  ;;  %v2323_v6 = vsub.f32 %v8434_v1, %v11238_v38 }
 0x18b   :  { %14440 = vst [vmem:[#allocation103_spill] sm:$0xff] %v11245_v3  ;;  %v7998_v62 = vpop.eup %7997  ;;  %v11247_v29 = vpop.f32.mrb[85].mxu0  ;;  %8015 = vlog2.f32 %v3078_v8 }
 0x18c   :  { %14441 = vst [vmem:[#allocation104_spill] sm:$0xff] %v11247_v29  ;;  %v8000_v54 = vpop.eup %7999  ;;  %v11253_v15 = vpop.xlane.xlu1 %2193  ;;  %8017 = vlog2.f32 %v7542_v42  ;;  %v2573_v4 = vmul.f32 1.442695, %v2323_v6  ;;  %v3692_v42 = vmul.f32 0.6931472, %v7996_v10 }
 0x18d   :  { %14442 = vst [vmem:[#allocation105_spill] sm:$0xff] %v11253_v15  ;;  %v7545_v12 = vpop.f32.mrb[8].mxu1  ;;  %7702 = vmatprep.mubr.msk.f32.mxu1 %vm1816_vm0, %v8000_v54  ;;  %v11256_v3 = vpop.xlane.xlu0 %2190  ;;  %8019 = vlog2.f32 %v3088_v26  ;;  %v2326_v8 = vsub.f32 %v8435_v22, %v11253_v15  ;;  %v8436_v26 = vld [vmem:[%s14234_s2 + $0x3e0] sm:$0xff]  ;;  %v3946_v22 = vadd.f32 %v3694_v44, %v9408_v9 }
 0x18e   :  { %14443 = vst [vmem:[#allocation106_spill] sm:$0xff] %v11256_v3  ;;  %v3098_v41 = vpop.f32.mrb[9].mxu1  ;;  %7703 = vmatmul.mubr.msk.f32.gmra.mrb[114].mxu1 %vm1816_vm0, %v7998_v62  ;;  %v11263_v1 = vpop.f32.mrb[86].mxu0  ;;  %8021 = vpow2.f32 %v2575_v59  ;;  %v2325_v48 = vsub.f32 %v8436_v26, %v11256_v3 }
 0x18f   :  { %14444 = vst [vmem:[#allocation107_spill] sm:$0xff] %v11263_v1  ;;  %v8002_v29 = vpop.eup %8001  ;;  %v11265_v38 = vpop.f32.mrb[87].mxu0  ;;  %8023 = vpow2.f32 %v2573_v4  ;;  %v2579_v6 = vmul.f32 1.442695, %v2326_v8  ;;  %v4081_v8 = vsel %vm4071_vm7, %v3946_v22, 0.0 }
 0x190   :  { %14445 = vst [vmem:[#allocation108_spill] sm:$0xff] %v11265_v38  ;;  %v8004_v54 = vpop.eup %8003  ;;  %v11272_v15 = vpop.xlane.xlu1 %2199  ;;  %8025 = vlog2.f32 %v7545_v12  ;;  %v2577_v4 = vmul.f32 1.442695, %v2325_v48  ;;  %v3698_v26 = vmul.f32 0.6931472, %v8002_v29  ;;  %4082 = vadd.xlane.f32.xlu1 %v4081_v8  ;;  %v3945_v12 = vadd.f32 %v3692_v42, %v9378_v51  ;;  %v8437_v29 = vld [vmem:[%s14234_s2 + $0x3f8] sm:$0xff] }
 0x191   :  { %14446 = vst [vmem:[#allocation109_spill] sm:$0xff] %v11272_v15  ;;  %v8006_v62 = vpop.eup %8005  ;;  %v7548_v10 = vpop.f32.mrb[10].mxu1  ;;  %8027 = vpow2.f32 %v2579_v6 }
 0x192   :  { %v11274_v59 = vpop.xlane.xlu0 %2196  ;;  %v8008_v38 = vpop.eup %8007  ;;  %7705 = vmatprep.mubr.msk.f32.mxu1 %vm1816_vm0, %v8006_v62  ;;  %8029 = vlog2.f32 %v3098_v41  ;;  %v2328_v41 = vsub.f32 %v8437_v29, %v11272_v15  ;;  %v4078_v8 = vsel %vm4071_vm7, %v3945_v12, 0.0  ;;  %v3948_v15 = vadd.f32 %v3698_v26, %v9430_v28 }
 0x193   :  { %14447 = vst [vmem:[#allocation110_spill] sm:$0xff] %v11274_v59  ;;  %v3108_v1 = vpop.f32.mrb[11].mxu1  ;;  %v8010_v30 = vpop.eup %8009  ;;  %7706 = vmatmul.mubr.msk.f32.gmra.mrb[116].mxu1 %vm1816_vm0, %v8004_v54  ;;  %8031 = vpow2.f32 %v2577_v4  ;;  %v3696_v22 = vmul.f32 0.6931472, %v8008_v38  ;;  %v8438_v54 = vld [vmem:[%s14234_s2 + $0x3f0] sm:$0xff]  ;;  %4079 = vadd.xlane.f32.xlu0 %v4078_v8 }
 0x194   :  { %v11279_v9 = vpop.f32.mrb[88].mxu0  ;;  %v8012_v44 = vpop.eup %8011  ;;  %v2327_v62 = vsub.f32 %v8438_v54, %v11274_v59  ;;  %v2583_v29 = vmul.f32 1.442695, %v2328_v41  ;;  %8033 = vlog2.f32 %v7548_v10 }
 0x195   :  { %14448 = vst [vmem:[#allocation111_spill] sm:$0xff] %v11279_v9  ;;  %v11282_v3 = vpop.xlane.xlu1 %4588  ;;  %v11284_v48 = vpop.f32.mrb[89].mxu0  ;;  %v3702_v9 = vmul.f32 0.6931472, %v8010_v30  ;;  %8035 = vlog2.f32 %v3108_v1  ;;  %v3947_v30 = vadd.f32 %v3696_v22, %v9438_v27 }
 0x196   :  { %14449 = vst [vmem:[#allocation112_spill] sm:$0xff] %v11282_v3  ;;  %14450 = vst [vmem:[#allocation113_spill] sm:$0xff] %v11284_v48  ;;  %v8014_v6 = vpop.eup %8013  ;;  %v7551_v4 = vpop.f32.mrb[12].mxu1  ;;  %v2581_v59 = vmul.f32 1.442695, %v2327_v62  ;;  %8037 = vpow2.f32 %v2583_v29 }
 0x197   :  { %v11294_v51 = vpop.xlane.xlu0 %4585  ;;  %v8016_v42 = vpop.eup %8015  ;;  %7708 = vmatprep.mubr.msk.f32.mxu1 %vm1816_vm0, %v8014_v6  ;;  %v4084_v62 = vsel %vm4071_vm7, %v3947_v30, 0.0  ;;  %v3950_v1 = vadd.f32 %v3702_v9, %v9454_v37 }
 0x198   :  { %14451 = vst [vmem:[#allocation114_spill] sm:$0xff] %v11294_v51  ;;  %v3118_v38 = vpop.f32.mrb[13].mxu1  ;;  %v11298_v3 = vpop.f32.mrb[90].mxu0  ;;  %7709 = vmatmul.mubr.msk.f32.gmra.mrb[118].mxu1 %vm1816_vm0, %v8012_v44  ;;  %v3700_v16 = vmul.f32 0.6931472, %v8016_v42  ;;  %8039 = vpow2.f32 %v2581_v59  ;;  %4085 = vadd.xlane.f32.xlu0 %v4084_v62 }
 0x199   :  { %14452 = vst [vmem:[#allocation115_spill] sm:$0xff] %v11298_v3  ;;  %v8018_v48 = vpop.eup %8017  ;;  %v11302_v54 = vpop.f32.mrb[91].mxu0  ;;  %v4087_v3 = vsel %vm4071_vm7, %v3948_v15, 0.0  ;;  %8041 = vlog2.f32 %v7551_v4  ;;  %v4093_v4 = vsel %vm4071_vm7, %v3950_v1, 0.0 }
 0x19a   :  { %v8020_v51 = vpop.eup %8019  ;;  %v11304_v12 = vpop.xlane.xlu1 %4594  ;;  %4088 = vadd.xlane.f32.xlu1 %v4087_v3  ;;  %v3706_v8 = vmul.f32 0.6931472, %v8018_v48  ;;  %8043 = vlog2.f32 %v3118_v38  ;;  %v3949_v37 = vadd.f32 %v3700_v16, %v9462_v43 }
 0x19b   :  { %14453 = vst [vmem:[#allocation116_spill] sm:$0xff] %v11304_v12  ;;  %v8022_v6 = vpop.eup %8021  ;;  %v7554_v41 = vpop.f32.mrb[14].mxu1  ;;  %v3704_v22 = vmul.f32 0.6931472, %v8020_v51 }
 0x19c   :  { %v11308_v10 = vpop.xlane.xlu0 %4591  ;;  %v8024_v28 = vpop.eup %8023  ;;  %8045 = vlog2.f32 %v7554_v41  ;;  %v3952_v43 = vadd.f32 %v3706_v8, %v9479_v57 }
 0x19d   :  { %14454 = vst [vmem:[#allocation117_spill] sm:$0xff] %v11308_v10  ;;  %v3128_v26 = vpop.f32.mrb[15].mxu1  ;;  %v8026_v44 = vpop.eup %8025  ;;  %7711 = vmatprep.mubr.msk.f32.mxu1 %vm1816_vm0, %v8024_v28  ;;  %v3951_v1 = vadd.f32 %v3704_v22, %v9487_v63 }
 0x19e   :  { %v11313_v42 = vpop.f32.mrb[92].mxu0  ;;  %v8028_v15 = vpop.eup %8027  ;;  %7712 = vmatmul.mubr.msk.f32.gmra.mrb[120].mxu1 %vm1816_vm0, %v8022_v6  ;;  %4094 = vadd.xlane.f32.xlu1 %v4093_v4  ;;  %v4090_v6 = vsel %vm4071_vm7, %v3949_v37, 0.0  ;;  %8047 = vlog2.f32 %v3128_v26  ;;  %v3710_v38 = vmul.f32 0.6931472, %v8026_v44  ;;  %v4099_v37 = vsel %vm4071_vm7, %v3952_v43, 0.0 }
 0x19f   :  { %v11316_v27 = vpop.xlane.xlu1 %4600  ;;  %v11318_v59 = vpop.f32.mrb[93].mxu0  ;;  %4091 = vadd.xlane.f32.xlu0 %v4090_v6 }
 0x1a0   :  { %14455 = vst [vmem:[#allocation118_spill] sm:$0xff] %v11316_v27  ;;  %v8030_v3 = vpop.eup %8029  ;;  %v7557_v9 = vpop.f32.mrb[16].mxu1  ;;  %v3954_v63 = vadd.f32 %v3710_v38, %v9503_v18 }
 0x1a1   :  { %v11322_v29 = vpop.xlane.xlu0 %4597  ;;  %v8032_v30 = vpop.eup %8031  ;;  %v3708_v62 = vmul.f32 0.6931472, %v8030_v3  ;;  %8049 = vlog2.f32 %v7557_v9  ;;  %v4096_v3 = vsel %vm4071_vm7, %v3951_v1, 0.0 }
 0x1a2   :  { %14456 = vst [vmem:[#allocation119_spill] sm:$0xff] %v11322_v29  ;;  %v3138_v48 = vpop.f32.mrb[17].mxu1  ;;  %v11324_v28 = vpop.f32.mrb[94].mxu0  ;;  %7714 = vmatprep.mubr.msk.f32.mxu1 %vm1816_vm0, %v8032_v30  ;;  %4100 = vadd.xlane.f32.xlu1 %v4099_v37 }
 0x1a3   :  { %v11328_v51 = vpop.f32.mrb[95].mxu0  ;;  %7715 = vmatmul.mubr.msk.f32.gmra.mrb[122].mxu1 %vm1816_vm0, %v8028_v15  ;;  %v11332_v16 = vpop.xlane.xlu1 %4606  ;;  %8051 = vlog2.f32 %v3138_v48  ;;  %4097 = vadd.xlane.f32.xlu0 %v4096_v3  ;;  %v3953_v22 = vadd.f32 %v3708_v62, %v9512_v21  ;;  %v4105_v48 = vsel %vm4071_vm7, %v3954_v63, 0.0 }
 0x1a4   :  { %14457 = vst [vmem:[#allocation120_spill] sm:$0xff] %v11332_v16  ;;  %v8034_v41 = vpop.eup %8033  ;;  %v7560_v4 = vpop.f32.mrb[18].mxu1 }
 0x1a5   :  { %v11335_v27 = vpop.xlane.xlu0 %4603  ;;  %v8036_v26 = vpop.eup %8035  ;;  %v3714_v8 = vmul.f32 0.6931472, %v8034_v41  ;;  %v4102_v18 = vsel %vm4071_vm7, %v3953_v22, 0.0  ;;  %8053 = vlog2.f32 %v7560_v4 }
 0x1a6   :  { %14458 = vst [vmem:[#allocation121_spill] sm:$0xff] %v11335_v27  ;;  %v3148_v30 = vpop.f32.mrb[19].mxu1  ;;  %v8038_v44 = vpop.eup %8037  ;;  %v3712_v43 = vmul.f32 0.6931472, %v8036_v26  ;;  %4106 = vadd.xlane.f32.xlu1 %v4105_v48 }
 0x1a7   :  { %v11339_v57 = vpop.f32.mrb[96].mxu0  ;;  %v8040_v15 = vpop.eup %8039  ;;  %4103 = vadd.xlane.f32.xlu0 %v4102_v18  ;;  %8055 = vlog2.f32 %v3148_v30 }
 0x1a8   :  { %v11343_v6 = vpop.xlane.xlu1 %4612  ;;  %v11345_v16 = vpop.f32.mrb[97].mxu0  ;;  %7717 = vmatprep.mubr.msk.f32.mxu1 %vm1816_vm0, %v8040_v15  ;;  %v3956_v15 = vadd.f32 %v3714_v8, %v9528_v34 }
 0x1a9   :  { %14459 = vst [vmem:[#allocation122_spill] sm:$0xff] %v11343_v6  ;;  %v8042_v9 = vpop.eup %8041  ;;  %v7563_v37 = vpop.f32.mrb[20].mxu1  ;;  %7718 = vmatmul.mubr.msk.f32.gmra.mrb[124].mxu1 %vm1816_vm0, %v8038_v44 }
 0x1aa   :  { %v11348_v1 = vpop.xlane.xlu0 %4609  ;;  %v3158_v41 = vpop.f32.mrb[21].mxu1  ;;  %v3718_v62 = vmul.f32 0.6931472, %v8042_v9  ;;  %v4111_v4 = vsel %vm4071_vm7, %v3956_v15, 0.0  ;;  %8057 = vlog2.f32 %v7563_v37 }
 0x1ab   :  { %14460 = vst [vmem:[#allocation123_spill] sm:$0xff] %v11348_v1  ;;  %v8044_v3 = vpop.eup %8043  ;;  %v11353_v21 = vpop.f32.mrb[98].mxu0  ;;  %v3955_v1 = vadd.f32 %v3712_v43, %v9537_v36  ;;  %4112 = vadd.xlane.f32.xlu1 %v4111_v4  ;;  %8059 = vlog2.f32 %v3158_v41 }
 0x1ac   :  { %v8046_v38 = vpop.eup %8045  ;;  %v3716_v26 = vmul.f32 0.6931472, %v8044_v3  ;;  %v11356_v6 = vpop.xlane.xlu1 %4618  ;;  %v3958_v3 = vadd.f32 %v3718_v62, %v9554_v52 }
 0x1ad   :  { %14461 = vst [vmem:[#allocation124_spill] sm:$0xff] %v11356_v6  ;;  %v11358_v63 = vpop.f32.mrb[99].mxu0  ;;  %v8048_v44 = vpop.eup %8047  ;;  %v3722_v29 = vmul.f32 0.6931472, %v8046_v38  ;;  %v4108_v9 = vsel %vm4071_vm7, %v3955_v1, 0.0 }
 0x1ae   :  { %v7566_v48 = vpop.f32.mrb[22].mxu1  ;;  %v11361_v27 = vpop.xlane.xlu0 %4615  ;;  %v3720_v8 = vmul.f32 0.6931472, %v8048_v44  ;;  %4109 = vadd.xlane.f32.xlu0 %v4108_v9  ;;  %v3957_v36 = vadd.f32 %v3716_v26, %v9563_v58  ;;  %v4117_v37 = vsel %vm4071_vm7, %v3958_v3, 0.0 }
 0x1af   :  { %14462 = vst [vmem:[#allocation125_spill] sm:$0xff] %v11361_v27  ;;  %v3168_v22 = vpop.f32.mrb[23].mxu1  ;;  %v11365_v30 = vpop.f32.mrb[100].mxu0  ;;  %8061 = vlog2.f32 %v7566_v48  ;;  %4118 = vadd.xlane.f32.xlu1 %v4117_v37  ;;  %v3960_v62 = vadd.f32 %v3722_v29, %v9580_v14 }
 0x1b0   :  { %v8050_v34 = vpop.eup %8049  ;;  %v11369_v43 = vpop.xlane.xlu1 %4624  ;;  %v4114_v1 = vsel %vm4071_vm7, %v3957_v36, 0.0  ;;  %8063 = vlog2.f32 %v3168_v22  ;;  %v3959_v26 = vadd.f32 %v3720_v8, %v9589_v20 }
 0x1b1   :  { %14463 = vst [vmem:[#allocation126_spill] sm:$0xff] %v11369_v43  ;;  %v11371_v18 = vpop.f32.mrb[101].mxu0  ;;  %v8052_v15 = vpop.eup %8051  ;;  %v3726_v52 = vmul.f32 0.6931472, %v8050_v34  ;;  %v4123_v22 = vsel %vm4071_vm7, %v3960_v62, 0.0 }
 0x1b2   :  { %v7569_v38 = vpop.f32.mrb[24].mxu1  ;;  %v11373_v4 = vpop.xlane.xlu0 %4621  ;;  %v3724_v58 = vmul.f32 0.6931472, %v8052_v15  ;;  %4115 = vadd.xlane.f32.xlu0 %v4114_v1  ;;  %v4120_v37 = vsel %vm4071_vm7, %v3959_v26, 0.0 }
 0x1b3   :  { %14464 = vst [vmem:[#allocation127_spill] sm:$0xff] %v11373_v4  ;;  %v3178_v44 = vpop.f32.mrb[25].mxu1  ;;  %v11377_v41 = vpop.f32.mrb[102].mxu0  ;;  %8065 = vlog2.f32 %v7569_v38  ;;  %4124 = vadd.xlane.f32.xlu1 %v4123_v22  ;;  %v3962_v29 = vadd.f32 %v3726_v52, %v9606_v33 }
 0x1b4   :  { %v11381_v9 = vpop.xlane.xlu1 %4630  ;;  %v11383_v43 = vpop.f32.mrb[103].mxu0  ;;  %8067 = vlog2.f32 %v3178_v44  ;;  %v3961_v8 = vadd.f32 %v3724_v58, %v9615_v35 }
 0x1b5   :  { %14465 = vst [vmem:[#allocation128_spill] sm:$0xff] %v11381_v9  ;;  %v8054_v3 = vpop.eup %8053  ;;  %v7572_v4 = vpop.f32.mrb[26].mxu1  ;;  %v4129_v6 = vsel %vm4071_vm7, %v3962_v29, 0.0 }
 0x1b6   :  { %v11385_v36 = vpop.xlane.xlu0 %4627  ;;  %v8056_v48 = vpop.eup %8055  ;;  %v3730_v20 = vmul.f32 0.6931472, %v8054_v3  ;;  %4121 = vadd.xlane.f32.xlu0 %v4120_v37  ;;  %v4126_v22 = vsel %vm4071_vm7, %v3961_v8, 0.0  ;;  %8069 = vlog2.f32 %v7572_v4 }
 0x1b7   :  { %14466 = vst [vmem:[#allocation129_spill] sm:$0xff] %v11385_v36  ;;  %v3188_v34 = vpop.f32.mrb[27].mxu1  ;;  %v11389_v15 = vpop.f32.mrb[104].mxu0  ;;  %v3728_v62 = vmul.f32 0.6931472, %v8056_v48  ;;  %4130 = vadd.xlane.f32.xlu1 %v4129_v6 }
 0x1b8   :  { %v11391_v14 = vpop.f32.mrb[105].mxu0  ;;  %v11395_v1 = vpop.xlane.xlu1 %4636  ;;  %8071 = vlog2.f32 %v3188_v34  ;;  %v3964_v58 = vadd.f32 %v3730_v20, %v9632_v56 }
 0x1b9   :  { %14467 = vst [vmem:[#allocation130_spill] sm:$0xff] %v11395_v1  ;;  %v8058_v9 = vpop.eup %8057  ;;  %v7575_v36 = vpop.f32.mrb[28].mxu1  ;;  %v3963_v29 = vadd.f32 %v3728_v62, %v9641_v60 }
 0x1ba   :  { %v11397_v26 = vpop.xlane.xlu0 %4633  ;;  %v8060_v38 = vpop.eup %8059  ;;  %v3734_v44 = vmul.f32 0.6931472, %v8058_v9  ;;  %4127 = vadd.xlane.f32.xlu0 %v4126_v22  ;;  %8073 = vlog2.f32 %v7575_v36 }
 0x1bb   :  { %14468 = vst [vmem:[#allocation131_spill] sm:$0xff] %v11397_v26  ;;  %v3198_v3 = vpop.f32.mrb[29].mxu1  ;;  %v11401_v37 = vpop.f32.mrb[106].mxu0  ;;  %v3732_v52 = vmul.f32 0.6931472, %v8060_v38  ;;  %v4135_v26 = vsel %vm4071_vm7, %v3964_v58, 0.0 }
 0x1bc   :  { %v11403_v33 = vpop.f32.mrb[107].mxu0  ;;  %v8062_v35 = vpop.eup %8061  ;;  %4136 = vadd.xlane.f32.xlu1 %v4135_v26  ;;  %v4132_v34 = vsel %vm4071_vm7, %v3963_v29, 0.0  ;;  %8075 = vlog2.f32 %v3198_v3  ;;  %v3966_v60 = vadd.f32 %v3734_v44, %v9658_v11 }
 0x1bd   :  { %v11406_v48 = vpop.xlane.xlu1 %4642  ;;  %v8064_v1 = vpop.eup %8063  ;;  %v3738_v9 = vmul.f32 0.6931472, %v8062_v35  ;;  %v3965_v62 = vadd.f32 %v3732_v52, %v9667_v2 }
 0x1be   :  { %14469 = vst [vmem:[#allocation132_spill] sm:$0xff] %v11406_v48  ;;  %v7578_v8 = vpop.f32.mrb[30].mxu1  ;;  %v11409_v4 = vpop.xlane.xlu0 %4639  ;;  %v3736_v20 = vmul.f32 0.6931472, %v8064_v1  ;;  %4133 = vadd.xlane.f32.xlu0 %v4132_v34  ;;  %v4141_v26 = vsel %vm4071_vm7, %v3966_v60, 0.0 }
 0x1bf   :  { %14470 = vst [vmem:[#allocation133_spill] sm:$0xff] %v11409_v4  ;;  %v3208_v6 = vpop.f32.mrb[31].mxu1  ;;  %v11412_v27 = vpop.f32.mrb[108].mxu0  ;;  %v4138_v35 = vsel %vm4071_vm7, %v3965_v62, 0.0  ;;  %8077 = vlog2.f32 %v7578_v8  ;;  %v3968_v44 = vadd.f32 %v3738_v9, %v9684_v32 }
 0x1c0   :  { %v11415_v38 = vpop.f32.mrb[109].mxu0  ;;  %v8066_v56 = vpop.eup %8065  ;;  %4142 = vadd.xlane.f32.xlu1 %v4141_v26  ;;  %8079 = vlog2.f32 %v3208_v6  ;;  %v3967_v52 = vadd.f32 %v3736_v20, %v9693_v39 }
 0x1c1   :  { %v11419_v22 = vpop.xlane.xlu1 %4648  ;;  %v7581_v36 = vpop.f32.mrb[32].mxu1  ;;  %v3742_v1 = vmul.f32 0.6931472, %v8066_v56  ;;  %v4147_v8 = vsel %vm4071_vm7, %v3968_v44, 0.0 }
 0x1c2   :  { %14471 = vst [vmem:[#allocation134_spill] sm:$0xff] %v11419_v22  ;;  %v11421_v58 = vpop.xlane.xlu0 %4645  ;;  %v8068_v48 = vpop.eup %8067  ;;  %4139 = vadd.xlane.f32.xlu0 %v4138_v35  ;;  %v4144_v22 = vsel %vm4071_vm7, %v3967_v52, 0.0  ;;  %8081 = vlog2.f32 %v7581_v36 }
 0x1c3   :  { %14472 = vst [vmem:[#allocation135_spill] sm:$0xff] %v11421_v58  ;;  %v3218_v29 = vpop.f32.mrb[33].mxu1  ;;  %v11425_v4 = vpop.f32.mrb[110].mxu0  ;;  %v3740_v2 = vmul.f32 0.6931472, %v8068_v48  ;;  %v3970_v32 = vadd.f32 %v3742_v1, %v9710_v50  ;;  %v14477_v1 = vld [vmem:[#allocation4_spill] sm:$0xff] }
 0x1c4   :  { %v11427_v3 = vpop.f32.mrb[111].mxu0  ;;  %v8070_v11 = vpop.eup %8069  ;;  %4148 = vadd.xlane.f32.xlu1 %v4147_v8  ;;  %8083 = vlog2.f32 %v3218_v29  ;;  %v14478_v8 = vld [vmem:[#allocation5_spill] sm:$0xff] }
 0x1c5   :  { %v7584_v34 = vpop.f32.mrb[34].mxu1  ;;  %v11431_v60 = vpop.xlane.xlu1 %4654  ;;  %v3746_v58 = vmul.f32 0.6931472, %v8070_v11  ;;  %v3969_v39 = vadd.f32 %v3740_v2, %v9721_v61  ;;  %v4153_v36 = vsel %vm4071_vm7, %v3970_v32, 0.0 }
 0x1c6   :  { %14473 = vst [vmem:[#allocation136_spill] sm:$0xff] %v11431_v60  ;;  %v8072_v62 = vpop.eup %8071  ;;  %v11435_v56 = vpop.xlane.xlu0 %4651  ;;  %4145 = vadd.xlane.f32.xlu0 %v4144_v22  ;;  %8085 = vlog2.f32 %v7584_v34 }
 0x1c7   :  { %14474 = vst [vmem:[#allocation137_spill] sm:$0xff] %v11435_v56  ;;  %v3228_v26 = vpop.f32.mrb[35].mxu1  ;;  %v8074_v48 = vpop.eup %8073  ;;  %v3744_v6 = vmul.f32 0.6931472, %v8072_v62  ;;  %v4150_v52 = vsel %vm4071_vm7, %v3969_v39, 0.0  ;;  %v3972_v2 = vadd.f32 %v3746_v58, %v14477_v1 }
 0x1c8   :  { %v11439_v9 = vpop.f32.mrb[112].mxu0  ;;  %v7587_v20 = vpop.f32.mrb[36].mxu1  ;;  %v3750_v22 = vmul.f32 0.6931472, %v8074_v48  ;;  %4154 = vadd.xlane.f32.xlu1 %v4153_v36  ;;  %8087 = vlog2.f32 %v3228_v26 }
 0x1c9   :  { %v11441_v35 = vpop.xlane.xlu1 %4660  ;;  %v8076_v44 = vpop.eup %8075  ;;  %8089 = vlog2.f32 %v7587_v20 }
 0x1ca   :  { %14475 = vst [vmem:[#allocation138_spill] sm:$0xff] %v11441_v35  ;;  %v11445_v11 = vpop.xlane.xlu0 %4657  ;;  %v11447_v62 = vpop.f32.mrb[113].mxu0  ;;  %v3748_v61 = vmul.f32 0.6931472, %v8076_v44  ;;  %4151 = vadd.xlane.f32.xlu0 %v4150_v52  ;;  %v3971_v35 = vadd.f32 %v3744_v6, %v14478_v8  ;;  %v14483_v6 = vld [vmem:[#allocation6_spill] sm:$0xff]  ;;  %v14484_v8 = vld [vmem:[#allocation7_spill] sm:$0xff] }
 0x1cb   :  { %14476 = vst [vmem:[#allocation139_spill] sm:$0xff] %v11445_v11  ;;  %v3238_v50 = vpop.f32.mrb[37].mxu1  ;;  %v8078_v29 = vpop.eup %8077  ;;  %v4159_v11 = vsel %vm4071_vm7, %v3972_v2, 0.0  ;;  %v3974_v1 = vadd.f32 %v3750_v22, %v14483_v6  ;;  %v14489_v6 = vld [vmem:[#allocation8_spill] sm:$0xff] }
 0x1cc   :  { %v11451_v60 = vpop.f32.mrb[114].mxu0  ;;  %v7590_v32 = vpop.f32.mrb[38].mxu1  ;;  %v4156_v48 = vsel %vm4071_vm7, %v3971_v35, 0.0  ;;  %v3754_v26 = vmul.f32 0.6931472, %v8078_v29  ;;  %4160 = vadd.xlane.f32.xlu1 %v4159_v11  ;;  %8091 = vlog2.f32 %v3238_v50 }
 0x1cd   :  { %14479 = vst [vmem:[#allocation4_spill] sm:$0xff] %v11451_v60  ;;  %v11453_v39 = vpop.xlane.xlu1 %4666  ;;  %v8080_v34 = vpop.eup %8079  ;;  %8093 = vlog2.f32 %v7590_v32 }
 0x1ce   :  { %14480 = vst [vmem:[#allocation5_spill] sm:$0xff] %v11453_v39  ;;  %v11457_v36 = vpop.xlane.xlu0 %4663  ;;  %v11459_v44 = vpop.f32.mrb[115].mxu0  ;;  %v3752_v52 = vmul.f32 0.6931472, %v8080_v34  ;;  %4157 = vadd.xlane.f32.xlu0 %v4156_v48  ;;  %v3973_v39 = vadd.f32 %v3748_v61, %v14484_v8  ;;  %v3976_v8 = vadd.f32 %v3754_v26, %v14489_v6  ;;  %v14496_v6 = vld [vmem:[#allocation11_spill] sm:$0xff] }
 0x1cf   :  { %14481 = vst [vmem:[#allocation140_spill] sm:$0xff] %v11457_v36  ;;  %14482 = vst [vmem:[#allocation141_spill] sm:$0xff] %v11459_v44  ;;  %v8082_v58 = vpop.eup %8081  ;;  %v3248_v56 = vpop.f32.mrb[39].mxu1  ;;  %v4165_v36 = vsel %vm4071_vm7, %v3974_v1, 0.0 }
 0x1d0   :  { %v11463_v12 = vpop.f32.mrb[116].mxu0  ;;  %v7593_v2 = vpop.f32.mrb[40].mxu1  ;;  %v4162_v29 = vsel %vm4071_vm7, %v3973_v39, 0.0  ;;  %v3758_v50 = vmul.f32 0.6931472, %v8082_v58  ;;  %4166 = vadd.xlane.f32.xlu1 %v4165_v36  ;;  %8095 = vlog2.f32 %v3248_v56 }
 0x1d1   :  { %14485 = vst [vmem:[#allocation6_spill] sm:$0xff] %v11463_v12  ;;  %v11465_v35 = vpop.xlane.xlu1 %4672  ;;  %v8084_v20 = vpop.eup %8083  ;;  %8097 = vlog2.f32 %v7593_v2 }
 0x1d2   :  { %14486 = vst [vmem:[#allocation7_spill] sm:$0xff] %v11465_v35  ;;  %v11469_v11 = vpop.xlane.xlu0 %4669  ;;  %v11471_v34 = vpop.f32.mrb[117].mxu0  ;;  %v3756_v48 = vmul.f32 0.6931472, %v8084_v20  ;;  %4163 = vadd.xlane.f32.xlu0 %v4162_v29  ;;  %v14490_v35 = vld [vmem:[#allocation9_spill] sm:$0xff] }
 0x1d3   :  { %14487 = vst [vmem:[#allocation142_spill] sm:$0xff] %v11469_v11  ;;  %14488 = vst [vmem:[#allocation143_spill] sm:$0xff] %v11471_v34  ;;  %v3258_v22 = vpop.f32.mrb[41].mxu1  ;;  %v8086_v61 = vpop.eup %8085  ;;  %v3975_v10 = vadd.f32 %v3752_v52, %v14490_v35  ;;  %v4171_v11 = vsel %vm4071_vm7, %v3976_v8, 0.0  ;;  %v14495_v52 = vld [vmem:[#allocation10_spill] sm:$0xff] }
 0x1d4   :  { %v11475_v12 = vpop.f32.mrb[118].mxu0  ;;  %v7596_v1 = vpop.f32.mrb[42].mxu1  ;;  %v3762_v56 = vmul.f32 0.6931472, %v8086_v61  ;;  %4172 = vadd.xlane.f32.xlu1 %v4171_v11  ;;  %8099 = vlog2.f32 %v3258_v22  ;;  %v3978_v35 = vadd.f32 %v3758_v50, %v14495_v52  ;;  %v14501_v52 = vld [vmem:[#allocation12_spill] sm:$0xff] }
 0x1d5   :  { %14491 = vst [vmem:[#allocation8_spill] sm:$0xff] %v11475_v12  ;;  %v11477_v39 = vpop.xlane.xlu1 %4678  ;;  %v8088_v32 = vpop.eup %8087  ;;  %v4168_v58 = vsel %vm4071_vm7, %v3975_v10, 0.0  ;;  %8101 = vlog2.f32 %v7596_v1 }
 0x1d6   :  { %14492 = vst [vmem:[#allocation9_spill] sm:$0xff] %v11477_v39  ;;  %v11481_v36 = vpop.xlane.xlu0 %4675  ;;  %v11483_v20 = vpop.f32.mrb[119].mxu0  ;;  %v3760_v29 = vmul.f32 0.6931472, %v8088_v32  ;;  %4169 = vadd.xlane.f32.xlu0 %v4168_v58  ;;  %v3977_v39 = vadd.f32 %v3756_v48, %v14496_v6  ;;  %v3980_v6 = vadd.f32 %v3762_v56, %v14501_v52 }
 0x1d7   :  { %14493 = vst [vmem:[#allocation144_spill] sm:$0xff] %v11481_v36  ;;  %14494 = vst [vmem:[#allocation145_spill] sm:$0xff] %v11483_v20  ;;  %v8090_v26 = vpop.eup %8089  ;;  %v3268_v12 = vpop.f32.mrb[43].mxu1  ;;  %v4177_v36 = vsel %vm4071_vm7, %v3978_v35, 0.0 }
 0x1d8   :  { %v11487_v34 = vpop.f32.mrb[120].mxu0  ;;  %v7599_v8 = vpop.f32.mrb[44].mxu1  ;;  %v4174_v61 = vsel %vm4071_vm7, %v3977_v39, 0.0  ;;  %v3766_v22 = vmul.f32 0.6931472, %v8090_v26  ;;  %4178 = vadd.xlane.f32.xlu1 %v4177_v36  ;;  %8103 = vlog2.f32 %v3268_v12 }
 0x1d9   :  { %14497 = vst [vmem:[#allocation10_spill] sm:$0xff] %v11487_v34  ;;  %v11489_v10 = vpop.xlane.xlu1 %4684  ;;  %v8092_v2 = vpop.eup %8091  ;;  %8105 = vlog2.f32 %v7599_v8 }
 0x1da   :  { %14498 = vst [vmem:[#allocation11_spill] sm:$0xff] %v11489_v10  ;;  %v11493_v11 = vpop.xlane.xlu0 %4681  ;;  %v11495_v32 = vpop.f32.mrb[121].mxu0  ;;  %v3764_v58 = vmul.f32 0.6931472, %v8092_v2  ;;  %4175 = vadd.xlane.f32.xlu0 %v4174_v61  ;;  %v14502_v10 = vld [vmem:[#allocation13_spill] sm:$0xff]  ;;  %v14508_v61 = vld [vmem:[#allocation15_spill] sm:$0xff] }
 0x1db   :  { %14499 = vst [vmem:[#allocation146_spill] sm:$0xff] %v11493_v11  ;;  %14500 = vst [vmem:[#allocation147_spill] sm:$0xff] %v11495_v32  ;;  %v3278_v50 = vpop.f32.mrb[45].mxu1  ;;  %v8094_v48 = vpop.eup %8093  ;;  %v3979_v34 = vadd.f32 %v3760_v29, %v14502_v10  ;;  %v4183_v32 = vsel %vm4071_vm7, %v3980_v6, 0.0  ;;  %v14507_v29 = vld [vmem:[#allocation14_spill] sm:$0xff] }
 0x1dc   :  { %v11499_v20 = vpop.f32.mrb[122].mxu0  ;;  %v7602_v35 = vpop.f32.mrb[46].mxu1  ;;  %v3770_v12 = vmul.f32 0.6931472, %v8094_v48  ;;  %4184 = vadd.xlane.f32.xlu1 %v4183_v32  ;;  %8107 = vlog2.f32 %v3278_v50  ;;  %v3982_v10 = vadd.f32 %v3766_v22, %v14507_v29  ;;  %v3981_v52 = vadd.f32 %v3764_v58, %v14508_v61  ;;  %v14514_v61 = vld [vmem:[#allocation17_spill] sm:$0xff] }
 0x1dd   :  { %14503 = vst [vmem:[#allocation12_spill] sm:$0xff] %v11499_v20  ;;  %v11501_v39 = vpop.xlane.xlu1 %4690  ;;  %v8096_v11 = vpop.eup %8095  ;;  %v4180_v36 = vsel %vm4071_vm7, %v3979_v34, 0.0  ;;  %8109 = vlog2.f32 %v7602_v35 }
 0x1de   :  { %14504 = vst [vmem:[#allocation13_spill] sm:$0xff] %v11501_v39  ;;  %v11505_v1 = vpop.xlane.xlu0 %4687  ;;  %v11507_v26 = vpop.f32.mrb[123].mxu0  ;;  %v3768_v2 = vmul.f32 0.6931472, %v8096_v11  ;;  %4181 = vadd.xlane.f32.xlu0 %v4180_v36  ;;  %v4186_v48 = vsel %vm4071_vm7, %v3981_v52, 0.0  ;;  %v14513_v36 = vld [vmem:[#allocation16_spill] sm:$0xff] }
 0x1df   :  { %14505 = vst [vmem:[#allocation148_spill] sm:$0xff] %v11505_v1  ;;  %14506 = vst [vmem:[#allocation149_spill] sm:$0xff] %v11507_v26  ;;  %v8098_v56 = vpop.eup %8097  ;;  %v3288_v39 = vpop.f32.mrb[47].mxu1  ;;  %v4189_v1 = vsel %vm4071_vm7, %v3982_v10, 0.0  ;;  %v3984_v29 = vadd.f32 %v3770_v12, %v14513_v36 }
 0x1e0   :  { %v11511_v20 = vpop.f32.mrb[124].mxu0  ;;  %v7605_v6 = vpop.f32.mrb[48].mxu1  ;;  %v3774_v50 = vmul.f32 0.6931472, %v8098_v56  ;;  %4190 = vadd.xlane.f32.xlu1 %v4189_v1  ;;  %8111 = vlog2.f32 %v3288_v39 }
 0x1e1   :  { %14509 = vst [vmem:[#allocation14_spill] sm:$0xff] %v11511_v20  ;;  %v11513_v34 = vpop.xlane.xlu1 %4696  ;;  %v8100_v8 = vpop.eup %8099  ;;  %8113 = vlog2.f32 %v7605_v6 }
 0x1e2   :  { %14510 = vst [vmem:[#allocation15_spill] sm:$0xff] %v11513_v34  ;;  %v11517_v32 = vpop.xlane.xlu0 %4693  ;;  %v11519_v11 = vpop.f32.mrb[125].mxu0  ;;  %v3772_v58 = vmul.f32 0.6931472, %v8100_v8  ;;  %4187 = vadd.xlane.f32.xlu0 %v4186_v48  ;;  %v3983_v34 = vadd.f32 %v3768_v2, %v14514_v61  ;;  %v14519_v48 = vld [vmem:[#allocation18_spill] sm:$0xff]  ;;  %v14520_v61 = vld [vmem:[#allocation19_spill] sm:$0xff] }
 0x1e3   :  { %14511 = vst [vmem:[#allocation150_spill] sm:$0xff] %v11517_v32  ;;  %14512 = vst [vmem:[#allocation151_spill] sm:$0xff] %v11519_v11  ;;  %v3298_v22 = vpop.f32.mrb[49].mxu1  ;;  %v11523_v20 = vpop.f32.mrb[126].mxu0  ;;  %v4195_v32 = vsel %vm4071_vm7, %v3984_v29, 0.0  ;;  %v3986_v36 = vadd.f32 %v3774_v50, %v14519_v48  ;;  %v14524_v48 = vld [vmem:[#allocation21_spill] sm:$0xff] }
 0x1e4   :  { %14515 = vst [vmem:[#allocation16_spill] sm:$0xff] %v11523_v20  ;;  %v8102_v10 = vpop.eup %8101  ;;  %v11525_v26 = vpop.f32.mrb[127].mxu0  ;;  %v4192_v1 = vsel %vm4071_vm7, %v3983_v34, 0.0  ;;  %4196 = vadd.xlane.f32.xlu1 %v4195_v32  ;;  %8115 = vlog2.f32 %v3298_v22 }
 0x1e5   :  { %14516 = vst [vmem:[#allocation17_spill] sm:$0xff] %v11525_v26  ;;  %v11527_v35 = vpop.xlane.xlu1 %4702  ;;  %v8104_v52 = vpop.eup %8103  ;;  %v3778_v2 = vmul.f32 0.6931472, %v8102_v10  ;;  %v3985_v26 = vadd.f32 %v3772_v58, %v14520_v61  ;;  %v4201_v34 = vsel %vm4071_vm7, %v3986_v36, 0.0  ;;  %v14523_v58 = vld [vmem:[#allocation20_spill] sm:$0xff] }
 0x1e6   :  { %14517 = vst [vmem:[#allocation152_spill] sm:$0xff] %v11527_v35  ;;  %v7530_v56 = vpop.f32.mrb[128].mxu0  ;;  %v7608_v8 = vpop.f32.mrb[50].mxu1  ;;  %4193 = vadd.xlane.f32.xlu0 %v4192_v1  ;;  %v3776_v11 = vmul.f32 0.6931472, %v8104_v52 }
 0x1e7   :  { %v11531_v39 = vpop.xlane.xlu0 %4699  ;;  %v8106_v12 = vpop.eup %8105  ;;  %v4198_v32 = vsel %vm4071_vm7, %v3985_v26, 0.0  ;;  %8117 = vlog2.f32 %v7530_v56  ;;  %v3988_v52 = vadd.f32 %v3778_v2, %v14523_v58 }
 0x1e8   :  { %14518 = vst [vmem:[#allocation153_spill] sm:$0xff] %v11531_v39  ;;  %v3048_v35 = vpop.f32.mrb[129].mxu0  ;;  %v3308_v20 = vpop.f32.mrb[51].mxu1  ;;  %v3782_v60 = vmul.f32 0.6931472, %v8106_v12  ;;  %4202 = vadd.xlane.f32.xlu1 %v4201_v34  ;;  %8119 = vlog2.f32 %v7608_v8  ;;  %v3987_v61 = vadd.f32 %v3776_v11, %v14524_v48 }
 0x1e9   :  { %v7611_v29 = vpop.f32.mrb[52].mxu1  ;;  %v11535_v44 = vpop.xlane.xlu1 %4708  ;;  %8121 = vlog2.f32 %v3048_v35  ;;  %v4207_v12 = vsel %vm4071_vm7, %v3988_v52, 0.0  ;;  %v14528_v35 = vld [vmem:[#allocation23_spill] sm:$0xff]  ;;  %v14530_v52 = vld [vmem:[#allocation25_spill] sm:$0xff] }
 0x1ea   :  { %14521 = vst [vmem:[#allocation18_spill] sm:$0xff] %v11535_v44  ;;  %v8108_v6 = vpop.eup %8107  ;;  %v3318_v39 = vpop.f32.mrb[53].mxu1  ;;  %4199 = vadd.xlane.f32.xlu0 %v4198_v32  ;;  %8123 = vlog2.f32 %v3308_v20  ;;  %v14526_v32 = vld [vmem:[#allocation22_spill] sm:$0xff] }
 0x1eb   :  { %v11539_v22 = vpop.xlane.xlu0 %4705  ;;  %v8110_v50 = vpop.eup %8109  ;;  %v3780_v10 = vmul.f32 0.6931472, %v8108_v6  ;;  %v4204_v6 = vsel %vm4071_vm7, %v3987_v61, 0.0  ;;  %v3990_v8 = vadd.f32 %v3782_v60, %v14526_v32  ;;  %8125 = vlog2.f32 %v7611_v29  ;;  %v14533_v29 = vld [vmem:[#allocation26_spill] sm:$0xff] }
 0x1ec   :  { %14522 = vst [vmem:[#allocation19_spill] sm:$0xff] %v11539_v22  ;;  %v3786_v1 = vmul.f32 0.6931472, %v8110_v50  ;;  %v7614_v44 = vpop.f32.mrb[54].mxu1  ;;  %v8112_v26 = vpop.eup %8111  ;;  %4208 = vadd.xlane.f32.xlu1 %v4207_v12  ;;  %v14529_v50 = vld [vmem:[#allocation24_spill] sm:$0xff]  ;;  %8127 = vlog2.f32 %v3318_v39 }
 0x1ed   :  { %v11543_v36 = vpop.xlane.xlu1 %4714  ;;  %v3328_v56 = vpop.f32.mrb[55].mxu1  ;;  %v3784_v34 = vmul.f32 0.6931472, %v8112_v26  ;;  %v3989_v11 = vadd.f32 %v3780_v10, %v14528_v35  ;;  %v4213_v20 = vsel %vm4071_vm7, %v3990_v8, 0.0  ;;  %8129 = vlog2.f32 %v7614_v44 }
 0x1ee   :  { %14525 = vst [vmem:[#allocation20_spill] sm:$0xff] %v11543_v36  ;;  %v8114_v2 = vpop.eup %8113  ;;  %4205 = vadd.xlane.f32.xlu0 %v4204_v6  ;;  %v3992_v58 = vadd.f32 %v3786_v1, %v14529_v50  ;;  %v7617_v26 = vpop.f32.mrb[56].mxu1  ;;  %8131 = vlog2.f32 %v3328_v56 }
 0x1ef   :  { %v11548_v22 = vpop.xlane.xlu0 %4711  ;;  %v3790_v48 = vmul.f32 0.6931472, %v8114_v2  ;;  %v3991_v36 = vadd.f32 %v3784_v34, %v14530_v52  ;;  %v8116_v61 = vpop.eup %8115  ;;  %v4210_v60 = vsel %vm4071_vm7, %v3989_v11, 0.0  ;;  %v14534_v2 = vld [vmem:[#allocation27_spill] sm:$0xff]  ;;  %8133 = vlog2.f32 %v7617_v26 }
 0x1f0   :  { %14527 = vst [vmem:[#allocation21_spill] sm:$0xff] %v11548_v22  ;;  %v3338_v32 = vpop.f32.mrb[57].mxu1  ;;  %v3788_v22 = vmul.f32 0.6931472, %v8116_v61  ;;  %4214 = vadd.xlane.f32.xlu1 %v4213_v20  ;;  %v4219_v10 = vsel %vm4071_vm7, %v3992_v58, 0.0 }
 0x1f1   :  { %v11554_v12 = vpop.xlane.xlu1 %4720  ;;  %v3994_v1 = vadd.f32 %v3790_v48, %v14533_v29  ;;  %v8118_v8 = vpop.eup %8117  ;;  %v4216_v34 = vsel %vm4071_vm7, %v3991_v36, 0.0  ;;  %8135 = vlog2.f32 %v3338_v32  ;;  %v14541_v32 = vld [vmem:[#allocation3_spill] sm:$0xff] }
 0x1f2   :  { %14531 = vst [vmem:[#allocation22_spill] sm:$0xff] %v11554_v12  ;;  %4211 = vadd.xlane.f32.xlu0 %v4210_v60  ;;  %v3993_v35 = vadd.f32 %v3788_v22, %v14534_v2  ;;  %v7620_v50 = vpop.f32.mrb[58].mxu1  ;;  %v8120_v11 = vpop.eup %8119  ;;  %v3690_v56 = vmul.f32 0.6931472, %v8118_v8 }
 0x1f3   :  { %v11557_v6 = vpop.xlane.xlu0 %4717  ;;  %v3348_v52 = vpop.f32.mrb[59].mxu1  ;;  %v3794_v61 = vmul.f32 0.6931472, %v8120_v11  ;;  %v4225_v48 = vsel %vm4071_vm7, %v3994_v1, 0.0  ;;  %8137 = vlog2.f32 %v7620_v50 }
 0x1f4   :  { %14532 = vst [vmem:[#allocation23_spill] sm:$0xff] %v11557_v6  ;;  %v8122_v20 = vpop.eup %8121  ;;  %4220 = vadd.xlane.f32.xlu1 %v4219_v10  ;;  %v4222_v36 = vsel %vm4071_vm7, %v3993_v35, 0.0  ;;  %v7623_v29 = vpop.f32.mrb[60].mxu1  ;;  %8139 = vlog2.f32 %v3348_v52 }
 0x1f5   :  { %v11563_v39 = vpop.xlane.xlu1 %4726  ;;  %v8124_v58 = vpop.eup %8123  ;;  %v3996_v22 = vadd.f32 %v3794_v61, %v10164_v19  ;;  %v3688_v10 = vmul.f32 0.6931472, %v8122_v20  ;;  %8141 = vlog2.f32 %v7623_v29 }
 0x1f6   :  { %14535 = vst [vmem:[#allocation24_spill] sm:$0xff] %v11563_v39  ;;  %4217 = vadd.xlane.f32.xlu0 %v4216_v34  ;;  %v3792_v44 = vmul.f32 0.6931472, %v8124_v58  ;;  %v3358_v39 = vpop.f32.mrb[61].mxu1  ;;  %v8126_v11 = vpop.eup %8125  ;;  %v3944_v58 = vadd.f32 %v3690_v56, %v14541_v32 }
 0x1f7   :  { %v11565_v60 = vpop.xlane.xlu0 %4723  ;;  %v8128_v1 = vpop.eup %8127  ;;  %v4231_v26 = vsel %vm4071_vm7, %v3996_v22, 0.0  ;;  %v3798_v8 = vmul.f32 0.6931472, %v8126_v11  ;;  %8143 = vlog2.f32 %v3358_v39 }
 0x1f8   :  { %14536 = vst [vmem:[#allocation25_spill] sm:$0xff] %v11565_v60  ;;  %4226 = vadd.xlane.f32.xlu1 %v4225_v48  ;;  %v14538_v60 = vld [vmem:[#allocation28_spill] sm:$0xff]  ;;  %v7626_v35 = vpop.f32.mrb[62].mxu1  ;;  %v8130_v48 = vpop.eup %8129  ;;  %v4075_v22 = vsel %vm4071_vm7, %v3944_v58, 0.0 }
 0x1f9   :  { %v11570_v2 = vpop.xlane.xlu1 %4732  ;;  %v3995_v12 = vadd.f32 %v3792_v44, %v14538_v60  ;;  %v3368_v20 = vpop.f32.mrb[63].mxu1  ;;  %v14542_v60 = vld [vmem:[#allocation2_spill] sm:$0xff]  ;;  %v3998_v52 = vadd.f32 %v3798_v8, %v10201_v31  ;;  %8145 = vlog2.f32 %v7626_v35 }
 0x1fa   :  { %14537 = vst [vmem:[#allocation26_spill] sm:$0xff] %v11570_v2  ;;  %4223 = vadd.xlane.f32.xlu0 %v4222_v36  ;;  %v3796_v2 = vmul.f32 0.6931472, %v8128_v1  ;;  %v3943_v44 = vadd.f32 %v3688_v10, %v14542_v60  ;;  %8147 = vlog2.f32 %v3368_v20  ;;  %v14547_v31 = vld [vmem:[#allocation30_spill] sm:$0xff] }
 0x1fb   :  { %v11573_v34 = vpop.xlane.xlu0 %4729  ;;  %v4228_v19 = vsel %vm4071_vm7, %v3995_v12, 0.0  ;;  %v3802_v12 = vmul.f32 0.6931472, %v8130_v48  ;;  %v4237_v39 = vsel %vm4071_vm7, %v3998_v52, 0.0 }
 0x1fc   :  { %14539 = vst [vmem:[#allocation27_spill] sm:$0xff] %v11573_v34  ;;  %4232 = vadd.xlane.f32.xlu1 %v4231_v26  ;;  %v8132_v34 = vpop.eup %8131  ;;  %v7629_v50 = vpop.f32.mrb[64].mxu1  ;;  %v4072_v1 = vsel %vm4071_vm7, %v3943_v44, 0.0  ;;  %v14544_v26 = vld [vmem:[#allocation29_spill] sm:$0xff]  ;;  %v14548_v44 = vld [vmem:[#allocation31_spill] sm:$0xff] }
 0x1fd   :  { %v11577_v61 = vpop.xlane.xlu1 %4738  ;;  %v3378_v11 = vpop.f32.mrb[65].mxu1  ;;  %v3800_v32 = vmul.f32 0.6931472, %v8132_v34  ;;  %v3997_v10 = vadd.f32 %v3796_v2, %v14544_v26  ;;  %v4000_v8 = vadd.f32 %v3802_v12, %v14547_v31  ;;  %8149 = vlog2.f32 %v7629_v50 }
 0x1fe   :  { %14540 = vst [vmem:[#allocation28_spill] sm:$0xff] %v11577_v61  ;;  %4229 = vadd.xlane.f32.xlu0 %v4228_v19  ;;  %v8134_v56 = vpop.eup %8133  ;;  %8151 = vlog2.f32 %v3378_v11 }
 0x1ff   :  { %v11581_v36 = vpop.xlane.xlu0 %4735  ;;  %v8136_v19 = vpop.eup %8135  ;;  %v3806_v48 = vmul.f32 0.6931472, %v8134_v56  ;;  %v4234_v2 = vsel %vm4071_vm7, %v3997_v10, 0.0  ;;  %v3999_v26 = vadd.f32 %v3800_v32, %v14548_v44  ;;  %v4243_v52 = vsel %vm4071_vm7, %v4000_v8, 0.0  ;;  %v14553_v8 = vld [vmem:[#allocation34_spill] sm:$0xff] }
 0x200   :  { %14543 = vst [vmem:[#allocation3_spill] sm:$0xff] %v11581_v36  ;;  %4076 = vadd.xlane.f32.xlu1 %v4075_v22  ;;  %v7632_v29 = vpop.f32.mrb[66].mxu1  ;;  %v8138_v22 = vpop.eup %8137  ;;  %v3804_v61 = vmul.f32 0.6931472, %v8136_v19 }
 0x201   :  { %v11587_v60 = vpop.xlane.xlu1 %4744  ;;  %v3388_v34 = vpop.f32.mrb[67].mxu1  ;;  %v3810_v56 = vmul.f32 0.6931472, %v8138_v22  ;;  %v4240_v10 = vsel %vm4071_vm7, %v3999_v26, 0.0  ;;  %8153 = vlog2.f32 %v7632_v29 }
 0x202   :  { %14545 = vst [vmem:[#allocation2_spill] sm:$0xff] %v11587_v60  ;;  %4073 = vadd.xlane.f32.xlu0 %v4072_v1  ;;  %v8140_v60 = vpop.eup %8139  ;;  %v14550_v1 = vld [vmem:[#allocation32_spill] sm:$0xff]  ;;  %8155 = vlog2.f32 %v3388_v34 }
 0x203   :  { %v11590_v58 = vpop.xlane.xlu0 %4741  ;;  %v4002_v12 = vadd.f32 %v3806_v48, %v14550_v1  ;;  %v3808_v19 = vmul.f32 0.6931472, %v8140_v60  ;;  %v4004_v48 = vadd.f32 %v3810_v56, %v14553_v8 }
 0x204   :  { %14546 = vst [vmem:[#allocation29_spill] sm:$0xff] %v11590_v58  ;;  %4238 = vadd.xlane.f32.xlu1 %v4237_v39  ;;  %v7635_v20 = vpop.f32.mrb[68].mxu1  ;;  %v8142_v58 = vpop.eup %8141  ;;  %v14551_v39 = vld [vmem:[#allocation33_spill] sm:$0xff] }
 0x205   :  { %v11595_v35 = vpop.xlane.xlu1 %4750  ;;  %v3398_v31 = vpop.f32.mrb[69].mxu1  ;;  %v4001_v32 = vadd.f32 %v3804_v61, %v14551_v39  ;;  %v3814_v22 = vmul.f32 0.6931472, %v8142_v58  ;;  %v4249_v11 = vsel %vm4071_vm7, %v4002_v12, 0.0  ;;  %v14555_v61 = vld [vmem:[#allocation35_spill] sm:$0xff]  ;;  %8157 = vlog2.f32 %v7635_v20  ;;  %v14557_v12 = vld [vmem:[#allocation36_spill] sm:$0xff] }
 0x206   :  { %4235 = vadd.xlane.f32.xlu0 %v4234_v2  ;;  %14549 = vst [vmem:[#allocation30_spill] sm:$0xff] %v11595_v35  ;;  %v8144_v44 = vpop.eup %8143  ;;  %8159 = vlog2.f32 %v3398_v31  ;;  %v4255_v56 = vsel %vm4071_vm7, %v4004_v48, 0.0  ;;  %v14560_v48 = vld [vmem:[#allocation38_spill] sm:$0xff] }
 0x207   :  { %v11601_v50 = vpop.xlane.xlu0 %4747  ;;  %v8146_v35 = vpop.eup %8145  ;;  %v3812_v60 = vmul.f32 0.6931472, %v8144_v44  ;;  %v4246_v26 = vsel %vm4071_vm7, %v4001_v32, 0.0  ;;  %v4006_v8 = vadd.f32 %v3814_v22, %v14557_v12 }
 0x208   :  { %4244 = vadd.xlane.f32.xlu1 %v4243_v52  ;;  %14552 = vst [vmem:[#allocation31_spill] sm:$0xff] %v11601_v50  ;;  %v7638_v2 = vpop.f32.mrb[70].mxu1  ;;  %v8148_v39 = vpop.eup %8147  ;;  %v3818_v58 = vmul.f32 0.6931472, %v8146_v35 }
 0x209   :  { %v3408_v1 = vpop.f32.mrb[71].mxu1  ;;  %v11606_v52 = vpop.xlane.xlu1 %4756  ;;  %v3816_v50 = vmul.f32 0.6931472, %v8148_v39  ;;  %8161 = vlog2.f32 %v7638_v2  ;;  %v4261_v31 = vsel %vm4071_vm7, %v4006_v8, 0.0  ;;  %v14563_v8 = vld [vmem:[#allocation40_spill] sm:$0xff] }
 0x20a   :  { %4241 = vadd.xlane.f32.xlu0 %v4240_v10  ;;  %14554 = vst [vmem:[#allocation32_spill] sm:$0xff] %v11606_v52  ;;  %v4003_v10 = vadd.f32 %v3808_v19, %v14555_v61  ;;  %v14558_v52 = vld [vmem:[#allocation37_spill] sm:$0xff]  ;;  %8163 = vlog2.f32 %v3408_v1  ;;  %v4008_v22 = vadd.f32 %v3818_v58, %v14560_v48 }
 0x20b   :  { %v11609_v34 = vpop.xlane.xlu0 %4753  ;;  %v4005_v19 = vadd.f32 %v3812_v60, %v14558_v52 }
 0x20c   :  { %4250 = vadd.xlane.f32.xlu1 %v4249_v11  ;;  %v7641_v29 = vpop.f32.mrb[72].mxu1  ;;  %14556 = vst [vmem:[#allocation33_spill] sm:$0xff] %v11609_v34  ;;  %v8150_v11 = vpop.eup %8149  ;;  %v4252_v32 = vsel %vm4071_vm7, %v4003_v10, 0.0  ;;  %v4267_v1 = vsel %vm4071_vm7, %v4008_v22, 0.0  ;;  %v14567_v22 = vld [vmem:[#allocation42_spill] sm:$0xff] }
 0x20d   :  { %v3418_v44 = vpop.f32.mrb[73].mxu1  ;;  %v8152_v61 = vpop.eup %8151  ;;  %v4258_v10 = vsel %vm4071_vm7, %v4005_v19, 0.0  ;;  %8165 = vlog2.f32 %v7641_v29  ;;  %v14565_v19 = vld [vmem:[#allocation41_spill] sm:$0xff] }
 0x20e   :  { %4247 = vadd.xlane.f32.xlu0 %v4246_v26  ;;  %v11615_v20 = vpop.xlane.xlu1 %4762  ;;  %v3822_v26 = vmul.f32 0.6931472, %v8150_v11  ;;  %v8154_v34 = vpop.eup %8153  ;;  %v3820_v39 = vmul.f32 0.6931472, %v8152_v61  ;;  %8167 = vlog2.f32 %v3418_v44 }
 0x20f   :  { %14559 = vst [vmem:[#allocation34_spill] sm:$0xff] %v11615_v20  ;;  %v8156_v52 = vpop.eup %8155  ;;  %v3826_v11 = vmul.f32 0.6931472, %v8154_v34 }
 0x210   :  { %4256 = vadd.xlane.f32.xlu1 %v4255_v56  ;;  %v7644_v35 = vpop.f32.mrb[74].mxu1  ;;  %v14561_v56 = vld [vmem:[#allocation39_spill] sm:$0xff]  ;;  %v4010_v58 = vadd.f32 %v3822_v26, %v14563_v8  ;;  %v8158_v20 = vpop.eup %8157  ;;  %v3824_v61 = vmul.f32 0.6931472, %v8156_v52 }
 0x211   :  { %v3428_v12 = vpop.f32.mrb[75].mxu1  ;;  %v4007_v60 = vadd.f32 %v3816_v50, %v14561_v56  ;;  %v4009_v56 = vadd.f32 %v3820_v39, %v14565_v19  ;;  %8169 = vlog2.f32 %v7644_v35  ;;  %v3830_v34 = vmul.f32 0.6931472, %v8158_v20 }
 0x212   :  { %4253 = vadd.xlane.f32.xlu0 %v4252_v32  ;;  %v11621_v32 = vpop.xlane.xlu0 %4759  ;;  %8171 = vlog2.f32 %v3428_v12  ;;  %v4273_v26 = vsel %vm4071_vm7, %v4010_v58, 0.0 }
 0x213   :  { %14562 = vst [vmem:[#allocation35_spill] sm:$0xff] %v11621_v32  ;;  %v4264_v50 = vsel %vm4071_vm7, %v4007_v60, 0.0  ;;  %v8160_v32 = vpop.eup %8159  ;;  %v4270_v60 = vsel %vm4071_vm7, %v4009_v56, 0.0 }
 0x214   :  { %4262 = vadd.xlane.f32.xlu1 %v4261_v31  ;;  %v7647_v2 = vpop.f32.mrb[76].mxu1  ;;  %v11625_v31 = vpop.xlane.xlu1 %4768 }
 0x215   :  { %v3438_v48 = vpop.f32.mrb[77].mxu1  ;;  %14564 = vst [vmem:[#allocation36_spill] sm:$0xff] %v11625_v31  ;;  %v8162_v8 = vpop.eup %8161  ;;  %v3828_v31 = vmul.f32 0.6931472, %v8160_v32  ;;  %8173 = vlog2.f32 %v7647_v2 }
 0x216   :  { %4259 = vadd.xlane.f32.xlu0 %v4258_v10  ;;  %v11629_v44 = vpop.xlane.xlu0 %4765  ;;  %v4012_v10 = vadd.f32 %v3826_v11, %v14567_v22  ;;  %v8164_v19 = vpop.eup %8163  ;;  %8175 = vlog2.f32 %v3438_v48  ;;  %v4014_v11 = vadd.f32 %v3830_v34, %v10472_v47  ;;  %v14572_v34 = vld [vmem:[#allocation45_spill] sm:$0xff] }
 0x217   :  { %14566 = vst [vmem:[#allocation37_spill] sm:$0xff] %v11629_v44  ;;  %v8166_v22 = vpop.eup %8165  ;;  %v3832_v32 = vmul.f32 0.6931472, %v8164_v19 }
 0x218   :  { %4268 = vadd.xlane.f32.xlu1 %v4267_v1  ;;  %v7650_v29 = vpop.f32.mrb[78].mxu1  ;;  %v14568_v1 = vld [vmem:[#allocation43_spill] sm:$0xff]  ;;  %v11635_v35 = vpop.xlane.xlu1 %4774  ;;  %v4279_v12 = vsel %vm4071_vm7, %v4012_v10, 0.0  ;;  %v4285_v47 = vsel %vm4071_vm7, %v4014_v11, 0.0 }
 0x219   :  { %v3448_v52 = vpop.f32.mrb[79].mxu1  ;;  %v4011_v39 = vadd.f32 %v3824_v61, %v14568_v1  ;;  %14569 = vst [vmem:[#allocation38_spill] sm:$0xff] %v11635_v35  ;;  %v8168_v1 = vpop.eup %8167  ;;  %8177 = vlog2.f32 %v7650_v29  ;;  %v14574_v11 = vld [vmem:[#allocation47_spill] sm:$0xff] }
 0x21a   :  { %4265 = vadd.xlane.f32.xlu0 %v4264_v50  ;;  %v3834_v50 = vmul.f32 0.6931472, %v8162_v8  ;;  %v3838_v8 = vmul.f32 0.6931472, %v8166_v22  ;;  %8179 = vlog2.f32 %v3448_v52  ;;  %v3836_v35 = vmul.f32 0.6931472, %v8168_v1 }
 0x21b   :  { %v4276_v56 = vsel %vm4071_vm7, %v4011_v39, 0.0  ;;  %v14573_v39 = vld [vmem:[#allocation46_spill] sm:$0xff] }
 0x21c   :  { %4274 = vadd.xlane.f32.xlu1 %v4273_v26  ;;  %v14570_v26 = vld [vmem:[#allocation44_spill] sm:$0xff]  ;;  %v4016_v10 = vadd.f32 %v3834_v50, %v14572_v34  ;;  %v4018_v50 = vadd.f32 %v3838_v8, %v14574_v11 }
 0x21d   :  { %v7653_v20 = vpop.f32.mrb[80].mxu1  ;;  %v4013_v61 = vadd.f32 %v3828_v31, %v14570_v26  ;;  %v11643_v2 = vpop.xlane.xlu1 %4082  ;;  %v4015_v26 = vadd.f32 %v3832_v32, %v14573_v39 }
 0x21e   :  { %4271 = vadd.xlane.f32.xlu0 %v4270_v60  ;;  %v3458_v58 = vpop.f32.mrb[81].mxu1  ;;  %v11641_v60 = vpop.xlane.xlu0 %4771  ;;  %8181 = vlog2.f32 %v7653_v20  ;;  %v4291_v52 = vsel %vm4071_vm7, %v4016_v10, 0.0  ;;  %v4297_v8 = vsel %vm4071_vm7, %v4018_v50, 0.0  ;;  %v14577_v10 = vld [vmem:[#allocation49_spill] sm:$0xff]  ;;  %v14581_v50 = vld [vmem:[#allocation51_spill] sm:$0xff] }
 0x21f   :  { %14571 = vst [vmem:[#allocation39_spill] sm:$0xff] %v11641_v60  ;;  %v4282_v31 = vsel %vm4071_vm7, %v4013_v61, 0.0  ;;  %8183 = vlog2.f32 %v3458_v58  ;;  %v4288_v32 = vsel %vm4071_vm7, %v4015_v26, 0.0  ;;  %v14576_v61 = vld [vmem:[#allocation48_spill] sm:$0xff]  ;;  %v14579_v26 = vld [vmem:[#allocation50_spill] sm:$0xff] }
 0x220   :  { %4280 = vadd.xlane.f32.xlu1 %v4279_v12  ;;  %v8170_v12 = vpop.eup %8169  ;;  %v4017_v39 = vadd.f32 %v3836_v35, %v14576_v61 }
 0x221   :  { %v7656_v48 = vpop.f32.mrb[82].mxu1  ;;  %v8172_v60 = vpop.eup %8171  ;;  %v3842_v22 = vmul.f32 0.6931472, %v8170_v12 }
 0x222   :  { %4277 = vadd.xlane.f32.xlu0 %v4276_v56  ;;  %v3468_v19 = vpop.f32.mrb[83].mxu1  ;;  %v11649_v56 = vpop.xlane.xlu0 %4079  ;;  %v3840_v1 = vmul.f32 0.6931472, %v8172_v60  ;;  %8185 = vlog2.f32 %v7656_v48  ;;  %v4294_v35 = vsel %vm4071_vm7, %v4017_v39, 0.0 }
 0x223   :  { %v8174_v44 = vpop.eup %8173  ;;  %8187 = vlog2.f32 %v3468_v19 }
 0x224   :  { %4286 = vadd.xlane.f32.xlu1 %v4285_v47  ;;  %v8176_v36 = vpop.eup %8175  ;;  %v3846_v12 = vmul.f32 0.6931472, %v8174_v44 }
 0x225   :  { %v7659_v29 = vpop.f32.mrb[84].mxu1  ;;  %v3844_v11 = vmul.f32 0.6931472, %v8176_v36 }
 0x226   :  { %4283 = vadd.xlane.f32.xlu0 %v4282_v31  ;;  %v3478_v34 = vpop.f32.mrb[85].mxu1  ;;  %v11657_v20 = vpop.xlane.xlu0 %4085  ;;  %v4020_v31 = vadd.f32 %v3842_v22, %v14577_v10  ;;  %8189 = vlog2.f32 %v7659_v29  ;;  %v4022_v10 = vadd.f32 %v3846_v12, %v14581_v50 }
 0x227   :  { %v11653_v47 = vpop.xlane.xlu1 %4088  ;;  %8191 = vlog2.f32 %v3478_v34 }
 0x228   :  { %4292 = vadd.xlane.f32.xlu1 %v4291_v52  ;;  %14575 = vst [vmem:[#allocation40_spill] sm:$0xff] %v11653_v47  ;;  %v8178_v52 = vpop.eup %8177  ;;  %v4303_v22 = vsel %vm4071_vm7, %v4020_v31, 0.0  ;;  %v4309_v12 = vsel %vm4071_vm7, %v4022_v10, 0.0  ;;  %v14585_v31 = vld [vmem:[#allocation53_spill] sm:$0xff]  ;;  %v14589_v10 = vld [vmem:[#allocation55_spill] sm:$0xff] }
 0x229   :  { %v7662_v58 = vpop.f32.mrb[86].mxu1  ;;  %v8180_v61 = vpop.eup %8179  ;;  %v3850_v19 = vmul.f32 0.6931472, %v8178_v52 }
 0x22a   :  { %4289 = vadd.xlane.f32.xlu0 %v4288_v32  ;;  %v3488_v60 = vpop.f32.mrb[87].mxu1  ;;  %v4019_v32 = vadd.f32 %v3840_v1, %v14579_v26  ;;  %v3848_v47 = vmul.f32 0.6931472, %v8180_v61  ;;  %8193 = vlog2.f32 %v7662_v58 }
 0x22b   :  { %v11661_v6 = vpop.xlane.xlu1 %4094  ;;  %8195 = vlog2.f32 %v3488_v60  ;;  %v4024_v50 = vadd.f32 %v3850_v19, %v14585_v31 }
 0x22c   :  { %4298 = vadd.xlane.f32.xlu1 %v4297_v8  ;;  %14578 = vst [vmem:[#allocation41_spill] sm:$0xff] %v11661_v6  ;;  %v11665_v48 = vpop.xlane.xlu0 %4091  ;;  %v8182_v8 = vpop.eup %8181  ;;  %v4300_v39 = vsel %vm4071_vm7, %v4019_v32, 0.0  ;;  %v14582_v6 = vld [vmem:[#allocation52_spill] sm:$0xff] }
 0x22d   :  { %14580 = vst [vmem:[#allocation42_spill] sm:$0xff] %v11665_v48  ;;  %v7665_v44 = vpop.f32.mrb[88].mxu1  ;;  %v4021_v1 = vadd.f32 %v3844_v11, %v14582_v6  ;;  %v8184_v26 = vpop.eup %8183  ;;  %v3854_v52 = vmul.f32 0.6931472, %v8182_v8  ;;  %v14586_v11 = vld [vmem:[#allocation54_spill] sm:$0xff]  ;;  %v4315_v19 = vsel %vm4071_vm7, %v4024_v50, 0.0 }
 0x22e   :  { %4295 = vadd.xlane.f32.xlu0 %v4294_v35  ;;  %v3498_v36 = vpop.f32.mrb[89].mxu1  ;;  %v3852_v48 = vmul.f32 0.6931472, %v8184_v26  ;;  %v4023_v32 = vadd.f32 %v3848_v47, %v14586_v11  ;;  %8197 = vlog2.f32 %v7665_v44  ;;  %v14593_v50 = vld [vmem:[#allocation57_spill] sm:$0xff] }
 0x22f   :  { %v11671_v35 = vpop.xlane.xlu1 %4100  ;;  %v4306_v6 = vsel %vm4071_vm7, %v4021_v1, 0.0  ;;  %8199 = vlog2.f32 %v3498_v36  ;;  %v4026_v31 = vadd.f32 %v3854_v52, %v14589_v10  ;;  %v14590_v1 = vld [vmem:[#allocation56_spill] sm:$0xff] }
 0x230   :  { %4304 = vadd.xlane.f32.xlu1 %v4303_v22  ;;  %14583 = vst [vmem:[#allocation43_spill] sm:$0xff] %v11671_v35  ;;  %v11673_v29 = vpop.xlane.xlu0 %4097  ;;  %v8186_v22 = vpop.eup %8185  ;;  %v4312_v47 = vsel %vm4071_vm7, %v4023_v32, 0.0  ;;  %v4025_v11 = vadd.f32 %v3852_v48, %v14590_v1  ;;  %v14594_v32 = vld [vmem:[#allocation58_spill] sm:$0xff] }
 0x231   :  { %14584 = vst [vmem:[#allocation44_spill] sm:$0xff] %v11673_v29  ;;  %v7668_v34 = vpop.f32.mrb[90].mxu1  ;;  %v8188_v35 = vpop.eup %8187  ;;  %v3858_v8 = vmul.f32 0.6931472, %v8186_v22  ;;  %v4321_v52 = vsel %vm4071_vm7, %v4026_v31, 0.0  ;;  %v14597_v31 = vld [vmem:[#allocation59_spill] sm:$0xff] }
 0x232   :  { %4301 = vadd.xlane.f32.xlu0 %v4300_v39  ;;  %v3508_v61 = vpop.f32.mrb[91].mxu1  ;;  %v3856_v29 = vmul.f32 0.6931472, %v8188_v35  ;;  %8201 = vlog2.f32 %v7668_v34  ;;  %v4318_v48 = vsel %vm4071_vm7, %v4025_v11, 0.0  ;;  %v14598_v11 = vld [vmem:[#allocation60_spill] sm:$0xff] }
 0x233   :  { %v11679_v39 = vpop.xlane.xlu1 %4106  ;;  %8203 = vlog2.f32 %v3508_v61  ;;  %v4028_v10 = vadd.f32 %v3858_v8, %v14593_v50 }
 0x234   :  { %4310 = vadd.xlane.f32.xlu1 %v4309_v12  ;;  %14587 = vst [vmem:[#allocation45_spill] sm:$0xff] %v11679_v39  ;;  %v11681_v58 = vpop.xlane.xlu0 %4103  ;;  %v8190_v12 = vpop.eup %8189  ;;  %v4027_v1 = vadd.f32 %v3856_v29, %v14594_v32 }
 0x235   :  { %14588 = vst [vmem:[#allocation46_spill] sm:$0xff] %v11681_v58  ;;  %v7671_v60 = vpop.f32.mrb[92].mxu1  ;;  %v8192_v39 = vpop.eup %8191  ;;  %v3862_v22 = vmul.f32 0.6931472, %v8190_v12  ;;  %v4327_v8 = vsel %vm4071_vm7, %v4028_v10, 0.0  ;;  %v14601_v10 = vld [vmem:[#allocation61_spill] sm:$0xff] }
 0x236   :  { %4307 = vadd.xlane.f32.xlu0 %v4306_v6  ;;  %v3518_v26 = vpop.f32.mrb[93].mxu1  ;;  %v3860_v58 = vmul.f32 0.6931472, %v8192_v39  ;;  %8205 = vlog2.f32 %v7671_v60  ;;  %v4324_v29 = vsel %vm4071_vm7, %v4027_v1, 0.0  ;;  %v14602_v1 = vld [vmem:[#allocation62_spill] sm:$0xff] }
 0x237   :  { %8207 = vlog2.f32 %v3518_v26  ;;  %v4030_v50 = vadd.f32 %v3862_v22, %v14597_v31 }
 0x238   :  { %4316 = vadd.xlane.f32.xlu1 %v4315_v19  ;;  %v11687_v6 = vpop.xlane.xlu1 %4112  ;;  %v8194_v19 = vpop.eup %8193  ;;  %v4029_v32 = vadd.f32 %v3860_v58, %v14598_v11 }
 0x239   :  { %14591 = vst [vmem:[#allocation47_spill] sm:$0xff] %v11687_v6  ;;  %v7674_v36 = vpop.f32.mrb[94].mxu1  ;;  %v8196_v6 = vpop.eup %8195  ;;  %v3866_v12 = vmul.f32 0.6931472, %v8194_v19  ;;  %v4333_v22 = vsel %vm4071_vm7, %v4030_v50, 0.0  ;;  %v14605_v50 = vld [vmem:[#allocation63_spill] sm:$0xff] }
 0x23a   :  { %4313 = vadd.xlane.f32.xlu0 %v4312_v47  ;;  %v3528_v35 = vpop.f32.mrb[95].mxu1  ;;  %8209 = vlog2.f32 %v7674_v36  ;;  %v4330_v58 = vsel %vm4071_vm7, %v4029_v32, 0.0  ;;  %v14606_v32 = vld [vmem:[#allocation64_spill] sm:$0xff] }
 0x23b   :  { %v11689_v44 = vpop.xlane.xlu0 %4109  ;;  %8211 = vlog2.f32 %v3528_v35  ;;  %v4032_v31 = vadd.f32 %v3866_v12, %v14601_v10 }
 0x23c   :  { %14592 = vst [vmem:[#allocation48_spill] sm:$0xff] %v11689_v44  ;;  %4322 = vadd.xlane.f32.xlu1 %v4321_v52  ;;  %v11695_v47 = vpop.xlane.xlu1 %4118  ;;  %v8198_v52 = vpop.eup %8197  ;;  %v3864_v44 = vmul.f32 0.6931472, %v8196_v6 }
 0x23d   :  { %14595 = vst [vmem:[#allocation49_spill] sm:$0xff] %v11695_v47  ;;  %v7677_v61 = vpop.f32.mrb[96].mxu1  ;;  %v8200_v47 = vpop.eup %8199  ;;  %v3870_v19 = vmul.f32 0.6931472, %v8198_v52  ;;  %v4339_v12 = vsel %vm4071_vm7, %v4032_v31, 0.0  ;;  %v14609_v31 = vld [vmem:[#allocation65_spill] sm:$0xff] }
 0x23e   :  { %4319 = vadd.xlane.f32.xlu0 %v4318_v48  ;;  %v3538_v39 = vpop.f32.mrb[97].mxu1  ;;  %v4031_v11 = vadd.f32 %v3864_v44, %v14602_v1  ;;  %8213 = vlog2.f32 %v7677_v61 }
 0x23f   :  { %v11697_v34 = vpop.xlane.xlu0 %4115  ;;  %8215 = vlog2.f32 %v3538_v39  ;;  %v4034_v10 = vadd.f32 %v3870_v19, %v14605_v50 }
 0x240   :  { %14596 = vst [vmem:[#allocation50_spill] sm:$0xff] %v11697_v34  ;;  %4328 = vadd.xlane.f32.xlu1 %v4327_v8  ;;  %v11703_v48 = vpop.xlane.xlu1 %4124  ;;  %v8202_v8 = vpop.eup %8201  ;;  %v3868_v34 = vmul.f32 0.6931472, %v8200_v47  ;;  %v4336_v44 = vsel %vm4071_vm7, %v4031_v11, 0.0  ;;  %v14610_v11 = vld [vmem:[#allocation66_spill] sm:$0xff] }
 0x241   :  { %14599 = vst [vmem:[#allocation51_spill] sm:$0xff] %v11703_v48  ;;  %v7680_v26 = vpop.f32.mrb[98].mxu1  ;;  %v8204_v48 = vpop.eup %8203  ;;  %v3874_v52 = vmul.f32 0.6931472, %v8202_v8  ;;  %v4345_v19 = vsel %vm4071_vm7, %v4034_v10, 0.0  ;;  %v14613_v10 = vld [vmem:[#allocation67_spill] sm:$0xff] }
 0x242   :  { %4325 = vadd.xlane.f32.xlu0 %v4324_v29  ;;  %v3548_v6 = vpop.f32.mrb[99].mxu1  ;;  %v4033_v1 = vadd.f32 %v3868_v34, %v14606_v32  ;;  %8217 = vlog2.f32 %v7680_v26 }
 0x243   :  { %v11705_v60 = vpop.xlane.xlu0 %4121  ;;  %8219 = vlog2.f32 %v3548_v6  ;;  %v4036_v50 = vadd.f32 %v3874_v52, %v14609_v31 }
 0x244   :  { %14600 = vst [vmem:[#allocation52_spill] sm:$0xff] %v11705_v60  ;;  %4334 = vadd.xlane.f32.xlu1 %v4333_v22  ;;  %v11711_v29 = vpop.xlane.xlu1 %4130  ;;  %v8206_v22 = vpop.eup %8205  ;;  %v3872_v60 = vmul.f32 0.6931472, %v8204_v48  ;;  %v4342_v34 = vsel %vm4071_vm7, %v4033_v1, 0.0  ;;  %v14614_v1 = vld [vmem:[#allocation68_spill] sm:$0xff] }
 0x245   :  { %14603 = vst [vmem:[#allocation53_spill] sm:$0xff] %v11711_v29  ;;  %v7683_v35 = vpop.f32.mrb[100].mxu1  ;;  %v8208_v29 = vpop.eup %8207  ;;  %v3878_v8 = vmul.f32 0.6931472, %v8206_v22  ;;  %v4351_v52 = vsel %vm4071_vm7, %v4036_v50, 0.0  ;;  %v14616_v50 = vld [vmem:[#allocation69_spill] sm:$0xff] }
 0x246   :  { %4331 = vadd.xlane.f32.xlu0 %v4330_v58  ;;  %v3558_v47 = vpop.f32.mrb[101].mxu1  ;;  %v4035_v32 = vadd.f32 %v3872_v60, %v14610_v11  ;;  %8221 = vlog2.f32 %v7683_v35 }
 0x247   :  { %v11713_v36 = vpop.xlane.xlu0 %4127  ;;  %8223 = vlog2.f32 %v3558_v47  ;;  %v4038_v31 = vadd.f32 %v3878_v8, %v14613_v10 }
 0x248   :  { %14604 = vst [vmem:[#allocation54_spill] sm:$0xff] %v11713_v36  ;;  %4340 = vadd.xlane.f32.xlu1 %v4339_v12  ;;  %v8210_v12 = vpop.eup %8209  ;;  %v3876_v36 = vmul.f32 0.6931472, %v8208_v29  ;;  %v4348_v60 = vsel %vm4071_vm7, %v4035_v32, 0.0  ;;  %v14617_v32 = vld [vmem:[#allocation70_spill] sm:$0xff] }
 0x249   :  { %v11719_v58 = vpop.xlane.xlu1 %4136  ;;  %v7686_v39 = vpop.f32.mrb[102].mxu1  ;;  %v3882_v22 = vmul.f32 0.6931472, %v8210_v12  ;;  %v4357_v8 = vsel %vm4071_vm7, %v4038_v31, 0.0 }
 0x24a   :  { %14607 = vst [vmem:[#allocation55_spill] sm:$0xff] %v11719_v58  ;;  %4337 = vadd.xlane.f32.xlu0 %v4336_v44  ;;  %v3568_v48 = vpop.f32.mrb[103].mxu1  ;;  %v8212_v58 = vpop.eup %8211  ;;  %v4037_v11 = vadd.f32 %v3876_v36, %v14614_v1  ;;  %8225 = vlog2.f32 %v7686_v39 }
 0x24b   :  { %v11721_v61 = vpop.xlane.xlu0 %4133  ;;  %8227 = vlog2.f32 %v3568_v48  ;;  %v4040_v10 = vadd.f32 %v3882_v22, %v14616_v50 }
 0x24c   :  { %14608 = vst [vmem:[#allocation56_spill] sm:$0xff] %v11721_v61  ;;  %4346 = vadd.xlane.f32.xlu1 %v4345_v19  ;;  %v8214_v19 = vpop.eup %8213  ;;  %v3880_v61 = vmul.f32 0.6931472, %v8212_v58  ;;  %v4354_v36 = vsel %vm4071_vm7, %v4037_v11, 0.0  ;;  %v14620_v11 = vld [vmem:[#allocation71_spill] sm:$0xff] }
 0x24d   :  { %v11727_v44 = vpop.xlane.xlu1 %4142  ;;  %v7689_v6 = vpop.f32.mrb[104].mxu1  ;;  %v3886_v12 = vmul.f32 0.6931472, %v8214_v19  ;;  %v4363_v22 = vsel %vm4071_vm7, %v4040_v10, 0.0 }
 0x24e   :  { %14611 = vst [vmem:[#allocation57_spill] sm:$0xff] %v11727_v44  ;;  %4343 = vadd.xlane.f32.xlu0 %v4342_v34  ;;  %v3578_v29 = vpop.f32.mrb[105].mxu1  ;;  %v8216_v44 = vpop.eup %8215  ;;  %v4039_v1 = vadd.f32 %v3880_v61, %v14617_v32  ;;  %8229 = vlog2.f32 %v7689_v6 }
 0x24f   :  { %v11729_v26 = vpop.xlane.xlu0 %4139  ;;  %8231 = vlog2.f32 %v3578_v29  ;;  %v4042_v31 = vadd.f32 %v3886_v12, %v10913_v55  ;;  %v14623_v12 = vld [vmem:[#allocation72_spill] sm:$0xff] }
 0x250   :  { %14612 = vst [vmem:[#allocation58_spill] sm:$0xff] %v11729_v26  ;;  %4352 = vadd.xlane.f32.xlu1 %v4351_v52  ;;  %v8218_v52 = vpop.eup %8217  ;;  %v3884_v26 = vmul.f32 0.6931472, %v8216_v44  ;;  %v4360_v61 = vsel %vm4071_vm7, %v4039_v1, 0.0  ;;  %v14624_v1 = vld [vmem:[#allocation73_spill] sm:$0xff] }
 0x251   :  { %v11735_v34 = vpop.xlane.xlu1 %4148  ;;  %v7692_v47 = vpop.f32.mrb[106].mxu1  ;;  %v3890_v19 = vmul.f32 0.6931472, %v8218_v52  ;;  %v4369_v55 = vsel %vm4071_vm7, %v4042_v31, 0.0  ;;  %v14625_v31 = vld [vmem:[#allocation74_spill] sm:$0xff] }
 0x252   :  { %14615 = vst [vmem:[#allocation59_spill] sm:$0xff] %v11735_v34  ;;  %4349 = vadd.xlane.f32.xlu0 %v4348_v60  ;;  %v3588_v58 = vpop.f32.mrb[107].mxu1  ;;  %v8220_v34 = vpop.eup %8219  ;;  %v4041_v32 = vadd.f32 %v3884_v26, %v14620_v11  ;;  %8233 = vlog2.f32 %v7692_v47 }
 0x253   :  { %v11737_v35 = vpop.xlane.xlu0 %4145  ;;  %v3888_v50 = vmul.f32 0.6931472, %v8220_v34  ;;  %8235 = vlog2.f32 %v3588_v58  ;;  %v4044_v10 = vadd.f32 %v3890_v19, %v14623_v12 }
 0x254   :  { %4358 = vadd.xlane.f32.xlu1 %v4357_v8  ;;  %v8222_v8 = vpop.eup %8221  ;;  %v4366_v26 = vsel %vm4071_vm7, %v4041_v32, 0.0 }
 0x255   :  { %v11743_v60 = vpop.xlane.xlu1 %4154  ;;  %v7695_v48 = vpop.f32.mrb[108].mxu1  ;;  %v3894_v52 = vmul.f32 0.6931472, %v8222_v8  ;;  %v4043_v11 = vadd.f32 %v3888_v50, %v14624_v1  ;;  %v4375_v19 = vsel %vm4071_vm7, %v4044_v10, 0.0 }
 0x256   :  { %14618 = vst [vmem:[#allocation60_spill] sm:$0xff] %v11743_v60  ;;  %4355 = vadd.xlane.f32.xlu0 %v4354_v36  ;;  %v3598_v44 = vpop.f32.mrb[109].mxu1  ;;  %v8224_v60 = vpop.eup %8223  ;;  %8237 = vlog2.f32 %v7695_v48 }
 0x257   :  { %v11745_v39 = vpop.xlane.xlu0 %4151  ;;  %8239 = vlog2.f32 %v3598_v44  ;;  %v4046_v12 = vadd.f32 %v3894_v52, %v14625_v31  ;;  %v4372_v50 = vsel %vm4071_vm7, %v4043_v11, 0.0 }
 0x258   :  { %14619 = vst [vmem:[#allocation61_spill] sm:$0xff] %v11745_v39  ;;  %4364 = vadd.xlane.f32.xlu1 %v4363_v22  ;;  %v8226_v22 = vpop.eup %8225  ;;  %v3892_v39 = vmul.f32 0.6931472, %v8224_v60 }
 0x259   :  { %v11751_v36 = vpop.xlane.xlu1 %4160  ;;  %v7698_v29 = vpop.f32.mrb[110].mxu1  ;;  %v3898_v8 = vmul.f32 0.6931472, %v8226_v22  ;;  %v4381_v52 = vsel %vm4071_vm7, %v4046_v12, 0.0 }
 0x25a   :  { %14621 = vst [vmem:[#allocation62_spill] sm:$0xff] %v11751_v36  ;;  %4361 = vadd.xlane.f32.xlu0 %v4360_v61  ;;  %v3608_v34 = vpop.f32.mrb[111].mxu1  ;;  %v8228_v36 = vpop.eup %8227  ;;  %v4045_v32 = vadd.f32 %v3892_v39, %v10986_v40  ;;  %8241 = vlog2.f32 %v7698_v29 }
 0x25b   :  { %v11753_v6 = vpop.xlane.xlu0 %4157  ;;  %8243 = vlog2.f32 %v3608_v34  ;;  %v4048_v10 = vadd.f32 %v3898_v8, %v11003_v0 }
 0x25c   :  { %14622 = vst [vmem:[#allocation63_spill] sm:$0xff] %v11753_v6  ;;  %4370 = vadd.xlane.f32.xlu1 %v4369_v55  ;;  %v8230_v55 = vpop.eup %8229  ;;  %v3896_v6 = vmul.f32 0.6931472, %v8228_v36  ;;  %v4378_v40 = vsel %vm4071_vm7, %v4045_v32, 0.0 }
 0x25d   :  { %v11759_v61 = vpop.xlane.xlu1 %4166  ;;  %v7701_v58 = vpop.f32.mrb[112].mxu1  ;;  %v3902_v22 = vmul.f32 0.6931472, %v8230_v55  ;;  %v4387_v12 = vsel %vm4071_vm7, %v4048_v10, 0.0 }
 0x25e   :  { %4367 = vadd.xlane.f32.xlu0 %v4366_v26  ;;  %v3618_v60 = vpop.f32.mrb[113].mxu1  ;;  %v8232_v1 = vpop.eup %8231  ;;  %v4047_v39 = vadd.f32 %v3896_v6, %v11012_v53  ;;  %8245 = vlog2.f32 %v7701_v58 }
 0x25f   :  { %v11761_v47 = vpop.xlane.xlu0 %4163  ;;  %v3900_v31 = vmul.f32 0.6931472, %v8232_v1  ;;  %8247 = vlog2.f32 %v3618_v60  ;;  %v4050_v0 = vadd.f32 %v3902_v22, %v11035_v24 }
 0x260   :  { %4376 = vadd.xlane.f32.xlu1 %v4375_v19  ;;  %v8234_v19 = vpop.eup %8233  ;;  %v4384_v32 = vsel %vm4071_vm7, %v4047_v39, 0.0 }
 0x261   :  { %v11767_v26 = vpop.xlane.xlu1 %4172  ;;  %v7704_v44 = vpop.f32.mrb[114].mxu1  ;;  %v3906_v34 = vmul.f32 0.6931472, %v8234_v19  ;;  %v4049_v53 = vadd.f32 %v3900_v31, %v11044_v5  ;;  %v4393_v24 = vsel %vm4071_vm7, %v4050_v0, 0.0 }
 0x262   :  { %4373 = vadd.xlane.f32.xlu0 %v4372_v50  ;;  %v3628_v36 = vpop.f32.mrb[115].mxu1  ;;  %v8236_v11 = vpop.eup %8235  ;;  %8249 = vlog2.f32 %v7704_v44 }
 0x263   :  { %v11769_v48 = vpop.xlane.xlu0 %4169  ;;  %v8238_v55 = vpop.eup %8237  ;;  %v3904_v1 = vmul.f32 0.6931472, %v8236_v11  ;;  %8251 = vlog2.f32 %v3628_v36  ;;  %v4052_v22 = vadd.f32 %v3906_v34, %v11065_v13  ;;  %v4390_v5 = vsel %vm4071_vm7, %v4049_v53, 0.0 }
 0x264   :  { %4382 = vadd.xlane.f32.xlu1 %v4381_v52  ;;  %v8240_v52 = vpop.eup %8239  ;;  %v3910_v60 = vmul.f32 0.6931472, %v8238_v55 }
 0x265   :  { %v11775_v50 = vpop.xlane.xlu1 %4178  ;;  %v8242_v19 = vpop.eup %8241  ;;  %v3908_v11 = vmul.f32 0.6931472, %v8240_v52  ;;  %v4051_v31 = vadd.f32 %v3904_v1, %v11075_v23  ;;  %v4399_v13 = vsel %vm4071_vm7, %v4052_v22, 0.0 }
 0x266   :  { %4379 = vadd.xlane.f32.xlu0 %v4378_v40  ;;  %v7707_v8 = vpop.f32.mrb[116].mxu1  ;;  %v3914_v36 = vmul.f32 0.6931472, %v8242_v19  ;;  %v4054_v34 = vadd.f32 %v3910_v60, %v11090_v46 }
 0x267   :  { %v11777_v29 = vpop.xlane.xlu0 %4175  ;;  %v3638_v6 = vpop.f32.mrb[117].mxu1  ;;  %8253 = vlog2.f32 %v7707_v8  ;;  %v4396_v53 = vsel %vm4071_vm7, %v4051_v31, 0.0  ;;  %v4053_v23 = vadd.f32 %v3908_v11, %v11101_v17  ;;  %v14627_v11 = vld [vmem:[#allocation85_spill] sm:$0xff] }
 0x268   :  { %4388 = vadd.xlane.f32.xlu1 %v4387_v12  ;;  %v8244_v12 = vpop.eup %8243  ;;  %8255 = vlog2.f32 %v3638_v6  ;;  %v4405_v46 = vsel %vm4071_vm7, %v4054_v34, 0.0  ;;  %v4056_v60 = vadd.f32 %v3914_v36, %v11118_v25 }
 0x269   :  { %v11783_v40 = vpop.xlane.xlu1 %4184  ;;  %v8246_v0 = vpop.eup %8245  ;;  %v3912_v55 = vmul.f32 0.6931472, %v8244_v12  ;;  %v4402_v17 = vsel %vm4071_vm7, %v4053_v23, 0.0 }
 0x26a   :  { %4385 = vadd.xlane.f32.xlu0 %v4384_v32  ;;  %v8248_v52 = vpop.eup %8247  ;;  %v3918_v6 = vmul.f32 0.6931472, %v8246_v0  ;;  %v4411_v25 = vsel %vm4071_vm7, %v4056_v60, 0.0 }
 0x26b   :  { %v11785_v58 = vpop.xlane.xlu0 %4181  ;;  %v7710_v10 = vpop.f32.mrb[118].mxu1  ;;  %v3916_v19 = vmul.f32 0.6931472, %v8248_v52  ;;  %v4055_v31 = vadd.f32 %v3912_v55, %v14627_v11 }
 0x26c   :  { %4394 = vadd.xlane.f32.xlu1 %v4393_v24  ;;  %v3648_v39 = vpop.f32.mrb[119].mxu1  ;;  %8257 = vlog2.f32 %v7710_v10  ;;  %v8250_v22 = vpop.eup %8249  ;;  %v4058_v36 = vadd.f32 %v3918_v6, %v11145_v49 }
 0x26d   :  { %v11791_v32 = vpop.xlane.xlu1 %4190  ;;  %8259 = vlog2.f32 %v3648_v39  ;;  %v3922_v39 = vmul.f32 0.6931472, %v8250_v22  ;;  %v4408_v55 = vsel %vm4071_vm7, %v4055_v31, 0.0  ;;  %v4057_v23 = vadd.f32 %v3916_v19, %v11152_v7  ;;  %v14631_v19 = vld [vmem:[#allocation90_spill] sm:$0xff] }
 0x26e   :  { %4391 = vadd.xlane.f32.xlu0 %v4390_v5  ;;  %v4417_v60 = vsel %vm4071_vm7, %v4058_v36, 0.0 }
 0x26f   :  { %v11793_v44 = vpop.xlane.xlu0 %4187  ;;  %v4060_v6 = vadd.f32 %v3922_v39, %v11168_v45  ;;  %v4414_v7 = vsel %vm4071_vm7, %v4057_v23, 0.0 }
 0x270   :  { %4400 = vadd.xlane.f32.xlu1 %v4399_v13  ;;  %v8252_v13 = vpop.eup %8251 }
 0x271   :  { %v7713_v1 = vpop.f32.mrb[120].mxu1  ;;  %v11799_v24 = vpop.xlane.xlu1 %4196  ;;  %v3920_v0 = vmul.f32 0.6931472, %v8252_v13  ;;  %v4423_v36 = vsel %vm4071_vm7, %v4060_v6, 0.0 }
 0x272   :  { %14626 = vst [vmem:[#allocation64_spill] sm:$0xff] %v11799_v24  ;;  %4397 = vadd.xlane.f32.xlu0 %v4396_v53  ;;  %v3658_v5 = vpop.f32.mrb[121].mxu1  ;;  %8261 = vlog2.f32 %v7713_v1  ;;  %v8254_v34 = vpop.eup %8253 }
 0x273   :  { %v11801_v8 = vpop.xlane.xlu0 %4193  ;;  %8263 = vlog2.f32 %v3658_v5  ;;  %v8256_v52 = vpop.eup %8255  ;;  %v3926_v5 = vmul.f32 0.6931472, %v8254_v34  ;;  %v4059_v31 = vadd.f32 %v3920_v0, %v14631_v19  ;;  %v14634_v34 = vld [vmem:[#allocation93_spill] sm:$0xff] }
 0x274   :  { %4406 = vadd.xlane.f32.xlu1 %v4405_v46  ;;  %v3924_v11 = vmul.f32 0.6931472, %v8256_v52  ;;  %v14635_v52 = vld [vmem:[#allocation94_spill] sm:$0xff] }
 0x275   :  { %v11807_v53 = vpop.xlane.xlu1 %4202  ;;  %v4062_v45 = vadd.f32 %v3926_v5, %v14634_v34  ;;  %v4420_v23 = vsel %vm4071_vm7, %v4059_v31, 0.0 }
 0x276   :  { %v7716_v12 = vpop.f32.mrb[122].mxu1  ;;  %14628 = vst [vmem:[#allocation65_spill] sm:$0xff] %v11807_v53  ;;  %4403 = vadd.xlane.f32.xlu0 %v4402_v17  ;;  %v8258_v22 = vpop.eup %8257  ;;  %v4061_v0 = vadd.f32 %v3924_v11, %v14635_v52  ;;  %v14641_v52 = vld [vmem:[#allocation75_spill] sm:$0xff] }
 0x277   :  { %v3668_v24 = vpop.f32.mrb[123].mxu1  ;;  %v11809_v10 = vpop.xlane.xlu0 %4199  ;;  %8265 = vlog2.f32 %v7716_v12 }
 0x278   :  { %4412 = vadd.xlane.f32.xlu1 %v4411_v25  ;;  %8267 = vlog2.f32 %v3668_v24  ;;  %v8260_v13 = vpop.eup %8259  ;;  %v3930_v24 = vmul.f32 0.6931472, %v8258_v22  ;;  %v14638_v22 = vld [vmem:[#allocation97_spill] sm:$0xff] }
 0x279   :  { %v11815_v46 = vpop.xlane.xlu1 %4208 }
 0x27a   :  { %14629 = vst [vmem:[#allocation66_spill] sm:$0xff] %v11815_v46  ;;  %4409 = vadd.xlane.f32.xlu0 %v4408_v55  ;;  %v3928_v55 = vmul.f32 0.6931472, %v8260_v13  ;;  %v4064_v6 = vadd.f32 %v3930_v24, %v14638_v22  ;;  %v4426_v13 = vsel %vm4071_vm7, %v4061_v0, 0.0  ;;  %v14644_v22 = vld [vmem:[#allocation101_spill] sm:$0xff]  ;;  %v14645_v0 = vld [vmem:[#allocation102_spill] sm:$0xff] }
 0x27b   :  { %v11817_v17 = vpop.xlane.xlu0 %4205 }
 0x27c   :  { %14630 = vst [vmem:[#allocation67_spill] sm:$0xff] %v11817_v17  ;;  %v7719_v1 = vpop.f32.mrb[124].mxu1  ;;  %4418 = vadd.xlane.f32.xlu1 %v4417_v60  ;;  %v8262_v39 = vpop.eup %8261  ;;  %v4435_v24 = vsel %vm4071_vm7, %v4064_v6, 0.0 }
 0x27d   :  { %v3678_v49 = vpop.f32.mrb[125].mxu1  ;;  %v11823_v25 = vpop.xlane.xlu1 %4214  ;;  %8269 = vlog2.f32 %v7719_v1  ;;  %v3934_v1 = vmul.f32 0.6931472, %v8262_v39  ;;  %v14643_v39 = vld [vmem:[#allocation76_spill] sm:$0xff] }
 0x27e   :  { %14632 = vst [vmem:[#allocation68_spill] sm:$0xff] %v11823_v25  ;;  %4415 = vadd.xlane.f32.xlu0 %v4414_v7  ;;  %8271 = vlog2.f32 %v3678_v49  ;;  %v8264_v60 = vpop.eup %8263  ;;  %v4429_v49 = vsel %vm4071_vm7, %v4062_v45, 0.0 }
 0x27f   :  { %v11825_v12 = vpop.xlane.xlu0 %4211  ;;  %v3932_v5 = vmul.f32 0.6931472, %v8264_v60  ;;  %v4066_v60 = vadd.f32 %v3934_v1, %v14644_v22  ;;  %v14649_v22 = vld [vmem:[#allocation105_spill] sm:$0xff] }
 0x280   :  { %14633 = vst [vmem:[#allocation69_spill] sm:$0xff] %v11825_v12  ;;  %4424 = vadd.xlane.f32.xlu1 %v4423_v36  ;;  %v14639_v36 = vld [vmem:[#allocation98_spill] sm:$0xff] }
 0x281   :  { %v11831_v19 = vpop.xlane.xlu1 %4220  ;;  %v8266_v25 = vpop.eup %8265  ;;  %v4063_v31 = vadd.f32 %v3928_v55, %v14639_v36  ;;  %v4065_v36 = vadd.f32 %v3932_v5, %v14645_v0  ;;  %v4441_v1 = vsel %vm4071_vm7, %v4066_v60, 0.0  ;;  %v14651_v0 = vld [vmem:[#allocation106_spill] sm:$0xff] }
 0x282   :  { %14636 = vst [vmem:[#allocation70_spill] sm:$0xff] %v11831_v19  ;;  %4421 = vadd.xlane.f32.xlu0 %v4420_v23  ;;  %v8268_v34 = vpop.eup %8267  ;;  %v1369_v23 = vand.u32 2147483647, %v14641_v52  ;;  %v3938_v45 = vmul.f32 0.6931472, %v8266_v25 }
 0x283   :  { %v11833_v7 = vpop.xlane.xlu0 %4217  ;;  %v3936_v12 = vmul.f32 0.6931472, %v8268_v34  ;;  %v4432_v55 = vsel %vm4071_vm7, %v4063_v31, 0.0  ;;  %v4438_v5 = vsel %vm4071_vm7, %v4065_v36, 0.0  ;;  %v14655_v36 = vld [vmem:[#allocation110_spill] sm:$0xff] }
 0x284   :  { %14637 = vst [vmem:[#allocation71_spill] sm:$0xff] %v11833_v7  ;;  %4430 = vadd.xlane.f32.xlu1 %v4429_v49  ;;  %v1368_v7 = vand.u32 2147483647, %v14643_v39  ;;  %v1497_v52 = vsub.f32 1.0, %v1369_v23  ;;  %v4068_v34 = vadd.f32 %v3938_v45, %v14649_v22  ;;  %v14653_v22 = vld [vmem:[#allocation109_spill] sm:$0xff] }
 0x285   :  { %v11839_v11 = vpop.xlane.xlu1 %4226 }
 0x286   :  { %14640 = vst [vmem:[#allocation72_spill] sm:$0xff] %v11839_v11  ;;  %4427 = vadd.xlane.f32.xlu0 %v4426_v13  ;;  %v1496_v25 = vsub.f32 1.0, %v1368_v7  ;;  %v4447_v45 = vsel %vm4071_vm7, %v4068_v34, 0.0 }
 0x287   :  { %v11842_v19 = vpop.xlane.xlu0 %4223  ;;  %v8270_v49 = vpop.eup %8269 }
 0x288   :  { %14642 = vst [vmem:[#allocation73_spill] sm:$0xff] %v11842_v19  ;;  %4436 = vadd.xlane.f32.xlu1 %v4435_v24  ;;  %v8272_v11 = vpop.eup %8271  ;;  %v14647_v19 = vld [vmem:[#allocation77_spill] sm:$0xff]  ;;  %v3942_v6 = vmul.f32 0.6931472, %v8270_v49  ;;  %v14650_v24 = vld [vmem:[#allocation78_spill] sm:$0xff]  ;;  %v1624_v7 = vmax.f32 %v1496_v25, 0.0 }
 0x289   :  { %v11849_v13 = vpop.xlane.xlu1 %4232  ;;  %v1371_v46 = vand.u32 2147483647, %v14647_v19  ;;  %v1370_v17 = vand.u32 2147483647, %v14650_v24  ;;  %v3940_v31 = vmul.f32 0.6931472, %v8272_v11 }
 0x28a   :  { %14646 = vst [vmem:[#allocation74_spill] sm:$0xff] %v11849_v13  ;;  %4433 = vadd.xlane.f32.xlu0 %v4432_v55  ;;  %v4067_v13 = vadd.f32 %v3936_v12, %v14651_v0  ;;  %v1625_v19 = vmax.f32 %v1497_v52, 0.0  ;;  %v14652_v49 = vld [vmem:[#allocation79_spill] sm:$0xff]  ;;  %v4070_v24 = vadd.f32 %v3942_v6, %v14653_v22 }
 0x28b   :  { %v11852_v39 = vpop.xlane.xlu0 %4229  ;;  %v1499_v23 = vsub.f32 1.0, %v1371_v46  ;;  %v1373_v60 = vand.u32 2147483647, %v14652_v49  ;;  %v1498_v11 = vsub.f32 1.0, %v1370_v17  ;;  %v4069_v0 = vadd.f32 %v3940_v31, %v14655_v36  ;;  %v8439_v46 = vld [vmem:[%s14234_s2 + $0x208] sm:$0xff]  ;;  %v8440_v17 = vld [vmem:[%s14234_s2 + $0x200] sm:$0xff] }
 0x28c   :  { %14648 = vst [vmem:[#allocation85_spill] sm:$0xff] %v11852_v39  ;;  %4442 = vadd.xlane.f32.xlu1 %v4441_v1  ;;  %v14654_v1 = vld [vmem:[#allocation80_spill] sm:$0xff]  ;;  %v4444_v12 = vsel %vm4071_vm7, %v4067_v13, 0.0  ;;  %v4521_v52 = vmul.f32 %v8439_v46, %v1625_v19  ;;  %v4520_v6 = vmul.f32 %v8440_v17, %v1624_v7  ;;  %v14658_v13 = vld [vmem:[#allocation81_spill] sm:$0xff]  ;;  %v4453_v31 = vsel %vm4071_vm7, %v4070_v24, 0.0 }
 0x28d   :  { %v11859_v55 = vpop.xlane.xlu1 %4076  ;;  %v1372_v53 = vand.u32 2147483647, %v14654_v1  ;;  %v1627_v25 = vmax.f32 %v1499_v23, 0.0  ;;  %v1501_v49 = vsub.f32 1.0, %v1373_v60  ;;  %v1626_v22 = vmax.f32 %v1498_v11, 0.0  ;;  %v8441_v46 = vld [vmem:[%s14234_s2 + $0x218] sm:$0xff] }
 0x28e   :  { %4439 = vadd.xlane.f32.xlu0 %v4438_v5  ;;  %v4450_v19 = vsel %vm4071_vm7, %v4069_v0, 0.0  ;;  %v14661_v60 = vld [vmem:[#allocation83_spill] sm:$0xff]  ;;  %v8442_v0 = vld [vmem:[%s14234_s2 + $0x210] sm:$0xff] }
 0x28f   :  { %v11861_v39 = vpop.xlane.xlu0 %4073  ;;  %v1500_v1 = vsub.f32 1.0, %v1372_v53  ;;  %v4523_v7 = vmul.f32 %v8441_v46, %v1627_v25  ;;  %v1377_v17 = vand.u32 2147483647, %v14661_v60  ;;  %v1629_v24 = vmax.f32 %v1501_v49, 0.0  ;;  %v14663_v53 = vld [vmem:[#allocation84_spill] sm:$0xff]  ;;  %v14665_v49 = vld [vmem:[#allocation86_spill] sm:$0xff] }
 0x290   :  { %4448 = vadd.xlane.f32.xlu1 %v4447_v45  ;;  %v1375_v45 = vand.u32 2147483647, %v14658_v13  ;;  %v4776_v25 = vsel %vm1816_vm0, %v4520_v6, 0.0  ;;  %v8444_v6 = vld [vmem:[%s14234_s2 + $0x220] sm:$0xff] }
 0x291   :  { %v11869_v5 = vpop.xlane.xlu1 %4238  ;;  %v1505_v60 = vsub.f32 1.0, %v1377_v17  ;;  %v14667_v17 = vld [vmem:[#allocation87_spill] sm:$0xff] }
 0x292   :  { %14656 = vst [vmem:[#allocation90_spill] sm:$0xff] %v11869_v5  ;;  %4445 = vadd.xlane.f32.xlu0 %v4444_v12  ;;  %v14659_v12 = vld [vmem:[#allocation82_spill] sm:$0xff]  ;;  %v1503_v11 = vsub.f32 1.0, %v1375_v45  ;;  %v1376_v5 = vand.u32 2147483647, %v14663_v53 }
 0x293   :  { %v11874_v34 = vpop.xlane.xlu0 %4235  ;;  %v1374_v36 = vand.u32 2147483647, %v14659_v12  ;;  %v4522_v12 = vmul.f32 %v8442_v0, %v1626_v22  ;;  %v1379_v45 = vand.u32 2147483647, %v14665_v49  ;;  %v1378_v0 = vand.u32 2147483647, %v14667_v17 }
 0x294   :  { %14657 = vst [vmem:[#allocation93_spill] sm:$0xff] %v11874_v34  ;;  %4454 = vadd.xlane.f32.xlu1 %v4453_v31  ;;  %v4779_v31 = vsel %vm1816_vm0, %v4521_v52, 0.0  ;;  %v8443_v52 = vld [vmem:[%s14234_s2 + $0x228] sm:$0xff]  ;;  %v1631_v34 = vmax.f32 %v1503_v11, 0.0  ;;  %v1504_v22 = vsub.f32 1.0, %v1376_v5  ;;  %v8445_v5 = vld [vmem:[%s14234_s2 + $0x238] sm:$0xff] }
 0x295   :  { %v11883_v23 = vpop.xlane.xlu1 %4244  ;;  %v4525_v53 = vmul.f32 %v8443_v52, %v1629_v24  ;;  %v1507_v24 = vsub.f32 1.0, %v1379_v45  ;;  %v1506_v17 = vsub.f32 1.0, %v1378_v0 }
 0x296   :  { %14660 = vst [vmem:[#allocation94_spill] sm:$0xff] %v11883_v23  ;;  %4451 = vadd.xlane.f32.xlu0 %v4450_v19  ;;  %v1628_v19 = vmax.f32 %v1500_v1, 0.0  ;;  %v1502_v23 = vsub.f32 1.0, %v1374_v36  ;;  %v4785_v1 = vsel %vm1816_vm0, %v4523_v7, 0.0  ;;  %v4527_v7 = vmul.f32 %v8445_v5, %v1631_v34  ;;  %v8447_v34 = vld [vmem:[%s14234_s2 + $0x248] sm:$0xff] }
 0x297   :  { %v11889_v13 = vpop.xlane.xlu0 %4241  ;;  %v1632_v52 = vmax.f32 %v1504_v22, 0.0 }
 0x298   :  { %14662 = vst [vmem:[#allocation97_spill] sm:$0xff] %v11889_v13  ;;  %4780 = vadd.xlane.f32.xlu1 %v4779_v31  ;;  %v4524_v36 = vmul.f32 %v8444_v6, %v1628_v19  ;;  %v1630_v31 = vmax.f32 %v1502_v23, 0.0  ;;  %v14670_v19 = vld [vmem:[#allocation88_spill] sm:$0xff]  ;;  %v4791_v6 = vsel %vm1816_vm0, %v4525_v53, 0.0  ;;  %v1635_v53 = vmax.f32 %v1507_v24, 0.0 }
 0x299   :  { %v11897_v46 = vpop.xlane.xlu1 %4250  ;;  %v1381_v23 = vand.u32 2147483647, %v14670_v19 }
 0x29a   :  { %14664 = vst [vmem:[#allocation98_spill] sm:$0xff] %v11897_v46  ;;  %4777 = vadd.xlane.f32.xlu0 %v4776_v25  ;;  %v4782_v25 = vsel %vm1816_vm0, %v4522_v12, 0.0  ;;  %v1633_v46 = vmax.f32 %v1505_v60, 0.0  ;;  %v8446_v12 = vld [vmem:[%s14234_s2 + $0x230] sm:$0xff]  ;;  %v14671_v60 = vld [vmem:[#allocation89_spill] sm:$0xff] }
 0x29b   :  { %v11900_v13 = vpop.xlane.xlu0 %4247  ;;  %v1380_v45 = vand.u32 2147483647, %v14671_v60  ;;  %v1509_v19 = vsub.f32 1.0, %v1381_v23  ;;  %v1634_v60 = vmax.f32 %v1506_v17, 0.0  ;;  %v14677_v23 = vld [vmem:[#allocation95_spill] sm:$0xff] }
 0x29c   :  { %14666 = vst [vmem:[#allocation75_spill] sm:$0xff] %v11900_v13  ;;  %4786 = vadd.xlane.f32.xlu1 %v4785_v1  ;;  %v4526_v1 = vmul.f32 %v8446_v12, %v1630_v31  ;;  %v4529_v22 = vmul.f32 %v8447_v34, %v1633_v46  ;;  %v8448_v31 = vld [vmem:[%s14234_s2 + $0x240] sm:$0xff]  ;;  %v8449_v34 = vld [vmem:[%s14234_s2 + $0x258] sm:$0xff] }
 0x29d   :  { %v11911_v49 = vpop.xlane.xlu1 %4256  ;;  %v4528_v0 = vmul.f32 %v8448_v31, %v1632_v52  ;;  %v4531_v52 = vmul.f32 %v8449_v34, %v1635_v53  ;;  %v1385_v31 = vand.u32 2147483647, %v14677_v23 }
 0x29e   :  { %14668 = vst [vmem:[#allocation76_spill] sm:$0xff] %v11911_v49  ;;  %4783 = vadd.xlane.f32.xlu0 %v4782_v25  ;;  %v4788_v25 = vsel %vm1816_vm0, %v4524_v36, 0.0  ;;  %v4797_v36 = vsel %vm1816_vm0, %v4527_v7, 0.0  ;;  %v4794_v46 = vsel %vm1816_vm0, %v4526_v1, 0.0  ;;  %v1637_v7 = vmax.f32 %v1509_v19, 0.0  ;;  %v8450_v1 = vld [vmem:[%s14234_s2 + $0x250] sm:$0xff] }
 0x29f   :  { %v11913_v11 = vpop.xlane.xlu0 %4253  ;;  %v4800_v53 = vsel %vm1816_vm0, %v4528_v0, 0.0  ;;  %v1513_v23 = vsub.f32 1.0, %v1385_v31  ;;  %v14681_v19 = vld [vmem:[#allocation99_spill] sm:$0xff]  ;;  %v8452_v0 = vld [vmem:[%s14234_s2 + $0x260] sm:$0xff]  ;;  %v14683_v31 = vld [vmem:[#allocation100_spill] sm:$0xff] }
 0x2a0   :  { %14669 = vst [vmem:[#allocation101_spill] sm:$0xff] %v11913_v11  ;;  %4792 = vadd.xlane.f32.xlu1 %v4791_v6  ;;  %v14674_v6 = vld [vmem:[#allocation91_spill] sm:$0xff] }
 0x2a1   :  { %v11925_v49 = vpop.xlane.xlu1 %4262  ;;  %v1383_v12 = vand.u32 2147483647, %v14674_v6 }
 0x2a2   :  { %14672 = vst [vmem:[#allocation102_spill] sm:$0xff] %v11925_v49  ;;  %4789 = vadd.xlane.f32.xlu0 %v4788_v25  ;;  %v1508_v25 = vsub.f32 1.0, %v1380_v45  ;;  %v14675_v49 = vld [vmem:[#allocation92_spill] sm:$0xff] }
 0x2a3   :  { %v11930_v5 = vpop.xlane.xlu0 %4259  ;;  %v1382_v11 = vand.u32 2147483647, %v14675_v49  ;;  %v1511_v17 = vsub.f32 1.0, %v1383_v12  ;;  %v14679_v45 = vld [vmem:[#allocation96_spill] sm:$0xff]  ;;  %v4803_v49 = vsel %vm1816_vm0, %v4529_v22, 0.0  ;;  %v8451_v22 = vld [vmem:[%s14234_s2 + $0x268] sm:$0xff] }
 0x2a4   :  { %14673 = vst [vmem:[#allocation77_spill] sm:$0xff] %v11930_v5  ;;  %4798 = vadd.xlane.f32.xlu1 %v4797_v36  ;;  %v1384_v5 = vand.u32 2147483647, %v14679_v45  ;;  %v4530_v36 = vmul.f32 %v8450_v1, %v1634_v60  ;;  %v1387_v12 = vand.u32 2147483647, %v14681_v19  ;;  %v4533_v45 = vmul.f32 %v8451_v22, %v1637_v7 }
 0x2a5   :  { %v11939_v24 = vpop.xlane.xlu1 %4268  ;;  %v1639_v13 = vmax.f32 %v1511_v17, 0.0  ;;  %v1386_v1 = vand.u32 2147483647, %v14683_v31 }
 0x2a6   :  { %14676 = vst [vmem:[#allocation105_spill] sm:$0xff] %v11939_v24  ;;  %4795 = vadd.xlane.f32.xlu0 %v4794_v46  ;;  %v1636_v46 = vmax.f32 %v1508_v25, 0.0  ;;  %v1510_v24 = vsub.f32 1.0, %v1382_v11  ;;  %v1512_v60 = vsub.f32 1.0, %v1384_v5  ;;  %v4809_v11 = vsel %vm1816_vm0, %v4531_v52, 0.0  ;;  %v8453_v5 = vld [vmem:[%s14234_s2 + $0x278] sm:$0xff] }
 0x2a7   :  { %v11945_v6 = vpop.xlane.xlu0 %4265  ;;  %v1515_v7 = vsub.f32 1.0, %v1387_v12  ;;  %v4535_v52 = vmul.f32 %v8453_v5, %v1639_v13  ;;  %v1514_v31 = vsub.f32 1.0, %v1386_v1  ;;  %v8455_v13 = vld [vmem:[%s14234_s2 + $0x288] sm:$0xff] }
 0x2a8   :  { %14678 = vst [vmem:[#allocation78_spill] sm:$0xff] %v11945_v6  ;;  %4804 = vadd.xlane.f32.xlu1 %v4803_v49  ;;  %v4532_v25 = vmul.f32 %v8452_v0, %v1636_v46  ;;  %v1638_v49 = vmax.f32 %v1510_v24, 0.0  ;;  %v1640_v22 = vmax.f32 %v1512_v60, 0.0  ;;  %v14686_v46 = vld [vmem:[#allocation103_spill] sm:$0xff]  ;;  %v4815_v0 = vsel %vm1816_vm0, %v4533_v45, 0.0 }
 0x2a9   :  { %v11953_v34 = vpop.xlane.xlu1 %4274  ;;  %v1389_v24 = vand.u32 2147483647, %v14686_v46  ;;  %v1643_v45 = vmax.f32 %v1515_v7, 0.0 }
 0x2aa   :  { %14680 = vst [vmem:[#allocation106_spill] sm:$0xff] %v11953_v34  ;;  %4801 = vadd.xlane.f32.xlu0 %v4800_v53  ;;  %v4806_v53 = vsel %vm1816_vm0, %v4530_v36, 0.0  ;;  %v1641_v34 = vmax.f32 %v1513_v23, 0.0  ;;  %v8454_v36 = vld [vmem:[%s14234_s2 + $0x270] sm:$0xff] }
 0x2ab   :  { %v11956_v6 = vpop.xlane.xlu0 %4271  ;;  %v14687_v23 = vld [vmem:[#allocation104_spill] sm:$0xff]  ;;  %v1517_v46 = vsub.f32 1.0, %v1389_v24  ;;  %v14693_v24 = vld [vmem:[#allocation111_spill] sm:$0xff] }
 0x2ac   :  { %14682 = vst [vmem:[#allocation79_spill] sm:$0xff] %v11956_v6  ;;  %4810 = vadd.xlane.f32.xlu1 %v4809_v11  ;;  %v4534_v11 = vmul.f32 %v8454_v36, %v1638_v49  ;;  %v1388_v12 = vand.u32 2147483647, %v14687_v23  ;;  %v4537_v60 = vmul.f32 %v8455_v13, %v1641_v34  ;;  %v8456_v49 = vld [vmem:[%s14234_s2 + $0x280] sm:$0xff]  ;;  %v1642_v23 = vmax.f32 %v1514_v31, 0.0  ;;  %v8457_v13 = vld [vmem:[%s14234_s2 + $0x298] sm:$0xff] }
 0x2ad   :  { %v11967_v19 = vpop.xlane.xlu1 %4280  ;;  %v4536_v1 = vmul.f32 %v8456_v49, %v1640_v22  ;;  %v4539_v22 = vmul.f32 %v8457_v13, %v1643_v45  ;;  %v1393_v49 = vand.u32 2147483647, %v14693_v24 }
 0x2ae   :  { %14684 = vst [vmem:[#allocation109_spill] sm:$0xff] %v11967_v19  ;;  %4807 = vadd.xlane.f32.xlu0 %v4806_v53  ;;  %v4812_v53 = vsel %vm1816_vm0, %v4532_v25, 0.0  ;;  %v4821_v25 = vsel %vm1816_vm0, %v4535_v52, 0.0  ;;  %v4818_v34 = vsel %vm1816_vm0, %v4534_v11, 0.0  ;;  %v1645_v52 = vmax.f32 %v1517_v46, 0.0  ;;  %v8458_v11 = vld [vmem:[%s14234_s2 + $0x290] sm:$0xff] }
 0x2af   :  { %v11969_v17 = vpop.xlane.xlu0 %4277  ;;  %v4824_v45 = vsel %vm1816_vm0, %v4536_v1, 0.0  ;;  %v1521_v24 = vsub.f32 1.0, %v1393_v49  ;;  %v14697_v46 = vld [vmem:[#allocation115_spill] sm:$0xff]  ;;  %v8460_v1 = vld [vmem:[%s14234_s2 + $0x2a0] sm:$0xff]  ;;  %v1394_v49 = vand.u32 2147483647, %v11302_v54 }
 0x2b0   :  { %14685 = vst [vmem:[#allocation80_spill] sm:$0xff] %v11969_v17  ;;  %4816 = vadd.xlane.f32.xlu1 %v4815_v0  ;;  %v14690_v0 = vld [vmem:[#allocation107_spill] sm:$0xff] }
 0x2b1   :  { %v11981_v19 = vpop.xlane.xlu1 %4286  ;;  %v1391_v36 = vand.u32 2147483647, %v14690_v0 }
 0x2b2   :  { %14688 = vst [vmem:[#allocation110_spill] sm:$0xff] %v11981_v19  ;;  %4813 = vadd.xlane.f32.xlu0 %v4812_v53  ;;  %v1516_v53 = vsub.f32 1.0, %v1388_v12  ;;  %v14691_v19 = vld [vmem:[#allocation108_spill] sm:$0xff]  ;;  %v14695_v12 = vld [vmem:[#allocation113_spill] sm:$0xff] }
 0x2b3   :  { %v11986_v5 = vpop.xlane.xlu0 %4283  ;;  %v1390_v17 = vand.u32 2147483647, %v14691_v19  ;;  %v1519_v31 = vsub.f32 1.0, %v1391_v36  ;;  %v4827_v19 = vsel %vm1816_vm0, %v4537_v60, 0.0  ;;  %v1395_v36 = vand.u32 2147483647, %v14697_v46 }
 0x2b4   :  { %14689 = vst [vmem:[#allocation81_spill] sm:$0xff] %v11986_v5  ;;  %4822 = vadd.xlane.f32.xlu1 %v4821_v25  ;;  %v1392_v5 = vand.u32 2147483647, %v14695_v12  ;;  %v4538_v25 = vmul.f32 %v8458_v11, %v1642_v23  ;;  %v8459_v60 = vld [vmem:[%s14234_s2 + $0x2a8] sm:$0xff]  ;;  %v1649_v46 = vmax.f32 %v1521_v24, 0.0 }
 0x2b5   :  { %v11995_v7 = vpop.xlane.xlu1 %4292  ;;  %v4541_v12 = vmul.f32 %v8459_v60, %v1645_v52  ;;  %v1647_v6 = vmax.f32 %v1519_v31, 0.0  ;;  %v1523_v52 = vsub.f32 1.0, %v1395_v36  ;;  %v1396_v24 = vand.u32 2147483647, %v11318_v59 }
 0x2b6   :  { %14692 = vst [vmem:[#allocation82_spill] sm:$0xff] %v11995_v7  ;;  %4819 = vadd.xlane.f32.xlu0 %v4818_v34  ;;  %v1644_v34 = vmax.f32 %v1516_v53, 0.0  ;;  %v1518_v7 = vsub.f32 1.0, %v1390_v17  ;;  %v1520_v23 = vsub.f32 1.0, %v1392_v5  ;;  %v4833_v17 = vsel %vm1816_vm0, %v4539_v22, 0.0  ;;  %v8461_v5 = vld [vmem:[%s14234_s2 + $0x2b8] sm:$0xff] }
 0x2b7   :  { %v12001_v0 = vpop.xlane.xlu0 %4289  ;;  %v4830_v11 = vsel %vm1816_vm0, %v4538_v25, 0.0  ;;  %v4543_v22 = vmul.f32 %v8461_v5, %v1647_v6  ;;  %v4839_v54 = vsel %vm1816_vm0, %v4541_v12, 0.0  ;;  %v8462_v25 = vld [vmem:[%s14234_s2 + $0x2b0] sm:$0xff]  ;;  %v1651_v12 = vmax.f32 %v1523_v52, 0.0 }
 0x2b8   :  { %14694 = vst [vmem:[#allocation83_spill] sm:$0xff] %v12001_v0  ;;  %4828 = vadd.xlane.f32.xlu1 %v4827_v19  ;;  %v4540_v53 = vmul.f32 %v8460_v1, %v1644_v34  ;;  %v1646_v19 = vmax.f32 %v1518_v7, 0.0  ;;  %v1648_v60 = vmax.f32 %v1520_v23, 0.0  ;;  %v1397_v7 = vand.u32 2147483647, %v11313_v42  ;;  %v8463_v42 = vld [vmem:[%s14234_s2 + $0x2c8] sm:$0xff] }
 0x2b9   :  { %v12009_v13 = vpop.xlane.xlu1 %4298  ;;  %v4545_v6 = vmul.f32 %v8463_v42, %v1649_v46 }
 0x2ba   :  { %14696 = vst [vmem:[#allocation84_spill] sm:$0xff] %v12009_v13  ;;  %4825 = vadd.xlane.f32.xlu0 %v4824_v45  ;;  %v4542_v34 = vmul.f32 %v8462_v25, %v1646_v19  ;;  %v4836_v36 = vsel %vm1816_vm0, %v4540_v53, 0.0  ;;  %v8464_v19 = vld [vmem:[%s14234_s2 + $0x2c0] sm:$0xff]  ;;  %v1525_v59 = vsub.f32 1.0, %v1397_v7  ;;  %v4845_v53 = vsel %vm1816_vm0, %v4543_v22, 0.0 }
 0x2bb   :  { %v12012_v0 = vpop.xlane.xlu0 %4295  ;;  %v1398_v25 = vand.u32 2147483647, %v11328_v51  ;;  %v1401_v7 = vand.u32 2147483647, %v11339_v57  ;;  %v4851_v51 = vsel %vm1816_vm0, %v4545_v6, 0.0 }
 0x2bc   :  { %14698 = vst [vmem:[#allocation86_spill] sm:$0xff] %v12012_v0  ;;  %4834 = vadd.xlane.f32.xlu1 %v4833_v17  ;;  %v1522_v17 = vsub.f32 1.0, %v1394_v49  ;;  %v4544_v49 = vmul.f32 %v8464_v19, %v1648_v60  ;;  %v4842_v46 = vsel %vm1816_vm0, %v4542_v34, 0.0  ;;  %v1653_v22 = vmax.f32 %v1525_v59, 0.0  ;;  %v8466_v34 = vld [vmem:[%s14234_s2 + $0x2d0] sm:$0xff] }
 0x2bd   :  { %v12023_v45 = vpop.xlane.xlu1 %4304  ;;  %v1529_v57 = vsub.f32 1.0, %v1401_v7  ;;  %v1403_v59 = vand.u32 2147483647, %v11353_v21  ;;  %v1402_v7 = vand.u32 2147483647, %v11358_v63 }
 0x2be   :  { %14699 = vst [vmem:[#allocation87_spill] sm:$0xff] %v12023_v45  ;;  %4831 = vadd.xlane.f32.xlu0 %v4830_v11  ;;  %v1399_v11 = vand.u32 2147483647, %v11324_v28  ;;  %v1650_v5 = vmax.f32 %v1522_v17, 0.0  ;;  %v14818_v45 = vld [vmem:[#allocation57_spill] sm:$0xff] }
 0x2bf   :  { %v12025_v31 = vpop.xlane.xlu0 %4301 }
 0x2c0   :  { %14700 = vst [vmem:[#allocation88_spill] sm:$0xff] %v12025_v31  ;;  %4840 = vadd.xlane.f32.xlu1 %v4839_v54  ;;  %v1524_v54 = vsub.f32 1.0, %v1396_v24  ;;  %v1527_v17 = vsub.f32 1.0, %v1399_v11  ;;  %v1400_v24 = vand.u32 2147483647, %v11345_v16  ;;  %v4546_v42 = vmul.f32 %v8466_v34, %v1650_v5  ;;  %v8467_v16 = vld [vmem:[%s14234_s2 + $0x2e8] sm:$0xff] }
 0x2c1   :  { %v12037_v1 = vpop.xlane.xlu1 %4310  ;;  %v4549_v6 = vmul.f32 %v8467_v16, %v1653_v22  ;;  %v1531_v22 = vsub.f32 1.0, %v1403_v59 }
 0x2c2   :  { %14701 = vst [vmem:[#allocation89_spill] sm:$0xff] %v12037_v1  ;;  %4837 = vadd.xlane.f32.xlu0 %v4836_v36  ;;  %v8465_v36 = vld [vmem:[%s14234_s2 + $0x2d8] sm:$0xff]  ;;  %v1652_v19 = vmax.f32 %v1524_v54, 0.0  ;;  %v1528_v5 = vsub.f32 1.0, %v1400_v24  ;;  %v4854_v21 = vsel %vm1816_vm0, %v4546_v42, 0.0  ;;  %v8470_v42 = vld [vmem:[%s14234_s2 + $0x2f0] sm:$0xff] }
 0x2c3   :  { %v12042_v23 = vpop.xlane.xlu0 %4307  ;;  %v4547_v60 = vmul.f32 %v8465_v36, %v1651_v12  ;;  %v4848_v12 = vsel %vm1816_vm0, %v4544_v49, 0.0  ;;  %v1655_v36 = vmax.f32 %v1527_v17, 0.0  ;;  %v8468_v49 = vld [vmem:[%s14234_s2 + $0x2e0] sm:$0xff]  ;;  %v4863_v63 = vsel %vm1816_vm0, %v4549_v6, 0.0  ;;  %v14806_v1 = vld [vmem:[#allocation53_spill] sm:$0xff] }
 0x2c4   :  { %14702 = vst [vmem:[#allocation91_spill] sm:$0xff] %v12042_v23  ;;  %4846 = vadd.xlane.f32.xlu1 %v4845_v53  ;;  %v1526_v53 = vsub.f32 1.0, %v1398_v25  ;;  %v4548_v25 = vmul.f32 %v8468_v49, %v1652_v19  ;;  %v1656_v16 = vmax.f32 %v1528_v5, 0.0  ;;  %v1405_v19 = vand.u32 2147483647, %v11365_v30  ;;  %v8471_v30 = vld [vmem:[%s14234_s2 + $0x308] sm:$0xff] }
 0x2c5   :  { %v12051_v52 = vpop.xlane.xlu1 %4316  ;;  %v4857_v54 = vsel %vm1816_vm0, %v4547_v60, 0.0  ;;  %v8469_v60 = vld [vmem:[%s14234_s2 + $0x2f8] sm:$0xff]  ;;  %v1659_v6 = vmax.f32 %v1531_v22, 0.0  ;;  %v14812_v23 = vld [vmem:[#allocation55_spill] sm:$0xff] }
 0x2c6   :  { %14703 = vst [vmem:[#allocation92_spill] sm:$0xff] %v12051_v52  ;;  %4843 = vadd.xlane.f32.xlu0 %v4842_v46  ;;  %v4551_v24 = vmul.f32 %v8469_v60, %v1655_v36  ;;  %v4860_v59 = vsel %vm1816_vm0, %v4548_v25, 0.0 }
 0x2c7   :  { %v12057_v28 = vpop.xlane.xlu0 %4313 }
 0x2c8   :  { %14704 = vst [vmem:[#allocation95_spill] sm:$0xff] %v12057_v28  ;;  %4852 = vadd.xlane.f32.xlu1 %v4851_v51  ;;  %v1654_v51 = vmax.f32 %v1526_v53, 0.0  ;;  %v4869_v25 = vsel %vm1816_vm0, %v4551_v24, 0.0 }
 0x2c9   :  { %v12065_v46 = vpop.xlane.xlu1 %4322 }
 0x2ca   :  { %14705 = vst [vmem:[#allocation96_spill] sm:$0xff] %v12065_v46  ;;  %4849 = vadd.xlane.f32.xlu0 %v4848_v12  ;;  %v1657_v12 = vmax.f32 %v1529_v57, 0.0  ;;  %v4550_v53 = vmul.f32 %v8470_v42, %v1654_v51  ;;  %v1404_v57 = vand.u32 2147483647, %v11371_v18  ;;  %v8472_v51 = vld [vmem:[%s14234_s2 + $0x300] sm:$0xff]  ;;  %v1533_v18 = vsub.f32 1.0, %v1405_v19 }
 0x2cb   :  { %v12068_v11 = vpop.xlane.xlu0 %4319  ;;  %v1406_v42 = vand.u32 2147483647, %v11383_v43  ;;  %v1409_v19 = vand.u32 2147483647, %v11389_v15  ;;  %v14800_v46 = vld [vmem:[#allocation51_spill] sm:$0xff] }
 0x2cc   :  { %14706 = vst [vmem:[#allocation99_spill] sm:$0xff] %v12068_v11  ;;  %4858 = vadd.xlane.f32.xlu1 %v4857_v54  ;;  %v1530_v54 = vsub.f32 1.0, %v1402_v7  ;;  %v4553_v36 = vmul.f32 %v8471_v30, %v1657_v12  ;;  %v4552_v7 = vmul.f32 %v8472_v51, %v1656_v16  ;;  %v4866_v12 = vsel %vm1816_vm0, %v4550_v53, 0.0  ;;  %v8474_v53 = vld [vmem:[%s14234_s2 + $0x310] sm:$0xff] }
 0x2cd   :  { %v12079_v34 = vpop.xlane.xlu1 %4328  ;;  %v1661_v24 = vmax.f32 %v1533_v18, 0.0  ;;  %v1537_v15 = vsub.f32 1.0, %v1409_v19  ;;  %v1411_v18 = vand.u32 2147483647, %v11401_v37  ;;  %v1410_v19 = vand.u32 2147483647, %v11403_v33 }
 0x2ce   :  { %14707 = vst [vmem:[#allocation100_spill] sm:$0xff] %v12079_v34  ;;  %4855 = vadd.xlane.f32.xlu0 %v4854_v21  ;;  %v1407_v21 = vand.u32 2147483647, %v11377_v41  ;;  %v1658_v60 = vmax.f32 %v1530_v54, 0.0  ;;  %v4875_v43 = vsel %vm1816_vm0, %v4553_v36, 0.0 }
 0x2cf   :  { %v12081_v17 = vpop.xlane.xlu0 %4325 }
 0x2d0   :  { %14708 = vst [vmem:[#allocation103_spill] sm:$0xff] %v12081_v17  ;;  %4864 = vadd.xlane.f32.xlu1 %v4863_v63  ;;  %v1532_v63 = vsub.f32 1.0, %v1404_v57  ;;  %v1535_v54 = vsub.f32 1.0, %v1407_v21  ;;  %v1408_v57 = vand.u32 2147483647, %v11391_v14  ;;  %v4554_v30 = vmul.f32 %v8474_v53, %v1658_v60  ;;  %v8475_v14 = vld [vmem:[%s14234_s2 + $0x328] sm:$0xff] }
 0x2d1   :  { %v12093_v49 = vpop.xlane.xlu1 %4334  ;;  %v4557_v36 = vmul.f32 %v8475_v14, %v1661_v24  ;;  %v1539_v24 = vsub.f32 1.0, %v1411_v18 }
 0x2d2   :  { %14709 = vst [vmem:[#allocation104_spill] sm:$0xff] %v12093_v49  ;;  %4861 = vadd.xlane.f32.xlu0 %v4860_v59  ;;  %v8473_v59 = vld [vmem:[%s14234_s2 + $0x318] sm:$0xff]  ;;  %v1660_v51 = vmax.f32 %v1532_v63, 0.0  ;;  %v1536_v60 = vsub.f32 1.0, %v1408_v57  ;;  %v4878_v37 = vsel %vm1816_vm0, %v4554_v30, 0.0  ;;  %v8478_v30 = vld [vmem:[%s14234_s2 + $0x330] sm:$0xff] }
 0x2d3   :  { %v12098_v5 = vpop.xlane.xlu0 %4331  ;;  %v4555_v16 = vmul.f32 %v8473_v59, %v1659_v6  ;;  %v4872_v6 = vsel %vm1816_vm0, %v4552_v7, 0.0  ;;  %v1663_v59 = vmax.f32 %v1535_v54, 0.0  ;;  %v8476_v7 = vld [vmem:[%s14234_s2 + $0x320] sm:$0xff]  ;;  %v4887_v33 = vsel %vm1816_vm0, %v4557_v36, 0.0  ;;  %v14794_v49 = vld [vmem:[#allocation49_spill] sm:$0xff] }
 0x2d4   :  { %14710 = vst [vmem:[#allocation107_spill] sm:$0xff] %v12098_v5  ;;  %4870 = vadd.xlane.f32.xlu1 %v4869_v25  ;;  %v1534_v25 = vsub.f32 1.0, %v1406_v42  ;;  %v4556_v42 = vmul.f32 %v8476_v7, %v1660_v51  ;;  %v1664_v14 = vmax.f32 %v1536_v60, 0.0  ;;  %v1413_v51 = vand.u32 2147483647, %v11412_v27  ;;  %v8479_v27 = vld [vmem:[%s14234_s2 + $0x348] sm:$0xff] }
 0x2d5   :  { %v12107_v22 = vpop.xlane.xlu1 %4340  ;;  %v4881_v63 = vsel %vm1816_vm0, %v4555_v16, 0.0  ;;  %v8477_v16 = vld [vmem:[%s14234_s2 + $0x338] sm:$0xff]  ;;  %v1667_v36 = vmax.f32 %v1539_v24, 0.0 }
 0x2d6   :  { %14711 = vst [vmem:[#allocation108_spill] sm:$0xff] %v12107_v22  ;;  %4867 = vadd.xlane.f32.xlu0 %v4866_v12  ;;  %v4559_v57 = vmul.f32 %v8477_v16, %v1663_v59  ;;  %v4884_v18 = vsel %vm1816_vm0, %v4556_v42, 0.0 }
 0x2d7   :  { %v12113_v41 = vpop.xlane.xlu0 %4337 }
 0x2d8   :  { %14712 = vst [vmem:[#allocation111_spill] sm:$0xff] %v12113_v41  ;;  %4876 = vadd.xlane.f32.xlu1 %v4875_v43  ;;  %v1662_v43 = vmax.f32 %v1534_v25, 0.0  ;;  %v4893_v42 = vsel %vm1816_vm0, %v4559_v57, 0.0 }
 0x2d9   :  { %v12121_v12 = vpop.xlane.xlu1 %4346 }
 0x2da   :  { %14713 = vst [vmem:[#allocation113_spill] sm:$0xff] %v12121_v12  ;;  %4873 = vadd.xlane.f32.xlu0 %v4872_v6  ;;  %v1665_v6 = vmax.f32 %v1537_v15, 0.0  ;;  %v4558_v25 = vmul.f32 %v8478_v30, %v1662_v43  ;;  %v1412_v15 = vand.u32 2147483647, %v11415_v38  ;;  %v8480_v43 = vld [vmem:[%s14234_s2 + $0x340] sm:$0xff]  ;;  %v1541_v38 = vsub.f32 1.0, %v1413_v51 }
 0x2db   :  { %v12124_v21 = vpop.xlane.xlu0 %4343  ;;  %v1414_v30 = vand.u32 2147483647, %v11427_v3  ;;  %v1417_v51 = vand.u32 2147483647, %v11439_v9  ;;  %v14788_v12 = vld [vmem:[#allocation47_spill] sm:$0xff] }
 0x2dc   :  { %14714 = vst [vmem:[#allocation115_spill] sm:$0xff] %v12124_v21  ;;  %4882 = vadd.xlane.f32.xlu1 %v4881_v63  ;;  %v1538_v63 = vsub.f32 1.0, %v1410_v19  ;;  %v4561_v59 = vmul.f32 %v8479_v27, %v1665_v6  ;;  %v4560_v19 = vmul.f32 %v8480_v43, %v1664_v14  ;;  %v4890_v6 = vsel %vm1816_vm0, %v4558_v25, 0.0  ;;  %v8482_v25 = vld [vmem:[%s14234_s2 + $0x350] sm:$0xff] }
 0x2dd   :  { %v12135_v53 = vpop.xlane.xlu1 %4352  ;;  %v1669_v57 = vmax.f32 %v1541_v38, 0.0  ;;  %v1545_v9 = vsub.f32 1.0, %v1417_v51  ;;  %v14722_v38 = vld [vmem:[#allocation4_spill] sm:$0xff]  ;;  %v14724_v51 = vld [vmem:[#allocation141_spill] sm:$0xff] }
 0x2de   :  { %14715 = vst [vmem:[#allocation154_spill] sm:$0xff] %v12135_v53  ;;  %4879 = vadd.xlane.f32.xlu0 %v4878_v37  ;;  %v1415_v37 = vand.u32 2147483647, %v11425_v4  ;;  %v1666_v16 = vmax.f32 %v1538_v63, 0.0  ;;  %v4899_v3 = vsel %vm1816_vm0, %v4561_v59, 0.0 }
 0x2df   :  { %v12137_v54 = vpop.xlane.xlu0 %4349 }
 0x2e0   :  { %14716 = vst [vmem:[#allocation155_spill] sm:$0xff] %v12137_v54  ;;  %4888 = vadd.xlane.f32.xlu1 %v4887_v33  ;;  %v1540_v33 = vsub.f32 1.0, %v1412_v15  ;;  %v1543_v63 = vsub.f32 1.0, %v1415_v37  ;;  %v1416_v15 = vand.u32 2147483647, %v11447_v62  ;;  %v4562_v27 = vmul.f32 %v8482_v25, %v1666_v16  ;;  %v8483_v62 = vld [vmem:[%s14234_s2 + $0x368] sm:$0xff] }
 0x2e1   :  { %v12149_v7 = vpop.xlane.xlu1 %4358  ;;  %v1419_v37 = vand.u32 2147483647, %v14722_v38  ;;  %v4565_v59 = vmul.f32 %v8483_v62, %v1669_v57  ;;  %v1418_v25 = vand.u32 2147483647, %v14724_v51 }
 0x2e2   :  { %14717 = vst [vmem:[#allocation156_spill] sm:$0xff] %v12149_v7  ;;  %4885 = vadd.xlane.f32.xlu0 %v4884_v18  ;;  %v8481_v18 = vld [vmem:[%s14234_s2 + $0x358] sm:$0xff]  ;;  %v1668_v43 = vmax.f32 %v1540_v33, 0.0  ;;  %v1544_v16 = vsub.f32 1.0, %v1416_v15 }
 0x2e3   :  { %v12154_v60 = vpop.xlane.xlu0 %4355  ;;  %v4563_v14 = vmul.f32 %v8481_v18, %v1667_v36  ;;  %v4896_v36 = vsel %vm1816_vm0, %v4560_v19, 0.0  ;;  %v8484_v19 = vld [vmem:[%s14234_s2 + $0x360] sm:$0xff]  ;;  %v1547_v57 = vsub.f32 1.0, %v1419_v37  ;;  %v1546_v51 = vsub.f32 1.0, %v1418_v25  ;;  %v14783_v7 = vld [vmem:[#allocation45_spill] sm:$0xff] }
 0x2e4   :  { %14718 = vst [vmem:[#allocation157_spill] sm:$0xff] %v12154_v60  ;;  %4894 = vadd.xlane.f32.xlu1 %v4893_v42  ;;  %v1542_v42 = vsub.f32 1.0, %v1414_v30  ;;  %v4564_v30 = vmul.f32 %v8484_v19, %v1668_v43  ;;  %v1672_v62 = vmax.f32 %v1544_v16, 0.0  ;;  %v14727_v43 = vld [vmem:[#allocation6_spill] sm:$0xff]  ;;  %v4911_v19 = vsel %vm1816_vm0, %v4565_v59, 0.0 }
 0x2e5   :  { %v12163_v24 = vpop.xlane.xlu1 %4364  ;;  %v4905_v33 = vsel %vm1816_vm0, %v4563_v14, 0.0  ;;  %v8485_v14 = vld [vmem:[%s14234_s2 + $0x378] sm:$0xff]  ;;  %v1675_v59 = vmax.f32 %v1547_v57, 0.0 }
 0x2e6   :  { %14719 = vst [vmem:[#allocation158_spill] sm:$0xff] %v12163_v24  ;;  %4891 = vadd.xlane.f32.xlu0 %v4890_v6  ;;  %v1671_v24 = vmax.f32 %v1543_v63, 0.0 }
 0x2e7   :  { %v12169_v4 = vpop.xlane.xlu0 %4361 }
 0x2e8   :  { %14720 = vst [vmem:[#allocation159_spill] sm:$0xff] %v12169_v4  ;;  %4900 = vadd.xlane.f32.xlu1 %v4899_v3  ;;  %v1670_v3 = vmax.f32 %v1542_v42, 0.0  ;;  %v4567_v15 = vmul.f32 %v8485_v14, %v1671_v24  ;;  %v1421_v42 = vand.u32 2147483647, %v14727_v43  ;;  %v8487_v24 = vld [vmem:[%s14234_s2 + $0x388] sm:$0xff] }
 0x2e9   :  { %v12177_v6 = vpop.xlane.xlu1 %4370 }
 0x2ea   :  { %14721 = vst [vmem:[#allocation160_spill] sm:$0xff] %v12177_v6  ;;  %4897 = vadd.xlane.f32.xlu0 %v4896_v36  ;;  %v4902_v36 = vsel %vm1816_vm0, %v4562_v27, 0.0  ;;  %v1673_v6 = vmax.f32 %v1545_v9, 0.0  ;;  %v8486_v27 = vld [vmem:[%s14234_s2 + $0x370] sm:$0xff]  ;;  %v14728_v9 = vld [vmem:[#allocation143_spill] sm:$0xff]  ;;  %v1549_v43 = vsub.f32 1.0, %v1421_v42 }
 0x2eb   :  { %v12180_v18 = vpop.xlane.xlu0 %4367  ;;  %v1420_v37 = vand.u32 2147483647, %v14728_v9  ;;  %v1674_v9 = vmax.f32 %v1546_v51, 0.0  ;;  %v14734_v42 = vld [vmem:[#allocation10_spill] sm:$0xff] }
 0x2ec   :  { %14723 = vst [vmem:[#allocation4_spill] sm:$0xff] %v12180_v18  ;;  %4906 = vadd.xlane.f32.xlu1 %v4905_v33  ;;  %v4566_v33 = vmul.f32 %v8486_v27, %v1670_v3  ;;  %v4569_v16 = vmul.f32 %v8487_v24, %v1673_v6  ;;  %v8488_v3 = vld [vmem:[%s14234_s2 + $0x380] sm:$0xff]  ;;  %v8489_v24 = vld [vmem:[%s14234_s2 + $0x398] sm:$0xff] }
 0x2ed   :  { %v12191_v38 = vpop.xlane.xlu1 %4376  ;;  %v4568_v25 = vmul.f32 %v8488_v3, %v1672_v62  ;;  %v4571_v62 = vmul.f32 %v8489_v24, %v1675_v59  ;;  %v1425_v3 = vand.u32 2147483647, %v14734_v42 }
 0x2ee   :  { %14725 = vst [vmem:[#allocation141_spill] sm:$0xff] %v12191_v38  ;;  %4903 = vadd.xlane.f32.xlu0 %v4902_v36  ;;  %v4908_v36 = vsel %vm1816_vm0, %v4564_v30, 0.0  ;;  %v4917_v30 = vsel %vm1816_vm0, %v4567_v15, 0.0  ;;  %v4914_v6 = vsel %vm1816_vm0, %v4566_v33, 0.0  ;;  %v1677_v15 = vmax.f32 %v1549_v43, 0.0  ;;  %v8490_v33 = vld [vmem:[%s14234_s2 + $0x390] sm:$0xff] }
 0x2ef   :  { %v12193_v63 = vpop.xlane.xlu0 %4373  ;;  %v4920_v59 = vsel %vm1816_vm0, %v4568_v25, 0.0  ;;  %v1553_v42 = vsub.f32 1.0, %v1425_v3  ;;  %v14738_v43 = vld [vmem:[#allocation12_spill] sm:$0xff]  ;;  %v8492_v25 = vld [vmem:[%s14234_s2 + $0x3a0] sm:$0xff]  ;;  %v14740_v3 = vld [vmem:[#allocation149_spill] sm:$0xff] }
 0x2f0   :  { %14726 = vst [vmem:[#allocation161_spill] sm:$0xff] %v12193_v63  ;;  %4912 = vadd.xlane.f32.xlu1 %v4911_v19  ;;  %v14731_v19 = vld [vmem:[#allocation8_spill] sm:$0xff] }
 0x2f1   :  { %v12205_v38 = vpop.xlane.xlu1 %4382  ;;  %v1423_v27 = vand.u32 2147483647, %v14731_v19 }
 0x2f2   :  { %14729 = vst [vmem:[#allocation6_spill] sm:$0xff] %v12205_v38  ;;  %4909 = vadd.xlane.f32.xlu0 %v4908_v36  ;;  %v1548_v36 = vsub.f32 1.0, %v1420_v37  ;;  %v14732_v38 = vld [vmem:[#allocation145_spill] sm:$0xff]  ;;  %v14736_v37 = vld [vmem:[#allocation147_spill] sm:$0xff] }
 0x2f3   :  { %v12210_v14 = vpop.xlane.xlu0 %4379  ;;  %v1422_v63 = vand.u32 2147483647, %v14732_v38  ;;  %v1551_v51 = vsub.f32 1.0, %v1423_v27  ;;  %v4923_v38 = vsel %vm1816_vm0, %v4569_v16, 0.0  ;;  %v1427_v27 = vand.u32 2147483647, %v14738_v43 }
 0x2f4   :  { %14730 = vst [vmem:[#allocation143_spill] sm:$0xff] %v12210_v14  ;;  %4918 = vadd.xlane.f32.xlu1 %v4917_v30  ;;  %v1424_v14 = vand.u32 2147483647, %v14736_v37  ;;  %v4570_v30 = vmul.f32 %v8490_v33, %v1674_v9  ;;  %v8491_v16 = vld [vmem:[%s14234_s2 + $0x3a8] sm:$0xff]  ;;  %v1426_v33 = vand.u32 2147483647, %v14740_v3 }
 0x2f5   :  { %v12219_v57 = vpop.xlane.xlu1 %4388  ;;  %v4573_v37 = vmul.f32 %v8491_v16, %v1677_v15  ;;  %v1679_v18 = vmax.f32 %v1551_v51, 0.0  ;;  %v1555_v15 = vsub.f32 1.0, %v1427_v27 }
 0x2f6   :  { %14733 = vst [vmem:[#allocation8_spill] sm:$0xff] %v12219_v57  ;;  %4915 = vadd.xlane.f32.xlu0 %v4914_v6  ;;  %v1676_v6 = vmax.f32 %v1548_v36, 0.0  ;;  %v1550_v57 = vsub.f32 1.0, %v1422_v63  ;;  %v1552_v9 = vsub.f32 1.0, %v1424_v14  ;;  %v4929_v63 = vsel %vm1816_vm0, %v4571_v62, 0.0  ;;  %v8493_v14 = vld [vmem:[%s14234_s2 + $0x3b8] sm:$0xff] }
 0x2f7   :  { %v12225_v19 = vpop.xlane.xlu0 %4385  ;;  %v4575_v62 = vmul.f32 %v8493_v14, %v1679_v18  ;;  %v1554_v3 = vsub.f32 1.0, %v1426_v33  ;;  %v8495_v18 = vld [vmem:[%s14234_s2 + $0x3c8] sm:$0xff] }
 0x2f8   :  { %14735 = vst [vmem:[#allocation145_spill] sm:$0xff] %v12225_v19  ;;  %4924 = vadd.xlane.f32.xlu1 %v4923_v38  ;;  %v4572_v36 = vmul.f32 %v8492_v25, %v1676_v6  ;;  %v1678_v38 = vmax.f32 %v1550_v57, 0.0  ;;  %v1680_v16 = vmax.f32 %v1552_v9, 0.0  ;;  %v14743_v6 = vld [vmem:[#allocation14_spill] sm:$0xff]  ;;  %v4935_v25 = vsel %vm1816_vm0, %v4573_v37, 0.0 }
 0x2f9   :  { %v12233_v24 = vpop.xlane.xlu1 %4394  ;;  %v1429_v57 = vand.u32 2147483647, %v14743_v6  ;;  %v1683_v37 = vmax.f32 %v1555_v15, 0.0 }
 0x2fa   :  { %14737 = vst [vmem:[#allocation10_spill] sm:$0xff] %v12233_v24  ;;  %4921 = vadd.xlane.f32.xlu0 %v4920_v59  ;;  %v4926_v59 = vsel %vm1816_vm0, %v4570_v30, 0.0  ;;  %v1681_v24 = vmax.f32 %v1553_v42, 0.0  ;;  %v8494_v30 = vld [vmem:[%s14234_s2 + $0x3b0] sm:$0xff]  ;;  %v14744_v42 = vld [vmem:[#allocation151_spill] sm:$0xff] }
 0x2fb   :  { %v12236_v19 = vpop.xlane.xlu0 %4391  ;;  %v1428_v27 = vand.u32 2147483647, %v14744_v42  ;;  %v1557_v6 = vsub.f32 1.0, %v1429_v57  ;;  %v1682_v42 = vmax.f32 %v1554_v3, 0.0 }
 0x2fc   :  { %14739 = vst [vmem:[#allocation147_spill] sm:$0xff] %v12236_v19  ;;  %4930 = vadd.xlane.f32.xlu1 %v4929_v63  ;;  %v4574_v63 = vmul.f32 %v8494_v30, %v1678_v38  ;;  %v4577_v9 = vmul.f32 %v8495_v18, %v1681_v24  ;;  %v8496_v38 = vld [vmem:[%s14234_s2 + $0x3c0] sm:$0xff] }
 0x2fd   :  { %v12247_v43 = vpop.xlane.xlu1 %4400  ;;  %v4576_v33 = vmul.f32 %v8496_v38, %v1680_v16  ;;  %v8497_v16 = vld [vmem:[%s14234_s2 + $0x3d8] sm:$0xff]  ;;  %v1685_v38 = vmax.f32 %v1557_v6, 0.0 }
 0x2fe   :  { %14741 = vst [vmem:[#allocation12_spill] sm:$0xff] %v12247_v43  ;;  %4927 = vadd.xlane.f32.xlu0 %v4926_v59  ;;  %v4932_v59 = vsel %vm1816_vm0, %v4572_v36, 0.0  ;;  %v4941_v36 = vsel %vm1816_vm0, %v4575_v62, 0.0  ;;  %v4938_v24 = vsel %vm1816_vm0, %v4574_v63, 0.0  ;;  %v4579_v57 = vmul.f32 %v8497_v16, %v1683_v37  ;;  %v8499_v37 = vld [vmem:[%s14234_s2 + $0x3e8] sm:$0xff] }
 0x2ff   :  { %v12249_v51 = vpop.xlane.xlu0 %4397  ;;  %v4947_v62 = vsel %vm1816_vm0, %v4577_v9, 0.0  ;;  %v4581_v9 = vmul.f32 %v8499_v37, %v1685_v38  ;;  %v8501_v38 = vld [vmem:[%s14234_s2 + $0x3f8] sm:$0xff] }
 0x300   :  { %14742 = vst [vmem:[#allocation149_spill] sm:$0xff] %v12249_v51  ;;  %4936 = vadd.xlane.f32.xlu1 %v4935_v25  ;;  %v14747_v25 = vld [vmem:[#allocation16_spill] sm:$0xff] }
 0x301   :  { %v12261_v43 = vpop.xlane.xlu1 %4406  ;;  %v1431_v30 = vand.u32 2147483647, %v14747_v25 }
 0x302   :  { %14745 = vst [vmem:[#allocation14_spill] sm:$0xff] %v12261_v43  ;;  %4933 = vadd.xlane.f32.xlu0 %v4932_v59  ;;  %v1556_v59 = vsub.f32 1.0, %v1428_v27  ;;  %v14748_v43 = vld [vmem:[#allocation17_spill] sm:$0xff] }
 0x303   :  { %v12266_v14 = vpop.xlane.xlu0 %4403  ;;  %v1430_v51 = vand.u32 2147483647, %v14748_v43  ;;  %v1559_v25 = vsub.f32 1.0, %v1431_v30  ;;  %v8498_v43 = vld [vmem:[%s14234_s2 + $0x3d0] sm:$0xff]  ;;  %v4953_v30 = vsel %vm1816_vm0, %v4579_v57, 0.0  ;;  %v4959_v57 = vsel %vm1816_vm0, %v4581_v9, 0.0 }
 0x304   :  { %14746 = vst [vmem:[#allocation151_spill] sm:$0xff] %v12266_v14  ;;  %4942 = vadd.xlane.f32.xlu1 %v4941_v36  ;;  %v4578_v3 = vmul.f32 %v8498_v43, %v1682_v42  ;;  %v1684_v63 = vmax.f32 %v1556_v59, 0.0  ;;  %v4944_v36 = vsel %vm1816_vm0, %v4576_v33, 0.0  ;;  %v8502_v43 = vld [vmem:[%s14234_s2 + $0x3f0] sm:$0xff] }
 0x305   :  { %v12275_v15 = vpop.xlane.xlu1 %4412  ;;  %v1558_v27 = vsub.f32 1.0, %v1430_v51  ;;  %v1687_v6 = vmax.f32 %v1559_v25, 0.0  ;;  %v8500_v51 = vld [vmem:[%s14234_s2 + $0x3e0] sm:$0xff] }
 0x306   :  { %14749 = vst [vmem:[#allocation16_spill] sm:$0xff] %v12275_v15  ;;  %4939 = vadd.xlane.f32.xlu0 %v4938_v24  ;;  %v4580_v42 = vmul.f32 %v8500_v51, %v1684_v63  ;;  %v4950_v33 = vsel %vm1816_vm0, %v4578_v3, 0.0 }
 0x307   :  { %v12277_v18 = vpop.xlane.xlu0 %4409  ;;  %v1686_v59 = vmax.f32 %v1558_v27, 0.0  ;;  %v4583_v25 = vmul.f32 %v8501_v38, %v1687_v6  ;;  %v14763_v38 = vld [vmem:[#allocation112_spill] sm:$0xff] }
 0x308   :  { %14750 = vst [vmem:[#allocation17_spill] sm:$0xff] %v12277_v18  ;;  %4948 = vadd.xlane.f32.xlu1 %v4947_v62  ;;  %v4956_v3 = vsel %vm1816_vm0, %v4580_v42, 0.0  ;;  %v14779_v18 = vld [vmem:[#allocation43_spill] sm:$0xff] }
 0x309   :  { %v12287_v24 = vpop.xlane.xlu1 %4418  ;;  %v4582_v63 = vmul.f32 %v8502_v43, %v1686_v59  ;;  %v4965_v37 = vsel %vm1816_vm0, %v4583_v25, 0.0 }
 0x30a   :  { %14751 = vst [vmem:[#allocation162_spill] sm:$0xff] %v12287_v24  ;;  %4945 = vadd.xlane.f32.xlu0 %v4944_v36 }
 0x30b   :  { %v12289_v15 = vpop.xlane.xlu0 %4415  ;;  %v4962_v6 = vsel %vm1816_vm0, %v4582_v63, 0.0  ;;  %v14766_v63 = vld [vmem:[#allocation117_spill] sm:$0xff] }
 0x30c   :  { %14752 = vst [vmem:[#allocation163_spill] sm:$0xff] %v12289_v15  ;;  %4954 = vadd.xlane.f32.xlu1 %v4953_v30 }
 0x30d   :  { %v12299_v16 = vpop.xlane.xlu1 %4424 }
 0x30e   :  { %14753 = vst [vmem:[#allocation164_spill] sm:$0xff] %v12299_v16  ;;  %4951 = vadd.xlane.f32.xlu0 %v4950_v33  ;;  %v14775_v16 = vld [vmem:[#allocation41_spill] sm:$0xff] }
 0x30f   :  { %v12301_v62 = vpop.xlane.xlu0 %4421 }
 0x310   :  { %14754 = vst [vmem:[#allocation165_spill] sm:$0xff] %v12301_v62  ;;  %4960 = vadd.xlane.f32.xlu1 %v4959_v57  ;;  %v4969_v57 = vsub.f32 %v11859_v55, %v14763_v38 }
 0x311   :  { %v12311_v27 = vpop.xlane.xlu1 %4430 }
 0x312   :  { %14755 = vst [vmem:[#allocation166_spill] sm:$0xff] %v12311_v27  ;;  %4957 = vadd.xlane.f32.xlu0 %v4956_v3  ;;  %v4970_v3 = vsub.f32 %v11649_v56, %v14766_v63  ;;  %v12355_v63 = vld [vmem:[%s14237_s1 + $0x10] sm:$0xff] }
 0x313   :  { %v12313_v36 = vpop.xlane.xlu0 %4427  ;;  %vm5098_vm10 = vcmp.gt.f32.partialorder %v12355_v63, 0.0 }
 0x314   :  { %14756 = vst [vmem:[#allocation167_spill] sm:$0xff] %v12313_v36  ;;  %4966 = vadd.xlane.f32.xlu1 %v4965_v37  ;;  %v12340_v37 = vld [vmem:[%s14237_s1 + $0x8] sm:$0xff] }
 0x315   :  { %v12317_v30 = vpop.xlane.xlu1 %4436  ;;  %vm5097_vm8 = vcmp.gt.f32.partialorder %v12340_v37, 0.0 }
 0x316   :  { %14757 = vst [vmem:[#allocation168_spill] sm:$0xff] %v12317_v30  ;;  %4963 = vadd.xlane.f32.xlu0 %v4962_v6  ;;  %v5225_v6 = vmul.f32 %v12340_v37, %v4969_v57  ;;  %v5226_v57 = vmul.f32 %v12355_v63, %v4970_v3  ;;  %v12374_v3 = vld [vmem:[%s14237_s1 + $0x18] sm:$0xff] }
 0x317   :  { %v12319_v9 = vpop.xlane.xlu0 %4433  ;;  %v14772_v30 = vld [vmem:[#allocation121_spill] sm:$0xff]  ;;  %vm5099_vm11 = vcmp.gt.f32.partialorder %v12374_v3, 0.0 }
 0x318   :  { %14758 = vst [vmem:[#allocation169_spill] sm:$0xff] %v12319_v9  ;;  %v14773_v9 = vld [vmem:[#allocation42_spill] sm:$0xff] }
 0x319   :  { %v12321_v51 = vpop.xlane.xlu1 %4442  ;;  %v4974_v27 = vsub.f32 %v14773_v9, %v14772_v30  ;;  %v12405_v30 = vld [vmem:[%s14237_s1 + $0x30] sm:$0xff] }
 0x31a   :  { %14759 = vst [vmem:[#allocation170_spill] sm:$0xff] %v12321_v51  ;;  %v14771_v51 = vld [vmem:[#allocation40_spill] sm:$0xff]  ;;  %vm5102_vm14 = vcmp.gt.f32.partialorder %v12405_v30, 0.0 }
 0x31b   :  { %v12323_v59 = vpop.xlane.xlu0 %4439  ;;  %v5230_v9 = vmul.f32 %v12405_v30, %v4974_v27  ;;  %v12427_v27 = vld [vmem:[%s14237_s1 + $0x40] sm:$0xff] }
 0x31c   :  { %14760 = vst [vmem:[#allocation171_spill] sm:$0xff] %v12323_v59  ;;  %vm5104_vm0 = vcmp.gt.f32.partialorder %v12427_v27, 0.0 }
 0x31d   :  { %v12325_v42 = vpop.xlane.xlu1 %4448 }
 0x31e   :  { %14761 = vst [vmem:[#allocation172_spill] sm:$0xff] %v12325_v42  ;;  %v14767_v42 = vld [vmem:[#allocation114_spill] sm:$0xff] }
 0x31f   :  { %v12327_v33 = vpop.xlane.xlu0 %4445 }
 0x320   :  { %14762 = vst [vmem:[#allocation173_spill] sm:$0xff] %v12327_v33  ;;  %v4968_v33 = vsub.f32 %v11861_v39, %v14767_v42  ;;  %v12363_v42 = vld [vmem:[%s14237_s1] sm:$0xff] }
 0x321   :  { %v12331_v25 = vpop.xlane.xlu1 %4454  ;;  %vm5096_vm9 = vcmp.gt.f32.partialorder %v12363_v42, 0.0 }
 0x322   :  { %14764 = vst [vmem:[#allocation112_spill] sm:$0xff] %v12331_v25  ;;  %v14768_v25 = vld [vmem:[#allocation116_spill] sm:$0xff] }
 0x323   :  { %v12333_v43 = vpop.xlane.xlu0 %4451  ;;  %v4971_v56 = vsub.f32 %v11643_v2, %v14768_v25 }
 0x324   :  { %14765 = vst [vmem:[#allocation174_spill] sm:$0xff] %v12333_v43  ;;  %v14769_v43 = vld [vmem:[#allocation119_spill] sm:$0xff] }
 0x325   :  { %5482 = vrot.lane.b32.xlu1 %v5225_v6, %s8632_s16  ;;  %v12346_v55 = vpop.xlane.xlu1 %4780  ;;  %v4972_v39 = vsub.f32 %v11657_v20, %v14769_v43  ;;  %v5224_v6 = vmul.f32 %v12363_v42, %v4968_v33  ;;  %v5227_v20 = vmul.f32 %v12374_v3, %v4971_v56  ;;  %v14770_v43 = vld [vmem:[#allocation118_spill] sm:$0xff] }
 0x326   :  { %v4973_v59 = vsub.f32 %v14771_v51, %v14770_v43  ;;  %v12383_v33 = vld [vmem:[%s14237_s1 + $0x20] sm:$0xff]  ;;  %v12396_v51 = vld [vmem:[%s14237_s1 + $0x28] sm:$0xff]  ;;  %v14774_v43 = vld [vmem:[#allocation120_spill] sm:$0xff] }
 0x327   :  { %v12348_v38 = vpop.xlane.xlu0 %4777  ;;  %v4975_v62 = vsub.f32 %v14775_v16, %v14774_v43  ;;  %v12418_v16 = vld [vmem:[%s14237_s1 + $0x38] sm:$0xff]  ;;  %v14778_v43 = vld [vmem:[#allocation122_spill] sm:$0xff]  ;;  %vm5100_vm12 = vcmp.gt.f32.partialorder %v12383_v33, 0.0  ;;  %vm5101_vm13 = vcmp.gt.f32.partialorder %v12396_v51, 0.0 }
 0x328   :  { %v4977_v14 = vsub.f32 %v14779_v18, %v14778_v43  ;;  %v12440_v18 = vld [vmem:[%s14237_s1 + $0x48] sm:$0xff]  ;;  %v14782_v43 = vld [vmem:[#allocation124_spill] sm:$0xff]  ;;  %vm5103_vm15 = vcmp.gt.f32.partialorder %v12418_v16, 0.0 }
 0x329   :  { %5484 = vrot.lane.b32.xlu1 %v5226_v57, %s8632_s16  ;;  %v12367_v2 = vpop.xlane.xlu1 %4786  ;;  %v5228_v57 = vmul.f32 %v12383_v33, %v4972_v39  ;;  %v14776_v39 = vld [vmem:[#allocation123_spill] sm:$0xff]  ;;  %v4979_v60 = vsub.f32 %v14783_v7, %v14782_v43  ;;  %v12462_v7 = vld [vmem:[%s14237_s1 + $0x58] sm:$0xff]  ;;  %v14787_v43 = vld [vmem:[#allocation126_spill] sm:$0xff]  ;;  %vm5105_vm1 = vcmp.gt.f32.partialorder %v12440_v18, 0.0 }
 0x32a   :  { %v4981_v21 = vsub.f32 %v14788_v12, %v14787_v43  ;;  %v12484_v12 = vld [vmem:[%s14237_s1 + $0x68] sm:$0xff]  ;;  %v14793_v43 = vld [vmem:[#allocation128_spill] sm:$0xff]  ;;  %vm5107_vm3 = vcmp.gt.f32.partialorder %v12462_v7, 0.0 }
 0x32b   :  { %v12369_v25 = vpop.xlane.xlu0 %4783  ;;  %v4983_v5 = vsub.f32 %v14794_v49, %v14793_v43  ;;  %v12506_v49 = vld [vmem:[%s14237_s1 + $0x78] sm:$0xff]  ;;  %v14799_v43 = vld [vmem:[#allocation130_spill] sm:$0xff]  ;;  %vm5109_vm5 = vcmp.gt.f32.partialorder %v12484_v12, 0.0 }
 0x32c   :  { %5480 = vrot.lane.b32.xlu0 %v5224_v6, %s8632_s16  ;;  %v5229_v6 = vmul.f32 %v12396_v51, %v4973_v59  ;;  %v4985_v11 = vsub.f32 %v14800_v46, %v14799_v43  ;;  %v12528_v46 = vld [vmem:[%s14237_s1 + $0x88] sm:$0xff]  ;;  %v14805_v43 = vld [vmem:[#allocation132_spill] sm:$0xff]  ;;  %vm5111_vm7 = vcmp.gt.f32.partialorder %v12506_v49, 0.0 }
 0x32d   :  { %5486 = vrot.lane.b32.xlu1 %v5227_v20, %s8632_s16  ;;  %v12389_v36 = vpop.xlane.xlu1 %4792  ;;  %v14777_v20 = vld [vmem:[#allocation44_spill] sm:$0xff] }
 0x32e   :  { %v4976_v24 = vsub.f32 %v14777_v20, %v14776_v39  ;;  %v14780_v39 = vld [vmem:[#allocation125_spill] sm:$0xff]  ;;  %v14781_v20 = vld [vmem:[#allocation46_spill] sm:$0xff] }
 0x32f   :  { %v12391_v56 = vpop.xlane.xlu0 %4789  ;;  %v4978_v19 = vsub.f32 %v14781_v20, %v14780_v39  ;;  %v14784_v39 = vld [vmem:[#allocation127_spill] sm:$0xff]  ;;  %v14785_v20 = vld [vmem:[#allocation48_spill] sm:$0xff] }
 0x330   :  { %5488 = vrot.lane.b32.xlu0 %v5228_v57, %s8632_s16  ;;  %v5231_v57 = vmul.f32 %v12418_v16, %v4975_v62  ;;  %v4980_v53 = vsub.f32 %v14785_v20, %v14784_v39  ;;  %v14789_v39 = vld [vmem:[#allocation129_spill] sm:$0xff]  ;;  %v14790_v20 = vld [vmem:[#allocation50_spill] sm:$0xff] }
 0x331   :  { %5490 = vrot.lane.b32.xlu1 %v5229_v6, %s8632_s16  ;;  %v12411_v15 = vpop.xlane.xlu1 %4798  ;;  %v5232_v6 = vmul.f32 %v12427_v27, %v4976_v24  ;;  %v12449_v24 = vld [vmem:[%s14237_s1 + $0x50] sm:$0xff]  ;;  %v4982_v22 = vsub.f32 %v14790_v20, %v14789_v39  ;;  %v14795_v39 = vld [vmem:[#allocation131_spill] sm:$0xff]  ;;  %v12836_v16 = vld [vmem:[%s14237_s1 + $0x138] sm:$0xff] }
 0x332   :  { %v14796_v20 = vld [vmem:[#allocation52_spill] sm:$0xff]  ;;  %vm5106_vm2 = vcmp.gt.f32.partialorder %v12449_v24, 0.0 }
 0x333   :  { %v12413_v59 = vpop.xlane.xlu0 %4795  ;;  %v4984_v34 = vsub.f32 %v14796_v20, %v14795_v39  ;;  %v14801_v39 = vld [vmem:[#allocation133_spill] sm:$0xff]  ;;  %v14802_v20 = vld [vmem:[#allocation54_spill] sm:$0xff] }
 0x334   :  { %5492 = vrot.lane.b32.xlu0 %v5230_v9, %s8632_s16  ;;  %v5233_v9 = vmul.f32 %v12440_v18, %v4977_v14  ;;  %v4986_v52 = vsub.f32 %v14802_v20, %v14801_v39  ;;  %v14807_v39 = vld [vmem:[#allocation135_spill] sm:$0xff]  ;;  %v14808_v20 = vld [vmem:[#allocation56_spill] sm:$0xff]  ;;  %v14883_v18 = vld [vmem:[#allocation18_spill] sm:$0xff] }
 0x335   :  { %5494 = vrot.lane.b32.xlu1 %v5231_v57, %s8632_s16  ;;  %v12433_v4 = vpop.xlane.xlu1 %4804  ;;  %v5234_v57 = vmul.f32 %v12449_v24, %v4978_v19  ;;  %v12471_v19 = vld [vmem:[%s14237_s1 + $0x60] sm:$0xff]  ;;  %v12858_v24 = vld [vmem:[%s14237_s1 + $0x148] sm:$0xff] }
 0x336   :  { %vm5108_vm4 = vcmp.gt.f32.partialorder %v12471_v19, 0.0 }
 0x337   :  { %v12435_v62 = vpop.xlane.xlu0 %4801 }
 0x338   :  { %5496 = vrot.lane.b32.xlu0 %v5232_v6, %s8632_s16  ;;  %v5235_v6 = vmul.f32 %v12462_v7, %v4979_v60  ;;  %v14886_v7 = vld [vmem:[#allocation20_spill] sm:$0xff] }
 0x339   :  { %5498 = vrot.lane.b32.xlu1 %v5233_v9, %s8632_s16  ;;  %v12455_v54 = vpop.xlane.xlu1 %4810  ;;  %v5236_v9 = vmul.f32 %v12471_v19, %v4980_v53  ;;  %v12493_v53 = vld [vmem:[%s14237_s1 + $0x70] sm:$0xff]  ;;  %v12880_v19 = vld [vmem:[%s14237_s1 + $0x158] sm:$0xff] }
 0x33a   :  { %14786 = vst [vmem:[#allocation117_spill] sm:$0xff] %v12455_v54  ;;  %v14835_v54 = vld [vmem:[#allocation62_spill] sm:$0xff]  ;;  %vm5110_vm6 = vcmp.gt.f32.partialorder %v12493_v53, 0.0 }
 0x33b   :  { %v12457_v14 = vpop.xlane.xlu0 %4807 }
 0x33c   :  { %5500 = vrot.lane.b32.xlu0 %v5234_v57, %s8632_s16  ;;  %v5237_v57 = vmul.f32 %v12484_v12, %v4981_v21  ;;  %v14890_v12 = vld [vmem:[#allocation22_spill] sm:$0xff] }
 0x33d   :  { %5502 = vrot.lane.b32.xlu1 %v5235_v6, %s8632_s16  ;;  %v12477_v41 = vpop.xlane.xlu1 %4816  ;;  %v5238_v6 = vmul.f32 %v12493_v53, %v4982_v22  ;;  %v12515_v22 = vld [vmem:[%s14237_s1 + $0x80] sm:$0xff]  ;;  %v12902_v53 = vld [vmem:[%s14237_s1 + $0x168] sm:$0xff] }
 0x33e   :  { %14791 = vst [vmem:[#allocation114_spill] sm:$0xff] %v12477_v41 }
 0x33f   :  { %v12479_v60 = vpop.xlane.xlu0 %4813 }
 0x340   :  { %14792 = vst [vmem:[#allocation116_spill] sm:$0xff] %v12479_v60  ;;  %5504 = vrot.lane.b32.xlu0 %v5236_v9, %s8632_s16  ;;  %v5239_v9 = vmul.f32 %v12506_v49, %v4983_v5  ;;  %v14829_v60 = vld [vmem:[#allocation60_spill] sm:$0xff] }
 0x341   :  { %5506 = vrot.lane.b32.xlu1 %v5237_v57, %s8632_s16  ;;  %v12499_v17 = vpop.xlane.xlu1 %4822  ;;  %v5240_v57 = vmul.f32 %v12515_v22, %v4984_v34  ;;  %v12537_v34 = vld [vmem:[%s14237_s1 + $0x90] sm:$0xff] }
 0x342   :  { %14797 = vst [vmem:[#allocation119_spill] sm:$0xff] %v12499_v17  ;;  %v4987_v17 = vsub.f32 %v14806_v1, %v14805_v43  ;;  %v12550_v1 = vld [vmem:[%s14237_s1 + $0x98] sm:$0xff]  ;;  %v14811_v43 = vld [vmem:[#allocation134_spill] sm:$0xff]  ;;  %v14894_v49 = vld [vmem:[#allocation24_spill] sm:$0xff] }
 0x343   :  { %v12501_v21 = vpop.xlane.xlu0 %4819 }
 0x344   :  { %14798 = vst [vmem:[#allocation118_spill] sm:$0xff] %v12501_v21  ;;  %5508 = vrot.lane.b32.xlu0 %v5238_v6, %s8632_s16  ;;  %v5241_v6 = vmul.f32 %v12528_v46, %v4985_v11  ;;  %v4989_v21 = vsub.f32 %v14812_v23, %v14811_v43  ;;  %v12572_v23 = vld [vmem:[%s14237_s1 + $0xa8] sm:$0xff]  ;;  %v14817_v43 = vld [vmem:[#allocation136_spill] sm:$0xff] }
 0x345   :  { %5510 = vrot.lane.b32.xlu1 %v5239_v9, %s8632_s16  ;;  %v12521_v28 = vpop.xlane.xlu1 %4828  ;;  %v5242_v9 = vmul.f32 %v12537_v34, %v4986_v52  ;;  %v12559_v52 = vld [vmem:[%s14237_s1 + $0xa0] sm:$0xff]  ;;  %v4991_v41 = vsub.f32 %v14818_v45, %v14817_v43  ;;  %v12594_v45 = vld [vmem:[%s14237_s1 + $0xb8] sm:$0xff] }
 0x346   :  { %14803 = vst [vmem:[#allocation40_spill] sm:$0xff] %v12521_v28  ;;  %v4988_v28 = vsub.f32 %v14808_v20, %v14807_v39  ;;  %v14813_v39 = vld [vmem:[#allocation137_spill] sm:$0xff]  ;;  %v14814_v20 = vld [vmem:[#allocation58_spill] sm:$0xff] }
 0x347   :  { %v12523_v5 = vpop.xlane.xlu0 %4825  ;;  %v14822_v43 = vld [vmem:[#allocation138_spill] sm:$0xff] }
 0x348   :  { %14804 = vst [vmem:[#allocation121_spill] sm:$0xff] %v12523_v5  ;;  %5512 = vrot.lane.b32.xlu0 %v5240_v57, %s8632_s16  ;;  %v5243_v57 = vmul.f32 %v12550_v1, %v4987_v17 }
 0x349   :  { %5514 = vrot.lane.b32.xlu1 %v5241_v6, %s8632_s16  ;;  %v12543_v5 = vpop.xlane.xlu1 %4834  ;;  %v5244_v6 = vmul.f32 %v12559_v52, %v4988_v28  ;;  %v12581_v28 = vld [vmem:[%s14237_s1 + $0xb0] sm:$0xff] }
 0x34a   :  { %14809 = vst [vmem:[#allocation42_spill] sm:$0xff] %v12543_v5  ;;  %v4990_v5 = vsub.f32 %v14814_v20, %v14813_v39  ;;  %v14819_v39 = vld [vmem:[#allocation139_spill] sm:$0xff] }
 0x34b   :  { %v12545_v11 = vpop.xlane.xlu0 %4831  ;;  %v4992_v20 = vsub.f32 %v11737_v35, %v14819_v39  ;;  %v12603_v35 = vld [vmem:[%s14237_s1 + $0xc0] sm:$0xff]  ;;  %v14825_v39 = vld [vmem:[#allocation61_spill] sm:$0xff] }
 0x34c   :  { %14810 = vst [vmem:[#allocation120_spill] sm:$0xff] %v12545_v11  ;;  %5516 = vrot.lane.b32.xlu0 %v5242_v9, %s8632_s16  ;;  %v5245_v9 = vmul.f32 %v12572_v23, %v4989_v21 }
 0x34d   :  { %5518 = vrot.lane.b32.xlu1 %v5243_v57, %s8632_s16  ;;  %v12565_v11 = vpop.xlane.xlu1 %4840  ;;  %v5246_v57 = vmul.f32 %v12581_v28, %v4990_v5  ;;  %v5248_v5 = vmul.f32 %v12603_v35, %v4992_v20  ;;  %v12625_v20 = vld [vmem:[%s14237_s1 + $0xd0] sm:$0xff] }
 0x34e   :  { %14815 = vst [vmem:[#allocation41_spill] sm:$0xff] %v12565_v11 }
 0x34f   :  { %v12567_v17 = vpop.xlane.xlu0 %4837 }
 0x350   :  { %14816 = vst [vmem:[#allocation123_spill] sm:$0xff] %v12567_v17  ;;  %5520 = vrot.lane.b32.xlu0 %v5244_v6, %s8632_s16  ;;  %v5247_v6 = vmul.f32 %v12594_v45, %v4991_v41  ;;  %v14823_v17 = vld [vmem:[#allocation59_spill] sm:$0xff] }
 0x351   :  { %5522 = vrot.lane.b32.xlu1 %v5245_v9, %s8632_s16  ;;  %v12587_v11 = vpop.xlane.xlu1 %4846  ;;  %v4993_v31 = vsub.f32 %v14823_v17, %v14822_v43  ;;  %v14824_v9 = vld [vmem:[#allocation140_spill] sm:$0xff]  ;;  %v12616_v17 = vld [vmem:[%s14237_s1 + $0xc8] sm:$0xff]  ;;  %v14828_v43 = vld [vmem:[#allocation5_spill] sm:$0xff] }
 0x352   :  { %14820 = vst [vmem:[#allocation44_spill] sm:$0xff] %v12587_v11  ;;  %v4994_v11 = vsub.f32 %v14825_v39, %v14824_v9  ;;  %v4995_v13 = vsub.f32 %v14829_v60, %v14828_v43  ;;  %v14830_v9 = vld [vmem:[#allocation142_spill] sm:$0xff]  ;;  %v14831_v39 = vld [vmem:[#allocation63_spill] sm:$0xff]  ;;  %v12638_v60 = vld [vmem:[%s14237_s1 + $0xd8] sm:$0xff] }
 0x353   :  { %v12589_v21 = vpop.xlane.xlu0 %4843  ;;  %v14834_v43 = vld [vmem:[#allocation7_spill] sm:$0xff] }
 0x354   :  { %14821 = vst [vmem:[#allocation122_spill] sm:$0xff] %v12589_v21  ;;  %5524 = vrot.lane.b32.xlu0 %v5246_v57, %s8632_s16  ;;  %v5249_v57 = vmul.f32 %v12616_v17, %v4993_v31  ;;  %v4997_v0 = vsub.f32 %v14835_v54, %v14834_v43  ;;  %v12660_v54 = vld [vmem:[%s14237_s1 + $0xe8] sm:$0xff]  ;;  %v14839_v43 = vld [vmem:[#allocation9_spill] sm:$0xff] }
 0x355   :  { %5526 = vrot.lane.b32.xlu1 %v5247_v6, %s8632_s16  ;;  %v12609_v21 = vpop.xlane.xlu1 %4852  ;;  %v5250_v6 = vmul.f32 %v12625_v20, %v4994_v11  ;;  %v12647_v11 = vld [vmem:[%s14237_s1 + $0xe0] sm:$0xff] }
 0x356   :  { %14826 = vst [vmem:[#allocation43_spill] sm:$0xff] %v12609_v21  ;;  %v4996_v21 = vsub.f32 %v14831_v39, %v14830_v9  ;;  %v14836_v9 = vld [vmem:[#allocation144_spill] sm:$0xff] }
 0x357   :  { %v12611_v41 = vpop.xlane.xlu0 %4849  ;;  %v4998_v39 = vsub.f32 %v11761_v47, %v14836_v9  ;;  %v12669_v47 = vld [vmem:[%s14237_s1 + $0xf0] sm:$0xff] }
 0x358   :  { %14827 = vst [vmem:[#allocation125_spill] sm:$0xff] %v12611_v41  ;;  %5528 = vrot.lane.b32.xlu0 %v5248_v5, %s8632_s16  ;;  %v5251_v5 = vmul.f32 %v12638_v60, %v4995_v13 }
 0x359   :  { %5530 = vrot.lane.b32.xlu1 %v5249_v57, %s8632_s16  ;;  %v12631_v41 = vpop.xlane.xlu1 %4858  ;;  %v5252_v57 = vmul.f32 %v12647_v11, %v4996_v21  ;;  %v5254_v21 = vmul.f32 %v12669_v47, %v4998_v39 }
 0x35a   :  { %14832 = vst [vmem:[#allocation46_spill] sm:$0xff] %v12631_v41 }
 0x35b   :  { %v12633_v31 = vpop.xlane.xlu0 %4855 }
 0x35c   :  { %14833 = vst [vmem:[#allocation124_spill] sm:$0xff] %v12633_v31  ;;  %5532 = vrot.lane.b32.xlu0 %v5250_v6, %s8632_s16  ;;  %v5253_v6 = vmul.f32 %v12660_v54, %v4997_v0  ;;  %v4999_v31 = vsub.f32 %v11759_v61, %v14839_v43  ;;  %v12682_v61 = vld [vmem:[%s14237_s1 + $0xf8] sm:$0xff]  ;;  %v14843_v43 = vld [vmem:[#allocation11_spill] sm:$0xff] }
 0x35d   :  { %5534 = vrot.lane.b32.xlu1 %v5251_v5, %s8632_s16  ;;  %v12653_v41 = vpop.xlane.xlu1 %4864  ;;  %v14840_v5 = vld [vmem:[#allocation146_spill] sm:$0xff] }
 0x35e   :  { %14837 = vst [vmem:[#allocation45_spill] sm:$0xff] %v12653_v41  ;;  %v5000_v9 = vsub.f32 %v11769_v48, %v14840_v5  ;;  %v12691_v48 = vld [vmem:[%s14237_s1 + $0x100] sm:$0xff] }
 0x35f   :  { %v12655_v13 = vpop.xlane.xlu0 %4861 }
 0x360   :  { %14838 = vst [vmem:[#allocation127_spill] sm:$0xff] %v12655_v13  ;;  %5536 = vrot.lane.b32.xlu0 %v5252_v57, %s8632_s16  ;;  %v5255_v57 = vmul.f32 %v12682_v61, %v4999_v31  ;;  %v5001_v13 = vsub.f32 %v11767_v26, %v14843_v43  ;;  %v5256_v39 = vmul.f32 %v12691_v48, %v5000_v9  ;;  %v12704_v26 = vld [vmem:[%s14237_s1 + $0x108] sm:$0xff]  ;;  %v14847_v43 = vld [vmem:[#allocation13_spill] sm:$0xff] }
 0x361   :  { %5538 = vrot.lane.b32.xlu1 %v5253_v6, %s8632_s16  ;;  %v12675_v41 = vpop.xlane.xlu1 %4870  ;;  %v14844_v6 = vld [vmem:[#allocation148_spill] sm:$0xff] }
 0x362   :  { %14841 = vst [vmem:[#allocation48_spill] sm:$0xff] %v12675_v41  ;;  %v5002_v5 = vsub.f32 %v11777_v29, %v14844_v6  ;;  %v12713_v29 = vld [vmem:[%s14237_s1 + $0x110] sm:$0xff] }
 0x363   :  { %v12677_v0 = vpop.xlane.xlu0 %4867 }
 0x364   :  { %14842 = vst [vmem:[#allocation126_spill] sm:$0xff] %v12677_v0  ;;  %5540 = vrot.lane.b32.xlu0 %v5254_v21, %s8632_s16  ;;  %v5257_v21 = vmul.f32 %v12704_v26, %v5001_v13  ;;  %v5003_v0 = vsub.f32 %v11775_v50, %v14847_v43  ;;  %v5258_v9 = vmul.f32 %v12713_v29, %v5002_v5  ;;  %v12726_v50 = vld [vmem:[%s14237_s1 + $0x118] sm:$0xff]  ;;  %v14851_v43 = vld [vmem:[#allocation15_spill] sm:$0xff] }
 0x365   :  { %5542 = vrot.lane.b32.xlu1 %v5255_v57, %s8632_s16  ;;  %v12697_v41 = vpop.xlane.xlu1 %4876  ;;  %v14848_v57 = vld [vmem:[#allocation150_spill] sm:$0xff] }
 0x366   :  { %14845 = vst [vmem:[#allocation47_spill] sm:$0xff] %v12697_v41  ;;  %v5004_v6 = vsub.f32 %v11785_v58, %v14848_v57  ;;  %v12735_v58 = vld [vmem:[%s14237_s1 + $0x120] sm:$0xff] }
 0x367   :  { %v12699_v31 = vpop.xlane.xlu0 %4873 }
 0x368   :  { %14846 = vst [vmem:[#allocation129_spill] sm:$0xff] %v12699_v31  ;;  %5544 = vrot.lane.b32.xlu0 %v5256_v39, %s8632_s16  ;;  %v5259_v39 = vmul.f32 %v12726_v50, %v5003_v0  ;;  %v5005_v31 = vsub.f32 %v11783_v40, %v14851_v43  ;;  %v5260_v5 = vmul.f32 %v12735_v58, %v5004_v6  ;;  %v12748_v40 = vld [vmem:[%s14237_s1 + $0x128] sm:$0xff]  ;;  %v12755_v6 = vld [vmem:[%s14237_s1 + $0x130] sm:$0xff] }
 0x369   :  { %5546 = vrot.lane.b32.xlu1 %v5257_v21, %s8632_s16  ;;  %v12719_v41 = vpop.xlane.xlu1 %4882  ;;  %v14852_v21 = vld [vmem:[#allocation153_spill] sm:$0xff] }
 0x36a   :  { %14849 = vst [vmem:[#allocation50_spill] sm:$0xff] %v12719_v41  ;;  %v5006_v57 = vsub.f32 %v11793_v44, %v14852_v21 }
 0x36b   :  { %v12721_v13 = vpop.xlane.xlu0 %4879 }
 0x36c   :  { %14850 = vst [vmem:[#allocation128_spill] sm:$0xff] %v12721_v13  ;;  %5548 = vrot.lane.b32.xlu0 %v5258_v9, %s8632_s16  ;;  %v5261_v9 = vmul.f32 %v12748_v40, %v5005_v31  ;;  %v5262_v44 = vmul.f32 %v12755_v6, %v5006_v57 }
 0x36d   :  { %5550 = vrot.lane.b32.xlu1 %v5259_v39, %s8632_s16  ;;  %v12741_v41 = vpop.xlane.xlu1 %4888 }
 0x36e   :  { %14853 = vst [vmem:[#allocation49_spill] sm:$0xff] %v12741_v41 }
 0x36f   :  { %v12743_v0 = vpop.xlane.xlu0 %4885 }
 0x370   :  { %14854 = vst [vmem:[#allocation131_spill] sm:$0xff] %v12743_v0  ;;  %5552 = vrot.lane.b32.xlu0 %v5260_v5, %s8632_s16 }
 0x371   :  { %5554 = vrot.lane.b32.xlu1 %v5261_v9, %s8632_s16  ;;  %v12759_v39 = vpop.xlane.xlu1 %4894 }
 0x372   :  { %14855 = vst [vmem:[#allocation52_spill] sm:$0xff] %v12759_v39 }
 0x373   :  { %v12761_v43 = vpop.xlane.xlu0 %4891 }
 0x374   :  { %14856 = vst [vmem:[#allocation130_spill] sm:$0xff] %v12761_v43  ;;  %5556 = vrot.lane.b32.xlu0 %v5262_v44, %s8632_s16 }
 0x375   :  { %v12764_v21 = vpop.xlane.xlu1 %4900 }
 0x376   :  { %14857 = vst [vmem:[#allocation51_spill] sm:$0xff] %v12764_v21 }
 0x377   :  { %v12766_v31 = vpop.xlane.xlu0 %4897 }
 0x378   :  { %14858 = vst [vmem:[#allocation133_spill] sm:$0xff] %v12766_v31 }
 0x379   :  { %v12768_v5 = vpop.xlane.xlu1 %4906 }
 0x37a   :  { %14859 = vst [vmem:[#allocation54_spill] sm:$0xff] %v12768_v5 }
 0x37b   :  { %v12770_v41 = vpop.xlane.xlu0 %4903 }
 0x37c   :  { %14860 = vst [vmem:[#allocation132_spill] sm:$0xff] %v12770_v41 }
 0x37d   :  { %v12772_v0 = vpop.xlane.xlu1 %4912 }
 0x37e   :  { %14861 = vst [vmem:[#allocation53_spill] sm:$0xff] %v12772_v0 }
 0x37f   :  { %v12774_v13 = vpop.xlane.xlu0 %4909 }
 0x380   :  { %14862 = vst [vmem:[#allocation135_spill] sm:$0xff] %v12774_v13 }
 0x381   :  { %v12776_v57 = vpop.xlane.xlu1 %4918 }
 0x382   :  { %14863 = vst [vmem:[#allocation56_spill] sm:$0xff] %v12776_v57 }
 0x383   :  { %v12778_v9 = vpop.xlane.xlu0 %4915 }
 0x384   :  { %14864 = vst [vmem:[#allocation134_spill] sm:$0xff] %v12778_v9 }
 0x385   :  { %v12780_v39 = vpop.xlane.xlu1 %4924 }
 0x386   :  { %14865 = vst [vmem:[#allocation55_spill] sm:$0xff] %v12780_v39 }
 0x387   :  { %v12782_v43 = vpop.xlane.xlu0 %4921 }
 0x388   :  { %14866 = vst [vmem:[#allocation137_spill] sm:$0xff] %v12782_v43 }
 0x389   :  { %v12784_v44 = vpop.xlane.xlu1 %4930 }
 0x38a   :  { %14867 = vst [vmem:[#allocation58_spill] sm:$0xff] %v12784_v44 }
 0x38b   :  { %v12786_v21 = vpop.xlane.xlu0 %4927 }
 0x38c   :  { %14868 = vst [vmem:[#allocation136_spill] sm:$0xff] %v12786_v21 }
 0x38d   :  { %v12788_v31 = vpop.xlane.xlu1 %4936 }
 0x38e   :  { %14869 = vst [vmem:[#allocation57_spill] sm:$0xff] %v12788_v31 }
 0x38f   :  { %v12790_v5 = vpop.xlane.xlu0 %4933 }
 0x390   :  { %14870 = vst [vmem:[#allocation139_spill] sm:$0xff] %v12790_v5 }
 0x391   :  { %v12792_v41 = vpop.xlane.xlu1 %4942 }
 0x392   :  { %14871 = vst [vmem:[#allocation138_spill] sm:$0xff] %v12792_v41 }
 0x393   :  { %v12794_v0 = vpop.xlane.xlu0 %4939 }
 0x394   :  { %14872 = vst [vmem:[#allocation59_spill] sm:$0xff] %v12794_v0 }
 0x395   :  { %v12796_v13 = vpop.xlane.xlu1 %4948 }
 0x396   :  { %14873 = vst [vmem:[#allocation140_spill] sm:$0xff] %v12796_v13 }
 0x397   :  { %v12798_v57 = vpop.xlane.xlu0 %4945 }
 0x398   :  { %14874 = vst [vmem:[#allocation61_spill] sm:$0xff] %v12798_v57 }
 0x399   :  { %v12800_v9 = vpop.xlane.xlu1 %4954 }
 0x39a   :  { %14875 = vst [vmem:[#allocation5_spill] sm:$0xff] %v12800_v9 }
 0x39b   :  { %v12802_v39 = vpop.xlane.xlu0 %4951 }
 0x39c   :  { %14876 = vst [vmem:[#allocation60_spill] sm:$0xff] %v12802_v39 }
 0x39d   :  { %v12804_v43 = vpop.xlane.xlu1 %4960 }
 0x39e   :  { %14877 = vst [vmem:[#allocation142_spill] sm:$0xff] %v12804_v43 }
 0x39f   :  { %v12806_v44 = vpop.xlane.xlu0 %4957 }
 0x3a0   :  { %14878 = vst [vmem:[#allocation63_spill] sm:$0xff] %v12806_v44 }
 0x3a1   :  { %v12808_v21 = vpop.xlane.xlu1 %4966 }
 0x3a2   :  { %14879 = vst [vmem:[#allocation7_spill] sm:$0xff] %v12808_v21 }
 0x3a3   :  { %v12810_v31 = vpop.xlane.xlu0 %4963 }
 0x3a4   :  { %14880 = vst [vmem:[#allocation62_spill] sm:$0xff] %v12810_v31 }
 0x3a5   :  { %v5483_v41 = vpop.permute.xlu1 %5482 }
 0x3a6   :  { %v5865_v13 = vsel %vm5097_vm8, %v5483_v41, 0.0  ;;  %vm5112_vm8 = vcmp.gt.f32.partialorder %v12515_v22, 0.0  ;;  %v12924_v22 = vld [vmem:[%s14237_s1 + $0x178] sm:$0xff] }
 0x3a7   :  { %v5481_v0 = vpop.permute.xlu0 %5480  ;;  %6122 = vrot.lane.b32.xlu0 %v5865_v13, %s8633_s11 }
 0x3a8   :  { %v5864_v57 = vsel %vm5096_vm9, %v5481_v0, 0.0  ;;  %vm5113_vm9 = vcmp.gt.f32.partialorder %v12528_v46, 0.0  ;;  %v14898_v46 = vld [vmem:[#allocation26_spill] sm:$0xff] }
 0x3a9   :  { %6120 = vrot.lane.b32.xlu1 %v5864_v57, %s8633_s11  ;;  %v5485_v43 = vpop.permute.xlu1 %5484 }
 0x3aa   :  { %v5866_v44 = vsel %vm5098_vm10, %v5485_v43, 0.0  ;;  %vm5114_vm10 = vcmp.gt.f32.partialorder %v12537_v34, 0.0  ;;  %v12946_v34 = vld [vmem:[%s14237_s1 + $0x188] sm:$0xff] }
 0x3ab   :  { %v5489_v21 = vpop.permute.xlu0 %5488 }
 0x3ac   :  { %v5868_v0 = vsel %vm5100_vm12, %v5489_v21, 0.0  ;;  %v14881_v21 = vld [vmem:[#allocation152_spill] sm:$0xff]  ;;  %vm5116_vm12 = vcmp.gt.f32.partialorder %v12559_v52, 0.0 }
 0x3ad   :  { %6124 = vrot.lane.b32.xlu1 %v5866_v44, %s8633_s11  ;;  %v5487_v37 = vpop.permute.xlu1 %5486  ;;  %v5007_v51 = vsub.f32 %v11791_v32, %v14881_v21  ;;  %v14885_v21 = vld [vmem:[#allocation21_spill] sm:$0xff] }
 0x3ae   :  { %v5867_v42 = vsel %vm5099_vm11, %v5487_v37, 0.0  ;;  %v14882_v37 = vld [vmem:[#allocation19_spill] sm:$0xff]  ;;  %vm5115_vm11 = vcmp.gt.f32.partialorder %v12550_v1, 0.0  ;;  %v14902_v1 = vld [vmem:[#allocation28_spill] sm:$0xff] }
 0x3af   :  { %v5493_v41 = vpop.permute.xlu0 %5492  ;;  %6126 = vrot.lane.b32.xlu0 %v5867_v42, %s8633_s11  ;;  %v5263_v27 = vmul.f32 %v12836_v16, %v5007_v51  ;;  %v5008_v42 = vsub.f32 %v11801_v8, %v14882_v37  ;;  %v5010_v51 = vsub.f32 %v11809_v10, %v14885_v21  ;;  %v12871_v37 = vld [vmem:[%s14237_s1 + $0x150] sm:$0xff]  ;;  %v12893_v21 = vld [vmem:[%s14237_s1 + $0x160] sm:$0xff] }
 0x3b0   :  { %v5870_v43 = vsel %vm5102_vm14, %v5493_v41, 0.0  ;;  %vm5118_vm14 = vcmp.gt.f32.partialorder %v12581_v28, 0.0  ;;  %v12990_v28 = vld [vmem:[%s14237_s1 + $0x1a8] sm:$0xff] }
 0x3b1   :  { %6128 = vrot.lane.b32.xlu1 %v5868_v0, %s8633_s11  ;;  %v5491_v63 = vpop.permute.xlu1 %5490  ;;  %v14884_v0 = vld [vmem:[#allocation64_spill] sm:$0xff] }
 0x3b2   :  { %v5869_v13 = vsel %vm5101_vm13, %v5491_v63, 0.0  ;;  %v5009_v63 = vsub.f32 %v14884_v0, %v14883_v18  ;;  %v14888_v18 = vld [vmem:[#allocation23_spill] sm:$0xff]  ;;  %vm5117_vm13 = vcmp.gt.f32.partialorder %v12572_v23, 0.0 }
 0x3b3   :  { %6130 = vrot.lane.b32.xlu0 %v5869_v13, %s8633_s11  ;;  %v5497_v3 = vpop.permute.xlu0 %5496  ;;  %v12849_v13 = vld [vmem:[%s14237_s1 + $0x140] sm:$0xff]  ;;  %v14889_v0 = vld [vmem:[#allocation67_spill] sm:$0xff] }
 0x3b4   :  { %v5872_v30 = vsel %vm5104_vm0, %v5497_v3, 0.0  ;;  %vm5120_vm0 = vcmp.gt.f32.partialorder %v12603_v35, 0.0 }
 0x3b5   :  { %6132 = vrot.lane.b32.xlu1 %v5870_v43, %s8633_s11  ;;  %v5495_v33 = vpop.permute.xlu1 %5494  ;;  %v5264_v43 = vmul.f32 %v12849_v13, %v5008_v42  ;;  %v5266_v42 = vmul.f32 %v12871_v37, %v5010_v51 }
 0x3b6   :  { %v5871_v57 = vsel %vm5103_vm15, %v5495_v33, 0.0  ;;  %v5265_v33 = vmul.f32 %v12858_v24, %v5009_v63  ;;  %v5012_v63 = vsub.f32 %v14889_v0, %v14888_v18  ;;  %v12915_v0 = vld [vmem:[%s14237_s1 + $0x170] sm:$0xff]  ;;  %vm5119_vm15 = vcmp.gt.f32.partialorder %v12594_v45, 0.0 }
 0x3b7   :  { %6134 = vrot.lane.b32.xlu0 %v5871_v57, %s8633_s11  ;;  %v5501_v41 = vpop.permute.xlu0 %5500 }
 0x3b8   :  { %v5874_v3 = vsel %vm5106_vm2, %v5501_v41, 0.0  ;;  %v5268_v51 = vmul.f32 %v12893_v21, %v5012_v63  ;;  %vm5122_vm2 = vcmp.gt.f32.partialorder %v12625_v20, 0.0 }
 0x3b9   :  { %6136 = vrot.lane.b32.xlu1 %v5872_v30, %s8633_s11  ;;  %v5499_v44 = vpop.permute.xlu1 %5498 }
 0x3ba   :  { %v5873_v32 = vsel %vm5105_vm1, %v5499_v44, 0.0  ;;  %v14887_v44 = vld [vmem:[#allocation65_spill] sm:$0xff]  ;;  %vm5121_vm1 = vcmp.gt.f32.partialorder %v12616_v17, 0.0  ;;  %v14914_v17 = vld [vmem:[#allocation32_spill] sm:$0xff] }
 0x3bb   :  { %6138 = vrot.lane.b32.xlu0 %v5873_v32, %s8633_s11  ;;  %v5505_v30 = vpop.permute.xlu0 %5504 }
 0x3bc   :  { %v5876_v32 = vsel %vm5108_vm4, %v5505_v30, 0.0  ;;  %vm5124_vm4 = vcmp.gt.f32.partialorder %v12647_v11, 0.0  ;;  %v13056_v11 = vld [vmem:[%s14237_s1 + $0x1d8] sm:$0xff] }
 0x3bd   :  { %5558 = vrot.lane.b32.xlu1 %v5263_v27, %s8632_s16  ;;  %v5503_v8 = vpop.permute.xlu1 %5502  ;;  %v5011_v27 = vsub.f32 %v14887_v44, %v14886_v7  ;;  %v14892_v44 = vld [vmem:[#allocation25_spill] sm:$0xff] }
 0x3be   :  { %v5875_v57 = vsel %vm5107_vm3, %v5503_v8, 0.0  ;;  %v14891_v8 = vld [vmem:[#allocation66_spill] sm:$0xff]  ;;  %vm5123_vm3 = vcmp.gt.f32.partialorder %v12638_v60, 0.0 }
 0x3bf   :  { %6140 = vrot.lane.b32.xlu0 %v5874_v3, %s8633_s11  ;;  %v5267_v41 = vmul.f32 %v12880_v19, %v5011_v27  ;;  %v5509_v3 = vpop.permute.xlu0 %5508  ;;  %v14893_v27 = vld [vmem:[#allocation69_spill] sm:$0xff] }
 0x3c1   :  { %5560 = vrot.lane.b32.xlu1 %v5264_v43, %s8632_s16  ;;  %v5507_v10 = vpop.permute.xlu1 %5506 }
 0x3c2   :  { %v5877_v43 = vsel %vm5109_vm5, %v5507_v10, 0.0  ;;  %vm5125_vm5 = vcmp.gt.f32.partialorder %v12660_v54, 0.0 }
 0x3c3   :  { %6142 = vrot.lane.b32.xlu0 %v5875_v57, %s8633_s11  ;;  %v5878_v57 = vsel %vm5110_vm6, %v5509_v3, 0.0  ;;  %v5513_v10 = vpop.permute.xlu0 %5512  ;;  %vm5126_vm6 = vcmp.gt.f32.partialorder %v12669_v47, 0.0 }
 0x3c5   :  { %5562 = vrot.lane.b32.xlu1 %v5265_v33, %s8632_s16  ;;  %v5013_v33 = vsub.f32 %v14891_v8, %v14890_v12  ;;  %v5511_v30 = vpop.permute.xlu1 %5510  ;;  %v14896_v8 = vld [vmem:[#allocation27_spill] sm:$0xff] }
 0x3c7   :  { %6144 = vrot.lane.b32.xlu0 %v5876_v32, %s8633_s11  ;;  %v5269_v7 = vmul.f32 %v12902_v53, %v5013_v33  ;;  %v5879_v32 = vsel %vm5111_vm7, %v5511_v30, 0.0  ;;  %v14897_v33 = vld [vmem:[#allocation71_spill] sm:$0xff]  ;;  %v5517_v30 = vpop.permute.xlu0 %5516  ;;  %vm5127_vm7 = vcmp.gt.f32.partialorder %v12682_v61, 0.0  ;;  %v14926_v61 = vld [vmem:[#allocation38_spill] sm:$0xff] }
 0x3c9   :  { %5564 = vrot.lane.b32.xlu1 %v5266_v42, %s8632_s16  ;;  %v5014_v42 = vsub.f32 %v14893_v27, %v14892_v44  ;;  %v5515_v3 = vpop.permute.xlu1 %5514  ;;  %v12937_v27 = vld [vmem:[%s14237_s1 + $0x180] sm:$0xff] }
 0x3cb   :  { %6146 = vrot.lane.b32.xlu0 %v5877_v43, %s8633_s11  ;;  %v5270_v63 = vmul.f32 %v12915_v0, %v5014_v42  ;;  %v5880_v43 = vsel %vm5112_vm8, %v5513_v10, 0.0  ;;  %vm5128_vm8 = vcmp.gt.f32.partialorder %v12691_v48, 0.0 }
 0x3cd   :  { %5566 = vrot.lane.b32.xlu1 %v5267_v41, %s8632_s16  ;;  %v14895_v41 = vld [vmem:[#allocation68_spill] sm:$0xff]  ;;  %v5519_v10 = vpop.permute.xlu1 %5518 }
 0x3ce   :  { %v5015_v18 = vsub.f32 %v14895_v41, %v14894_v49  ;;  %v14900_v41 = vld [vmem:[#allocation3_spill] sm:$0xff] }
 0x3cf   :  { %6148 = vrot.lane.b32.xlu0 %v5878_v57, %s8633_s11  ;;  %v5881_v57 = vsel %vm5113_vm9, %v5515_v3, 0.0  ;;  %v5521_v3 = vpop.permute.xlu0 %5520  ;;  %vm5129_vm9 = vcmp.gt.f32.partialorder %v12704_v26, 0.0 }
 0x3d0   :  { %v5271_v12 = vmul.f32 %v12924_v22, %v5015_v18  ;;  %v14901_v18 = vld [vmem:[#allocation73_spill] sm:$0xff] }
 0x3d1   :  { %5568 = vrot.lane.b32.xlu1 %v5268_v51, %s8632_s16  ;;  %v5016_v51 = vsub.f32 %v14897_v33, %v14896_v8  ;;  %v12959_v33 = vld [vmem:[%s14237_s1 + $0x190] sm:$0xff] }
 0x3d3   :  { %6150 = vrot.lane.b32.xlu0 %v5879_v32, %s8633_s11  ;;  %v5272_v42 = vmul.f32 %v12937_v27, %v5016_v51  ;;  %v5882_v32 = vsel %vm5114_vm10, %v5517_v30, 0.0  ;;  %v5523_v30 = vpop.permute.xlu1 %5522  ;;  %v5525_v52 = vpop.permute.xlu0 %5524  ;;  %vm5130_vm10 = vcmp.gt.f32.partialorder %v12713_v29, 0.0 }
 0x3d5   :  { %5570 = vrot.lane.b32.xlu1 %v5269_v7, %s8632_s16  ;;  %v14899_v7 = vld [vmem:[#allocation70_spill] sm:$0xff] }
 0x3d6   :  { %v5017_v44 = vsub.f32 %v14899_v7, %v14898_v46  ;;  %v12968_v46 = vld [vmem:[%s14237_s1 + $0x198] sm:$0xff] }
 0x3d7   :  { %6152 = vrot.lane.b32.xlu0 %v5880_v43, %s8633_s11  ;;  %v5883_v43 = vsel %vm5115_vm11, %v5519_v10, 0.0  ;;  %v5885_v10 = vsel %vm5117_vm13, %v5523_v30, 0.0  ;;  %v5527_v23 = vpop.permute.xlu1 %5526  ;;  %vm5131_vm11 = vcmp.gt.f32.partialorder %v12726_v50, 0.0  ;;  %vm5133_vm13 = vcmp.gt.f32.partialorder %v12748_v40, 0.0 }
 0x3d8   :  { %v5273_v49 = vmul.f32 %v12946_v34, %v5017_v44  ;;  %v14904_v44 = vld [vmem:[#allocation29_spill] sm:$0xff]  ;;  %v5887_v30 = vsel %vm5119_vm15, %v5527_v23, 0.0  ;;  %vm5135_vm15 = vcmp.gt.f32.partialorder %v12836_v16, 0.0 }
 0x3d9   :  { %5572 = vrot.lane.b32.xlu1 %v5270_v63, %s8632_s16  ;;  %v5018_v63 = vsub.f32 %v14901_v18, %v14900_v41  ;;  %v14907_v41 = vld [vmem:[#allocation74_spill] sm:$0xff]  ;;  %v13012_v23 = vld [vmem:[%s14237_s1 + $0x1b8] sm:$0xff] }
 0x3db   :  { %6154 = vrot.lane.b32.xlu0 %v5881_v57, %s8633_s11  ;;  %v5274_v51 = vmul.f32 %v12959_v33, %v5018_v63  ;;  %v5884_v57 = vsel %vm5116_vm12, %v5521_v3, 0.0  ;;  %v12981_v63 = vld [vmem:[%s14237_s1 + $0x1a0] sm:$0xff]  ;;  %v5886_v3 = vsel %vm5118_vm14, %v5525_v52, 0.0  ;;  %vm5132_vm12 = vcmp.gt.f32.partialorder %v12735_v58, 0.0 }
 0x3dc   :  { %v14910_v52 = vld [vmem:[#allocation30_spill] sm:$0xff]  ;;  %vm5134_vm14 = vcmp.gt.f32.partialorder %v12755_v6, 0.0 }
 0x3dd   :  { %5574 = vrot.lane.b32.xlu1 %v5271_v12, %s8632_s16  ;;  %v14903_v12 = vld [vmem:[#allocation72_spill] sm:$0xff] }
 0x3de   :  { %v5019_v8 = vsub.f32 %v14903_v12, %v14902_v1  ;;  %v5529_v1 = vpop.permute.xlu0 %5528 }
 0x3df   :  { %6156 = vrot.lane.b32.xlu0 %v5882_v32, %s8633_s11 }
 0x3e0   :  { %v5275_v7 = vmul.f32 %v12968_v46, %v5019_v8  ;;  %v14908_v8 = vld [vmem:[#allocation31_spill] sm:$0xff] }
 0x3e1   :  { %5576 = vrot.lane.b32.xlu1 %v5272_v42, %s8632_s16  ;;  %v14905_v42 = vld [vmem:[#allocation85_spill] sm:$0xff] }
 0x3e2   :  { %v5020_v32 = vsub.f32 %v14905_v42, %v14904_v44  ;;  %v5533_v45 = vpop.permute.xlu0 %5532  ;;  %v14911_v44 = vld [vmem:[#allocation90_spill] sm:$0xff] }
 0x3e3   :  { %6158 = vrot.lane.b32.xlu0 %v5883_v43, %s8633_s11  ;;  %v5023_v42 = vsub.f32 %v14911_v44, %v14910_v52  ;;  %v5890_v52 = vsel %vm5122_vm2, %v5533_v45, 0.0  ;;  %v14918_v45 = vld [vmem:[#allocation34_spill] sm:$0xff]  ;;  %vm5138_vm2 = vcmp.gt.f32.partialorder %v12871_v37, 0.0 }
 0x3e4   :  { %v5276_v43 = vmul.f32 %v12981_v63, %v5020_v32  ;;  %v13003_v32 = vld [vmem:[%s14237_s1 + $0x1b0] sm:$0xff] }
 0x3e5   :  { %5578 = vrot.lane.b32.xlu1 %v5273_v49, %s8632_s16  ;;  %v14906_v49 = vld [vmem:[#allocation2_spill] sm:$0xff] }
 0x3e6   :  { %v5021_v18 = vsub.f32 %v14907_v41, %v14906_v49  ;;  %v5888_v49 = vsel %vm5120_vm0, %v5529_v1, 0.0  ;;  %v5279_v41 = vmul.f32 %v13012_v23, %v5023_v42  ;;  %v5537_v1 = vpop.permute.xlu0 %5536  ;;  %vm5136_vm0 = vcmp.gt.f32.partialorder %v12849_v13, 0.0 }
 0x3e7   :  { %6160 = vrot.lane.b32.xlu0 %v5884_v57, %s8633_s11 }
 0x3e8   :  { %v5277_v12 = vmul.f32 %v12990_v28, %v5021_v18  ;;  %v14912_v18 = vld [vmem:[#allocation33_spill] sm:$0xff] }
 0x3e9   :  { %5580 = vrot.lane.b32.xlu1 %v5274_v51, %s8632_s16  ;;  %v14909_v51 = vld [vmem:[#allocation93_spill] sm:$0xff] }
 0x3ea   :  { %v5022_v57 = vsub.f32 %v14909_v51, %v14908_v8  ;;  %v14915_v8 = vld [vmem:[#allocation94_spill] sm:$0xff]  ;;  %v5541_v20 = vpop.permute.xlu0 %5540 }
 0x3eb   :  { %6162 = vrot.lane.b32.xlu0 %v5885_v10, %s8633_s11  ;;  %v5025_v51 = vsub.f32 %v14915_v8, %v14914_v17  ;;  %v5892_v8 = vsel %vm5124_vm4, %v5537_v1, 0.0  ;;  %v14922_v1 = vld [vmem:[#allocation36_spill] sm:$0xff]  ;;  %vm5140_vm4 = vcmp.gt.f32.partialorder %v12893_v21, 0.0 }
 0x3ec   :  { %v5278_v10 = vmul.f32 %v13003_v32, %v5022_v57  ;;  %v13025_v57 = vld [vmem:[%s14237_s1 + $0x1c0] sm:$0xff] }
 0x3ed   :  { %5582 = vrot.lane.b32.xlu1 %v5275_v7, %s8632_s16  ;;  %v5531_v7 = vpop.permute.xlu1 %5530 }
 0x3ef   :  { %6164 = vrot.lane.b32.xlu0 %v5886_v3, %s8633_s11 }
 0x3f1   :  { %5584 = vrot.lane.b32.xlu1 %v5276_v43, %s8632_s16  ;;  %v5535_v35 = vpop.permute.xlu1 %5534  ;;  %v14913_v43 = vld [vmem:[#allocation97_spill] sm:$0xff] }
 0x3f2   :  { %v5024_v3 = vsub.f32 %v14913_v43, %v14912_v18  ;;  %v5891_v18 = vsel %vm5123_vm3, %v5535_v35, 0.0  ;;  %v14919_v43 = vld [vmem:[#allocation98_spill] sm:$0xff]  ;;  %v5545_v35 = vpop.permute.xlu0 %5544  ;;  %vm5139_vm3 = vcmp.gt.f32.partialorder %v12880_v19, 0.0 }
 0x3f3   :  { %6166 = vrot.lane.b32.xlu0 %v5887_v30, %s8633_s11 }
 0x3f4   :  { %v5280_v30 = vmul.f32 %v13025_v57, %v5024_v3  ;;  %v5027_v3 = vsub.f32 %v14919_v43, %v14918_v45  ;;  %v13069_v45 = vld [vmem:[%s14237_s1 + $0x1e0] sm:$0xff] }
 0x3f5   :  { %5586 = vrot.lane.b32.xlu1 %v5277_v12, %s8632_s16  ;;  %v5889_v12 = vsel %vm5121_vm1, %v5531_v7, 0.0  ;;  %v5539_v44 = vpop.permute.xlu1 %5538  ;;  %v13034_v7 = vld [vmem:[%s14237_s1 + $0x1c8] sm:$0xff]  ;;  %vm5137_vm1 = vcmp.gt.f32.partialorder %v12858_v24, 0.0 }
 0x3f6   :  { %v5281_v42 = vmul.f32 %v13034_v7, %v5025_v51  ;;  %v5283_v51 = vmul.f32 %v13056_v11, %v5027_v3  ;;  %v5549_v54 = vpop.permute.xlu0 %5548  ;;  %v5894_v3 = vsel %vm5126_vm6, %v5541_v20, 0.0  ;;  %vm5142_vm6 = vcmp.gt.f32.partialorder %v12915_v0, 0.0 }
 0x3f7   :  { %6168 = vrot.lane.b32.xlu0 %v5888_v49, %s8633_s11  ;;  %v14917_v49 = vld [vmem:[#allocation75_spill] sm:$0xff] }
 0x3f9   :  { %5588 = vrot.lane.b32.xlu1 %v5278_v10, %s8632_s16  ;;  %v14916_v10 = vld [vmem:[#allocation35_spill] sm:$0xff]  ;;  %v5543_v60 = vpop.permute.xlu1 %5542 }
 0x3fa   :  { %v5553_v20 = vpop.permute.xlu0 %5552 }
 0x3fb   :  { %6170 = vrot.lane.b32.xlu0 %v5889_v12, %s8633_s11  ;;  %v13047_v12 = vld [vmem:[%s14237_s1 + $0x1d0] sm:$0xff] }
 0x3fd   :  { %5590 = vrot.lane.b32.xlu1 %v5279_v41, %s8632_s16  ;;  %v5026_v41 = vsub.f32 %v14917_v49, %v14916_v10  ;;  %v5893_v10 = vsel %vm5125_vm5, %v5539_v44, 0.0  ;;  %v5547_v49 = vpop.permute.xlu1 %5546  ;;  %v13078_v44 = vld [vmem:[%s14237_s1 + $0x1e8] sm:$0xff]  ;;  %vm5141_vm5 = vcmp.gt.f32.partialorder %v12902_v53, 0.0 }
 0x3fe   :  { %v5557_v48 = vpop.permute.xlu0 %5556 }
 0x3ff   :  { %6172 = vrot.lane.b32.xlu0 %v5890_v52, %s8633_s11  ;;  %v5282_v17 = vmul.f32 %v13047_v12, %v5026_v41  ;;  %v14921_v52 = vld [vmem:[#allocation101_spill] sm:$0xff]  ;;  %v14923_v41 = vld [vmem:[#allocation76_spill] sm:$0xff] }
 0x401   :  { %5592 = vrot.lane.b32.xlu1 %v5280_v30, %s8632_s16  ;;  %v14920_v30 = vld [vmem:[#allocation37_spill] sm:$0xff]  ;;  %v5551_v47 = vpop.permute.xlu1 %5550 }
 0x403   :  { %6174 = vrot.lane.b32.xlu0 %v5891_v18, %s8633_s11  ;;  %v5029_v18 = vsub.f32 %v14923_v41, %v14922_v1  ;;  %v13091_v1 = vld [vmem:[%s14237_s1 + $0x1f0] sm:$0xff] }
 0x405   :  { %5594 = vrot.lane.b32.xlu1 %v5281_v42, %s8632_s16  ;;  %v5028_v42 = vsub.f32 %v14921_v52, %v14920_v30  ;;  %v5895_v52 = vsel %vm5127_vm7, %v5543_v60, 0.0  ;;  %v13100_v60 = vld [vmem:[%s14237_s1 + $0x1f8] sm:$0xff]  ;;  %vm5143_vm7 = vcmp.gt.f32.partialorder %v12924_v22, 0.0 }
 0x407   :  { %6176 = vrot.lane.b32.xlu0 %v5892_v8, %s8633_s11  ;;  %v5284_v43 = vmul.f32 %v13069_v45, %v5028_v42  ;;  %v14924_v8 = vld [vmem:[#allocation39_spill] sm:$0xff]  ;;  %v14927_v42 = vld [vmem:[#allocation102_spill] sm:$0xff] }
 0x409   :  { %5596 = vrot.lane.b32.xlu1 %v5282_v17, %s8632_s16  ;;  %v5285_v17 = vmul.f32 %v13078_v44, %v5029_v18  ;;  %v5896_v18 = vsel %vm5128_vm8, %v5545_v35, 0.0  ;;  %vm5144_vm8 = vcmp.gt.f32.partialorder %v12937_v27, 0.0 }
 0x40b   :  { %6178 = vrot.lane.b32.xlu0 %v5893_v10, %s8633_s11  ;;  %v5031_v10 = vsub.f32 %v14927_v42, %v14926_v61  ;;  %v13117_v61 = vld [vmem:[%s14237_s1 + $0x200] sm:$0xff] }
 0x40d   :  { %5598 = vrot.lane.b32.xlu1 %v5283_v51, %s8632_s16  ;;  %v14925_v51 = vld [vmem:[#allocation77_spill] sm:$0xff] }
 0x40e   :  { %v5030_v30 = vsub.f32 %v14925_v51, %v14924_v8  ;;  %v5897_v51 = vsel %vm5129_vm9, %v5547_v49, 0.0  ;;  %v5898_v49 = vsel %vm5130_vm10, %v5549_v54, 0.0  ;;  %vm5145_vm9 = vcmp.gt.f32.partialorder %v12946_v34, 0.0 }
 0x40f   :  { %6180 = vrot.lane.b32.xlu0 %v5894_v3, %s8633_s11  ;;  %v5287_v3 = vmul.f32 %v13100_v60, %v5031_v10  ;;  %vm5146_vm10 = vcmp.gt.f32.partialorder %v12959_v33, 0.0 }
 0x410   :  { %v5286_v41 = vmul.f32 %v13091_v1, %v5030_v30  ;;  %v14929_v30 = vld [vmem:[#allocation105_spill] sm:$0xff] }
 0x411   :  { %5600 = vrot.lane.b32.xlu1 %v5284_v43, %s8632_s16  ;;  %v5555_v43 = vpop.permute.xlu1 %5554 }
 0x413   :  { %6182 = vrot.lane.b32.xlu0 %v5895_v52, %s8633_s11  ;;  %v5033_v52 = vsub.f32 %v14929_v30, %v12346_v55  ;;  %v13130_v55 = vld [vmem:[%s14237_s1 + $0x208] sm:$0xff] }
 0x415   :  { %5602 = vrot.lane.b32.xlu1 %v5285_v17, %s8632_s16  ;;  %v14928_v17 = vld [vmem:[#allocation78_spill] sm:$0xff]  ;;  %v5289_v10 = vmul.f32 %v13130_v55, %v5033_v52 }
 0x416   :  { %v5032_v8 = vsub.f32 %v14928_v17, %v12348_v38  ;;  %v14931_v17 = vld [vmem:[#allocation106_spill] sm:$0xff] }
 0x417   :  { %6184 = vrot.lane.b32.xlu0 %v5896_v18, %s8633_s11  ;;  %v5899_v18 = vsel %vm5131_vm11, %v5551_v47, 0.0  ;;  %v5900_v47 = vsel %vm5132_vm12, %v5553_v20, 0.0  ;;  %vm5147_vm11 = vcmp.gt.f32.partialorder %v12968_v46, 0.0  ;;  %vm5148_vm12 = vcmp.gt.f32.partialorder %v12981_v63, 0.0 }
 0x418   :  { %v5288_v38 = vmul.f32 %v13117_v61, %v5032_v8  ;;  %v5035_v8 = vsub.f32 %v14931_v17, %v12367_v2  ;;  %v13160_v2 = vld [vmem:[%s14237_s1 + $0x218] sm:$0xff] }
 0x419   :  { %5604 = vrot.lane.b32.xlu1 %v5286_v41, %s8632_s16  ;;  %v13110_v26 = vpop.permute.xlu0 %6122  ;;  %v14930_v41 = vld [vmem:[#allocation79_spill] sm:$0xff] }
 0x41a   :  { %v5034_v54 = vsub.f32 %v14930_v41, %v12369_v25  ;;  %v5291_v52 = vmul.f32 %v13160_v2, %v5035_v8  ;;  %v14933_v41 = vld [vmem:[#allocation109_spill] sm:$0xff] }
 0x41b   :  { %v13105_v35 = vpop.permute.xlu1 %6120  ;;  %6186 = vrot.lane.b32.xlu0 %v5897_v51, %s8633_s11  ;;  %v13147_v51 = vld [vmem:[%s14237_s1 + $0x210] sm:$0xff] }
 0x41c   :  { %v5290_v25 = vmul.f32 %v13147_v51, %v5034_v54  ;;  %v5037_v54 = vsub.f32 %v14933_v41, %v12389_v36  ;;  %v13188_v36 = vld [vmem:[%s14237_s1 + $0x228] sm:$0xff] }
 0x41d   :  { %5606 = vrot.lane.b32.xlu1 %v5287_v3, %s8632_s16 }
 0x41e   :  { %v5293_v8 = vmul.f32 %v13188_v36, %v5037_v54 }
 0x41f   :  { %v13120_v42 = vpop.permute.xlu1 %6124  ;;  %6188 = vrot.lane.b32.xlu0 %v5898_v49, %s8633_s11  ;;  %v5901_v49 = vsel %vm5133_vm13, %v5555_v43, 0.0  ;;  %v5902_v43 = vsel %vm5134_vm14, %v5557_v48, 0.0  ;;  %vm5149_vm13 = vcmp.gt.f32.partialorder %v12990_v28, 0.0  ;;  %vm5150_vm14 = vcmp.gt.f32.partialorder %v13003_v32, 0.0 }
 0x421   :  { %5608 = vrot.lane.b32.xlu1 %v5288_v38, %s8632_s16  ;;  %v13125_v29 = vpop.permute.xlu0 %6126  ;;  %v14932_v38 = vld [vmem:[#allocation80_spill] sm:$0xff] }
 0x422   :  { %v5036_v20 = vsub.f32 %v14932_v38, %v12391_v56  ;;  %v14935_v38 = vld [vmem:[#allocation110_spill] sm:$0xff] }
 0x423   :  { %v13135_v3 = vpop.permute.xlu1 %6128  ;;  %6190 = vrot.lane.b32.xlu0 %v5899_v18, %s8633_s11  ;;  %v13177_v18 = vld [vmem:[%s14237_s1 + $0x220] sm:$0xff] }
 0x424   :  { %v5292_v56 = vmul.f32 %v13177_v18, %v5036_v20  ;;  %v5039_v20 = vsub.f32 %v14935_v38, %v12411_v15  ;;  %v13214_v15 = vld [vmem:[%s14237_s1 + $0x238] sm:$0xff] }
 0x425   :  { %5610 = vrot.lane.b32.xlu1 %v5289_v10, %s8632_s16  ;;  %v13140_v50 = vpop.permute.xlu0 %6130 }
 0x427   :  { %v13150_v30 = vpop.permute.xlu1 %6132  ;;  %6192 = vrot.lane.b32.xlu0 %v5900_v47, %s8633_s11 }
 0x429   :  { %5612 = vrot.lane.b32.xlu1 %v5290_v25, %s8632_s16  ;;  %v13155_v58 = vpop.permute.xlu0 %6134  ;;  %v14934_v25 = vld [vmem:[#allocation81_spill] sm:$0xff] }
 0x42a   :  { %v5038_v47 = vsub.f32 %v14934_v25, %v12413_v59 }
 0x42b   :  { %v13165_v10 = vpop.permute.xlu1 %6136  ;;  %6194 = vrot.lane.b32.xlu0 %v5901_v49, %s8633_s11  ;;  %v13203_v49 = vld [vmem:[%s14237_s1 + $0x230] sm:$0xff] }
 0x42c   :  { %v5294_v59 = vmul.f32 %v13203_v49, %v5038_v47  ;;  %v14937_v47 = vld [vmem:[#allocation82_spill] sm:$0xff] }
 0x42d   :  { %5614 = vrot.lane.b32.xlu1 %v5291_v52, %s8632_s16  ;;  %v13170_v40 = vpop.permute.xlu0 %6138 }
 0x42f   :  { %v5559_v17 = vpop.permute.xlu1 %5558  ;;  %6196 = vrot.lane.b32.xlu0 %v5902_v43, %s8633_s11  ;;  %v14936_v43 = vld [vmem:[#allocation83_spill] sm:$0xff] }
 0x430   :  { %v5903_v48 = vsel %vm5135_vm15, %v5559_v17, 0.0  ;;  %v5040_v17 = vsub.f32 %v14936_v43, %v12435_v62  ;;  %vm5151_vm15 = vcmp.gt.f32.partialorder %v13012_v23, 0.0 }
 0x431   :  { %5616 = vrot.lane.b32.xlu1 %v5292_v56, %s8632_s16  ;;  %v13183_v6 = vpop.permute.xlu0 %6140  ;;  %v5295_v56 = vmul.f32 %v13214_v15, %v5039_v20 }
 0x433   :  { %v5561_v52 = vpop.permute.xlu1 %5560  ;;  %6198 = vrot.lane.b32.xlu0 %v5903_v48, %s8633_s11  ;;  %v5041_v48 = vsub.f32 %v14937_v47, %v12433_v4  ;;  %v13240_v4 = vld [vmem:[%s14237_s1 + $0x248] sm:$0xff]  ;;  %v13255_v47 = vld [vmem:[%s14237_s1 + $0x250] sm:$0xff] }
 0x434   :  { %v5904_v41 = vsel %vm5136_vm0, %v5561_v52, 0.0  ;;  %v13229_v52 = vld [vmem:[%s14237_s1 + $0x240] sm:$0xff]  ;;  %vm5152_vm0 = vcmp.gt.f32.partialorder %v13025_v57, 0.0 }
 0x435   :  { %5618 = vrot.lane.b32.xlu1 %v5293_v8, %s8632_s16  ;;  %v13196_v16 = vpop.permute.xlu0 %6142  ;;  %v5296_v62 = vmul.f32 %v13229_v52, %v5040_v17  ;;  %v14939_v17 = vld [vmem:[#allocation117_spill] sm:$0xff] }
 0x437   :  { %v5563_v54 = vpop.permute.xlu1 %5562  ;;  %6200 = vrot.lane.b32.xlu0 %v5904_v41, %s8633_s11  ;;  %v14938_v41 = vld [vmem:[#allocation86_spill] sm:$0xff] }
 0x438   :  { %v5905_v8 = vsel %vm5137_vm1, %v5563_v54, 0.0  ;;  %v5042_v54 = vsub.f32 %v14938_v41, %v12457_v14  ;;  %v14942_v41 = vld [vmem:[#allocation88_spill] sm:$0xff]  ;;  %vm5153_vm1 = vcmp.gt.f32.partialorder %v13034_v7, 0.0 }
 0x439   :  { %5620 = vrot.lane.b32.xlu1 %v5294_v59, %s8632_s16  ;;  %v13209_v13 = vpop.permute.xlu0 %6144  ;;  %v5297_v59 = vmul.f32 %v13240_v4, %v5041_v48 }
 0x43a   :  { %v5298_v14 = vmul.f32 %v13255_v47, %v5042_v54 }
 0x43b   :  { %v5565_v25 = vpop.permute.xlu1 %5564  ;;  %6202 = vrot.lane.b32.xlu0 %v5905_v8, %s8633_s11  ;;  %v14940_v8 = vld [vmem:[#allocation84_spill] sm:$0xff] }
 0x43c   :  { %v5906_v38 = vsel %vm5138_vm2, %v5565_v25, 0.0  ;;  %v5043_v25 = vsub.f32 %v14940_v8, %v14939_v17  ;;  %v14943_v17 = vld [vmem:[#allocation114_spill] sm:$0xff]  ;;  %v14944_v8 = vld [vmem:[#allocation87_spill] sm:$0xff]  ;;  %vm5154_vm2 = vcmp.gt.f32.partialorder %v13047_v12, 0.0 }
 0x43d   :  { %5622 = vrot.lane.b32.xlu1 %v5295_v56, %s8632_s16  ;;  %v13222_v24 = vpop.permute.xlu0 %6146 }
 0x43f   :  { %v5567_v20 = vpop.permute.xlu1 %5566  ;;  %6204 = vrot.lane.b32.xlu0 %v5906_v38, %s8633_s11  ;;  %v13266_v38 = vld [vmem:[%s14237_s1 + $0x258] sm:$0xff] }
 0x440   :  { %v5907_v56 = vsel %vm5139_vm3, %v5567_v20, 0.0  ;;  %v5299_v20 = vmul.f32 %v13266_v38, %v5043_v25  ;;  %v13281_v25 = vld [vmem:[%s14237_s1 + $0x260] sm:$0xff]  ;;  %vm6504_vm3 = vcmask 7168  }
 0x441   :  { %5624 = vrot.lane.b32.xlu1 %v5296_v62, %s8632_s16  ;;  %v13235_v37 = vpop.permute.xlu0 %6148  ;;  %v6506_v12 = vsel %vm6504_vm3, %v13110_v26, 0.0  ;;  %v6508_v26 = vsel %vm6504_vm3, %v13120_v42, 0.0 }
 0x443   :  { %v5569_v43 = vpop.permute.xlu1 %5568  ;;  %6206 = vrot.lane.b32.xlu0 %v5907_v56, %s8633_s11 }
 0x444   :  { %v5908_v48 = vsel %vm5140_vm4, %v5569_v43, 0.0  ;;  %vm5155_vm4 = vcmp.gt.f32.partialorder %v13056_v11, 0.0  ;;  %v14980_v11 = vld [vmem:[#allocation124_spill] sm:$0xff] }
 0x445   :  { %5626 = vrot.lane.b32.xlu1 %v5297_v59, %s8632_s16  ;;  %v13248_v19 = vpop.permute.xlu0 %6150  ;;  %v14941_v59 = vld [vmem:[#allocation116_spill] sm:$0xff] }
 0x446   :  { %v5044_v54 = vsub.f32 %v14942_v41, %v14941_v59 }
 0x447   :  { %v5571_v62 = vpop.permute.xlu1 %5570  ;;  %6208 = vrot.lane.b32.xlu0 %v5908_v48, %s8633_s11 }
 0x448   :  { %v5909_v56 = vsel %vm5141_vm5, %v5571_v62, 0.0  ;;  %v5300_v48 = vmul.f32 %v13281_v25, %v5044_v54  ;;  %vm5156_vm5 = vcmp.gt.f32.partialorder %v13069_v45, 0.0  ;;  %v6510_v45 = vsel %vm6504_vm3, %v13125_v29, 0.0  ;;  %v14985_v29 = vld [vmem:[#allocation155_spill] sm:$0xff] }
 0x449   :  { %5628 = vrot.lane.b32.xlu1 %v5298_v14, %s8632_s16  ;;  %v13261_v21 = vpop.permute.xlu0 %6152  ;;  %v5045_v14 = vsub.f32 %v14944_v8, %v14943_v17  ;;  %v14946_v17 = vld [vmem:[#allocation91_spill] sm:$0xff] }
 0x44b   :  { %v5573_v43 = vpop.permute.xlu1 %5572  ;;  %6210 = vrot.lane.b32.xlu0 %v5909_v56, %s8633_s11  ;;  %v14945_v56 = vld [vmem:[#allocation118_spill] sm:$0xff] }
 0x44c   :  { %v5910_v62 = vsel %vm5142_vm6, %v5573_v43, 0.0  ;;  %v5046_v54 = vsub.f32 %v14946_v17, %v14945_v56  ;;  %vm5157_vm6 = vcmp.gt.f32.partialorder %v13078_v44, 0.0  ;;  %v6512_v44 = vsel %vm6504_vm3, %v13135_v3, 0.0 }
 0x44d   :  { %5630 = vrot.lane.b32.xlu1 %v5299_v20, %s8632_s16  ;;  %v13274_v53 = vpop.permute.xlu0 %6154  ;;  %v13292_v20 = vld [vmem:[%s14237_s1 + $0x268] sm:$0xff] }
 0x44e   :  { %v5301_v41 = vmul.f32 %v13292_v20, %v5045_v14  ;;  %v13307_v14 = vld [vmem:[%s14237_s1 + $0x270] sm:$0xff] }
 0x44f   :  { %v5575_v59 = vpop.permute.xlu1 %5574  ;;  %6212 = vrot.lane.b32.xlu0 %v5910_v62, %s8633_s11  ;;  %v14948_v62 = vld [vmem:[#allocation89_spill] sm:$0xff]  ;;  %v5302_v56 = vmul.f32 %v13307_v14, %v5046_v54 }
 0x450   :  { %v5911_v43 = vsel %vm5143_vm7, %v5575_v59, 0.0  ;;  %vm5158_vm7 = vcmp.gt.f32.partialorder %v13091_v1, 0.0  ;;  %v6514_v1 = vsel %vm6504_vm3, %v13140_v50, 0.0  ;;  %v14989_v50 = vld [vmem:[#allocation157_spill] sm:$0xff] }
 0x451   :  { %5632 = vrot.lane.b32.xlu1 %v5300_v48, %s8632_s16  ;;  %v13287_v0 = vpop.permute.xlu0 %6156  ;;  %v14947_v48 = vld [vmem:[#allocation119_spill] sm:$0xff] }
 0x452   :  { %v5047_v31 = vsub.f32 %v14948_v62, %v14947_v48  ;;  %v14950_v48 = vld [vmem:[#allocation121_spill] sm:$0xff]  ;;  %v14951_v62 = vld [vmem:[#allocation95_spill] sm:$0xff] }
 0x453   :  { %v5577_v8 = vpop.permute.xlu1 %5576  ;;  %6214 = vrot.lane.b32.xlu0 %v5911_v43, %s8633_s11  ;;  %v5048_v54 = vsub.f32 %v14951_v62, %v14950_v48 }
 0x454   :  { %v5912_v59 = vsel %vm5144_vm8, %v5577_v8, 0.0  ;;  %vm5159_vm8 = vcmp.gt.f32.partialorder %v13100_v60, 0.0  ;;  %v6516_v60 = vsel %vm6504_vm3, %v13150_v30, 0.0 }
 0x455   :  { %5634 = vrot.lane.b32.xlu1 %v5301_v41, %s8632_s16  ;;  %v13300_v22 = vpop.permute.xlu0 %6158  ;;  %v13318_v41 = vld [vmem:[%s14237_s1 + $0x278] sm:$0xff] }
 0x456   :  { %14949 = vst [vmem:[#allocation144_spill] sm:$0xff] %v13318_v41  ;;  %v5303_v43 = vmul.f32 %v13318_v41, %v5047_v31  ;;  %v13333_v31 = vld [vmem:[%s14237_s1 + $0x280] sm:$0xff] }
 0x457   :  { %v5579_v17 = vpop.permute.xlu1 %5578  ;;  %6216 = vrot.lane.b32.xlu0 %v5912_v59, %s8633_s11  ;;  %v14953_v59 = vld [vmem:[#allocation92_spill] sm:$0xff]  ;;  %14954 = vst [vmem:[#allocation9_spill] sm:$0xff] %v13333_v31  ;;  %v5304_v48 = vmul.f32 %v13333_v31, %v5048_v54  ;;  %v14982_v41 = vld [vmem:[#allocation46_spill] sm:$0xff] }
 0x458   :  { %v5913_v8 = vsel %vm5145_vm9, %v5579_v17, 0.0  ;;  %vm5160_vm9 = vcmp.gt.f32.partialorder %v13117_v61, 0.0  ;;  %v6518_v61 = vsel %vm6504_vm3, %v13155_v58, 0.0  ;;  %v14993_v58 = vld [vmem:[#allocation159_spill] sm:$0xff] }
 0x459   :  { %5636 = vrot.lane.b32.xlu1 %v5302_v56, %s8632_s16  ;;  %v13313_v27 = vpop.permute.xlu0 %6160  ;;  %v14952_v56 = vld [vmem:[#allocation40_spill] sm:$0xff] }
 0x45a   :  { %v5049_v39 = vsub.f32 %v14953_v59, %v14952_v56  ;;  %v14956_v56 = vld [vmem:[#allocation120_spill] sm:$0xff]  ;;  %v14957_v59 = vld [vmem:[#allocation99_spill] sm:$0xff] }
 0x45b   :  { %v5581_v9 = vpop.permute.xlu1 %5580  ;;  %6218 = vrot.lane.b32.xlu0 %v5913_v8, %s8633_s11  ;;  %v5050_v54 = vsub.f32 %v14957_v59, %v14956_v56 }
 0x45c   :  { %v5914_v17 = vsel %vm5146_vm10, %v5581_v9, 0.0  ;;  %vm5161_vm10 = vcmp.gt.f32.partialorder %v13130_v55, 0.0  ;;  %v6520_v55 = vsel %vm6504_vm3, %v13165_v10, 0.0 }
 0x45d   :  { %5638 = vrot.lane.b32.xlu1 %v5303_v43, %s8632_s16  ;;  %v13326_v34 = vpop.permute.xlu0 %6162  ;;  %v13344_v43 = vld [vmem:[%s14237_s1 + $0x288] sm:$0xff] }
 0x45e   :  { %14955 = vst [vmem:[#allocation146_spill] sm:$0xff] %v13344_v43  ;;  %v5305_v8 = vmul.f32 %v13344_v43, %v5049_v39  ;;  %v13359_v39 = vld [vmem:[%s14237_s1 + $0x290] sm:$0xff] }
 0x45f   :  { %v5583_v62 = vpop.permute.xlu1 %5582  ;;  %6220 = vrot.lane.b32.xlu0 %v5914_v17, %s8633_s11  ;;  %v14959_v17 = vld [vmem:[#allocation96_spill] sm:$0xff]  ;;  %14960 = vst [vmem:[#allocation11_spill] sm:$0xff] %v13359_v39  ;;  %v5306_v56 = vmul.f32 %v13359_v39, %v5050_v54 }
 0x460   :  { %v5915_v9 = vsel %vm5147_vm11, %v5583_v62, 0.0  ;;  %vm5162_vm11 = vcmp.gt.f32.partialorder %v13147_v51, 0.0  ;;  %v6522_v51 = vsel %vm6504_vm3, %v13170_v40, 0.0 }
 0x461   :  { %5640 = vrot.lane.b32.xlu1 %v5304_v48, %s8632_s16  ;;  %v13339_v33 = vpop.permute.xlu0 %6164  ;;  %v14958_v48 = vld [vmem:[#allocation42_spill] sm:$0xff] }
 0x462   :  { %v5051_v31 = vsub.f32 %v14959_v17, %v14958_v48  ;;  %v14962_v48 = vld [vmem:[#allocation123_spill] sm:$0xff] }
 0x463   :  { %v5585_v5 = vpop.permute.xlu1 %5584  ;;  %6222 = vrot.lane.b32.xlu0 %v5915_v9, %s8633_s11  ;;  %v14963_v17 = vld [vmem:[#allocation103_spill] sm:$0xff] }
 0x464   :  { %v5916_v62 = vsel %vm5148_vm12, %v5585_v5, 0.0  ;;  %v5052_v54 = vsub.f32 %v14963_v17, %v14962_v48  ;;  %vm5163_vm12 = vcmp.gt.f32.partialorder %v13160_v2, 0.0 }
 0x465   :  { %5642 = vrot.lane.b32.xlu1 %v5305_v8, %s8632_s16  ;;  %v13352_v46 = vpop.permute.xlu0 %6166  ;;  %v13370_v8 = vld [vmem:[%s14237_s1 + $0x298] sm:$0xff] }
 0x466   :  { %14961 = vst [vmem:[#allocation148_spill] sm:$0xff] %v13370_v8  ;;  %v5307_v9 = vmul.f32 %v13370_v8, %v5051_v31  ;;  %v13385_v31 = vld [vmem:[%s14237_s1 + $0x2a0] sm:$0xff] }
 0x467   :  { %v5587_v59 = vpop.permute.xlu1 %5586  ;;  %6224 = vrot.lane.b32.xlu0 %v5916_v62, %s8633_s11  ;;  %v14965_v62 = vld [vmem:[#allocation100_spill] sm:$0xff]  ;;  %14966 = vst [vmem:[#allocation13_spill] sm:$0xff] %v13385_v31  ;;  %v5308_v48 = vmul.f32 %v13385_v31, %v5052_v54 }
 0x468   :  { %v5917_v5 = vsel %vm5149_vm13, %v5587_v59, 0.0  ;;  %vm5164_vm13 = vcmp.gt.f32.partialorder %v13177_v18, 0.0 }
 0x469   :  { %5644 = vrot.lane.b32.xlu1 %v5306_v56, %s8632_s16  ;;  %v13365_v63 = vpop.permute.xlu0 %6168  ;;  %v14964_v56 = vld [vmem:[#allocation41_spill] sm:$0xff] }
 0x46a   :  { %v5053_v43 = vsub.f32 %v14965_v62, %v14964_v56  ;;  %v14968_v56 = vld [vmem:[#allocation122_spill] sm:$0xff]  ;;  %v14969_v62 = vld [vmem:[#allocation107_spill] sm:$0xff] }
 0x46b   :  { %v5589_v39 = vpop.permute.xlu1 %5588  ;;  %6226 = vrot.lane.b32.xlu0 %v5917_v5, %s8633_s11  ;;  %v5054_v54 = vsub.f32 %v14969_v62, %v14968_v56 }
 0x46c   :  { %v5918_v59 = vsel %vm5150_vm14, %v5589_v39, 0.0  ;;  %vm5165_vm14 = vcmp.gt.f32.partialorder %v13188_v36, 0.0 }
 0x46d   :  { %5646 = vrot.lane.b32.xlu1 %v5307_v9, %s8632_s16  ;;  %v13378_v28 = vpop.permute.xlu0 %6170  ;;  %v13396_v9 = vld [vmem:[%s14237_s1 + $0x2a8] sm:$0xff] }
 0x46e   :  { %14967 = vst [vmem:[#allocation150_spill] sm:$0xff] %v13396_v9  ;;  %v5309_v5 = vmul.f32 %v13396_v9, %v5053_v43  ;;  %v13411_v43 = vld [vmem:[%s14237_s1 + $0x2b0] sm:$0xff] }
 0x46f   :  { %v5591_v17 = vpop.permute.xlu1 %5590  ;;  %6228 = vrot.lane.b32.xlu0 %v5918_v59, %s8633_s11  ;;  %v14971_v59 = vld [vmem:[#allocation104_spill] sm:$0xff]  ;;  %14972 = vst [vmem:[#allocation15_spill] sm:$0xff] %v13411_v43  ;;  %v5310_v56 = vmul.f32 %v13411_v43, %v5054_v54 }
 0x470   :  { %v5919_v39 = vsel %vm5151_vm15, %v5591_v17, 0.0  ;;  %vm5166_vm15 = vcmp.gt.f32.partialorder %v13203_v49, 0.0 }
 0x471   :  { %5648 = vrot.lane.b32.xlu1 %v5308_v48, %s8632_s16  ;;  %v13391_v32 = vpop.permute.xlu0 %6172  ;;  %v14970_v48 = vld [vmem:[#allocation44_spill] sm:$0xff] }
 0x472   :  { %v5055_v8 = vsub.f32 %v14971_v59, %v14970_v48  ;;  %v14974_v48 = vld [vmem:[#allocation125_spill] sm:$0xff]  ;;  %v14975_v59 = vld [vmem:[#allocation111_spill] sm:$0xff] }
 0x473   :  { %v5593_v31 = vpop.permute.xlu1 %5592  ;;  %6230 = vrot.lane.b32.xlu0 %v5919_v39, %s8633_s11  ;;  %v5056_v54 = vsub.f32 %v14975_v59, %v14974_v48 }
 0x474   :  { %v5920_v17 = vsel %vm5152_vm0, %v5593_v31, 0.0  ;;  %vm5167_vm0 = vcmp.gt.f32.partialorder %v13214_v15, 0.0 }
 0x475   :  { %5650 = vrot.lane.b32.xlu1 %v5309_v5, %s8632_s16  ;;  %v13404_v23 = vpop.permute.xlu0 %6174  ;;  %v13422_v5 = vld [vmem:[%s14237_s1 + $0x2b8] sm:$0xff] }
 0x476   :  { %14973 = vst [vmem:[#allocation153_spill] sm:$0xff] %v13422_v5  ;;  %v5311_v39 = vmul.f32 %v13422_v5, %v5055_v8  ;;  %v13437_v8 = vld [vmem:[%s14237_s1 + $0x2c0] sm:$0xff] }
 0x477   :  { %v5595_v62 = vpop.permute.xlu1 %5594  ;;  %6232 = vrot.lane.b32.xlu0 %v5920_v17, %s8633_s11  ;;  %v14977_v17 = vld [vmem:[#allocation108_spill] sm:$0xff]  ;;  %14978 = vst [vmem:[#allocation152_spill] sm:$0xff] %v13437_v8 }
 0x478   :  { %v5921_v31 = vsel %vm5153_vm1, %v5595_v62, 0.0  ;;  %v5312_v62 = vmul.f32 %v13437_v8, %v5056_v54  ;;  %v13452_v54 = vld [vmem:[%s14237_s1 + $0x2c8] sm:$0xff]  ;;  %vm5168_vm1 = vcmp.gt.f32.partialorder %v13229_v52, 0.0 }
 0x479   :  { %5652 = vrot.lane.b32.xlu1 %v5310_v56, %s8632_s16  ;;  %v13417_v57 = vpop.permute.xlu0 %6176  ;;  %v14976_v56 = vld [vmem:[#allocation43_spill] sm:$0xff]  ;;  %14979 = vst [vmem:[#allocation19_spill] sm:$0xff] %v13452_v54 }
 0x47a   :  { %v5057_v9 = vsub.f32 %v14977_v17, %v14976_v56  ;;  %v14981_v56 = vld [vmem:[#allocation115_spill] sm:$0xff] }
 0x47b   :  { %v5597_v43 = vpop.permute.xlu1 %5596  ;;  %6234 = vrot.lane.b32.xlu0 %v5921_v31, %s8633_s11  ;;  %v5058_v17 = vsub.f32 %v14981_v56, %v14980_v11  ;;  %v13469_v11 = vld [vmem:[%s14237_s1 + $0x2d0] sm:$0xff] }
 0x47c   :  { %v5922_v48 = vsel %vm5154_vm2, %v5597_v43, 0.0  ;;  %v5313_v43 = vmul.f32 %v13452_v54, %v5057_v9  ;;  %v14983_v9 = vld [vmem:[#allocation113_spill] sm:$0xff]  ;;  %vm5169_vm2 = vcmp.gt.f32.partialorder %v13240_v4, 0.0 }
 0x47d   :  { %5654 = vrot.lane.b32.xlu1 %v5311_v39, %s8632_s16  ;;  %v13430_v7 = vpop.permute.xlu0 %6178  ;;  %v6505_v39 = vsel %vm6504_vm3, %v13105_v35, 0.0  ;;  %v5059_v54 = vsub.f32 %v14983_v9, %v14982_v41  ;;  %v5314_v42 = vmul.f32 %v13469_v11, %v5058_v17  ;;  %v14984_v17 = vld [vmem:[#allocation127_spill] sm:$0xff]  ;;  %v14986_v9 = vld [vmem:[#allocation45_spill] sm:$0xff] }
 0x47e   :  { %v6507_v35 = vadd.f32 %v6506_v12, %v6505_v39 }
 0x47f   :  { %v5599_v59 = vpop.permute.xlu1 %5598  ;;  %6236 = vrot.lane.b32.xlu0 %v5922_v48, %s8633_s11 }
 0x480   :  { %v5923_v48 = vsel %vm5155_vm4, %v5599_v59, 0.0  ;;  %vm5170_vm4 = vcmp.gt.f32.partialorder %v13255_v47, 0.0 }
 0x481   :  { %5656 = vrot.lane.b32.xlu1 %v5312_v62, %s8632_s16  ;;  %v13447_v31 = vpop.permute.xlu0 %6180  ;;  %v6509_v62 = vadd.f32 %v6508_v26, %v6507_v35 }
 0x483   :  { %v5601_v8 = vpop.permute.xlu1 %5600  ;;  %6238 = vrot.lane.b32.xlu0 %v5923_v48, %s8633_s11  ;;  %v6511_v39 = vadd.f32 %v6510_v45, %v6509_v62  ;;  %v13499_v45 = vld [vmem:[%s14237_s1 + $0x2e0] sm:$0xff] }
 0x484   :  { %v5924_v59 = vsel %vm5156_vm5, %v5601_v8, 0.0  ;;  %v5060_v8 = vsub.f32 %v14985_v29, %v14984_v17  ;;  %v13512_v17 = vld [vmem:[%s14237_s1 + $0x2e8] sm:$0xff]  ;;  %vm5171_vm5 = vcmp.gt.f32.partialorder %v13266_v38, 0.0 }
 0x485   :  { %5658 = vrot.lane.b32.xlu1 %v5313_v43, %s8632_s16  ;;  %v13462_v5 = vpop.permute.xlu0 %6182  ;;  %v13482_v43 = vld [vmem:[%s14237_s1 + $0x2d8] sm:$0xff]  ;;  %v6513_v35 = vadd.f32 %v6512_v44, %v6511_v39 }
 0x486   :  { %v5315_v56 = vmul.f32 %v13482_v43, %v5059_v54  ;;  %v5316_v3 = vmul.f32 %v13499_v45, %v5060_v8  ;;  %v14988_v8 = vld [vmem:[#allocation126_spill] sm:$0xff] }
 0x487   :  { %v5603_v12 = vpop.permute.xlu1 %5602  ;;  %6240 = vrot.lane.b32.xlu0 %v5924_v59, %s8633_s11  ;;  %v6515_v39 = vadd.f32 %v6514_v1, %v6513_v35  ;;  %v5062_v44 = vsub.f32 %v14989_v50, %v14988_v8  ;;  %v13529_v1 = vld [vmem:[%s14237_s1 + $0x2f0] sm:$0xff]  ;;  %v13542_v8 = vld [vmem:[%s14237_s1 + $0x2f8] sm:$0xff] }
 0x488   :  { %v5925_v26 = vsel %vm5157_vm6, %v5603_v12, 0.0  ;;  %vm5172_vm6 = vcmp.gt.f32.partialorder %v13281_v25, 0.0 }
 0x489   :  { %5660 = vrot.lane.b32.xlu1 %v5314_v42, %s8632_s16  ;;  %v13477_v41 = vpop.permute.xlu0 %6184  ;;  %v14987_v42 = vld [vmem:[#allocation154_spill] sm:$0xff]  ;;  %v6517_v35 = vadd.f32 %v6516_v60, %v6515_v39  ;;  %v5318_v30 = vmul.f32 %v13529_v1, %v5062_v44  ;;  %v14992_v44 = vld [vmem:[#allocation129_spill] sm:$0xff] }
 0x48a   :  { %v5061_v54 = vsub.f32 %v14987_v42, %v14986_v9  ;;  %v14990_v42 = vld [vmem:[#allocation48_spill] sm:$0xff]  ;;  %v5064_v60 = vsub.f32 %v14993_v58, %v14992_v44  ;;  %v13574_v58 = vld [vmem:[%s14237_s1 + $0x308] sm:$0xff] }
 0x48b   :  { %v5605_v48 = vpop.permute.xlu1 %5604  ;;  %6242 = vrot.lane.b32.xlu0 %v5925_v26, %s8633_s11  ;;  %v6519_v39 = vadd.f32 %v6518_v61, %v6517_v35  ;;  %v13559_v61 = vld [vmem:[%s14237_s1 + $0x300] sm:$0xff] }
 0x48c   :  { %v5926_v59 = vsel %vm5158_vm7, %v5605_v48, 0.0  ;;  %v5317_v29 = vmul.f32 %v13512_v17, %v5061_v54  ;;  %v5320_v10 = vmul.f32 %v13559_v61, %v5064_v60  ;;  %v14996_v60 = vld [vmem:[#allocation128_spill] sm:$0xff]  ;;  %vm5173_vm7 = vcmp.gt.f32.partialorder %v13292_v20, 0.0 }
 0x48d   :  { %5662 = vrot.lane.b32.xlu1 %v5315_v56, %s8632_s16  ;;  %v13492_v62 = vpop.permute.xlu0 %6186  ;;  %v6521_v35 = vadd.f32 %v6520_v55, %v6519_v39  ;;  %v6524_v39 = vsel %vm6504_vm3, %v13183_v6, 0.0  ;;  %v14997_v55 = vld [vmem:[#allocation4_spill] sm:$0xff] }
 0x48e   :  { %v5066_v2 = vsub.f32 %v14997_v55, %v14996_v60 }
 0x48f   :  { %v5607_v12 = vpop.permute.xlu1 %5606  ;;  %6244 = vrot.lane.b32.xlu0 %v5926_v59, %s8633_s11 }
 0x490   :  { %v5927_v26 = vsel %vm5159_vm8, %v5607_v12, 0.0  ;;  %vm5174_vm8 = vcmp.gt.f32.partialorder %v13307_v14, 0.0 }
 0x491   :  { %5664 = vrot.lane.b32.xlu1 %v5316_v3, %s8632_s16  ;;  %v13507_v56 = vpop.permute.xlu0 %6188  ;;  %v14991_v3 = vld [vmem:[#allocation156_spill] sm:$0xff] }
 0x492   :  { %v5063_v54 = vsub.f32 %v14991_v3, %v14990_v42  ;;  %v14994_v3 = vld [vmem:[#allocation47_spill] sm:$0xff] }
 0x493   :  { %v5609_v48 = vpop.permute.xlu1 %5608  ;;  %6246 = vrot.lane.b32.xlu0 %v5927_v26, %s8633_s11 }
 0x494   :  { %v5928_v59 = vsel %vm5160_vm9, %v5609_v48, 0.0  ;;  %v5319_v50 = vmul.f32 %v13542_v8, %v5063_v54 }
 0x495   :  { %5666 = vrot.lane.b32.xlu1 %v5317_v29, %s8632_s16  ;;  %v13522_v9 = vpop.permute.xlu0 %6190 }
 0x497   :  { %v5611_v12 = vpop.permute.xlu1 %5610  ;;  %6248 = vrot.lane.b32.xlu0 %v5928_v59, %s8633_s11 }
 0x498   :  { %v5929_v26 = vsel %vm5161_vm10, %v5611_v12, 0.0 }
 0x499   :  { %5668 = vrot.lane.b32.xlu1 %v5318_v30, %s8632_s16  ;;  %v13537_v29 = vpop.permute.xlu0 %6192  ;;  %v14995_v30 = vld [vmem:[#allocation158_spill] sm:$0xff] }
 0x49a   :  { %v5065_v54 = vsub.f32 %v14995_v30, %v14994_v3 }
 0x49b   :  { %v5613_v48 = vpop.permute.xlu1 %5612  ;;  %6250 = vrot.lane.b32.xlu0 %v5929_v26, %s8633_s11  ;;  %v6526_v26 = vsel %vm6504_vm3, %v13196_v16, 0.0  ;;  %v13593_v16 = vld [vmem:[%s14237_s1 + $0x310] sm:$0xff] }
 0x49c   :  { %v5930_v59 = vsel %vm5162_vm11, %v5613_v48, 0.0  ;;  %v5321_v40 = vmul.f32 %v13574_v58, %v5065_v54  ;;  %v5322_v18 = vmul.f32 %v13593_v16, %v5066_v2  ;;  %v13608_v2 = vld [vmem:[%s14237_s1 + $0x318] sm:$0xff] }
 0x49d   :  { %5670 = vrot.lane.b32.xlu1 %v5319_v50, %s8632_s16  ;;  %v13552_v42 = vpop.permute.xlu0 %6194  ;;  %v6523_v50 = vadd.f32 %v6522_v51, %v6521_v35  ;;  %v6528_v35 = vsel %vm6504_vm3, %v13209_v13, 0.0  ;;  %v14999_v51 = vld [vmem:[#allocation160_spill] sm:$0xff] }
 0x49f   :  { %v5615_v12 = vpop.permute.xlu1 %5614  ;;  %6252 = vrot.lane.b32.xlu0 %v5930_v59, %s8633_s11  ;;  %v6525_v3 = vadd.f32 %v6524_v39, %v6523_v50 }
 0x4a0   :  { %v5931_v48 = vsel %vm5163_vm12, %v5615_v12, 0.0  ;;  %v6530_v12 = vsel %vm6504_vm3, %v13222_v24, 0.0 }
 0x4a1   :  { %5672 = vrot.lane.b32.xlu1 %v5320_v10, %s8632_s16  ;;  %v13569_v44 = vpop.permute.xlu0 %6196  ;;  %v6527_v30 = vadd.f32 %v6526_v26, %v6525_v3  ;;  %v14998_v10 = vld [vmem:[#allocation50_spill] sm:$0xff]  ;;  %v15000_v26 = vld [vmem:[#allocation131_spill] sm:$0xff] }
 0x4a2   :  { %v5067_v59 = vsub.f32 %v14999_v51, %v14998_v10 }
 0x4a3   :  { %v5617_v6 = vpop.permute.xlu1 %5616  ;;  %6254 = vrot.lane.b32.xlu0 %v5931_v48, %s8633_s11  ;;  %v6529_v50 = vadd.f32 %v6528_v35, %v6527_v30  ;;  %v15001_v48 = vld [vmem:[#allocation161_spill] sm:$0xff]  ;;  %v6536_v30 = vsel %vm6504_vm3, %v13261_v21, 0.0 }
 0x4a4   :  { %v5932_v39 = vsel %vm5164_vm13, %v5617_v6, 0.0  ;;  %v5323_v24 = vmul.f32 %v13608_v2, %v5067_v59  ;;  %v5068_v36 = vsub.f32 %v15001_v48, %v15000_v26  ;;  %v6534_v6 = vsel %vm6504_vm3, %v13248_v19, 0.0  ;;  %v15002_v59 = vld [vmem:[#allocation49_spill] sm:$0xff]  ;;  %v13627_v19 = vld [vmem:[%s14237_s1 + $0x320] sm:$0xff]  ;;  %v13642_v26 = vld [vmem:[%s14237_s1 + $0x328] sm:$0xff] }
 0x4a5   :  { %5674 = vrot.lane.b32.xlu1 %v5321_v40, %s8632_s16  ;;  %v13586_v54 = vpop.permute.xlu0 %6198  ;;  %v6532_v40 = vsel %vm6504_vm3, %v13235_v37, 0.0  ;;  %v6531_v60 = vadd.f32 %v6530_v12, %v6529_v50  ;;  %v15004_v48 = vld [vmem:[#allocation130_spill] sm:$0xff] }
 0x4a6   :  { %v5324_v49 = vmul.f32 %v13627_v19, %v5068_v36  ;;  %v15005_v36 = vld [vmem:[#allocation143_spill] sm:$0xff] }
 0x4a7   :  { %v5619_v13 = vpop.permute.xlu1 %5618  ;;  %6256 = vrot.lane.b32.xlu0 %v5932_v39, %s8633_s11  ;;  %v6533_v35 = vadd.f32 %v6532_v40, %v6531_v60  ;;  %v6538_v39 = vsel %vm6504_vm3, %v13274_v53, 0.0  ;;  %v6540_v40 = vsel %vm6504_vm3, %v13287_v0, 0.0  ;;  %v5070_v15 = vsub.f32 %v15005_v36, %v15004_v48  ;;  %v15009_v48 = vld [vmem:[#allocation145_spill] sm:$0xff] }
 0x4a8   :  { %v5933_v3 = vsel %vm5165_vm14, %v5619_v13, 0.0  ;;  %v6550_v36 = vsel %vm6504_vm3, %v13352_v46, 0.0  ;;  %v13695_v46 = vld [vmem:[%s14237_s1 + $0x340] sm:$0xff] }
 0x4a9   :  { %5676 = vrot.lane.b32.xlu1 %v5322_v18, %s8632_s16  ;;  %v13603_v55 = vpop.permute.xlu0 %6200  ;;  %v6535_v10 = vadd.f32 %v6534_v6, %v6533_v35  ;;  %v15003_v18 = vld [vmem:[#allocation141_spill] sm:$0xff]  ;;  %v6542_v6 = vsel %vm6504_vm3, %v13300_v22, 0.0  ;;  %v6544_v35 = vsel %vm6504_vm3, %v13313_v27, 0.0  ;;  %v13661_v22 = vld [vmem:[%s14237_s1 + $0x330] sm:$0xff] }
 0x4aa   :  { %v5069_v12 = vsub.f32 %v15003_v18, %v15002_v59  ;;  %v15006_v59 = vld [vmem:[#allocation52_spill] sm:$0xff]  ;;  %v15007_v18 = vld [vmem:[#allocation6_spill] sm:$0xff]  ;;  %v5326_v52 = vmul.f32 %v13661_v22, %v5070_v15 }
 0x4ab   :  { %v5621_v37 = vpop.permute.xlu1 %5620  ;;  %6258 = vrot.lane.b32.xlu0 %v5933_v3, %s8633_s11  ;;  %v6537_v50 = vadd.f32 %v6536_v30, %v6535_v10 }
 0x4ac   :  { %v5934_v13 = vsel %vm5166_vm15, %v5621_v37, 0.0  ;;  %v5325_v53 = vmul.f32 %v13642_v26, %v5069_v12  ;;  %v5071_v12 = vsub.f32 %v15007_v18, %v15006_v59  ;;  %v6554_v18 = vsel %vm6504_vm3, %v13378_v28, 0.0 }
 0x4ad   :  { %5678 = vrot.lane.b32.xlu1 %v5323_v24, %s8632_s16  ;;  %v13620_v51 = vpop.permute.xlu0 %6202  ;;  %v6539_v60 = vadd.f32 %v6538_v39, %v6537_v50 }
 0x4af   :  { %v5623_v21 = vpop.permute.xlu1 %5622  ;;  %6260 = vrot.lane.b32.xlu0 %v5934_v13, %s8633_s11  ;;  %v6541_v37 = vadd.f32 %v6540_v40, %v6539_v60  ;;  %v13676_v60 = vld [vmem:[%s14237_s1 + $0x338] sm:$0xff] }
 0x4b0   :  { %v5935_v3 = vsel %vm5167_vm0, %v5623_v21, 0.0  ;;  %v6548_v21 = vsel %vm6504_vm3, %v13339_v33, 0.0 }
 0x4b1   :  { %5680 = vrot.lane.b32.xlu1 %v5324_v49, %s8632_s16  ;;  %v13637_v24 = vpop.permute.xlu0 %6204  ;;  %v6543_v30 = vadd.f32 %v6542_v6, %v6541_v37  ;;  %v6546_v49 = vsel %vm6504_vm3, %v13326_v34, 0.0  ;;  %v5327_v34 = vmul.f32 %v13676_v60, %v5071_v12 }
 0x4b3   :  { %v5625_v0 = vpop.permute.xlu1 %5624  ;;  %6262 = vrot.lane.b32.xlu0 %v5935_v3, %s8633_s11  ;;  %v6545_v13 = vadd.f32 %v6544_v35, %v6543_v30  ;;  %v6552_v3 = vsel %vm6504_vm3, %v13365_v63, 0.0  ;;  %v15010_v35 = vld [vmem:[#allocation51_spill] sm:$0xff]  ;;  %v15011_v30 = vld [vmem:[#allocation8_spill] sm:$0xff] }
 0x4b4   :  { %v5936_v39 = vsel %vm5168_vm1, %v5625_v0, 0.0  ;;  %v5073_v59 = vsub.f32 %v15011_v30, %v15010_v35 }
 0x4b5   :  { %5682 = vrot.lane.b32.xlu1 %v5325_v53, %s8632_s16  ;;  %v13654_v10 = vpop.permute.xlu0 %6206  ;;  %v6547_v50 = vadd.f32 %v6546_v49, %v6545_v13  ;;  %v15008_v53 = vld [vmem:[#allocation133_spill] sm:$0xff]  ;;  %v6556_v49 = vsel %vm6504_vm3, %v13391_v32, 0.0  ;;  %v13710_v13 = vld [vmem:[%s14237_s1 + $0x348] sm:$0xff] }
 0x4b6   :  { %v5072_v4 = vsub.f32 %v15009_v48, %v15008_v53  ;;  %v5329_v28 = vmul.f32 %v13710_v13, %v5073_v59  ;;  %v6564_v59 = vsel %vm6504_vm3, %v13447_v31, 0.0 }
 0x4b7   :  { %v5627_v27 = vpop.permute.xlu1 %5626  ;;  %6264 = vrot.lane.b32.xlu0 %v5936_v39, %s8633_s11  ;;  %v6549_v6 = vadd.f32 %v6548_v21, %v6547_v50  ;;  %v15012_v21 = vld [vmem:[#allocation132_spill] sm:$0xff]  ;;  %v15013_v50 = vld [vmem:[#allocation147_spill] sm:$0xff] }
 0x4b8   :  { %v5937_v15 = vsel %vm5169_vm2, %v5627_v27, 0.0  ;;  %v5328_v47 = vmul.f32 %v13695_v46, %v5072_v4  ;;  %v5074_v38 = vsub.f32 %v15013_v50, %v15012_v21  ;;  %v6560_v4 = vsel %vm6504_vm3, %v13417_v57, 0.0 }
 0x4b9   :  { %5684 = vrot.lane.b32.xlu1 %v5326_v52, %s8632_s16  ;;  %v13671_v40 = vpop.permute.xlu0 %6208  ;;  %v6551_v0 = vadd.f32 %v6550_v36, %v6549_v6  ;;  %v15015_v6 = vld [vmem:[#allocation10_spill] sm:$0xff]  ;;  %v6568_v21 = vsel %vm6504_vm3, %v13477_v41, 0.0 }
 0x4bb   :  { %v5629_v33 = vpop.permute.xlu1 %5628  ;;  %6266 = vrot.lane.b32.xlu0 %v5937_v15, %s8633_s11  ;;  %v6553_v52 = vadd.f32 %v6552_v3, %v6551_v0  ;;  %v6562_v0 = vsel %vm6504_vm3, %v13430_v7, 0.0 }
 0x4bc   :  { %v5938_v12 = vsel %vm5170_vm4, %v5629_v33, 0.0  ;;  %v15014_v33 = vld [vmem:[#allocation54_spill] sm:$0xff] }
 0x4bd   :  { %5686 = vrot.lane.b32.xlu1 %v5327_v34, %s8632_s16  ;;  %v13688_v37 = vpop.permute.xlu0 %6210  ;;  %v6555_v39 = vadd.f32 %v6554_v18, %v6553_v52  ;;  %v6558_v34 = vsel %vm6504_vm3, %v13404_v23, 0.0  ;;  %v5075_v3 = vsub.f32 %v15015_v6, %v15014_v33  ;;  %v13729_v23 = vld [vmem:[%s14237_s1 + $0x350] sm:$0xff]  ;;  %v15017_v52 = vld [vmem:[#allocation149_spill] sm:$0xff]  ;;  %v6572_v6 = vsel %vm6504_vm3, %v13507_v56, 0.0 }
 0x4be   :  { %v5330_v25 = vmul.f32 %v13729_v23, %v5074_v38  ;;  %v15020_v33 = vld [vmem:[#allocation144_spill] sm:$0xff] }
 0x4bf   :  { %v5631_v63 = vpop.permute.xlu1 %5630  ;;  %6268 = vrot.lane.b32.xlu0 %v5938_v12, %s8633_s11  ;;  %v6557_v48 = vadd.f32 %v6556_v49, %v6555_v39  ;;  %v13744_v12 = vld [vmem:[%s14237_s1 + $0x358] sm:$0xff]  ;;  %v6566_v49 = vsel %vm6504_vm3, %v13462_v5, 0.0  ;;  %v13763_v5 = vld [vmem:[%s14237_s1 + $0x360] sm:$0xff]  ;;  %vm5175_vm9 = vcmp.gt.f32.partialorder %v15020_v33, 0.0 }
 0x4c0   :  { %v5939_v53 = vsel %vm5171_vm5, %v5631_v63, 0.0  ;;  %v5331_v7 = vmul.f32 %v13744_v12, %v5075_v3  ;;  %v15016_v63 = vld [vmem:[#allocation135_spill] sm:$0xff]  ;;  %v15028_v33 = vld [vmem:[#allocation17_spill] sm:$0xff]  ;;  %vm5186_vm5 = vcmp.gt.f32.partialorder %v13469_v11, 0.0 }
 0x4c1   :  { %5688 = vrot.lane.b32.xlu1 %v5328_v47, %s8632_s16  ;;  %v13705_v27 = vpop.permute.xlu0 %6212  ;;  %v6559_v36 = vadd.f32 %v6558_v34, %v6557_v48  ;;  %v5076_v20 = vsub.f32 %v15017_v52, %v15016_v63  ;;  %v15018_v34 = vld [vmem:[#allocation53_spill] sm:$0xff]  ;;  %v6570_v48 = vsel %vm6504_vm3, %v13492_v62, 0.0  ;;  %v6576_v52 = vsel %vm6504_vm3, %v13537_v29, 0.0 }
 0x4c2   :  { %v15023_v63 = vld [vmem:[#allocation9_spill] sm:$0xff] }
 0x4c3   :  { %v5633_v32 = vpop.permute.xlu1 %5632  ;;  %6270 = vrot.lane.b32.xlu0 %v5939_v53, %s8633_s11  ;;  %v6561_v30 = vadd.f32 %v6560_v4, %v6559_v36  ;;  %v15019_v53 = vld [vmem:[#allocation12_spill] sm:$0xff]  ;;  %v5332_v14 = vmul.f32 %v13763_v5, %v5076_v20  ;;  %vm5176_vm10 = vcmp.gt.f32.partialorder %v15023_v63, 0.0 }
 0x4c4   :  { %v5940_v35 = vsel %vm5172_vm6, %v5633_v32, 0.0  ;;  %v5077_v32 = vsub.f32 %v15019_v53, %v15018_v34  ;;  %vm5187_vm6 = vcmp.gt.f32.partialorder %v13482_v43, 0.0 }
 0x4c5   :  { %5690 = vrot.lane.b32.xlu1 %v5329_v28, %s8632_s16  ;;  %v13722_v15 = vpop.permute.xlu0 %6214  ;;  %v6563_v47 = vadd.f32 %v6562_v0, %v6561_v30  ;;  %v13778_v0 = vld [vmem:[%s14237_s1 + $0x368] sm:$0xff] }
 0x4c6   :  { %v5333_v62 = vmul.f32 %v13778_v0, %v5077_v32  ;;  %v15026_v32 = vld [vmem:[#allocation146_spill] sm:$0xff] }
 0x4c7   :  { %v5635_v57 = vpop.permute.xlu1 %5634  ;;  %6272 = vrot.lane.b32.xlu0 %v5940_v35, %s8633_s11  ;;  %v6565_v28 = vadd.f32 %v6564_v59, %v6563_v47  ;;  %v15021_v35 = vld [vmem:[#allocation134_spill] sm:$0xff]  ;;  %v6574_v59 = vsel %vm6504_vm3, %v13522_v9, 0.0  ;;  %v13797_v9 = vld [vmem:[%s14237_s1 + $0x370] sm:$0xff]  ;;  %vm5177_vm11 = vcmp.gt.f32.partialorder %v15026_v32, 0.0  ;;  %v15034_v32 = vld [vmem:[#allocation163_spill] sm:$0xff] }
 0x4c8   :  { %v5941_v39 = vsel %vm5173_vm7, %v5635_v57, 0.0  ;;  %v15022_v57 = vld [vmem:[#allocation151_spill] sm:$0xff]  ;;  %vm5188_vm7 = vcmp.gt.f32.partialorder %v13499_v45, 0.0 }
 0x4c9   :  { %5692 = vrot.lane.b32.xlu1 %v5330_v25, %s8632_s16  ;;  %v13739_v18 = vpop.permute.xlu0 %6216  ;;  %v6567_v50 = vadd.f32 %v6566_v49, %v6565_v28  ;;  %v5078_v30 = vsub.f32 %v15022_v57, %v15021_v35  ;;  %v15029_v57 = vld [vmem:[#allocation11_spill] sm:$0xff] }
 0x4ca   :  { %vm5178_vm12 = vcmp.gt.f32.partialorder %v15029_v57, 0.0 }
 0x4cb   :  { %v5637_v31 = vpop.permute.xlu1 %5636  ;;  %6274 = vrot.lane.b32.xlu0 %v5941_v39, %s8633_s11  ;;  %v6569_v36 = vadd.f32 %v6568_v21, %v6567_v50  ;;  %v15024_v39 = vld [vmem:[#allocation56_spill] sm:$0xff]  ;;  %v5334_v21 = vmul.f32 %v13797_v9, %v5078_v30  ;;  %v6578_v50 = vsel %vm6504_vm3, %v13552_v42, 0.0  ;;  %v6584_v30 = vsel %vm6504_vm3, %v13603_v55, 0.0 }
 0x4cc   :  { %v5942_v4 = vsel %vm5174_vm8, %v5637_v31, 0.0  ;;  %v15025_v31 = vld [vmem:[#allocation14_spill] sm:$0xff]  ;;  %vm5189_vm8 = vcmp.gt.f32.partialorder %v13512_v17, 0.0 }
 0x4cd   :  { %5694 = vrot.lane.b32.xlu1 %v5331_v7, %s8632_s16  ;;  %v13756_v38 = vpop.permute.xlu0 %6218  ;;  %v6571_v3 = vadd.f32 %v6570_v48, %v6569_v36  ;;  %v5079_v28 = vsub.f32 %v15025_v31, %v15024_v39  ;;  %v15027_v36 = vld [vmem:[#allocation137_spill] sm:$0xff] }
 0x4cf   :  { %v5639_v41 = vpop.permute.xlu1 %5638  ;;  %6276 = vrot.lane.b32.xlu0 %v5942_v4, %s8633_s11  ;;  %v6573_v7 = vadd.f32 %v6572_v6, %v6571_v3  ;;  %v5080_v6 = vsub.f32 %v15028_v33, %v15027_v36  ;;  %v6582_v3 = vsel %vm6504_vm3, %v13586_v54, 0.0  ;;  %v13831_v54 = vld [vmem:[%s14237_s1 + $0x380] sm:$0xff]  ;;  %v15035_v33 = vld [vmem:[#allocation13_spill] sm:$0xff] }
 0x4d0   :  { %v5943_v47 = vsel %vm5175_vm9, %v5639_v41, 0.0  ;;  %v13812_v41 = vld [vmem:[%s14237_s1 + $0x378] sm:$0xff]  ;;  %vm5180_vm14 = vcmp.gt.f32.partialorder %v15035_v33, 0.0  ;;  %vm5190_vm9 = vcmp.gt.f32.partialorder %v13529_v1, 0.0 }
 0x4d1   :  { %5696 = vrot.lane.b32.xlu1 %v5332_v14, %s8632_s16  ;;  %v13773_v25 = vpop.permute.xlu0 %6220  ;;  %v6575_v20 = vadd.f32 %v6574_v59, %v6573_v7  ;;  %v6580_v14 = vsel %vm6504_vm3, %v13569_v44, 0.0  ;;  %v5335_v42 = vmul.f32 %v13812_v41, %v5079_v28  ;;  %v15031_v7 = vld [vmem:[#allocation16_spill] sm:$0xff] }
 0x4d2   :  { %v15032_v28 = vld [vmem:[#allocation148_spill] sm:$0xff] }
 0x4d3   :  { %v5641_v56 = vpop.permute.xlu1 %5640  ;;  %6278 = vrot.lane.b32.xlu0 %v5943_v47, %s8633_s11  ;;  %v6577_v53 = vadd.f32 %v6576_v52, %v6575_v20  ;;  %v5336_v52 = vmul.f32 %v13831_v54, %v5080_v6  ;;  %v6586_v20 = vsel %vm6504_vm3, %v13620_v51, 0.0  ;;  %vm5179_vm13 = vcmp.gt.f32.partialorder %v15032_v28, 0.0  ;;  %v15040_v28 = vld [vmem:[#allocation165_spill] sm:$0xff] }
 0x4d4   :  { %v5944_v34 = vsel %vm5176_vm10, %v5641_v56, 0.0  ;;  %v15030_v56 = vld [vmem:[#allocation55_spill] sm:$0xff]  ;;  %v6592_v6 = vsel %vm6504_vm3, %v13671_v40, 0.0  ;;  %vm5191_vm10 = vcmp.gt.f32.partialorder %v13542_v8, 0.0 }
 0x4d5   :  { %5698 = vrot.lane.b32.xlu1 %v5333_v62, %s8632_s16  ;;  %v13790_v49 = vpop.permute.xlu0 %6222  ;;  %v6579_v48 = vadd.f32 %v6578_v50, %v6577_v53  ;;  %v5081_v63 = vsub.f32 %v15031_v7, %v15030_v56  ;;  %v15033_v53 = vld [vmem:[#allocation136_spill] sm:$0xff] }
 0x4d7   :  { %v5643_v29 = vpop.permute.xlu1 %5642  ;;  %6280 = vrot.lane.b32.xlu0 %v5944_v34, %s8633_s11  ;;  %v6581_v35 = vadd.f32 %v6580_v14, %v6579_v48  ;;  %v5082_v14 = vsub.f32 %v15034_v32, %v15033_v53  ;;  %v6590_v48 = vsel %vm6504_vm3, %v13654_v10, 0.0  ;;  %v13865_v10 = vld [vmem:[%s14237_s1 + $0x390] sm:$0xff]  ;;  %v15041_v32 = vld [vmem:[#allocation15_spill] sm:$0xff] }
 0x4d8   :  { %v5945_v62 = vsel %vm5177_vm11, %v5643_v29, 0.0  ;;  %v13846_v29 = vld [vmem:[%s14237_s1 + $0x388] sm:$0xff]  ;;  %vm5182_vm0 = vcmp.gt.f32.partialorder %v15041_v32, 0.0  ;;  %vm5192_vm11 = vcmp.gt.f32.partialorder %v13559_v61, 0.0 }
 0x4d9   :  { %5700 = vrot.lane.b32.xlu1 %v5334_v21, %s8632_s16  ;;  %v13807_v4 = vpop.permute.xlu0 %6224  ;;  %v6583_v59 = vadd.f32 %v6582_v3, %v6581_v35  ;;  %v6588_v21 = vsel %vm6504_vm3, %v13637_v24, 0.0  ;;  %v5337_v51 = vmul.f32 %v13846_v29, %v5081_v63  ;;  %v15037_v35 = vld [vmem:[#allocation162_spill] sm:$0xff] }
 0x4da   :  { %v15038_v63 = vld [vmem:[#allocation150_spill] sm:$0xff] }
 0x4db   :  { %v5645_v44 = vpop.permute.xlu1 %5644  ;;  %6282 = vrot.lane.b32.xlu0 %v5945_v62, %s8633_s11  ;;  %v6585_v31 = vadd.f32 %v6584_v30, %v6583_v59  ;;  %v5338_v30 = vmul.f32 %v13865_v10, %v5082_v14  ;;  %v6594_v59 = vsel %vm6504_vm3, %v13688_v37, 0.0  ;;  %vm5181_vm15 = vcmp.gt.f32.partialorder %v15038_v63, 0.0  ;;  %v15046_v63 = vld [vmem:[#allocation167_spill] sm:$0xff] }
 0x4dc   :  { %v5946_v39 = vsel %vm5178_vm12, %v5645_v44, 0.0  ;;  %v15036_v44 = vld [vmem:[#allocation58_spill] sm:$0xff]  ;;  %v6600_v14 = vsel %vm6504_vm3, %v13739_v18, 0.0  ;;  %vm5193_vm12 = vcmp.gt.f32.partialorder %v13574_v58, 0.0 }
 0x4dd   :  { %5702 = vrot.lane.b32.xlu1 %v5335_v42, %s8632_s16  ;;  %v13824_v47 = vpop.permute.xlu0 %6226  ;;  %v6587_v50 = vadd.f32 %v6586_v20, %v6585_v31  ;;  %v5083_v57 = vsub.f32 %v15037_v35, %v15036_v44  ;;  %v15039_v31 = vld [vmem:[#allocation139_spill] sm:$0xff] }
 0x4df   :  { %v5647_v55 = vpop.permute.xlu1 %5646  ;;  %6284 = vrot.lane.b32.xlu0 %v5946_v39, %s8633_s11  ;;  %v6589_v36 = vadd.f32 %v6588_v21, %v6587_v50  ;;  %v5084_v21 = vsub.f32 %v15040_v28, %v15039_v31  ;;  %v6598_v50 = vsel %vm6504_vm3, %v13722_v15, 0.0  ;;  %v13895_v15 = vld [vmem:[%s14237_s1 + $0x3a0] sm:$0xff]  ;;  %v15047_v28 = vld [vmem:[#allocation152_spill] sm:$0xff] }
 0x4e0   :  { %v5947_v42 = vsel %vm5179_vm13, %v5647_v55, 0.0  ;;  %v13878_v55 = vld [vmem:[%s14237_s1 + $0x398] sm:$0xff]  ;;  %vm5184_vm2 = vcmp.gt.f32.partialorder %v15047_v28, 0.0  ;;  %vm5194_vm13 = vcmp.gt.f32.partialorder %v13593_v16, 0.0 }
 0x4e1   :  { %5704 = vrot.lane.b32.xlu1 %v5336_v52, %s8632_s16  ;;  %v13841_v34 = vpop.permute.xlu0 %6228  ;;  %v6591_v3 = vadd.f32 %v6590_v48, %v6589_v36  ;;  %v6596_v52 = vsel %vm6504_vm3, %v13705_v27, 0.0  ;;  %v5339_v37 = vmul.f32 %v13878_v55, %v5083_v57  ;;  %v15043_v36 = vld [vmem:[#allocation164_spill] sm:$0xff]  ;;  %v15044_v57 = vld [vmem:[#allocation153_spill] sm:$0xff] }
 0x4e2   :  { %vm5183_vm1 = vcmp.gt.f32.partialorder %v15044_v57, 0.0  ;;  %v15052_v57 = vld [vmem:[#allocation169_spill] sm:$0xff] }
 0x4e3   :  { %v5649_v24 = vpop.permute.xlu1 %5648  ;;  %6286 = vrot.lane.b32.xlu0 %v5947_v42, %s8633_s11  ;;  %v6593_v7 = vadd.f32 %v6592_v6, %v6591_v3  ;;  %v5340_v6 = vmul.f32 %v13895_v15, %v5084_v21  ;;  %v6602_v3 = vsel %vm6504_vm3, %v13756_v38, 0.0  ;;  %v6608_v21 = vsel %vm6504_vm3, %v13807_v4, 0.0 }
 0x4e4   :  { %v5948_v56 = vsel %vm5180_vm14, %v5649_v24, 0.0  ;;  %v15042_v24 = vld [vmem:[#allocation57_spill] sm:$0xff]  ;;  %vm5195_vm14 = vcmp.gt.f32.partialorder %v13608_v2, 0.0 }
 0x4e5   :  { %5706 = vrot.lane.b32.xlu1 %v5337_v51, %s8632_s16  ;;  %v13858_v62 = vpop.permute.xlu0 %6230  ;;  %v6595_v20 = vadd.f32 %v6594_v59, %v6593_v7  ;;  %v5085_v33 = vsub.f32 %v15043_v36, %v15042_v24  ;;  %v15045_v7 = vld [vmem:[#allocation59_spill] sm:$0xff] }
 0x4e7   :  { %v5651_v40 = vpop.permute.xlu1 %5650  ;;  %6288 = vrot.lane.b32.xlu0 %v5948_v56, %s8633_s11  ;;  %v6597_v27 = vadd.f32 %v6596_v52, %v6595_v20  ;;  %v5086_v52 = vsub.f32 %v15046_v63, %v15045_v7  ;;  %v6606_v20 = vsel %vm6504_vm3, %v13790_v49, 0.0  ;;  %v13925_v49 = vld [vmem:[%s14237_s1 + $0x3b0] sm:$0xff] }
 0x4e8   :  { %v5949_v51 = vsel %vm5181_vm15, %v5651_v40, 0.0  ;;  %v13908_v40 = vld [vmem:[%s14237_s1 + $0x3a8] sm:$0xff]  ;;  %vm5196_vm15 = vcmp.gt.f32.partialorder %v13627_v19, 0.0 }
 0x4e9   :  { %5708 = vrot.lane.b32.xlu1 %v5338_v30, %s8632_s16  ;;  %v6233_v39 = vpop.permute.xlu0 %6232  ;;  %v6599_v48 = vadd.f32 %v6598_v50, %v6597_v27  ;;  %v6604_v30 = vsel %vm6504_vm3, %v13773_v25, 0.0  ;;  %v5341_v38 = vmul.f32 %v13908_v40, %v5085_v33  ;;  %v15049_v27 = vld [vmem:[#allocation166_spill] sm:$0xff]  ;;  %v15050_v33 = vld [vmem:[#allocation19_spill] sm:$0xff] }
 0x4ea   :  { %vm5185_vm4 = vcmp.gt.f32.partialorder %v15050_v33, 0.0  ;;  %v6616_v63 = vsel %vm6504_vm3, %v6233_v39, 0.0 }
 0x4eb   :  { %v5653_v53 = vpop.permute.xlu1 %5652  ;;  %6290 = vrot.lane.b32.xlu0 %v5949_v51, %s8633_s11  ;;  %v6601_v18 = vadd.f32 %v6600_v14, %v6599_v48  ;;  %v5342_v14 = vmul.f32 %v13925_v49, %v5086_v52  ;;  %v6610_v48 = vsel %vm6504_vm3, %v13824_v47, 0.0 }
 0x4ec   :  { %v5950_v44 = vsel %vm5182_vm0, %v5653_v53, 0.0  ;;  %v15048_v53 = vld [vmem:[#allocation138_spill] sm:$0xff]  ;;  %vm5197_vm0 = vcmp.gt.f32.partialorder %v13642_v26, 0.0 }
 0x4ed   :  { %5710 = vrot.lane.b32.xlu1 %v5339_v37, %s8632_s16  ;;  %v6235_v42 = vpop.permute.xlu0 %6234  ;;  %v6603_v59 = vadd.f32 %v6602_v3, %v6601_v18  ;;  %v5087_v32 = vsub.f32 %v15049_v27, %v15048_v53  ;;  %v15051_v18 = vld [vmem:[#allocation61_spill] sm:$0xff] }
 0x4ee   :  { %v6618_v11 = vsel %vm6504_vm3, %v6235_v42, 0.0 }
 0x4ef   :  { %v5655_v35 = vpop.permute.xlu1 %5654  ;;  %6292 = vrot.lane.b32.xlu0 %v5950_v44, %s8633_s11  ;;  %v6605_v25 = vadd.f32 %v6604_v30, %v6603_v59  ;;  %v5088_v30 = vsub.f32 %v15052_v57, %v15051_v18  ;;  %v6614_v59 = vsel %vm6504_vm3, %v13858_v62, 0.0  ;;  %v13954_v62 = vld [vmem:[%s14237_s1 + $0x3c0] sm:$0xff]  ;;  %v15057_v18 = vld [vmem:[#allocation5_spill] sm:$0xff] }
 0x4f0   :  { %v5951_v37 = vsel %vm5183_vm1, %v5655_v35, 0.0  ;;  %v13938_v35 = vld [vmem:[%s14237_s1 + $0x3b8] sm:$0xff]  ;;  %v15058_v57 = vld [vmem:[#allocation170_spill] sm:$0xff]  ;;  %vm5198_vm1 = vcmp.gt.f32.partialorder %v13661_v22, 0.0 }
 0x4f1   :  { %5712 = vrot.lane.b32.xlu1 %v5340_v6, %s8632_s16  ;;  %v6237_v56 = vpop.permute.xlu0 %6236  ;;  %v6607_v50 = vadd.f32 %v6606_v20, %v6605_v25  ;;  %v6612_v6 = vsel %vm6504_vm3, %v13841_v34, 0.0  ;;  %v5343_v47 = vmul.f32 %v13938_v35, %v5087_v32  ;;  %v5344_v28 = vmul.f32 %v13954_v62, %v5088_v30 }
 0x4f2   :  { %v6620_v39 = vsel %vm6504_vm3, %v6237_v56, 0.0  ;;  %v5091_v30 = vsub.f32 %v15058_v57, %v15057_v18  ;;  %v15063_v18 = vld [vmem:[#allocation62_spill] sm:$0xff] }
 0x4f3   :  { %v5657_v31 = vpop.permute.xlu1 %5656  ;;  %6294 = vrot.lane.b32.xlu0 %v5951_v37, %s8633_s11  ;;  %v6609_v4 = vadd.f32 %v6608_v21, %v6607_v50  ;;  %v15053_v37 = vld [vmem:[#allocation140_spill] sm:$0xff]  ;;  %v15064_v57 = vld [vmem:[#allocation174_spill] sm:$0xff] }
 0x4f4   :  { %v5952_v24 = vsel %vm5184_vm2, %v5657_v31, 0.0  ;;  %v15054_v31 = vld [vmem:[#allocation168_spill] sm:$0xff]  ;;  %vm5199_vm2 = vcmp.gt.f32.partialorder %v13676_v60, 0.0 }
 0x4f5   :  { %5714 = vrot.lane.b32.xlu1 %v5341_v38, %s8632_s16  ;;  %v6239_v51 = vpop.permute.xlu0 %6238  ;;  %v6611_v3 = vadd.f32 %v6610_v48, %v6609_v4  ;;  %v5089_v25 = vsub.f32 %v15054_v31, %v15053_v37  ;;  %v15055_v48 = vld [vmem:[#allocation60_spill] sm:$0xff]  ;;  %v13991_v37 = vld [vmem:[%s14237_s1 + $0x3d8] sm:$0xff]  ;;  %v15059_v31 = vld [vmem:[#allocation63_spill] sm:$0xff] }
 0x4f6   :  { %v6622_v43 = vsel %vm6504_vm3, %v6239_v51, 0.0  ;;  %v13980_v51 = vld [vmem:[%s14237_s1 + $0x3d0] sm:$0xff] }
 0x4f7   :  { %v5659_v36 = vpop.permute.xlu1 %5658  ;;  %6296 = vrot.lane.b32.xlu0 %v5952_v24, %s8633_s11  ;;  %v6613_v34 = vadd.f32 %v6612_v6, %v6611_v3  ;;  %v15056_v24 = vld [vmem:[#allocation171_spill] sm:$0xff] }
 0x4f8   :  { %v5953_v38 = vsel %vm5185_vm4, %v5659_v36, 0.0  ;;  %v5090_v36 = vsub.f32 %v15056_v24, %v15055_v48  ;;  %v14006_v24 = vld [vmem:[%s14237_s1 + $0x3e0] sm:$0xff]  ;;  %vm5200_vm4 = vcmp.gt.f32.partialorder %v13695_v46, 0.0 }
 0x4f9   :  { %5716 = vrot.lane.b32.xlu1 %v5342_v14, %s8632_s16  ;;  %v6241_v44 = vpop.permute.xlu0 %6240  ;;  %v6615_v52 = vadd.f32 %v6614_v59, %v6613_v34  ;;  %v13965_v14 = vld [vmem:[%s14237_s1 + $0x3c8] sm:$0xff] }
 0x4fa   :  { %v5345_v42 = vmul.f32 %v13965_v14, %v5089_v25  ;;  %v6624_v56 = vsel %vm6504_vm3, %v6241_v44, 0.0  ;;  %v5346_v59 = vmul.f32 %v13980_v51, %v5090_v36  ;;  %v15060_v25 = vld [vmem:[#allocation173_spill] sm:$0xff] }
 0x4fb   :  { %v5661_v7 = vpop.permute.xlu1 %5660  ;;  %6298 = vrot.lane.b32.xlu0 %v5953_v38, %s8633_s11  ;;  %v6617_v53 = vadd.f32 %v6616_v63, %v6615_v52 }
 0x4fc   :  { %v5954_v21 = vsel %vm5186_vm5, %v5661_v7, 0.0  ;;  %vm5201_vm5 = vcmp.gt.f32.partialorder %v13710_v13, 0.0 }
 0x4fd   :  { %5718 = vrot.lane.b32.xlu1 %v5343_v47, %s8632_s16  ;;  %v6243_v20 = vpop.permute.xlu0 %6242  ;;  %v6619_v27 = vadd.f32 %v6618_v11, %v6617_v53 }
 0x4fe   :  { %v6626_v45 = vsel %vm6504_vm3, %v6243_v20, 0.0  ;;  %v5347_v20 = vmul.f32 %v13991_v37, %v5091_v30  ;;  %v5094_v30 = vsub.f32 %v15064_v57, %v15063_v18 }
 0x4ff   :  { %v5663_v50 = vpop.permute.xlu1 %5662  ;;  %6300 = vrot.lane.b32.xlu0 %v5954_v21, %s8633_s11  ;;  %v6621_v6 = vadd.f32 %v6620_v39, %v6619_v27 }
 0x500   :  { %v5955_v4 = vsel %vm5187_vm6, %v5663_v50, 0.0  ;;  %vm5202_vm6 = vcmp.gt.f32.partialorder %v13729_v23, 0.0 }
 0x501   :  { %5720 = vrot.lane.b32.xlu1 %v5344_v28, %s8632_s16  ;;  %v6245_v32 = vpop.permute.xlu0 %6244  ;;  %v6623_v3 = vadd.f32 %v6622_v43, %v6621_v6  ;;  %v5092_v28 = vsub.f32 %v15060_v25, %v15059_v31 }
 0x502   :  { %v6628_v44 = vsel %vm6504_vm3, %v6245_v32, 0.0  ;;  %v15061_v32 = vld [vmem:[#allocation142_spill] sm:$0xff] }
 0x503   :  { %v5665_v33 = vpop.permute.xlu1 %5664  ;;  %6302 = vrot.lane.b32.xlu0 %v5955_v4, %s8633_s11  ;;  %v6625_v34 = vadd.f32 %v6624_v56, %v6623_v3  ;;  %v5348_v36 = vmul.f32 %v14006_v24, %v5092_v28  ;;  %v14016_v3 = vld [vmem:[%s14237_s1 + $0x3e8] sm:$0xff]  ;;  %v14045_v28 = vld [vmem:[%s14237_s1 + $0x3f8] sm:$0xff] }
 0x504   :  { %v5956_v38 = vsel %vm5188_vm7, %v5665_v33, 0.0  ;;  %vm5203_vm7 = vcmp.gt.f32.partialorder %v13744_v12, 0.0 }
 0x505   :  { %5722 = vrot.lane.b32.xlu1 %v5345_v42, %s8632_s16  ;;  %v6247_v47 = vpop.permute.xlu0 %6246  ;;  %v6627_v63 = vadd.f32 %v6626_v45, %v6625_v34  ;;  %v15062_v42 = vld [vmem:[#allocation172_spill] sm:$0xff]  ;;  %v15065_v34 = vld [vmem:[#allocation7_spill] sm:$0xff] }
 0x506   :  { %v6630_v17 = vsel %vm6504_vm3, %v6247_v47, 0.0  ;;  %v5093_v48 = vsub.f32 %v15062_v42, %v15061_v32 }
 0x507   :  { %v5667_v7 = vpop.permute.xlu1 %5666  ;;  %6304 = vrot.lane.b32.xlu0 %v5956_v38, %s8633_s11  ;;  %v6629_v50 = vadd.f32 %v6628_v44, %v6627_v63  ;;  %v15066_v44 = vld [vmem:[#allocation112_spill] sm:$0xff] }
 0x508   :  { %v5957_v11 = vsel %vm5189_vm8, %v5667_v7, 0.0  ;;  %v5349_v47 = vmul.f32 %v14016_v3, %v5093_v48  ;;  %v5095_v63 = vsub.f32 %v15066_v44, %v15065_v34  ;;  %vm5204_vm8 = vcmp.gt.f32.partialorder %v13763_v5, 0.0 }
 0x509   :  { %5724 = vrot.lane.b32.xlu1 %v5346_v59, %s8632_s16  ;;  %v6249_v52 = vpop.permute.xlu0 %6248  ;;  %v6631_v39 = vadd.f32 %v6630_v17, %v6629_v50 }
 0x50a   :  { %v6632_v53 = vsel %vm6504_vm3, %v6249_v52, 0.0  ;;  %v14034_v52 = vld [vmem:[%s14237_s1 + $0x3f0] sm:$0xff]  ;;  %v5351_v17 = vmul.f32 %v14045_v28, %v5095_v63 }
 0x50b   :  { %v5669_v21 = vpop.permute.xlu1 %5668  ;;  %6306 = vrot.lane.b32.xlu0 %v5957_v11, %s8633_s11  ;;  %v6633_v33 = vadd.f32 %v6632_v53, %v6631_v39 }
 0x50c   :  { %v5958_v43 = vsel %vm5190_vm9, %v5669_v21, 0.0  ;;  %vm5205_vm9 = vcmp.gt.f32.partialorder %v13778_v0, 0.0 }
 0x50d   :  { %5726 = vrot.lane.b32.xlu1 %v5347_v20, %s8632_s16  ;;  %v6251_v27 = vpop.permute.xlu0 %6250  ;;  %v5350_v20 = vmul.f32 %v14034_v52, %v5094_v30 }
 0x50e   :  { %v6634_v1 = vsel %vm6504_vm3, %v6251_v27, 0.0 }
 0x50f   :  { %v5671_v4 = vpop.permute.xlu1 %5670  ;;  %6308 = vrot.lane.b32.xlu0 %v5958_v43, %s8633_s11  ;;  %v6635_v6 = vadd.f32 %v6634_v1, %v6633_v33 }
 0x510   :  { %v5959_v59 = vsel %vm5191_vm10, %v5671_v4, 0.0  ;;  %vm5206_vm10 = vcmp.gt.f32.partialorder %v13797_v9, 0.0 }
 0x511   :  { %5728 = vrot.lane.b32.xlu1 %v5348_v36, %s8632_s16  ;;  %v6253_v56 = vpop.permute.xlu0 %6252 }
 0x512   :  { %v6636_v45 = vsel %vm6504_vm3, %v6253_v56, 0.0 }
 0x513   :  { %v5673_v8 = vpop.permute.xlu1 %5672  ;;  %v14022_v38 = vadd.f32 %v6636_v45, %v6635_v6  ;;  %6310 = vrot.lane.b32.xlu0 %v5959_v59, %s8633_s11 }
 0x514   :  { %v5960_v31 = vsel %vm5192_vm11, %v5673_v8, 0.0  ;;  %vm5207_vm11 = vcmp.gt.f32.partialorder %v13812_v41, 0.0 }
 0x515   :  { %5730 = vrot.lane.b32.xlu1 %v5349_v47, %s8632_s16  ;;  %v14027_v7 = vpop.permute.xlu0 %6254 }
 0x517   :  { %v5675_v25 = vpop.permute.xlu1 %5674  ;;  %6312 = vrot.lane.b32.xlu0 %v5960_v31, %s8633_s11 }
 0x518   :  { %v5961_v11 = vsel %vm5193_vm12, %v5675_v25, 0.0  ;;  %vm5208_vm12 = vcmp.gt.f32.partialorder %v13831_v54, 0.0 }
 0x519   :  { %5732 = vrot.lane.b32.xlu1 %v5350_v20, %s8632_s16  ;;  %v14040_v61 = vpop.permute.xlu0 %6256 }
 0x51b   :  { %v5677_v21 = vpop.permute.xlu1 %5676  ;;  %6314 = vrot.lane.b32.xlu0 %v5961_v11, %s8633_s11 }
 0x51c   :  { %v5962_v50 = vsel %vm5194_vm13, %v5677_v21, 0.0  ;;  %vm5209_vm13 = vcmp.gt.f32.partialorder %v13846_v29, 0.0 }
 0x51d   :  { %5734 = vrot.lane.b32.xlu1 %v5351_v17, %s8632_s16  ;;  %v14052_v58 = vpop.permute.xlu0 %6258 }
 0x51f   :  { %v5679_v53 = vpop.permute.xlu1 %5678  ;;  %6316 = vrot.lane.b32.xlu0 %v5962_v50, %s8633_s11 }
 0x520   :  { %v5963_v39 = vsel %vm5195_vm14, %v5679_v53, 0.0  ;;  %vm5210_vm14 = vcmp.gt.f32.partialorder %v13865_v10, 0.0 }
 0x521   :  { %6318 = vrot.lane.b32.xlu1 %v5963_v39, %s8633_s11  ;;  %v14057_v27 = vpop.permute.xlu0 %6260 }
 0x523   :  { %v5681_v16 = vpop.permute.xlu1 %5680 }
 0x524   :  { %v5964_v32 = vsel %vm5196_vm15, %v5681_v16, 0.0  ;;  %vm5211_vm15 = vcmp.gt.f32.partialorder %v13878_v55, 0.0 }
 0x525   :  { %6320 = vrot.lane.b32.xlu0 %v5964_v32, %s8633_s11  ;;  %v14061_v2 = vpop.permute.xlu0 %6262 }
 0x527   :  { %v5683_v42 = vpop.permute.xlu1 %5682 }
 0x528   :  { %v5965_v48 = vsel %vm5197_vm0, %v5683_v42, 0.0  ;;  %vm5212_vm0 = vcmp.gt.f32.partialorder %v13895_v15, 0.0 }
 0x529   :  { %6322 = vrot.lane.b32.xlu1 %v5965_v48, %s8633_s11  ;;  %v14065_v36 = vpop.permute.xlu0 %6264 }
 0x52b   :  { %v5685_v43 = vpop.permute.xlu1 %5684 }
 0x52c   :  { %v5966_v19 = vsel %vm5198_vm1, %v5685_v43, 0.0  ;;  %vm5213_vm1 = vcmp.gt.f32.partialorder %v13908_v40, 0.0 }
 0x52d   :  { %6324 = vrot.lane.b32.xlu0 %v5966_v19, %s8633_s11  ;;  %v14069_v1 = vpop.permute.xlu0 %6266 }
 0x52f   :  { %v5687_v4 = vpop.permute.xlu1 %5686 }
 0x530   :  { %v5967_v26 = vsel %vm5199_vm2, %v5687_v4, 0.0  ;;  %vm5214_vm2 = vcmp.gt.f32.partialorder %v13925_v49, 0.0 }
 0x531   :  { %6326 = vrot.lane.b32.xlu1 %v5967_v26, %s8633_s11  ;;  %v14073_v33 = vpop.permute.xlu0 %6268 }
 0x533   :  { %v5689_v6 = vpop.permute.xlu1 %5688 }
 0x534   :  { %v5968_v22 = vsel %vm5200_vm4, %v5689_v6, 0.0  ;;  %vm5215_vm4 = vcmp.gt.f32.partialorder %v13938_v35, 0.0 }
 0x535   :  { %6328 = vrot.lane.b32.xlu0 %v5968_v22, %s8633_s11  ;;  %v14077_v56 = vpop.permute.xlu0 %6270 }
 0x537   :  { %v5691_v47 = vpop.permute.xlu1 %5690 }
 0x538   :  { %v5969_v60 = vsel %vm5201_vm5, %v5691_v47, 0.0  ;;  %vm5216_vm5 = vcmp.gt.f32.partialorder %v13954_v62, 0.0 }
 0x539   :  { %6330 = vrot.lane.b32.xlu1 %v5969_v60, %s8633_s11  ;;  %v14081_v30 = vpop.permute.xlu0 %6272 }
 0x53b   :  { %v5693_v18 = vpop.permute.xlu1 %5692 }
 0x53c   :  { %v5970_v57 = vsel %vm5202_vm6, %v5693_v18, 0.0  ;;  %vm5217_vm6 = vcmp.gt.f32.partialorder %v13965_v14, 0.0 }
 0x53d   :  { %6332 = vrot.lane.b32.xlu0 %v5970_v57, %s8633_s11  ;;  %v14087_v13 = vpop.permute.xlu0 %6274 }
 0x53f   :  { %v5695_v46 = vpop.permute.xlu1 %5694 }
 0x540   :  { %v5971_v59 = vsel %vm5203_vm7, %v5695_v46, 0.0  ;;  %vm5218_vm7 = vcmp.gt.f32.partialorder %v13980_v51, 0.0  ;;  %v6638_v51 = vsel %vm6504_vm3, %v14027_v7, 0.0  ;;  %v6644_v7 = vsel %vm6504_vm3, %v14057_v27, 0.0 }
 0x541   :  { %6334 = vrot.lane.b32.xlu1 %v5971_v59, %s8633_s11  ;;  %v14091_v44 = vpop.permute.xlu0 %6276  ;;  %v6650_v27 = vsel %vm6504_vm3, %v14069_v1, 0.0 }
 0x542   :  { %v6660_v1 = vsel %vm6504_vm3, %v14091_v44, 0.0 }
 0x543   :  { %v5697_v45 = vpop.permute.xlu1 %5696 }
 0x544   :  { %v5972_v8 = vsel %vm5204_vm8, %v5697_v45, 0.0  ;;  %vm5219_vm8 = vcmp.gt.f32.partialorder %v13991_v37, 0.0  ;;  %v6640_v37 = vsel %vm6504_vm3, %v14040_v61, 0.0 }
 0x545   :  { %6336 = vrot.lane.b32.xlu0 %v5972_v8, %s8633_s11  ;;  %v14097_v5 = vpop.permute.xlu0 %6278  ;;  %v6639_v8 = vadd.f32 %v6638_v51, %v14022_v38  ;;  %v6646_v38 = vsel %vm6504_vm3, %v14061_v2, 0.0  ;;  %v6654_v2 = vsel %vm6504_vm3, %v14077_v56, 0.0 }
 0x547   :  { %v5699_v23 = vpop.permute.xlu1 %5698 }
 0x548   :  { %v5973_v34 = vsel %vm5205_vm9, %v5699_v23, 0.0  ;;  %vm5220_vm9 = vcmp.gt.f32.partialorder %v14006_v24, 0.0  ;;  %v6642_v24 = vsel %vm6504_vm3, %v14052_v58, 0.0  ;;  %v6641_v23 = vadd.f32 %v6640_v37, %v6639_v8 }
 0x549   :  { %6338 = vrot.lane.b32.xlu1 %v5973_v34, %s8633_s11  ;;  %v14101_v17 = vpop.permute.xlu0 %6280  ;;  %v6648_v58 = vsel %vm6504_vm3, %v14065_v36, 0.0  ;;  %v6656_v36 = vsel %vm6504_vm3, %v14081_v30, 0.0 }
 0x54a   :  { %v6664_v56 = vsel %vm6504_vm3, %v14101_v17, 0.0 }
 0x54b   :  { %v5701_v12 = vpop.permute.xlu1 %5700 }
 0x54c   :  { %v5974_v63 = vsel %vm5206_vm10, %v5701_v12, 0.0  ;;  %vm5221_vm10 = vcmp.gt.f32.partialorder %v14016_v3, 0.0 }
 0x54d   :  { %6340 = vrot.lane.b32.xlu0 %v5974_v63, %s8633_s11  ;;  %v14107_v41 = vpop.permute.xlu0 %6282  ;;  %v6643_v63 = vadd.f32 %v6642_v24, %v6641_v23 }
 0x54e   :  { %v6666_v30 = vsel %vm6504_vm3, %v14107_v41, 0.0 }
 0x54f   :  { %v5703_v20 = vpop.permute.xlu1 %5702  ;;  %v6645_v61 = vadd.f32 %v6644_v7, %v6643_v63 }
 0x550   :  { %v5975_v31 = vsel %vm5207_vm11, %v5703_v20, 0.0  ;;  %vm5222_vm11 = vcmp.gt.f32.partialorder %v14034_v52, 0.0 }
 0x551   :  { %6342 = vrot.lane.b32.xlu1 %v5975_v31, %s8633_s11  ;;  %v14111_v39 = vpop.permute.xlu0 %6284  ;;  %v6647_v31 = vadd.f32 %v6646_v38, %v6645_v61 }
 0x553   :  { %v5705_v0 = vpop.permute.xlu1 %5704 }
 0x554   :  { %v5976_v25 = vsel %vm5208_vm12, %v5705_v0, 0.0  ;;  %vm5223_vm12 = vcmp.gt.f32.partialorder %v14045_v28, 0.0  ;;  %v6652_v28 = vsel %vm6504_vm3, %v14073_v33, 0.0  ;;  %v6662_v33 = vsel %vm6504_vm3, %v14097_v5, 0.0 }
 0x555   :  { %6344 = vrot.lane.b32.xlu0 %v5976_v25, %s8633_s11  ;;  %v14117_v10 = vpop.permute.xlu0 %6286  ;;  %v6649_v25 = vadd.f32 %v6648_v58, %v6647_v31 }
 0x556   :  { %v6670_v44 = vsel %vm6504_vm3, %v14117_v10, 0.0 }
 0x557   :  { %v5707_v9 = vpop.permute.xlu1 %5706 }
 0x558   :  { %v5977_v11 = vsel %vm5209_vm13, %v5707_v9, 0.0  ;;  %v6651_v9 = vadd.f32 %v6650_v27, %v6649_v25 }
 0x559   :  { %6346 = vrot.lane.b32.xlu1 %v5977_v11, %s8633_s11  ;;  %v14121_v43 = vpop.permute.xlu0 %6288 }
 0x55a   :  { %v6653_v11 = vadd.f32 %v6652_v28, %v6651_v9  ;;  %v6672_v5 = vsel %vm6504_vm3, %v14121_v43, 0.0 }
 0x55b   :  { %v5709_v21 = vpop.permute.xlu1 %5708 }
 0x55c   :  { %v5978_v50 = vsel %vm5210_vm14, %v5709_v21, 0.0 }
 0x55d   :  { %6348 = vrot.lane.b32.xlu0 %v5978_v50, %s8633_s11  ;;  %v14127_v40 = vpop.permute.xlu0 %6290  ;;  %v6655_v50 = vadd.f32 %v6654_v2, %v6653_v11 }
 0x55e   :  { %v6674_v17 = vsel %vm6504_vm3, %v14127_v40, 0.0 }
 0x55f   :  { %v5711_v54 = vpop.permute.xlu1 %5710 }
 0x560   :  { %v5979_v53 = vsel %vm5211_vm15, %v5711_v54, 0.0  ;;  %v6658_v54 = vsel %vm6504_vm3, %v14087_v13, 0.0  ;;  %v6668_v13 = vsel %vm6504_vm3, %v14111_v39, 0.0 }
 0x561   :  { %6350 = vrot.lane.b32.xlu1 %v5979_v53, %s8633_s11  ;;  %v14131_v22 = vpop.permute.xlu0 %6292  ;;  %v6657_v53 = vadd.f32 %v6656_v36, %v6655_v50 }
 0x562   :  { %v6676_v41 = vsel %vm6504_vm3, %v14131_v22, 0.0 }
 0x563   :  { %v5713_v29 = vpop.permute.xlu1 %5712 }
 0x564   :  { %v5980_v16 = vsel %vm5212_vm0, %v5713_v29, 0.0  ;;  %v6659_v29 = vadd.f32 %v6658_v54, %v6657_v53 }
 0x565   :  { %6352 = vrot.lane.b32.xlu0 %v5980_v16, %s8633_s11  ;;  %v14137_v62 = vpop.permute.xlu0 %6294 }
 0x566   :  { %v6678_v39 = vsel %vm6504_vm3, %v14137_v62, 0.0 }
 0x567   :  { %v5715_v32 = vpop.permute.xlu1 %5714 }
 0x568   :  { %v5981_v42 = vsel %vm5213_vm1, %v5715_v32, 0.0  ;;  %v6661_v32 = vadd.f32 %v6660_v1, %v6659_v29 }
 0x569   :  { %6354 = vrot.lane.b32.xlu1 %v5981_v42, %s8633_s11  ;;  %v6297_v46 = vpop.permute.xlu0 %6296 }
 0x56a   :  { %v6663_v42 = vadd.f32 %v6662_v33, %v6661_v32  ;;  %v6680_v10 = vsel %vm6504_vm3, %v6297_v46, 0.0 }
 0x56b   :  { %v5717_v55 = vpop.permute.xlu1 %5716 }
 0x56c   :  { %v5982_v48 = vsel %vm5214_vm2, %v5717_v55, 0.0  ;;  %v6665_v55 = vadd.f32 %v6664_v56, %v6663_v42 }
 0x56d   :  { %6356 = vrot.lane.b32.xlu0 %v5982_v48, %s8633_s11  ;;  %v6299_v34 = vpop.permute.xlu0 %6298 }
 0x56e   :  { %v6682_v43 = vsel %vm6504_vm3, %v6299_v34, 0.0 }
 0x56f   :  { %v5719_v15 = vpop.permute.xlu1 %5718 }
 0x570   :  { %v5983_v19 = vsel %vm5215_vm4, %v5719_v15, 0.0  ;;  %v6667_v15 = vadd.f32 %v6666_v30, %v6665_v55 }
 0x571   :  { %6358 = vrot.lane.b32.xlu1 %v5983_v19, %s8633_s11  ;;  %v6301_v0 = vpop.permute.xlu0 %6300 }
 0x572   :  { %v6669_v19 = vadd.f32 %v6668_v13, %v6667_v15 }
 0x573   :  { %v5721_v4 = vpop.permute.xlu1 %5720 }
 0x574   :  { %v5984_v26 = vsel %vm5216_vm5, %v5721_v4, 0.0  ;;  %v6671_v4 = vadd.f32 %v6670_v44, %v6669_v19 }
 0x575   :  { %6360 = vrot.lane.b32.xlu0 %v5984_v26, %s8633_s11  ;;  %v6303_v21 = vpop.permute.xlu0 %6302 }
 0x576   :  { %v6686_v51 = vsel %vm6504_vm3, %v6303_v21, 0.0 }
 0x577   :  { %v5723_v49 = vpop.permute.xlu1 %5722 }
 0x578   :  { %v5985_v6 = vsel %vm5217_vm6, %v5723_v49, 0.0  ;;  %v6673_v49 = vadd.f32 %v6672_v5, %v6671_v4 }
 0x579   :  { %6362 = vrot.lane.b32.xlu1 %v5985_v6, %s8633_s11  ;;  %v6305_v16 = vpop.permute.xlu0 %6304 }
 0x57a   :  { %v6675_v6 = vadd.f32 %v6674_v17, %v6673_v49  ;;  %v6688_v22 = vsel %vm6504_vm3, %v6305_v16, 0.0 }
 0x57b   :  { %v5725_v35 = vpop.permute.xlu1 %5724 }
 0x57c   :  { %v5986_v47 = vsel %vm5218_vm7, %v5725_v35, 0.0  ;;  %v6677_v35 = vadd.f32 %v6676_v41, %v6675_v6 }
 0x57d   :  { %6364 = vrot.lane.b32.xlu0 %v5986_v47, %s8633_s11  ;;  %v6307_v48 = vpop.permute.xlu0 %6306 }
 0x57e   :  { %v6690_v62 = vsel %vm6504_vm3, %v6307_v48, 0.0 }
 0x57f   :  { %v5727_v60 = vpop.permute.xlu1 %5726 }
 0x580   :  { %v5987_v18 = vsel %vm5219_vm8, %v5727_v60, 0.0  ;;  %v6679_v60 = vadd.f32 %v6678_v39, %v6677_v35 }
 0x581   :  { %6366 = vrot.lane.b32.xlu1 %v5987_v18, %s8633_s11  ;;  %v6309_v26 = vpop.permute.xlu0 %6308 }
 0x582   :  { %v6681_v18 = vadd.f32 %v6680_v10, %v6679_v60  ;;  %v6692_v46 = vsel %vm6504_vm3, %v6309_v26, 0.0 }
 0x583   :  { %v5729_v14 = vpop.permute.xlu1 %5728 }
 0x584   :  { %v5988_v57 = vsel %vm5220_vm9, %v5729_v14, 0.0  ;;  %v6684_v14 = vsel %vm6504_vm3, %v6301_v0, 0.0 }
 0x585   :  { %6368 = vrot.lane.b32.xlu0 %v5988_v57, %s8633_s11  ;;  %v6311_v47 = vpop.permute.xlu0 %6310  ;;  %v6683_v57 = vadd.f32 %v6682_v43, %v6681_v18 }
 0x586   :  { %v6694_v23 = vsel %vm6504_vm3, %v6311_v47, 0.0 }
 0x587   :  { %v5731_v59 = vpop.permute.xlu1 %5730 }
 0x588   :  { %v5989_v45 = vsel %vm5221_vm10, %v5731_v59, 0.0  ;;  %v6685_v59 = vadd.f32 %v6684_v14, %v6683_v57 }
 0x589   :  { %6370 = vrot.lane.b32.xlu1 %v5989_v45, %s8633_s11  ;;  %v6313_v40 = vpop.permute.xlu0 %6312 }
 0x58a   :  { %v6687_v37 = vadd.f32 %v6686_v51, %v6685_v59 }
 0x58b   :  { %v5733_v3 = vpop.permute.xlu1 %5732 }
 0x58c   :  { %v5990_v12 = vsel %vm5222_vm11, %v5733_v3, 0.0  ;;  %v6689_v45 = vadd.f32 %v6688_v22, %v6687_v37  ;;  %v6696_v3 = vsel %vm6504_vm3, %v6313_v40, 0.0 }
 0x58d   :  { %6372 = vrot.lane.b32.xlu0 %v5990_v12, %s8633_s11  ;;  %v6315_v8 = vpop.permute.xlu0 %6314 }
 0x58e   :  { %v6691_v24 = vadd.f32 %v6690_v62, %v6689_v45  ;;  %v6698_v63 = vsel %vm6504_vm3, %v6315_v8, 0.0 }
 0x58f   :  { %v5735_v52 = vpop.permute.xlu1 %5734 }
 0x590   :  { %v5991_v20 = vsel %vm5223_vm12, %v5735_v52, 0.0  ;;  %v6693_v34 = vadd.f32 %v6692_v46, %v6691_v24 }
 0x591   :  { %6374 = vrot.lane.b32.xlu1 %v5991_v20, %s8633_s11  ;;  %v6317_v12 = vpop.permute.xlu0 %6316 }
 0x592   :  { %v6695_v7 = vadd.f32 %v6694_v23, %v6693_v34  ;;  %v6700_v61 = vsel %vm6504_vm3, %v6317_v12, 0.0 }
 0x593   :  { %v6319_v58 = vpop.permute.xlu1 %6318 }
 0x594   :  { %v6697_v38 = vadd.f32 %v6696_v3, %v6695_v7  ;;  %v6702_v31 = vsel %vm6504_vm3, %v6319_v58, 0.0 }
 0x596   :  { %v6699_v52 = vadd.f32 %v6698_v63, %v6697_v38 }
 0x597   :  { %v6321_v0 = vpop.permute.xlu0 %6320 }
 0x598   :  { %v6701_v20 = vadd.f32 %v6700_v61, %v6699_v52  ;;  %v6704_v28 = vsel %vm6504_vm3, %v6321_v0, 0.0 }
 0x59a   :  { %v6703_v27 = vadd.f32 %v6702_v31, %v6701_v20 }
 0x59b   :  { %v6323_v25 = vpop.permute.xlu1 %6322 }
 0x59c   :  { %v6706_v2 = vsel %vm6504_vm3, %v6323_v25, 0.0  ;;  %v6705_v11 = vadd.f32 %v6704_v28, %v6703_v27 }
 0x59e   :  { %v6707_v50 = vadd.f32 %v6706_v2, %v6705_v11 }
 0x59f   :  { %v6325_v9 = vpop.permute.xlu0 %6324 }
 0x5a0   :  { %v6708_v36 = vsel %vm6504_vm3, %v6325_v9, 0.0 }
 0x5a1   :  { %v6709_v1 = vadd.f32 %v6708_v36, %v6707_v50 }
 0x5a3   :  { %v6327_v21 = vpop.permute.xlu1 %6326 }
 0x5a4   :  { %v6710_v53 = vsel %vm6504_vm3, %v6327_v21, 0.0 }
 0x5a5   :  { %v6711_v33 = vadd.f32 %v6710_v53, %v6709_v1 }
 0x5a7   :  { %v6329_v54 = vpop.permute.xlu0 %6328 }
 0x5a8   :  { %v6712_v16 = vsel %vm6504_vm3, %v6329_v54, 0.0 }
 0x5a9   :  { %v6713_v42 = vadd.f32 %v6712_v16, %v6711_v33 }
 0x5ab   :  { %v6331_v29 = vpop.permute.xlu1 %6330 }
 0x5ac   :  { %v6714_v56 = vsel %vm6504_vm3, %v6331_v29, 0.0 }
 0x5ad   :  { %v6715_v48 = vadd.f32 %v6714_v56, %v6713_v42 }
 0x5af   :  { %v6333_v32 = vpop.permute.xlu0 %6332 }
 0x5b0   :  { %v6716_v55 = vsel %vm6504_vm3, %v6333_v32, 0.0 }
 0x5b1   :  { %v6717_v44 = vadd.f32 %v6716_v55, %v6715_v48 }
 0x5b3   :  { %v6335_v30 = vpop.permute.xlu1 %6334 }
 0x5b4   :  { %v6718_v15 = vsel %vm6504_vm3, %v6335_v30, 0.0 }
 0x5b5   :  { %v6719_v4 = vadd.f32 %v6718_v15, %v6717_v44 }
 0x5b7   :  { %v6337_v13 = vpop.permute.xlu0 %6336 }
 0x5b8   :  { %v6720_v5 = vsel %vm6504_vm3, %v6337_v13, 0.0 }
 0x5b9   :  { %v6721_v49 = vadd.f32 %v6720_v5, %v6719_v4 }
 0x5bb   :  { %v6339_v19 = vpop.permute.xlu1 %6338 }
 0x5bc   :  { %v6722_v17 = vsel %vm6504_vm3, %v6339_v19, 0.0 }
 0x5bd   :  { %v6723_v39 = vadd.f32 %v6722_v17, %v6721_v49 }
 0x5bf   :  { %v6341_v26 = vpop.permute.xlu0 %6340 }
 0x5c0   :  { %v6724_v6 = vsel %vm6504_vm3, %v6341_v26, 0.0 }
 0x5c1   :  { %v6725_v10 = vadd.f32 %v6724_v6, %v6723_v39 }
 0x5c3   :  { %v6343_v41 = vpop.permute.xlu1 %6342 }
 0x5c4   :  { %v6726_v47 = vsel %vm6504_vm3, %v6343_v41, 0.0 }
 0x5c5   :  { %v6727_v18 = vadd.f32 %v6726_v47, %v6725_v10 }
 0x5c7   :  { %v6345_v35 = vpop.permute.xlu0 %6344 }
 0x5c8   :  { %v6728_v43 = vsel %vm6504_vm3, %v6345_v35, 0.0 }
 0x5c9   :  { %v6729_v40 = vadd.f32 %v6728_v43, %v6727_v18 }
 0x5cb   :  { %v6347_v60 = vpop.permute.xlu1 %6346 }
 0x5cc   :  { %v6730_v57 = vsel %vm6504_vm3, %v6347_v60, 0.0 }
 0x5cd   :  { %v6731_v22 = vadd.f32 %v6730_v57, %v6729_v40 }
 0x5cf   :  { %v6349_v14 = vpop.permute.xlu0 %6348 }
 0x5d0   :  { %v6732_v59 = vsel %vm6504_vm3, %v6349_v14, 0.0 }
 0x5d1   :  { %v6733_v45 = vadd.f32 %v6732_v59, %v6731_v22 }
 0x5d3   :  { %v6351_v51 = vpop.permute.xlu1 %6350 }
 0x5d4   :  { %v6734_v62 = vsel %vm6504_vm3, %v6351_v51, 0.0 }
 0x5d5   :  { %v6735_v24 = vadd.f32 %v6734_v62, %v6733_v45 }
 0x5d7   :  { %v6353_v37 = vpop.permute.xlu0 %6352 }
 0x5d8   :  { %v6736_v46 = vsel %vm6504_vm3, %v6353_v37, 0.0 }
 0x5d9   :  { %v6737_v3 = vadd.f32 %v6736_v46, %v6735_v24 }
 0x5db   :  { %v6355_v8 = vpop.permute.xlu1 %6354 }
 0x5dc   :  { %v6738_v34 = vsel %vm6504_vm3, %v6355_v8, 0.0 }
 0x5dd   :  { %v6739_v63 = vadd.f32 %v6738_v34, %v6737_v3 }
 0x5df   :  { %v6357_v23 = vpop.permute.xlu0 %6356 }
 0x5e0   :  { %v6740_v12 = vsel %vm6504_vm3, %v6357_v23, 0.0 }
 0x5e1   :  { %v6741_v52 = vadd.f32 %v6740_v12, %v6739_v63 }
 0x5e3   :  { %v6359_v7 = vpop.permute.xlu1 %6358 }
 0x5e4   :  { %v6742_v61 = vsel %vm6504_vm3, %v6359_v7, 0.0 }
 0x5e5   :  { %v6743_v31 = vadd.f32 %v6742_v61, %v6741_v52 }
 0x5e7   :  { %v6361_v38 = vpop.permute.xlu0 %6360 }
 0x5e8   :  { %v6744_v20 = vsel %vm6504_vm3, %v6361_v38, 0.0 }
 0x5e9   :  { %v6745_v25 = vadd.f32 %v6744_v20, %v6743_v31 }
 0x5eb   :  { %v6363_v58 = vpop.permute.xlu1 %6362 }
 0x5ec   :  { %v6746_v27 = vsel %vm6504_vm3, %v6363_v58, 0.0 }
 0x5ed   :  { %v6747_v2 = vadd.f32 %v6746_v27, %v6745_v25 }
 0x5ef   :  { %v6365_v0 = vpop.permute.xlu0 %6364 }
 0x5f0   :  { %v6748_v9 = vsel %vm6504_vm3, %v6365_v0, 0.0 }
 0x5f1   :  { %v6749_v36 = vadd.f32 %v6748_v9, %v6747_v2 }
 0x5f3   :  { %v6367_v28 = vpop.permute.xlu1 %6366 }
 0x5f4   :  { %v6750_v21 = vsel %vm6504_vm3, %v6367_v28, 0.0 }
 0x5f5   :  { %v6751_v53 = vadd.f32 %v6750_v21, %v6749_v36 }
 0x5f7   :  { %v6369_v11 = vpop.permute.xlu0 %6368 }
 0x5f8   :  { %v6752_v54 = vsel %vm6504_vm3, %v6369_v11, 0.0 }
 0x5f9   :  { %v6753_v29 = vadd.f32 %v6752_v54, %v6751_v53 }
 0x5fb   :  { %v6371_v50 = vpop.permute.xlu1 %6370 }
 0x5fc   :  { %v6754_v1 = vsel %vm6504_vm3, %v6371_v50, 0.0 }
 0x5fd   :  { %v6755_v32 = vadd.f32 %v6754_v1, %v6753_v29 }
 0x5ff   :  { %v6373_v16 = vpop.permute.xlu0 %6372 }
 0x600   :  { %v6756_v33 = vsel %vm6504_vm3, %v6373_v16, 0.0 }
 0x601   :  { %v6757_v56 = vadd.f32 %v6756_v33, %v6755_v32 }
 0x603   :  { %v6375_v42 = vpop.permute.xlu1 %6374 }
 0x604   :  { %v6758_v30 = vsel %vm6504_vm3, %v6375_v42, 0.0 }
 0x605   :  { %v6759_v55 = vadd.f32 %v6758_v30, %v6757_v56 }
 0x607   :  { %6760 = vadd.xlane.f32.xlu0 %v6759_v55 }
 0x694   :  { %v6761_v48 = vpop.xlane.xlu0 %6760 }
 0x695   :  { %v6762_v13 = vrot.slane %v6761_v48, 4 }
 0x697   :  { %v6763_v15 = vadd.f32 %v6762_v13, %v6761_v48 }
 0x699   :  { %v6764_v44 = vrot.slane %v6763_v15, 2 }
 0x69b   :  { %v6765_v19 = vadd.f32 %v6764_v44, %v6763_v15 }
 0x69d   :  { %v6766_v5 = vrot.slane %v6765_v19, 1 }
 0x69f   :  { %v6767_v4 = vadd.f32 %v6766_v5, %v6765_v19 }
 0x6a1   :  { %7752 = vpush %v6767_v4 }
 0x6d2   :  { %s7753_s1 = spop %7752 }
 0x6d3   :  { %s6769_s16 = smul.f32 0.0009765625, %s7753_s1 }
 0x6d5   :  { %v6770_v26 = vstv %s6769_s16 }
 0x6d6   :  { %6771 = vst [vmem:[%s14240_s6] sm:$0xff] %v6770_v26 }

</bundles_post_ra>
